<compile_context>
chip_gen: v5e
topology: v5e:2x2
jax: 0.10.0
libtpu: 0.0.40
codegen_flags: <defaults>
</compile_context>

<pallas_src>
import functools

import jax
import jax.numpy as jnp
import numpy as np
from jax.experimental import pallas as pl
from jax.experimental.pallas import tpu as pltpu


# ----------------------------------------------------------------------------
# Pallas kernels
# ----------------------------------------------------------------------------
def _conv_pool_kernel(cols_ref, w_ref, b_ref, o_ref, *, mq):
    # cols: (4*mq, K) -- four pooling quadrants stacked along rows (each mq rows,
    # mq a multiple of 8).  One MXU matmul + bias + ReLU, then the 2x2 max-pool is
    # a max over the four sublane-aligned row blocks.
    y = jnp.dot(cols_ref[...], w_ref[...], preferred_element_type=jnp.float32)
    y = jnp.maximum(y + b_ref[...], 0.0)
    p01 = jnp.maximum(y[0 * mq:1 * mq, :], y[1 * mq:2 * mq, :])
    p23 = jnp.maximum(y[2 * mq:3 * mq, :], y[3 * mq:4 * mq, :])
    o_ref[...] = jnp.maximum(p01, p23)


def _fc_tail_kernel(x_ref, w1_ref, b1_ref, w2_ref, b2_ref, w3_ref, b3_ref, o_ref):
    # Fused fc1 -> ReLU -> fc2 -> ReLU -> fc3 (+ ensemble sum folded into w3/b3).
    h = jnp.dot(x_ref[...], w1_ref[...], preferred_element_type=jnp.float32)
    h = jnp.maximum(h + b1_ref[...], 0.0)
    h = jnp.dot(h, w2_ref[...], preferred_element_type=jnp.float32)
    h = jnp.maximum(h + b2_ref[...], 0.0)
    o_ref[...] = jnp.dot(h, w3_ref[...], preferred_element_type=jnp.float32) + b3_ref[...]


# ----------------------------------------------------------------------------
# pallas_call wrappers (full-extent blocks, no explicit padding)
# ----------------------------------------------------------------------------
_VMEM_LIMIT = 32 * 1024 * 1024  # safe on v5e/v6e/v7x; actual use well below


def conv_pool(cols, w, b, mq):
    """Fused conv-as-matmul + bias + ReLU + 2x2 max-pool.

    cols: (4*mq, K) quadrant-grouped im2col rows; w: (K, C); b: (C,) -> out (mq, C).
    """
    K = cols.shape[1]
    C = w.shape[1]
    bias2 = b.reshape(1, C).astype(jnp.float32)
    flops = 2 * cols.shape[0] * K * C + 4 * cols.shape[0] * C
    bytes_accessed = 4 * (cols.size + w.size + bias2.size + mq * C)
    return pl.pallas_call(
        functools.partial(_conv_pool_kernel, mq=mq),
        out_shape=jax.ShapeDtypeStruct((mq, C), jnp.float32),
        grid=(1,),
        in_specs=[pl.BlockSpec((4 * mq, K), lambda i: (0, 0)),
                  pl.BlockSpec((K, C), lambda i: (0, 0)),
                  pl.BlockSpec((1, C), lambda i: (0, 0))],
        out_specs=pl.BlockSpec((mq, C), lambda i: (0, 0)),
        compiler_params=pltpu.CompilerParams(
            dimension_semantics=("arbitrary",),
            vmem_limit_bytes=_VMEM_LIMIT),
        cost_estimate=pl.CostEstimate(flops=flops, transcendentals=0,
                                      bytes_accessed=bytes_accessed),
    )(cols.astype(jnp.float32), w.astype(jnp.float32), bias2)


def fc_tail(x, w1, b1, w2, b2, w3, b3):
    """Fused FC tail for the whole ensemble: x (N, 400*E) -> logits (N, nClasses)."""
    N = x.shape[0]
    nc = w3.shape[1]
    b1_2 = b1.reshape(1, -1).astype(jnp.float32)
    b2_2 = b2.reshape(1, -1).astype(jnp.float32)
    b3_2 = b3.reshape(1, -1).astype(jnp.float32)
    flops = 2 * N * (w1.shape[0] * w1.shape[1] + w2.shape[0] * w2.shape[1]
                     + w3.shape[0] * w3.shape[1])
    bytes_accessed = 4 * (x.size + w1.size + w2.size + w3.size
                          + b1_2.size + b2_2.size + b3_2.size + N * nc)
    return pl.pallas_call(
        _fc_tail_kernel,
        out_shape=jax.ShapeDtypeStruct((N, nc), jnp.float32),
        grid=(1,),
        in_specs=[pl.BlockSpec(x.shape, lambda i: (0, 0)),
                  pl.BlockSpec(w1.shape, lambda i: (0, 0)),
                  pl.BlockSpec(b1_2.shape, lambda i: (0, 0)),
                  pl.BlockSpec(w2.shape, lambda i: (0, 0)),
                  pl.BlockSpec(b2_2.shape, lambda i: (0, 0)),
                  pl.BlockSpec(w3.shape, lambda i: (0, 0)),
                  pl.BlockSpec(b3_2.shape, lambda i: (0, 0))],
        out_specs=pl.BlockSpec((N, nc), lambda i: (0, 0)),
        compiler_params=pltpu.CompilerParams(
            dimension_semantics=("arbitrary",),
            vmem_limit_bytes=_VMEM_LIMIT),
        cost_estimate=pl.CostEstimate(flops=flops, transcendentals=0,
                                      bytes_accessed=bytes_accessed),
    )(x.astype(jnp.float32), w1, b1_2, w2, b2_2, w3, b3_2)


# ----------------------------------------------------------------------------
# XLA-side layout glue: quadrant-grouped im2col
# ----------------------------------------------------------------------------
def _round_up(v, m):
    return ((v + m - 1) // m) * m


def im2col_quadrants(x_nhwc, kh, kw, pad):
    """Extract kh x kw patches, grouped by 2x2-pool quadrant.

    Returns (cols, m, mq): cols has shape (4*mq, kh*kw*C) where quadrant q=(di,dj)
    occupies rows [q*mq, q*mq+m) in (n, oh//2, ow//2) order (K order = (kh, kw, c));
    m = N*(Ho//2)*(Wo//2), mq = m rounded up to a multiple of 8 (pad rows are zero).
    """
    if pad:
        x_nhwc = jnp.pad(x_nhwc, ((0, 0), (pad, pad), (pad, pad), (0, 0)))
    N, H, W, C = x_nhwc.shape
    Ho, Wo = H - kh + 1, W - kw + 1
    K = kh * kw * C
    slices = [x_nhwc[:, i:i + Ho, j:j + Wo, :] for i in range(kh) for j in range(kw)]
    patches = jnp.stack(slices, axis=3).reshape(N, Ho, Wo, K)   # K order (kh, kw, c)
    m = N * (Ho // 2) * (Wo // 2)
    mq = _round_up(m, 8)
    quads = jnp.stack([patches[:, di::2, dj::2, :].reshape(m, K)
                       for di in (0, 1) for dj in (0, 1)], axis=0)   # (4, m, K)
    if mq != m:
        quads = jnp.pad(quads, ((0, 0), (0, mq - m), (0, 0)))
    return quads.reshape(4 * mq, K), m, mq


# ----------------------------------------------------------------------------
# One-time parameter preparation (ensemble folded into stacked / block-diag weights)
# ----------------------------------------------------------------------------
def prepare_ensemble_params(params_list):
    E = len(params_list)
    eye = jnp.eye(E, dtype=jnp.float32)

    # conv1: input is shared -> stack filters along output channels: (25, 6E)
    w1 = jnp.concatenate(
        [jnp.transpose(p['conv1_w'], (2, 3, 1, 0)).reshape(25, 6) for p in params_list],
        axis=1)
    b1 = jnp.concatenate([p['conv1_b'] for p in params_list])

    # conv2: block-diagonal over the ensemble axis: (5*5*6E, 16E)
    blk = jnp.stack([jnp.transpose(p['conv2_w'], (2, 3, 1, 0)) for p in params_list], 0)
    w2 = jnp.einsum('eklcd,ef->klecfd', blk, eye).reshape(5 * 5 * E * 6, E * 16)
    b2 = jnp.concatenate([p['conv2_b'] for p in params_list])

    # fc1: fold the PyTorch NCHW-flatten permutation (c,h,w)->(h,w,c) into the rows,
    # then block-diagonal over the ensemble: (5*5*16E, 120E)
    blk = jnp.stack([jnp.transpose(p['fc1_w'].T.reshape(16, 5, 5, 120), (1, 2, 0, 3))
                     for p in params_list], 0)                       # (E, 5, 5, 16, 120)
    w1f = jnp.einsum('ehwcj,ef->hwecfj', blk, eye).reshape(5 * 5 * E * 16, E * 120)
    b1f = jnp.concatenate([p['fc1_b'] for p in params_list])

    # fc2: block-diagonal: (120E, 84E)
    blk = jnp.stack([p['fc2_w'].T for p in params_list], 0)          # (E, 120, 84)
    w2f = jnp.einsum('eij,ef->eifj', blk, eye).reshape(E * 120, E * 84)
    b2f = jnp.concatenate([p['fc2_b'] for p in params_list])

    # fc3: vertical stack of per-model weights -> the matmul sums the ensemble logits
    w3f = jnp.concatenate([p['fc3_w'].T for p in params_list], axis=0)   # (84E, nC)
    b3f = jnp.stack([p['fc3_b'] for p in params_list], 0).sum(0)

    return dict(w1=w1, b1=b1, w2=w2, b2=b2,
                w1f=w1f, b1f=b1f, w2f=w2f, b2f=b2f, w3f=w3f, b3f=b3f)


# ----------------------------------------------------------------------------
# Ensemble forward: 3 pallas_calls total
# ----------------------------------------------------------------------------
def lenet_ensemble_forward(x_nchw, pp):
    N = x_nchw.shape[0]
    x = jnp.transpose(x_nchw, (0, 2, 3, 1))                       # NCHW -> NHWC (N,28,28,1)

    # conv1 (all E members at once: shared input, stacked output channels) + pool
    cols, m1, mq1 = im2col_quadrants(x, 5, 5, pad=2)              # (4*mq1, 25)
    c1 = pp['w1'].shape[1]                                        # 6*E
    h = conv_pool(cols, pp['w1'], pp['b1'], mq1)                  # (mq1, 6E) pooled
    h = h[:m1].reshape(N, 14, 14, c1)

    # conv2 (block-diagonal over ensemble) + pool
    cols, m2, mq2 = im2col_quadrants(h, 5, 5, pad=0)              # (4*mq2, 25*6E)
    c2 = pp['w2'].shape[1]                                        # 16*E
    h = conv_pool(cols, pp['w2'], pp['b2'], mq2)                  # (mq2, 16E) pooled
    h = h[:m2].reshape(N, 5 * 5 * c2)                             # (N, 400*E), (h,w,e,c) order

    # fused FC tail + ensemble sum
    return fc_tail(h, pp['w1f'], pp['b1f'], pp['w2f'], pp['b2f'], pp['w3f'], pp['b3f'])


# ----------------------------------------------------------------------------
# Deterministic parameter init (PyTorch-style uniform(-1/sqrt(fan_in), 1/sqrt(fan_in)))
# ----------------------------------------------------------------------------
def init_lenet_params(key, n_classes):
    ks = jax.random.split(key, 10)

    def u(k, shape, fan_in):
        bound = 1.0 / np.sqrt(fan_in)
        return jax.random.uniform(k, shape, jnp.float32, -bound, bound)

    return dict(
        conv1_w=u(ks[0], (6, 1, 5, 5), 1 * 5 * 5),
        conv1_b=u(ks[1], (6,), 1 * 5 * 5),
        conv2_w=u(ks[2], (16, 6, 5, 5), 6 * 5 * 5),
        conv2_b=u(ks[3], (16,), 6 * 5 * 5),
        fc1_w=u(ks[4], (120, 400), 400),
        fc1_b=u(ks[5], (120,), 400),
        fc2_w=u(ks[6], (84, 120), 120),
        fc2_b=u(ks[7], (84,), 120),
        fc3_w=u(ks[8], (n_classes, 84), 84),
        fc3_b=u(ks[9], (n_classes,), 84),
    )


# ----------------------------------------------------------------------------
# Pure-JAX reference (per-model, PyTorch semantics) for correctness check only
# ----------------------------------------------------------------------------
def lenet_ref(x, p):
    dn = ('NCHW', 'OIHW', 'NCHW')
    h = jax.lax.conv_general_dilated(x, p['conv1_w'], (1, 1),
                                     [(2, 2), (2, 2)], dimension_numbers=dn)
    h = jax.nn.relu(h + p['conv1_b'][None, :, None, None])
    N, C, H, W = h.shape
    h = h.reshape(N, C, H // 2, 2, W // 2, 2).max(axis=(3, 5))
    h = jax.lax.conv_general_dilated(h, p['conv2_w'], (1, 1),
                                     'VALID', dimension_numbers=dn)
    h = jax.nn.relu(h + p['conv2_b'][None, :, None, None])
    N, C, H, W = h.shape
    h = h.reshape(N, C, H // 2, 2, W // 2, 2).max(axis=(3, 5))
    h = h.reshape(N, -1)
    h = jax.nn.relu(h @ p['fc1_w'].T + p['fc1_b'])
    h = jax.nn.relu(h @ p['fc2_w'].T + p['fc2_b'])
    return h @ p['fc3_w'].T + p['fc3_b']


def ensemble_ref(x, params_list, n_classes):
    out = jnp.zeros((x.shape[0], n_classes), jnp.float32)
    for p in params_list:
        out = out + lenet_ref(x, p)
    return out


# ----------------------------------------------------------------------------
if __name__ == "__main__":
    n_classes = 10
    ensemble = 5
    batch = 2

    key = jax.random.PRNGKey(0)
    kx, kp = jax.random.split(key)
    x = jax.random.normal(kx, (batch, 1, 28, 28), jnp.float32)   # fMNIST-shaped NCHW input
    params_list = [init_lenet_params(k, n_classes)
                   for k in jax.random.split(kp, ensemble)]

    # Fold the ensemble into stacked / block-diagonal parameters ONCE, outside the forward.
    prepped = jax.tree_util.tree_map(lambda a: a, prepare_ensemble_params(params_list))

    fwd = jax.jit(lenet_ensemble_forward)
    out = fwd(x, prepped)
    out = jax.block_until_ready(out)

    ref = jax.block_until_ready(ensemble_ref(x, params_list, n_classes))
    np.testing.assert_allclose(np.asarray(out), np.asarray(ref), rtol=2e-2, atol=2e-2)

    print("KERNEL_OK")
</pallas_src>

<mosaic_0001>
module attributes {stable_mosaic.version = 11 : i64} {
  func.func @_conv_pool_kernel(%arg0: i32, %arg1: memref<1568x25xf32, #tpu.memory_space<vmem>>, %arg2: memref<25x30xf32, #tpu.memory_space<vmem>>, %arg3: memref<1x30xf32, #tpu.memory_space<vmem>>, %arg4: memref<392x30xf32, #tpu.memory_space<vmem>>) attributes {dimension_semantics = [#tpu.dimension_semantics<arbitrary>], iteration_bounds = array<i64: 1>, scalar_prefetch = 0 : i64, scratch_operands = 0 : i64, tpu.core_type = #tpu.core_type<tc>, window_params = [{pipeline_mode = #tpu.pipeline_mode<synchronous>, transform_indices = @transform_0, window_bounds = array<i64: 1568, 25>}, {pipeline_mode = #tpu.pipeline_mode<synchronous>, transform_indices = @transform_1, window_bounds = array<i64: 25, 30>}, {pipeline_mode = #tpu.pipeline_mode<synchronous>, transform_indices = @transform_2, window_bounds = array<i64: 1, 30>}, {pipeline_mode = #tpu.pipeline_mode<synchronous>, transform_indices = @transform_3, window_bounds = array<i64: 392, 30>}]} {
    %c0 = arith.constant 0 : index
    %c0_0 = arith.constant 0 : index
    %0 = vector.load %arg1[%c0, %c0_0] : memref<1568x25xf32, #tpu.memory_space<vmem>>, vector<1568x25xf32>
    %c0_1 = arith.constant 0 : index
    %c0_2 = arith.constant 0 : index
    %1 = vector.load %arg2[%c0_1, %c0_2] : memref<25x30xf32, #tpu.memory_space<vmem>>, vector<25x30xf32>
    %cst = arith.constant dense<0.000000e+00> : vector<1568x30xf32>
    %2 = tpu.matmul %0, %1, %cst {dimension_numbers = #tpu.dot_dimension_numbers<[1], [0], [0], [1], [0, 0, 1, 1], [], []>} : vector<1568x25xf32>, vector<25x30xf32>, vector<1568x30xf32> -> vector<1568x30xf32>
    %c0_3 = arith.constant 0 : index
    %c0_4 = arith.constant 0 : index
    %3 = vector.load %arg3[%c0_3, %c0_4] : memref<1x30xf32, #tpu.memory_space<vmem>>, vector<1x30xf32>
    %4 = vector.broadcast %3 : vector<1x30xf32> to vector<1568x30xf32>
    %5 = arith.addf %2, %4 : vector<1568x30xf32>
    %cst_5 = arith.constant 0.000000e+00 : f32
    %6 = vector.broadcast %cst_5 : f32 to vector<1568x30xf32>
    %7 = arith.maximumf %5, %6 : vector<1568x30xf32>
    %8 = vector.extract_strided_slice %7 {offsets = [0, 0], sizes = [392, 30], strides = [1, 1]} : vector<1568x30xf32> to vector<392x30xf32>
    %9 = vector.extract_strided_slice %7 {offsets = [392, 0], sizes = [392, 30], strides = [1, 1]} : vector<1568x30xf32> to vector<392x30xf32>
    %10 = arith.maximumf %8, %9 : vector<392x30xf32>
    %11 = vector.extract_strided_slice %7 {offsets = [784, 0], sizes = [392, 30], strides = [1, 1]} : vector<1568x30xf32> to vector<392x30xf32>
    %12 = vector.extract_strided_slice %7 {offsets = [1176, 0], sizes = [392, 30], strides = [1, 1]} : vector<1568x30xf32> to vector<392x30xf32>
    %13 = arith.maximumf %11, %12 : vector<392x30xf32>
    %14 = arith.maximumf %10, %13 : vector<392x30xf32>
    %c0_6 = arith.constant 0 : index
    %c0_7 = arith.constant 0 : index
    %15 = vector.load %arg4[%c0_6, %c0_7] : memref<392x30xf32, #tpu.memory_space<vmem>>, vector<392x30xf32>
    tpu.vector_store %arg4[%c0_6, %c0_7], %14 {strides = array<i32>} : memref<392x30xf32, #tpu.memory_space<vmem>>, vector<392x30xf32>,
    return
  }
  func.func @transform_0(%arg0: i32) -> (i32, i32) {
    %c0_i32 = arith.constant 0 : i32
    %c0_i32_0 = arith.constant 0 : i32
    %c0_i32_1 = arith.constant 0 : i32
    return %c0_i32, %c0_i32_0 : i32, i32
  }
  func.func @transform_1(%arg0: i32) -> (i32, i32) {
    %c0_i32 = arith.constant 0 : i32
    %c0_i32_0 = arith.constant 0 : i32
    %c0_i32_1 = arith.constant 0 : i32
    return %c0_i32, %c0_i32_0 : i32, i32
  }
  func.func @transform_2(%arg0: i32) -> (i32, i32) {
    %c0_i32 = arith.constant 0 : i32
    %c0_i32_0 = arith.constant 0 : i32
    %c0_i32_1 = arith.constant 0 : i32
    return %c0_i32, %c0_i32_0 : i32, i32
  }
  func.func @transform_3(%arg0: i32) -> (i32, i32) {
    %c0_i32 = arith.constant 0 : i32
    %c0_i32_0 = arith.constant 0 : i32
    %c0_i32_1 = arith.constant 0 : i32
    return %c0_i32, %c0_i32_0 : i32, i32
  }
}

module attributes {stable_mosaic.version = 11 : i64} {
  func.func @_conv_pool_kernel(%arg0: i32, %arg1: memref<224x750xf32, #tpu.memory_space<vmem>>, %arg2: memref<750x80xf32, #tpu.memory_space<vmem>>, %arg3: memref<1x80xf32, #tpu.memory_space<vmem>>, %arg4: memref<56x80xf32, #tpu.memory_space<vmem>>) attributes {dimension_semantics = [#tpu.dimension_semantics<arbitrary>], iteration_bounds = array<i64: 1>, scalar_prefetch = 0 : i64, scratch_operands = 0 : i64, tpu.core_type = #tpu.core_type<tc>, window_params = [{pipeline_mode = #tpu.pipeline_mode<synchronous>, transform_indices = @transform_0, window_bounds = array<i64: 224, 750>}, {pipeline_mode = #tpu.pipeline_mode<synchronous>, transform_indices = @transform_1, window_bounds = array<i64: 750, 80>}, {pipeline_mode = #tpu.pipeline_mode<synchronous>, transform_indices = @transform_2, window_bounds = array<i64: 1, 80>}, {pipeline_mode = #tpu.pipeline_mode<synchronous>, transform_indices = @transform_3, window_bounds = array<i64: 56, 80>}]} {
    %c0 = arith.constant 0 : index
    %c0_0 = arith.constant 0 : index
    %0 = vector.load %arg1[%c0, %c0_0] : memref<224x750xf32, #tpu.memory_space<vmem>>, vector<224x750xf32>
    %c0_1 = arith.constant 0 : index
    %c0_2 = arith.constant 0 : index
    %1 = vector.load %arg2[%c0_1, %c0_2] : memref<750x80xf32, #tpu.memory_space<vmem>>, vector<750x80xf32>
    %cst = arith.constant dense<0.000000e+00> : vector<224x80xf32>
    %2 = tpu.matmul %0, %1, %cst {dimension_numbers = #tpu.dot_dimension_numbers<[1], [0], [0], [1], [0, 0, 1, 1], [], []>} : vector<224x750xf32>, vector<750x80xf32>, vector<224x80xf32> -> vector<224x80xf32>
    %c0_3 = arith.constant 0 : index
    %c0_4 = arith.constant 0 : index
    %3 = vector.load %arg3[%c0_3, %c0_4] : memref<1x80xf32, #tpu.memory_space<vmem>>, vector<1x80xf32>
    %4 = vector.broadcast %3 : vector<1x80xf32> to vector<224x80xf32>
    %5 = arith.addf %2, %4 : vector<224x80xf32>
    %cst_5 = arith.constant 0.000000e+00 : f32
    %6 = vector.broadcast %cst_5 : f32 to vector<224x80xf32>
    %7 = arith.maximumf %5, %6 : vector<224x80xf32>
    %8 = vector.extract_strided_slice %7 {offsets = [0, 0], sizes = [56, 80], strides = [1, 1]} : vector<224x80xf32> to vector<56x80xf32>
    %9 = vector.extract_strided_slice %7 {offsets = [56, 0], sizes = [56, 80], strides = [1, 1]} : vector<224x80xf32> to vector<56x80xf32>
    %10 = arith.maximumf %8, %9 : vector<56x80xf32>
    %11 = vector.extract_strided_slice %7 {offsets = [112, 0], sizes = [56, 80], strides = [1, 1]} : vector<224x80xf32> to vector<56x80xf32>
    %12 = vector.extract_strided_slice %7 {offsets = [168, 0], sizes = [56, 80], strides = [1, 1]} : vector<224x80xf32> to vector<56x80xf32>
    %13 = arith.maximumf %11, %12 : vector<56x80xf32>
    %14 = arith.maximumf %10, %13 : vector<56x80xf32>
    %c0_6 = arith.constant 0 : index
    %c0_7 = arith.constant 0 : index
    %15 = vector.load %arg4[%c0_6, %c0_7] : memref<56x80xf32, #tpu.memory_space<vmem>>, vector<56x80xf32>
    tpu.vector_store %arg4[%c0_6, %c0_7], %14 {strides = array<i32>} : memref<56x80xf32, #tpu.memory_space<vmem>>, vector<56x80xf32>,
    return
  }
  func.func @transform_0(%arg0: i32) -> (i32, i32) {
    %c0_i32 = arith.constant 0 : i32
    %c0_i32_0 = arith.constant 0 : i32
    %c0_i32_1 = arith.constant 0 : i32
    return %c0_i32, %c0_i32_0 : i32, i32
  }
  func.func @transform_1(%arg0: i32) -> (i32, i32) {
    %c0_i32 = arith.constant 0 : i32
    %c0_i32_0 = arith.constant 0 : i32
    %c0_i32_1 = arith.constant 0 : i32
    return %c0_i32, %c0_i32_0 : i32, i32
  }
  func.func @transform_2(%arg0: i32) -> (i32, i32) {
    %c0_i32 = arith.constant 0 : i32
    %c0_i32_0 = arith.constant 0 : i32
    %c0_i32_1 = arith.constant 0 : i32
    return %c0_i32, %c0_i32_0 : i32, i32
  }
  func.func @transform_3(%arg0: i32) -> (i32, i32) {
    %c0_i32 = arith.constant 0 : i32
    %c0_i32_0 = arith.constant 0 : i32
    %c0_i32_1 = arith.constant 0 : i32
    return %c0_i32, %c0_i32_0 : i32, i32
  }
}

module attributes {stable_mosaic.version = 11 : i64} {
  func.func @_fc_tail_kernel(%arg0: i32, %arg1: memref<2x2000xf32, #tpu.memory_space<vmem>>, %arg2: memref<2000x600xf32, #tpu.memory_space<vmem>>, %arg3: memref<1x600xf32, #tpu.memory_space<vmem>>, %arg4: memref<600x420xf32, #tpu.memory_space<vmem>>, %arg5: memref<1x420xf32, #tpu.memory_space<vmem>>, %arg6: memref<420x10xf32, #tpu.memory_space<vmem>>, %arg7: memref<1x10xf32, #tpu.memory_space<vmem>>, %arg8: memref<2x10xf32, #tpu.memory_space<vmem>>) attributes {dimension_semantics = [#tpu.dimension_semantics<arbitrary>], iteration_bounds = array<i64: 1>, scalar_prefetch = 0 : i64, scratch_operands = 0 : i64, tpu.core_type = #tpu.core_type<tc>, window_params = [{pipeline_mode = #tpu.pipeline_mode<synchronous>, transform_indices = @transform_0, window_bounds = array<i64: 2, 2000>}, {pipeline_mode = #tpu.pipeline_mode<synchronous>, transform_indices = @transform_1, window_bounds = array<i64: 2000, 600>}, {pipeline_mode = #tpu.pipeline_mode<synchronous>, transform_indices = @transform_2, window_bounds = array<i64: 1, 600>}, {pipeline_mode = #tpu.pipeline_mode<synchronous>, transform_indices = @transform_3, window_bounds = array<i64: 600, 420>}, {pipeline_mode = #tpu.pipeline_mode<synchronous>, transform_indices = @transform_4, window_bounds = array<i64: 1, 420>}, {pipeline_mode = #tpu.pipeline_mode<synchronous>, transform_indices = @transform_5, window_bounds = array<i64: 420, 10>}, {pipeline_mode = #tpu.pipeline_mode<synchronous>, transform_indices = @transform_6, window_bounds = array<i64: 1, 10>}, {pipeline_mode = #tpu.pipeline_mode<synchronous>, transform_indices = @transform_7, window_bounds = array<i64: 2, 10>}]} {
    %c0 = arith.constant 0 : index
    %c0_0 = arith.constant 0 : index
    %0 = vector.load %arg1[%c0, %c0_0] : memref<2x2000xf32, #tpu.memory_space<vmem>>, vector<2x2000xf32>
    %c0_1 = arith.constant 0 : index
    %c0_2 = arith.constant 0 : index
    %1 = vector.load %arg2[%c0_1, %c0_2] : memref<2000x600xf32, #tpu.memory_space<vmem>>, vector<2000x600xf32>
    %cst = arith.constant dense<0.000000e+00> : vector<2x600xf32>
    %2 = tpu.matmul %0, %1, %cst {dimension_numbers = #tpu.dot_dimension_numbers<[1], [0], [0], [1], [0, 0, 1, 1], [], []>} : vector<2x2000xf32>, vector<2000x600xf32>, vector<2x600xf32> -> vector<2x600xf32>
    %c0_3 = arith.constant 0 : index
    %c0_4 = arith.constant 0 : index
    %3 = vector.load %arg3[%c0_3, %c0_4] : memref<1x600xf32, #tpu.memory_space<vmem>>, vector<1x600xf32>
    %4 = vector.broadcast %3 : vector<1x600xf32> to vector<2x600xf32>
    %5 = arith.addf %2, %4 : vector<2x600xf32>
    %cst_5 = arith.constant 0.000000e+00 : f32
    %6 = vector.broadcast %cst_5 : f32 to vector<2x600xf32>
    %7 = arith.maximumf %5, %6 : vector<2x600xf32>
    %c0_6 = arith.constant 0 : index
    %c0_7 = arith.constant 0 : index
    %8 = vector.load %arg4[%c0_6, %c0_7] : memref<600x420xf32, #tpu.memory_space<vmem>>, vector<600x420xf32>
    %cst_8 = arith.constant dense<0.000000e+00> : vector<2x420xf32>
    %9 = tpu.matmul %7, %8, %cst_8 {dimension_numbers = #tpu.dot_dimension_numbers<[1], [0], [0], [1], [0, 0, 1, 1], [], []>} : vector<2x600xf32>, vector<600x420xf32>, vector<2x420xf32> -> vector<2x420xf32>
    %c0_9 = arith.constant 0 : index
    %c0_10 = arith.constant 0 : index
    %10 = vector.load %arg5[%c0_9, %c0_10] : memref<1x420xf32, #tpu.memory_space<vmem>>, vector<1x420xf32>
    %11 = vector.broadcast %10 : vector<1x420xf32> to vector<2x420xf32>
    %12 = arith.addf %9, %11 : vector<2x420xf32>
    %cst_11 = arith.constant 0.000000e+00 : f32
    %13 = vector.broadcast %cst_11 : f32 to vector<2x420xf32>
    %14 = arith.maximumf %12, %13 : vector<2x420xf32>
    %c0_12 = arith.constant 0 : index
    %c0_13 = arith.constant 0 : index
    %15 = vector.load %arg6[%c0_12, %c0_13] : memref<420x10xf32, #tpu.memory_space<vmem>>, vector<420x10xf32>
    %cst_14 = arith.constant dense<0.000000e+00> : vector<2x10xf32>
    %16 = tpu.matmul %14, %15, %cst_14 {dimension_numbers = #tpu.dot_dimension_numbers<[1], [0], [0], [1], [0, 0, 1, 1], [], []>} : vector<2x420xf32>, vector<420x10xf32>, vector<2x10xf32> -> vector<2x10xf32>
    %c0_15 = arith.constant 0 : index
    %c0_16 = arith.constant 0 : index
    %17 = vector.load %arg7[%c0_15, %c0_16] : memref<1x10xf32, #tpu.memory_space<vmem>>, vector<1x10xf32>
    %18 = vector.broadcast %17 : vector<1x10xf32> to vector<2x10xf32>
    %19 = arith.addf %16, %18 : vector<2x10xf32>
    %c0_17 = arith.constant 0 : index
    %c0_18 = arith.constant 0 : index
    %20 = vector.load %arg8[%c0_17, %c0_18] : memref<2x10xf32, #tpu.memory_space<vmem>>, vector<2x10xf32>
    tpu.vector_store %arg8[%c0_17, %c0_18], %19 {strides = array<i32>} : memref<2x10xf32, #tpu.memory_space<vmem>>, vector<2x10xf32>,
    return
  }
  func.func @transform_0(%arg0: i32) -> (i32, i32) {
    %c0_i32 = arith.constant 0 : i32
    %c0_i32_0 = arith.constant 0 : i32
    %c0_i32_1 = arith.constant 0 : i32
    return %c0_i32, %c0_i32_0 : i32, i32
  }
  func.func @transform_1(%arg0: i32) -> (i32, i32) {
    %c0_i32 = arith.constant 0 : i32
    %c0_i32_0 = arith.constant 0 : i32
    %c0_i32_1 = arith.constant 0 : i32
    return %c0_i32, %c0_i32_0 : i32, i32
  }
  func.func @transform_2(%arg0: i32) -> (i32, i32) {
    %c0_i32 = arith.constant 0 : i32
    %c0_i32_0 = arith.constant 0 : i32
    %c0_i32_1 = arith.constant 0 : i32
    return %c0_i32, %c0_i32_0 : i32, i32
  }
  func.func @transform_3(%arg0: i32) -> (i32, i32) {
    %c0_i32 = arith.constant 0 : i32
    %c0_i32_0 = arith.constant 0 : i32
    %c0_i32_1 = arith.constant 0 : i32
    return %c0_i32, %c0_i32_0 : i32, i32
  }
  func.func @transform_4(%arg0: i32) -> (i32, i32) {
    %c0_i32 = arith.constant 0 : i32
    %c0_i32_0 = arith.constant 0 : i32
    %c0_i32_1 = arith.constant 0 : i32
    return %c0_i32, %c0_i32_0 : i32, i32
  }
  func.func @transform_5(%arg0: i32) -> (i32, i32) {
    %c0_i32 = arith.constant 0 : i32
    %c0_i32_0 = arith.constant 0 : i32
    %c0_i32_1 = arith.constant 0 : i32
    return %c0_i32, %c0_i32_0 : i32, i32
  }
  func.func @transform_6(%arg0: i32) -> (i32, i32) {
    %c0_i32 = arith.constant 0 : i32
    %c0_i32_0 = arith.constant 0 : i32
    %c0_i32_1 = arith.constant 0 : i32
    return %c0_i32, %c0_i32_0 : i32, i32
  }
  func.func @transform_7(%arg0: i32) -> (i32, i32) {
    %c0_i32 = arith.constant 0 : i32
    %c0_i32_0 = arith.constant 0 : i32
    %c0_i32_1 = arith.constant 0 : i32
    return %c0_i32, %c0_i32_0 : i32, i32
  }
}

</mosaic_0001>

<bundles_post_ra>
// kernel: lenet_ensemble_forward.3
= control target key start
LH: loop header
LB: loop body
LE: loop exit
PB: predicated region body
PF: predicated region fallthrough
CT: control target
= control target key end

     0   :  { %vm807_vm0 = vcmask 1040384   ;;  %vm218_vm1 = vcmask 203776   ;;  %vm1759_vm2 = vcmask 244736   ;;  %s3240_s1 = inlined_call_operand.vmem [shape: f32[25,30], index: 1, kind: input, shape index: {}]   ;;  %s3241_s0 = inlined_call_operand.vmem [shape: f32[1568,25], index: 0, kind: input, shape index: {}]   ;;  %s3242_s2 = inlined_call_operand.vmem [shape: f32[1,30], index: 2, kind: input, shape index: {}]   ;;  %s3243_s3 = inlined_call_operand.vmem [shape: f32[392,30], index: 3, kind: output, shape index: {}]  }
   0x1   :  { %v213_v0 = vld [vmem:[%s3240_s1 + $0x18] sm:$0x1]  ;;  %v212_v1 = vld [vmem:[%s3240_s1 + $0x10] sm:$0xff]  ;;  %v211_v2 = vld [vmem:[%s3240_s1 + $0x8] sm:$0xff] }
   0x2   :  { %2011 = vmatpush.msk.msra.mxu2 %vm807_vm0, %v213_v0  ;;  %2012 = vmatpush.msk.msra.mxu3 %vm807_vm0, %v213_v0  ;;  %v210_v3 = vld [vmem:[%s3240_s1] sm:$0xff]  ;;  %v112_v4 = vld [vmem:[%s3241_s0 + $0x310] sm:$0xff]  ;;  %v161_v5 = vld [vmem:[%s3241_s0 + $0x498] sm:$0xff] }
   0x3   :  { %1813 = vmatpush.msk.msra.mxu0 %vm807_vm0, %v213_v0  ;;  %2010 = vmatpush.msk.msra.mxu1 %vm807_vm0, %v213_v0  ;;  %v14_v6 = vld [vmem:[%s3241_s0] sm:$0xff]  ;;  %v63_v7 = vld [vmem:[%s3241_s0 + $0x188] sm:$0xff]  ;;  %v113_v8 = vld [vmem:[%s3241_s0 + $0x318] sm:$0xff] }
   0x4   :  { %2014 = vmatpush.msra.mxu2 %v212_v1  ;;  %2015 = vmatpush.msra.mxu3 %v212_v1  ;;  %v162_v9 = vld [vmem:[%s3241_s0 + $0x4a0] sm:$0xff]  ;;  %v15_v10 = vld [vmem:[%s3241_s0 + $0x8] sm:$0xff]  ;;  %v64_v11 = vld [vmem:[%s3241_s0 + $0x190] sm:$0xff] }
   0x5   :  { %824 = vmatpush.msra.mxu0 %v212_v1  ;;  %2013 = vmatpush.msra.mxu1 %v212_v1  ;;  %v114_v12 = vld [vmem:[%s3241_s0 + $0x320] sm:$0xff]  ;;  %v163_v13 = vld [vmem:[%s3241_s0 + $0x4a8] sm:$0xff]  ;;  %v16_v14 = vld [vmem:[%s3241_s0 + $0x10] sm:$0xff] }
   0x6   :  { %2017 = vmatpush.msra.mxu2 %v211_v2  ;;  %2018 = vmatpush.msra.mxu3 %v211_v2  ;;  %v65_v15 = vld [vmem:[%s3241_s0 + $0x198] sm:$0xff]  ;;  %v115_v16 = vld [vmem:[%s3241_s0 + $0x328] sm:$0xff]  ;;  %v164_v17 = vld [vmem:[%s3241_s0 + $0x4b0] sm:$0xff] }
   0x7   :  { %825 = vmatpush.msra.mxu0 %v211_v2  ;;  %2016 = vmatpush.msra.mxu1 %v211_v2  ;;  %v17_v18 = vld [vmem:[%s3241_s0 + $0x18] sm:$0xff]  ;;  %v66_v19 = vld [vmem:[%s3241_s0 + $0x1a0] sm:$0xff]  ;;  %v116_v20 = vld [vmem:[%s3241_s0 + $0x330] sm:$0xff] }
   0x8   :  { %2020 = vmatpush.msra.mxu2 %v210_v3  ;;  %2021 = vmatpush.msra.mxu3 %v210_v3  ;;  %v165_v21 = vld [vmem:[%s3241_s0 + $0x4b8] sm:$0xff]  ;;  %v18_v22 = vld [vmem:[%s3241_s0 + $0x20] sm:$0xff]  ;;  %v67_v23 = vld [vmem:[%s3241_s0 + $0x1a8] sm:$0xff] }
   0x9   :  { %1912 = vmatmul.msk.f32.vlgmr.msra.gmra.mxu2 %vm218_vm1, %v112_v4  ;;  %1961 = vmatmul.msk.f32.vlgmr.msra.gmra.mxu3 %vm218_vm1, %v161_v5  ;;  %v117_v24 = vld [vmem:[%s3241_s0 + $0x338] sm:$0xff]  ;;  %v166_v25 = vld [vmem:[%s3241_s0 + $0x4c0] sm:$0xff]  ;;  %v19_v26 = vld [vmem:[%s3241_s0 + $0x28] sm:$0xff] }
   0xa   :  { %826 = vmatpush.msra.mxu0 %v210_v3  ;;  %2019 = vmatpush.msra.mxu1 %v210_v3  ;;  %v68_v27 = vld [vmem:[%s3241_s0 + $0x1b0] sm:$0xff]  ;;  %v118_v28 = vld [vmem:[%s3241_s0 + $0x340] sm:$0xff]  ;;  %v167_v29 = vld [vmem:[%s3241_s0 + $0x4c8] sm:$0xff] }
   0xb   :  { %1814 = vmatmul.msk.f32.vlgmr.msra.gmra.mxu0 %vm218_vm1, %v14_v6  ;;  %1863 = vmatmul.msk.f32.vlgmr.msra.gmra.mxu1 %vm218_vm1, %v63_v7  ;;  %v20_v30 = vld [vmem:[%s3241_s0 + $0x30] sm:$0xff]  ;;  %v69_v31 = vld [vmem:[%s3241_s0 + $0x1b8] sm:$0xff]  ;;  %v119_v32 = vld [vmem:[%s3241_s0 + $0x348] sm:$0xff] }
   0xc   :  { %v168_v33 = vld [vmem:[%s3241_s0 + $0x4d0] sm:$0xff]  ;;  %v21_v34 = vld [vmem:[%s3241_s0 + $0x38] sm:$0xff]  ;;  %v70_v35 = vld [vmem:[%s3241_s0 + $0x1c0] sm:$0xff] }
   0xd   :  { %v120_v36 = vld [vmem:[%s3241_s0 + $0x350] sm:$0xff]  ;;  %v169_v37 = vld [vmem:[%s3241_s0 + $0x4d8] sm:$0xff]  ;;  %v22_v38 = vld [vmem:[%s3241_s0 + $0x40] sm:$0xff] }
   0xe   :  { %v71_v39 = vld [vmem:[%s3241_s0 + $0x1c8] sm:$0xff]  ;;  %v121_v40 = vld [vmem:[%s3241_s0 + $0x358] sm:$0xff]  ;;  %v170_v41 = vld [vmem:[%s3241_s0 + $0x4e0] sm:$0xff] }
   0xf   :  { %v23_v42 = vld [vmem:[%s3241_s0 + $0x48] sm:$0xff]  ;;  %v72_v43 = vld [vmem:[%s3241_s0 + $0x1d0] sm:$0xff]  ;;  %v122_v44 = vld [vmem:[%s3241_s0 + $0x360] sm:$0xff] }
  0x10   :  { %v171_v45 = vld [vmem:[%s3241_s0 + $0x4e8] sm:$0xff]  ;;  %v24_v46 = vld [vmem:[%s3241_s0 + $0x50] sm:$0xff]  ;;  %v73_v47 = vld [vmem:[%s3241_s0 + $0x1d8] sm:$0xff] }
  0x11   :  { %1913 = vmatmul.msk.f32.gmra.mxu2 %vm218_vm1, %v113_v8  ;;  %1962 = vmatmul.msk.f32.gmra.mxu3 %vm218_vm1, %v162_v9  ;;  %v123_v48 = vld [vmem:[%s3241_s0 + $0x368] sm:$0xff]  ;;  %v172_v49 = vld [vmem:[%s3241_s0 + $0x4f0] sm:$0xff]  ;;  %v25_v50 = vld [vmem:[%s3241_s0 + $0x58] sm:$0xff] }
  0x12   :  { %v74_v51 = vld [vmem:[%s3241_s0 + $0x1e0] sm:$0xff]  ;;  %v124_v52 = vld [vmem:[%s3241_s0 + $0x370] sm:$0xff]  ;;  %v173_v53 = vld [vmem:[%s3241_s0 + $0x4f8] sm:$0xff] }
  0x13   :  { %1815 = vmatmul.msk.f32.gmra.mxu0 %vm218_vm1, %v15_v10  ;;  %1864 = vmatmul.msk.f32.gmra.mxu1 %vm218_vm1, %v64_v11  ;;  %v26_v54 = vld [vmem:[%s3241_s0 + $0x60] sm:$0xff]  ;;  %v75_v55 = vld [vmem:[%s3241_s0 + $0x1e8] sm:$0xff]  ;;  %v125_v56 = vld [vmem:[%s3241_s0 + $0x378] sm:$0xff] }
  0x14   :  { %v174_v57 = vld [vmem:[%s3241_s0 + $0x500] sm:$0xff]  ;;  %v27_v58 = vld [vmem:[%s3241_s0 + $0x68] sm:$0xff]  ;;  %v76_v59 = vld [vmem:[%s3241_s0 + $0x1f0] sm:$0xff] }
  0x15   :  { %v126_v60 = vld [vmem:[%s3241_s0 + $0x380] sm:$0xff]  ;;  %v175_v61 = vld [vmem:[%s3241_s0 + $0x508] sm:$0xff]  ;;  %v28_v62 = vld [vmem:[%s3241_s0 + $0x70] sm:$0xff] }
  0x16   :  { %v77_v63 = vld [vmem:[%s3241_s0 + $0x1f8] sm:$0xff]  ;;  %v127_v0 = vld [vmem:[%s3241_s0 + $0x388] sm:$0xff]  ;;  %v176_v1 = vld [vmem:[%s3241_s0 + $0x510] sm:$0xff] }
  0x17   :  { %v29_v2 = vld [vmem:[%s3241_s0 + $0x78] sm:$0xff]  ;;  %v78_v3 = vld [vmem:[%s3241_s0 + $0x200] sm:$0xff]  ;;  %v128_v5 = vld [vmem:[%s3241_s0 + $0x390] sm:$0xff] }
  0x18   :  { %v2316_v4 = vld [vmem:[%s3242_s2] ss:$0 sm:$0xff]  ;;  %v177_v6 = vld [vmem:[%s3241_s0 + $0x518] sm:$0xff]  ;;  %v79_v10 = vld [vmem:[%s3241_s0 + $0x208] sm:$0xff] }
  0x19   :  { %1914 = vmatmul.msk.f32.gmra.mxu2 %vm218_vm1, %v114_v12  ;;  %1963 = vmatmul.msk.f32.gmra.mxu3 %vm218_vm1, %v163_v13  ;;  %v30_v9 = vld [vmem:[%s3241_s0 + $0x80] sm:$0xff] }
  0x1b   :  { %1816 = vmatmul.msk.f32.gmra.mxu0 %vm218_vm1, %v16_v14  ;;  %1865 = vmatmul.msk.f32.gmra.mxu1 %vm218_vm1, %v65_v15 }
  0x21   :  { %1915 = vmatmul.msk.f32.gmra.mxu2 %vm218_vm1, %v115_v16  ;;  %1964 = vmatmul.msk.f32.gmra.mxu3 %vm218_vm1, %v164_v17 }
  0x23   :  { %1817 = vmatmul.msk.f32.gmra.mxu0 %vm218_vm1, %v17_v18  ;;  %1866 = vmatmul.msk.f32.gmra.mxu1 %vm218_vm1, %v66_v19  ;;  %v129_v19 = vld [vmem:[%s3241_s0 + $0x398] sm:$0xff] }
  0x29   :  { %1916 = vmatmul.msk.f32.gmra.mxu2 %vm218_vm1, %v116_v20  ;;  %1965 = vmatmul.msk.f32.gmra.mxu3 %vm218_vm1, %v165_v21  ;;  %v178_v20 = vld [vmem:[%s3241_s0 + $0x520] sm:$0xff] }
  0x2b   :  { %1818 = vmatmul.msk.f32.gmra.mxu0 %vm218_vm1, %v18_v22  ;;  %1867 = vmatmul.msk.f32.gmra.mxu1 %vm218_vm1, %v67_v23 }
  0x31   :  { %1917 = vmatmul.msk.f32.gmra.mxu2 %vm218_vm1, %v117_v24  ;;  %1966 = vmatmul.msk.f32.gmra.mxu3 %vm218_vm1, %v166_v25 }
  0x33   :  { %1819 = vmatmul.msk.f32.gmra.mxu0 %vm218_vm1, %v19_v26  ;;  %1868 = vmatmul.msk.f32.gmra.mxu1 %vm218_vm1, %v68_v27  ;;  %v31_v26 = vld [vmem:[%s3241_s0 + $0x88] sm:$0xff]  ;;  %v80_v27 = vld [vmem:[%s3241_s0 + $0x210] sm:$0xff] }
  0x39   :  { %1918 = vmatmul.msk.f32.gmra.mxu2 %vm218_vm1, %v118_v28  ;;  %1967 = vmatmul.msk.f32.gmra.mxu3 %vm218_vm1, %v167_v29 }
  0x3b   :  { %1820 = vmatmul.msk.f32.gmra.mxu0 %vm218_vm1, %v20_v30  ;;  %1869 = vmatmul.msk.f32.gmra.mxu1 %vm218_vm1, %v69_v31 }
  0x41   :  { %1919 = vmatmul.msk.f32.gmra.mxu2 %vm218_vm1, %v119_v32  ;;  %1968 = vmatmul.msk.f32.gmra.mxu3 %vm218_vm1, %v168_v33 }
  0x43   :  { %1821 = vmatmul.msk.f32.gmra.mxu0 %vm218_vm1, %v21_v34  ;;  %1870 = vmatmul.msk.f32.gmra.mxu1 %vm218_vm1, %v70_v35 }
  0x49   :  { %1920 = vmatmul.msk.f32.gmra.mxu2 %vm218_vm1, %v120_v36  ;;  %1969 = vmatmul.msk.f32.gmra.mxu3 %vm218_vm1, %v169_v37 }
  0x4b   :  { %1822 = vmatmul.msk.f32.gmra.mxu0 %vm218_vm1, %v22_v38  ;;  %1871 = vmatmul.msk.f32.gmra.mxu1 %vm218_vm1, %v71_v39  ;;  %v130_v38 = vld [vmem:[%s3241_s0 + $0x3a0] sm:$0xff]  ;;  %v179_v39 = vld [vmem:[%s3241_s0 + $0x528] sm:$0xff] }
  0x51   :  { %1921 = vmatmul.msk.f32.gmra.mxu2 %vm218_vm1, %v121_v40  ;;  %1970 = vmatmul.msk.f32.gmra.mxu3 %vm218_vm1, %v170_v41 }
  0x53   :  { %1823 = vmatmul.msk.f32.gmra.mxu0 %vm218_vm1, %v23_v42  ;;  %1872 = vmatmul.msk.f32.gmra.mxu1 %vm218_vm1, %v72_v43 }
  0x59   :  { %1922 = vmatmul.msk.f32.gmra.mxu2 %vm218_vm1, %v122_v44  ;;  %1971 = vmatmul.msk.f32.gmra.mxu3 %vm218_vm1, %v171_v45  ;;  %v32_v45 = vld [vmem:[%s3241_s0 + $0x90] sm:$0xff] }
  0x5b   :  { %1824 = vmatmul.msk.f32.gmra.mxu0 %vm218_vm1, %v24_v46  ;;  %1873 = vmatmul.msk.f32.gmra.mxu1 %vm218_vm1, %v73_v47  ;;  %v81_v46 = vld [vmem:[%s3241_s0 + $0x218] sm:$0xff] }
  0x61   :  { %1923 = vmatmul.msk.f32.gmra.mxu2 %vm218_vm1, %v123_v48  ;;  %1972 = vmatmul.msk.f32.gmra.mxu3 %vm218_vm1, %v172_v49 }
  0x63   :  { %1825 = vmatmul.msk.f32.gmra.mxu0 %vm218_vm1, %v25_v50  ;;  %1874 = vmatmul.msk.f32.gmra.mxu1 %vm218_vm1, %v74_v51 }
  0x69   :  { %1924 = vmatmul.msk.f32.gmra.mxu2 %vm218_vm1, %v124_v52  ;;  %1973 = vmatmul.msk.f32.gmra.mxu3 %vm218_vm1, %v173_v53 }
  0x6b   :  { %1826 = vmatmul.msk.f32.gmra.mxu0 %vm218_vm1, %v26_v54  ;;  %1875 = vmatmul.msk.f32.gmra.mxu1 %vm218_vm1, %v75_v55 }
  0x71   :  { %1925 = vmatmul.msk.f32.gmra.mxu2 %vm218_vm1, %v125_v56  ;;  %1974 = vmatmul.msk.f32.gmra.mxu3 %vm218_vm1, %v174_v57  ;;  %v131_v57 = vld [vmem:[%s3241_s0 + $0x3a8] sm:$0xff] }
  0x73   :  { %1827 = vmatmul.msk.f32.gmra.mxu0 %vm218_vm1, %v27_v58  ;;  %1876 = vmatmul.msk.f32.gmra.mxu1 %vm218_vm1, %v76_v59  ;;  %v180_v58 = vld [vmem:[%s3241_s0 + $0x530] sm:$0xff] }
  0x79   :  { %1926 = vmatmul.msk.f32.gmra.mxu2 %vm218_vm1, %v126_v60  ;;  %1975 = vmatmul.msk.f32.gmra.mxu3 %vm218_vm1, %v175_v61 }
  0x7b   :  { %1828 = vmatmul.msk.f32.gmra.mxu0 %vm218_vm1, %v28_v62  ;;  %1877 = vmatmul.msk.f32.gmra.mxu1 %vm218_vm1, %v77_v63 }
  0x81   :  { %1927 = vmatmul.msk.f32.gmra.mxu2 %vm218_vm1, %v127_v0  ;;  %1976 = vmatmul.msk.f32.gmra.mxu3 %vm218_vm1, %v176_v1  ;;  %v33_v0 = vld [vmem:[%s3241_s0 + $0x98] sm:$0xff]  ;;  %v82_v1 = vld [vmem:[%s3241_s0 + $0x220] sm:$0xff] }
  0x83   :  { %1829 = vmatmul.msk.f32.gmra.mxu0 %vm218_vm1, %v29_v2  ;;  %1878 = vmatmul.msk.f32.gmra.mxu1 %vm218_vm1, %v78_v3 }
  0x88   :  { %v828_v7 = vpop.f32.mrf.mxu0  ;;  %v975_v8 = vpop.f32.mrf.mxu1 }
  0x89   :  { %1928 = vmatmul.msk.f32.gmra.mxu2 %vm218_vm1, %v128_v5  ;;  %1977 = vmatmul.msk.f32.gmra.mxu3 %vm218_vm1, %v177_v6  ;;  %v829_v11 = vadd.f32 %v2316_v4, %v828_v7  ;;  %v976_v12 = vadd.f32 %v2316_v4, %v975_v8 }
  0x8b   :  { %v1416_v13 = vmax.f32 %v829_v11, 0.0  ;;  %v1465_v14 = vmax.f32 %v976_v12, 0.0  ;;  %1830 = vmatmul.msk.f32.gmra.mxu0 %vm218_vm1, %v30_v9  ;;  %1879 = vmatmul.msk.f32.gmra.mxu1 %vm218_vm1, %v79_v10 }
  0x8c   :  { %v1122_v15 = vpop.f32.mrf.mxu2  ;;  %v1269_v16 = vpop.f32.mrf.mxu3 }
  0x8d   :  { %v1123_v17 = vadd.f32 %v2316_v4, %v1122_v15  ;;  %v1270_v18 = vadd.f32 %v2316_v4, %v1269_v16  ;;  %v1612_v21 = vmax.f32 %v1416_v13, %v1465_v14  ;;  %v132_v13 = vld [vmem:[%s3241_s0 + $0x3b0] sm:$0xff]  ;;  %v181_v14 = vld [vmem:[%s3241_s0 + $0x538] sm:$0xff] }
  0x8f   :  { %v1514_v22 = vmax.f32 %v1123_v17, 0.0  ;;  %v1563_v23 = vmax.f32 %v1270_v18, 0.0 }
  0x90   :  { %v831_v24 = vpop.f32.mrf.mxu0  ;;  %v978_v25 = vpop.f32.mrf.mxu1 }
  0x91   :  { %v1661_v28 = vmax.f32 %v1514_v22, %v1563_v23  ;;  %1929 = vmatmul.msk.f32.gmra.mxu2 %vm218_vm1, %v129_v19  ;;  %1978 = vmatmul.msk.f32.gmra.mxu3 %vm218_vm1, %v178_v20  ;;  %v832_v29 = vadd.f32 %v2316_v4, %v831_v24  ;;  %v979_v30 = vadd.f32 %v2316_v4, %v978_v25  ;;  %v34_v20 = vld [vmem:[%s3241_s0 + $0xa0] sm:$0xff] }
  0x93   :  { %v1710_v31 = vmax.f32 %v1612_v21, %v1661_v28  ;;  %v1417_v32 = vmax.f32 %v832_v29, 0.0  ;;  %v1466_v33 = vmax.f32 %v979_v30, 0.0  ;;  %1831 = vmatmul.msk.f32.gmra.mxu0 %vm218_vm1, %v31_v26  ;;  %1880 = vmatmul.msk.f32.gmra.mxu1 %vm218_vm1, %v80_v27  ;;  %v83_v21 = vld [vmem:[%s3241_s0 + $0x228] sm:$0xff] }
  0x94   :  { %v1125_v34 = vpop.f32.mrf.mxu2  ;;  %v1272_v35 = vpop.f32.mrf.mxu3 }
  0x95   :  { %1760 = vst.msk [vmem:[%s3243_s3] sm:$0xff] %vm1759_vm2, %v1710_v31  ;;  %v1126_v36 = vadd.f32 %v2316_v4, %v1125_v34  ;;  %v1273_v37 = vadd.f32 %v2316_v4, %v1272_v35  ;;  %v1613_v40 = vmax.f32 %v1417_v32, %v1466_v33  ;;  %v133_v32 = vld [vmem:[%s3241_s0 + $0x3b8] sm:$0xff]  ;;  %v182_v33 = vld [vmem:[%s3241_s0 + $0x540] sm:$0xff] }
  0x97   :  { %v1515_v41 = vmax.f32 %v1126_v36, 0.0  ;;  %v1564_v42 = vmax.f32 %v1273_v37, 0.0 }
  0x98   :  { %v834_v43 = vpop.f32.mrf.mxu0  ;;  %v981_v44 = vpop.f32.mrf.mxu1 }
  0x99   :  { %v1662_v47 = vmax.f32 %v1515_v41, %v1564_v42  ;;  %1930 = vmatmul.msk.f32.gmra.mxu2 %vm218_vm1, %v130_v38  ;;  %1979 = vmatmul.msk.f32.gmra.mxu3 %vm218_vm1, %v179_v39  ;;  %v835_v48 = vadd.f32 %v2316_v4, %v834_v43  ;;  %v982_v49 = vadd.f32 %v2316_v4, %v981_v44  ;;  %v35_v39 = vld [vmem:[%s3241_s0 + $0xa8] sm:$0xff] }
  0x9b   :  { %v1711_v50 = vmax.f32 %v1613_v40, %v1662_v47  ;;  %v1418_v51 = vmax.f32 %v835_v48, 0.0  ;;  %v1467_v52 = vmax.f32 %v982_v49, 0.0  ;;  %1832 = vmatmul.msk.f32.gmra.mxu0 %vm218_vm1, %v32_v45  ;;  %1881 = vmatmul.msk.f32.gmra.mxu1 %vm218_vm1, %v81_v46  ;;  %v84_v40 = vld [vmem:[%s3241_s0 + $0x230] sm:$0xff] }
  0x9c   :  { %v1128_v53 = vpop.f32.mrf.mxu2  ;;  %v1275_v54 = vpop.f32.mrf.mxu3 }
  0x9d   :  { %1761 = vst.msk [vmem:[%s3243_s3 + $0x8] sm:$0xff] %vm1759_vm2, %v1711_v50  ;;  %v1129_v55 = vadd.f32 %v2316_v4, %v1128_v53  ;;  %v1276_v56 = vadd.f32 %v2316_v4, %v1275_v54  ;;  %v1614_v59 = vmax.f32 %v1418_v51, %v1467_v52  ;;  %v134_v51 = vld [vmem:[%s3241_s0 + $0x3c0] sm:$0xff]  ;;  %v183_v52 = vld [vmem:[%s3241_s0 + $0x548] sm:$0xff] }
  0x9f   :  { %v1516_v60 = vmax.f32 %v1129_v55, 0.0  ;;  %v1565_v61 = vmax.f32 %v1276_v56, 0.0 }
  0xa0   :  { %v837_v62 = vpop.f32.mrf.mxu0  ;;  %v984_v63 = vpop.f32.mrf.mxu1 }
  0xa1   :  { %v1663_v2 = vmax.f32 %v1516_v60, %v1565_v61  ;;  %1931 = vmatmul.msk.f32.gmra.mxu2 %vm218_vm1, %v131_v57  ;;  %1980 = vmatmul.msk.f32.gmra.mxu3 %vm218_vm1, %v180_v58  ;;  %v838_v3 = vadd.f32 %v2316_v4, %v837_v62  ;;  %v985_v5 = vadd.f32 %v2316_v4, %v984_v63  ;;  %v36_v58 = vld [vmem:[%s3241_s0 + $0xb0] sm:$0xff] }
  0xa3   :  { %v1712_v6 = vmax.f32 %v1614_v59, %v1663_v2  ;;  %v1419_v7 = vmax.f32 %v838_v3, 0.0  ;;  %v1468_v8 = vmax.f32 %v985_v5, 0.0  ;;  %1833 = vmatmul.msk.f32.gmra.mxu0 %vm218_vm1, %v33_v0  ;;  %1882 = vmatmul.msk.f32.gmra.mxu1 %vm218_vm1, %v82_v1  ;;  %v85_v59 = vld [vmem:[%s3241_s0 + $0x238] sm:$0xff] }
  0xa4   :  { %v1131_v9 = vpop.f32.mrf.mxu2  ;;  %v1278_v10 = vpop.f32.mrf.mxu3 }
  0xa5   :  { %1762 = vst.msk [vmem:[%s3243_s3 + $0x10] sm:$0xff] %vm1759_vm2, %v1712_v6  ;;  %v1132_v11 = vadd.f32 %v2316_v4, %v1131_v9  ;;  %v1279_v12 = vadd.f32 %v2316_v4, %v1278_v10  ;;  %v1615_v15 = vmax.f32 %v1419_v7, %v1468_v8  ;;  %v135_v7 = vld [vmem:[%s3241_s0 + $0x3c8] sm:$0xff]  ;;  %v184_v8 = vld [vmem:[%s3241_s0 + $0x550] sm:$0xff] }
  0xa7   :  { %v1517_v16 = vmax.f32 %v1132_v11, 0.0  ;;  %v1566_v17 = vmax.f32 %v1279_v12, 0.0 }
  0xa8   :  { %v840_v18 = vpop.f32.mrf.mxu0  ;;  %v987_v19 = vpop.f32.mrf.mxu1 }
  0xa9   :  { %v1664_v22 = vmax.f32 %v1517_v16, %v1566_v17  ;;  %1932 = vmatmul.msk.f32.gmra.mxu2 %vm218_vm1, %v132_v13  ;;  %1981 = vmatmul.msk.f32.gmra.mxu3 %vm218_vm1, %v181_v14  ;;  %v841_v23 = vadd.f32 %v2316_v4, %v840_v18  ;;  %v988_v24 = vadd.f32 %v2316_v4, %v987_v19  ;;  %v37_v14 = vld [vmem:[%s3241_s0 + $0xb8] sm:$0xff] }
  0xab   :  { %v1713_v25 = vmax.f32 %v1615_v15, %v1664_v22  ;;  %v1420_v26 = vmax.f32 %v841_v23, 0.0  ;;  %v1469_v27 = vmax.f32 %v988_v24, 0.0  ;;  %1834 = vmatmul.msk.f32.gmra.mxu0 %vm218_vm1, %v34_v20  ;;  %1883 = vmatmul.msk.f32.gmra.mxu1 %vm218_vm1, %v83_v21  ;;  %v86_v15 = vld [vmem:[%s3241_s0 + $0x240] sm:$0xff] }
  0xac   :  { %v1134_v28 = vpop.f32.mrf.mxu2  ;;  %v1281_v29 = vpop.f32.mrf.mxu3 }
  0xad   :  { %1763 = vst.msk [vmem:[%s3243_s3 + $0x18] sm:$0xff] %vm1759_vm2, %v1713_v25  ;;  %v1135_v30 = vadd.f32 %v2316_v4, %v1134_v28  ;;  %v1282_v31 = vadd.f32 %v2316_v4, %v1281_v29  ;;  %v1616_v34 = vmax.f32 %v1420_v26, %v1469_v27  ;;  %v136_v26 = vld [vmem:[%s3241_s0 + $0x3d0] sm:$0xff]  ;;  %v185_v27 = vld [vmem:[%s3241_s0 + $0x558] sm:$0xff] }
  0xaf   :  { %v1518_v35 = vmax.f32 %v1135_v30, 0.0  ;;  %v1567_v36 = vmax.f32 %v1282_v31, 0.0 }
  0xb0   :  { %v843_v37 = vpop.f32.mrf.mxu0  ;;  %v990_v38 = vpop.f32.mrf.mxu1 }
  0xb1   :  { %v1665_v41 = vmax.f32 %v1518_v35, %v1567_v36  ;;  %1933 = vmatmul.msk.f32.gmra.mxu2 %vm218_vm1, %v133_v32  ;;  %1982 = vmatmul.msk.f32.gmra.mxu3 %vm218_vm1, %v182_v33  ;;  %v844_v42 = vadd.f32 %v2316_v4, %v843_v37  ;;  %v991_v43 = vadd.f32 %v2316_v4, %v990_v38  ;;  %v38_v33 = vld [vmem:[%s3241_s0 + $0xc0] sm:$0xff] }
  0xb3   :  { %v1714_v44 = vmax.f32 %v1616_v34, %v1665_v41  ;;  %v1421_v45 = vmax.f32 %v844_v42, 0.0  ;;  %v1470_v46 = vmax.f32 %v991_v43, 0.0  ;;  %1835 = vmatmul.msk.f32.gmra.mxu0 %vm218_vm1, %v35_v39  ;;  %1884 = vmatmul.msk.f32.gmra.mxu1 %vm218_vm1, %v84_v40  ;;  %v87_v34 = vld [vmem:[%s3241_s0 + $0x248] sm:$0xff] }
  0xb4   :  { %v1137_v47 = vpop.f32.mrf.mxu2  ;;  %v1284_v48 = vpop.f32.mrf.mxu3 }
  0xb5   :  { %1764 = vst.msk [vmem:[%s3243_s3 + $0x20] sm:$0xff] %vm1759_vm2, %v1714_v44  ;;  %v1138_v49 = vadd.f32 %v2316_v4, %v1137_v47  ;;  %v1285_v50 = vadd.f32 %v2316_v4, %v1284_v48  ;;  %v1617_v53 = vmax.f32 %v1421_v45, %v1470_v46  ;;  %v137_v45 = vld [vmem:[%s3241_s0 + $0x3d8] sm:$0xff]  ;;  %v186_v46 = vld [vmem:[%s3241_s0 + $0x560] sm:$0xff] }
  0xb7   :  { %v1519_v54 = vmax.f32 %v1138_v49, 0.0  ;;  %v1568_v55 = vmax.f32 %v1285_v50, 0.0 }
  0xb8   :  { %v846_v56 = vpop.f32.mrf.mxu0  ;;  %v993_v57 = vpop.f32.mrf.mxu1 }
  0xb9   :  { %v1666_v60 = vmax.f32 %v1519_v54, %v1568_v55  ;;  %1934 = vmatmul.msk.f32.gmra.mxu2 %vm218_vm1, %v134_v51  ;;  %1983 = vmatmul.msk.f32.gmra.mxu3 %vm218_vm1, %v183_v52  ;;  %v847_v61 = vadd.f32 %v2316_v4, %v846_v56  ;;  %v994_v62 = vadd.f32 %v2316_v4, %v993_v57  ;;  %v39_v52 = vld [vmem:[%s3241_s0 + $0xc8] sm:$0xff] }
  0xbb   :  { %v1715_v63 = vmax.f32 %v1617_v53, %v1666_v60  ;;  %v1422_v0 = vmax.f32 %v847_v61, 0.0  ;;  %v1471_v1 = vmax.f32 %v994_v62, 0.0  ;;  %1836 = vmatmul.msk.f32.gmra.mxu0 %vm218_vm1, %v36_v58  ;;  %1885 = vmatmul.msk.f32.gmra.mxu1 %vm218_vm1, %v85_v59  ;;  %v88_v53 = vld [vmem:[%s3241_s0 + $0x250] sm:$0xff] }
  0xbc   :  { %v1140_v2 = vpop.f32.mrf.mxu2  ;;  %v1287_v3 = vpop.f32.mrf.mxu3 }
  0xbd   :  { %1765 = vst.msk [vmem:[%s3243_s3 + $0x28] sm:$0xff] %vm1759_vm2, %v1715_v63  ;;  %v1141_v5 = vadd.f32 %v2316_v4, %v1140_v2  ;;  %v1288_v6 = vadd.f32 %v2316_v4, %v1287_v3  ;;  %v1618_v9 = vmax.f32 %v1422_v0, %v1471_v1  ;;  %v138_v0 = vld [vmem:[%s3241_s0 + $0x3e0] sm:$0xff]  ;;  %v187_v1 = vld [vmem:[%s3241_s0 + $0x568] sm:$0xff] }
  0xbf   :  { %v1520_v10 = vmax.f32 %v1141_v5, 0.0  ;;  %v1569_v11 = vmax.f32 %v1288_v6, 0.0 }
  0xc0   :  { %v849_v12 = vpop.f32.mrf.mxu0  ;;  %v996_v13 = vpop.f32.mrf.mxu1 }
  0xc1   :  { %v1667_v16 = vmax.f32 %v1520_v10, %v1569_v11  ;;  %1935 = vmatmul.msk.f32.gmra.mxu2 %vm218_vm1, %v135_v7  ;;  %1984 = vmatmul.msk.f32.gmra.mxu3 %vm218_vm1, %v184_v8  ;;  %v850_v17 = vadd.f32 %v2316_v4, %v849_v12  ;;  %v997_v18 = vadd.f32 %v2316_v4, %v996_v13  ;;  %v40_v8 = vld [vmem:[%s3241_s0 + $0xd0] sm:$0xff] }
  0xc3   :  { %v1716_v19 = vmax.f32 %v1618_v9, %v1667_v16  ;;  %v1423_v20 = vmax.f32 %v850_v17, 0.0  ;;  %v1472_v21 = vmax.f32 %v997_v18, 0.0  ;;  %1837 = vmatmul.msk.f32.gmra.mxu0 %vm218_vm1, %v37_v14  ;;  %1886 = vmatmul.msk.f32.gmra.mxu1 %vm218_vm1, %v86_v15  ;;  %v89_v9 = vld [vmem:[%s3241_s0 + $0x258] sm:$0xff] }
  0xc4   :  { %v1143_v22 = vpop.f32.mrf.mxu2  ;;  %v1290_v23 = vpop.f32.mrf.mxu3 }
  0xc5   :  { %1766 = vst.msk [vmem:[%s3243_s3 + $0x30] sm:$0xff] %vm1759_vm2, %v1716_v19  ;;  %v1144_v24 = vadd.f32 %v2316_v4, %v1143_v22  ;;  %v1291_v25 = vadd.f32 %v2316_v4, %v1290_v23  ;;  %v1619_v28 = vmax.f32 %v1423_v20, %v1472_v21  ;;  %v139_v20 = vld [vmem:[%s3241_s0 + $0x3e8] sm:$0xff]  ;;  %v188_v21 = vld [vmem:[%s3241_s0 + $0x570] sm:$0xff] }
  0xc7   :  { %v1521_v29 = vmax.f32 %v1144_v24, 0.0  ;;  %v1570_v30 = vmax.f32 %v1291_v25, 0.0 }
  0xc8   :  { %v852_v31 = vpop.f32.mrf.mxu0  ;;  %v999_v32 = vpop.f32.mrf.mxu1 }
  0xc9   :  { %v1668_v35 = vmax.f32 %v1521_v29, %v1570_v30  ;;  %1936 = vmatmul.msk.f32.gmra.mxu2 %vm218_vm1, %v136_v26  ;;  %1985 = vmatmul.msk.f32.gmra.mxu3 %vm218_vm1, %v185_v27  ;;  %v853_v36 = vadd.f32 %v2316_v4, %v852_v31  ;;  %v1000_v37 = vadd.f32 %v2316_v4, %v999_v32  ;;  %v41_v27 = vld [vmem:[%s3241_s0 + $0xd8] sm:$0xff] }
  0xcb   :  { %v1717_v38 = vmax.f32 %v1619_v28, %v1668_v35  ;;  %v1424_v39 = vmax.f32 %v853_v36, 0.0  ;;  %v1473_v40 = vmax.f32 %v1000_v37, 0.0  ;;  %1838 = vmatmul.msk.f32.gmra.mxu0 %vm218_vm1, %v38_v33  ;;  %1887 = vmatmul.msk.f32.gmra.mxu1 %vm218_vm1, %v87_v34  ;;  %v90_v28 = vld [vmem:[%s3241_s0 + $0x260] sm:$0xff] }
  0xcc   :  { %v1146_v41 = vpop.f32.mrf.mxu2  ;;  %v1293_v42 = vpop.f32.mrf.mxu3 }
  0xcd   :  { %1767 = vst.msk [vmem:[%s3243_s3 + $0x38] sm:$0xff] %vm1759_vm2, %v1717_v38  ;;  %v1147_v43 = vadd.f32 %v2316_v4, %v1146_v41  ;;  %v1294_v44 = vadd.f32 %v2316_v4, %v1293_v42  ;;  %v1620_v47 = vmax.f32 %v1424_v39, %v1473_v40  ;;  %v140_v39 = vld [vmem:[%s3241_s0 + $0x3f0] sm:$0xff]  ;;  %v189_v40 = vld [vmem:[%s3241_s0 + $0x578] sm:$0xff] }
  0xcf   :  { %v1522_v48 = vmax.f32 %v1147_v43, 0.0  ;;  %v1571_v49 = vmax.f32 %v1294_v44, 0.0 }
  0xd0   :  { %v855_v50 = vpop.f32.mrf.mxu0  ;;  %v1002_v51 = vpop.f32.mrf.mxu1 }
  0xd1   :  { %v1669_v54 = vmax.f32 %v1522_v48, %v1571_v49  ;;  %1937 = vmatmul.msk.f32.gmra.mxu2 %vm218_vm1, %v137_v45  ;;  %1986 = vmatmul.msk.f32.gmra.mxu3 %vm218_vm1, %v186_v46  ;;  %v856_v55 = vadd.f32 %v2316_v4, %v855_v50  ;;  %v1003_v56 = vadd.f32 %v2316_v4, %v1002_v51  ;;  %v42_v46 = vld [vmem:[%s3241_s0 + $0xe0] sm:$0xff] }
  0xd3   :  { %v1718_v57 = vmax.f32 %v1620_v47, %v1669_v54  ;;  %v1425_v58 = vmax.f32 %v856_v55, 0.0  ;;  %v1474_v59 = vmax.f32 %v1003_v56, 0.0  ;;  %1839 = vmatmul.msk.f32.gmra.mxu0 %vm218_vm1, %v39_v52  ;;  %1888 = vmatmul.msk.f32.gmra.mxu1 %vm218_vm1, %v88_v53  ;;  %v91_v47 = vld [vmem:[%s3241_s0 + $0x268] sm:$0xff] }
  0xd4   :  { %v1149_v60 = vpop.f32.mrf.mxu2  ;;  %v1296_v61 = vpop.f32.mrf.mxu3 }
  0xd5   :  { %1768 = vst.msk [vmem:[%s3243_s3 + $0x40] sm:$0xff] %vm1759_vm2, %v1718_v57  ;;  %v1150_v62 = vadd.f32 %v2316_v4, %v1149_v60  ;;  %v1297_v63 = vadd.f32 %v2316_v4, %v1296_v61  ;;  %v1621_v2 = vmax.f32 %v1425_v58, %v1474_v59  ;;  %v141_v58 = vld [vmem:[%s3241_s0 + $0x3f8] sm:$0xff]  ;;  %v190_v59 = vld [vmem:[%s3241_s0 + $0x580] sm:$0xff] }
  0xd7   :  { %v1523_v3 = vmax.f32 %v1150_v62, 0.0  ;;  %v1572_v5 = vmax.f32 %v1297_v63, 0.0 }
  0xd8   :  { %v858_v6 = vpop.f32.mrf.mxu0  ;;  %v1005_v7 = vpop.f32.mrf.mxu1 }
  0xd9   :  { %v1670_v10 = vmax.f32 %v1523_v3, %v1572_v5  ;;  %1938 = vmatmul.msk.f32.gmra.mxu2 %vm218_vm1, %v138_v0  ;;  %1987 = vmatmul.msk.f32.gmra.mxu3 %vm218_vm1, %v187_v1  ;;  %v859_v11 = vadd.f32 %v2316_v4, %v858_v6  ;;  %v1006_v12 = vadd.f32 %v2316_v4, %v1005_v7  ;;  %v43_v1 = vld [vmem:[%s3241_s0 + $0xe8] sm:$0xff] }
  0xdb   :  { %v1719_v13 = vmax.f32 %v1621_v2, %v1670_v10  ;;  %v1426_v14 = vmax.f32 %v859_v11, 0.0  ;;  %v1475_v15 = vmax.f32 %v1006_v12, 0.0  ;;  %1840 = vmatmul.msk.f32.gmra.mxu0 %vm218_vm1, %v40_v8  ;;  %1889 = vmatmul.msk.f32.gmra.mxu1 %vm218_vm1, %v89_v9  ;;  %v92_v2 = vld [vmem:[%s3241_s0 + $0x270] sm:$0xff] }
  0xdc   :  { %v1152_v16 = vpop.f32.mrf.mxu2  ;;  %v1299_v17 = vpop.f32.mrf.mxu3 }
  0xdd   :  { %1769 = vst.msk [vmem:[%s3243_s3 + $0x48] sm:$0xff] %vm1759_vm2, %v1719_v13  ;;  %v1153_v18 = vadd.f32 %v2316_v4, %v1152_v16  ;;  %v1300_v19 = vadd.f32 %v2316_v4, %v1299_v17  ;;  %v1622_v22 = vmax.f32 %v1426_v14, %v1475_v15  ;;  %v142_v14 = vld [vmem:[%s3241_s0 + $0x400] sm:$0xff]  ;;  %v191_v15 = vld [vmem:[%s3241_s0 + $0x588] sm:$0xff] }
  0xdf   :  { %v1524_v23 = vmax.f32 %v1153_v18, 0.0  ;;  %v1573_v24 = vmax.f32 %v1300_v19, 0.0 }
  0xe0   :  { %v861_v25 = vpop.f32.mrf.mxu0  ;;  %v1008_v26 = vpop.f32.mrf.mxu1 }
  0xe1   :  { %v1671_v29 = vmax.f32 %v1524_v23, %v1573_v24  ;;  %1939 = vmatmul.msk.f32.gmra.mxu2 %vm218_vm1, %v139_v20  ;;  %1988 = vmatmul.msk.f32.gmra.mxu3 %vm218_vm1, %v188_v21  ;;  %v862_v30 = vadd.f32 %v2316_v4, %v861_v25  ;;  %v1009_v31 = vadd.f32 %v2316_v4, %v1008_v26  ;;  %v44_v21 = vld [vmem:[%s3241_s0 + $0xf0] sm:$0xff] }
  0xe3   :  { %v1720_v32 = vmax.f32 %v1622_v22, %v1671_v29  ;;  %v1427_v33 = vmax.f32 %v862_v30, 0.0  ;;  %v1476_v34 = vmax.f32 %v1009_v31, 0.0  ;;  %1841 = vmatmul.msk.f32.gmra.mxu0 %vm218_vm1, %v41_v27  ;;  %1890 = vmatmul.msk.f32.gmra.mxu1 %vm218_vm1, %v90_v28  ;;  %v93_v22 = vld [vmem:[%s3241_s0 + $0x278] sm:$0xff] }
  0xe4   :  { %v1155_v35 = vpop.f32.mrf.mxu2  ;;  %v1302_v36 = vpop.f32.mrf.mxu3 }
  0xe5   :  { %1770 = vst.msk [vmem:[%s3243_s3 + $0x50] sm:$0xff] %vm1759_vm2, %v1720_v32  ;;  %v1156_v37 = vadd.f32 %v2316_v4, %v1155_v35  ;;  %v1303_v38 = vadd.f32 %v2316_v4, %v1302_v36  ;;  %v1623_v41 = vmax.f32 %v1427_v33, %v1476_v34  ;;  %v143_v33 = vld [vmem:[%s3241_s0 + $0x408] sm:$0xff]  ;;  %v192_v34 = vld [vmem:[%s3241_s0 + $0x590] sm:$0xff] }
  0xe7   :  { %v1525_v42 = vmax.f32 %v1156_v37, 0.0  ;;  %v1574_v43 = vmax.f32 %v1303_v38, 0.0 }
  0xe8   :  { %v864_v44 = vpop.f32.mrf.mxu0  ;;  %v1011_v45 = vpop.f32.mrf.mxu1 }
  0xe9   :  { %v1672_v48 = vmax.f32 %v1525_v42, %v1574_v43  ;;  %1940 = vmatmul.msk.f32.gmra.mxu2 %vm218_vm1, %v140_v39  ;;  %1989 = vmatmul.msk.f32.gmra.mxu3 %vm218_vm1, %v189_v40  ;;  %v865_v49 = vadd.f32 %v2316_v4, %v864_v44  ;;  %v1012_v50 = vadd.f32 %v2316_v4, %v1011_v45  ;;  %v45_v40 = vld [vmem:[%s3241_s0 + $0xf8] sm:$0xff] }
  0xeb   :  { %v1721_v51 = vmax.f32 %v1623_v41, %v1672_v48  ;;  %v1428_v52 = vmax.f32 %v865_v49, 0.0  ;;  %v1477_v53 = vmax.f32 %v1012_v50, 0.0  ;;  %1842 = vmatmul.msk.f32.gmra.mxu0 %vm218_vm1, %v42_v46  ;;  %1891 = vmatmul.msk.f32.gmra.mxu1 %vm218_vm1, %v91_v47  ;;  %v94_v41 = vld [vmem:[%s3241_s0 + $0x280] sm:$0xff] }
  0xec   :  { %v1158_v54 = vpop.f32.mrf.mxu2  ;;  %v1305_v55 = vpop.f32.mrf.mxu3 }
  0xed   :  { %1771 = vst.msk [vmem:[%s3243_s3 + $0x58] sm:$0xff] %vm1759_vm2, %v1721_v51  ;;  %v1159_v56 = vadd.f32 %v2316_v4, %v1158_v54  ;;  %v1306_v57 = vadd.f32 %v2316_v4, %v1305_v55  ;;  %v1624_v60 = vmax.f32 %v1428_v52, %v1477_v53  ;;  %v144_v52 = vld [vmem:[%s3241_s0 + $0x410] sm:$0xff]  ;;  %v193_v53 = vld [vmem:[%s3241_s0 + $0x598] sm:$0xff] }
  0xef   :  { %v1526_v61 = vmax.f32 %v1159_v56, 0.0  ;;  %v1575_v62 = vmax.f32 %v1306_v57, 0.0 }
  0xf0   :  { %v867_v63 = vpop.f32.mrf.mxu0  ;;  %v1014_v0 = vpop.f32.mrf.mxu1 }
  0xf1   :  { %v1673_v3 = vmax.f32 %v1526_v61, %v1575_v62  ;;  %1941 = vmatmul.msk.f32.gmra.mxu2 %vm218_vm1, %v141_v58  ;;  %1990 = vmatmul.msk.f32.gmra.mxu3 %vm218_vm1, %v190_v59  ;;  %v868_v5 = vadd.f32 %v2316_v4, %v867_v63  ;;  %v1015_v6 = vadd.f32 %v2316_v4, %v1014_v0  ;;  %v46_v59 = vld [vmem:[%s3241_s0 + $0x100] sm:$0xff] }
  0xf3   :  { %v1722_v7 = vmax.f32 %v1624_v60, %v1673_v3  ;;  %v1429_v8 = vmax.f32 %v868_v5, 0.0  ;;  %v1478_v9 = vmax.f32 %v1015_v6, 0.0  ;;  %1843 = vmatmul.msk.f32.gmra.mxu0 %vm218_vm1, %v43_v1  ;;  %1892 = vmatmul.msk.f32.gmra.mxu1 %vm218_vm1, %v92_v2  ;;  %v95_v60 = vld [vmem:[%s3241_s0 + $0x288] sm:$0xff] }
  0xf4   :  { %v1161_v10 = vpop.f32.mrf.mxu2  ;;  %v1308_v11 = vpop.f32.mrf.mxu3 }
  0xf5   :  { %1772 = vst.msk [vmem:[%s3243_s3 + $0x60] sm:$0xff] %vm1759_vm2, %v1722_v7  ;;  %v1162_v12 = vadd.f32 %v2316_v4, %v1161_v10  ;;  %v1309_v13 = vadd.f32 %v2316_v4, %v1308_v11  ;;  %v1625_v16 = vmax.f32 %v1429_v8, %v1478_v9  ;;  %v145_v8 = vld [vmem:[%s3241_s0 + $0x418] sm:$0xff]  ;;  %v194_v9 = vld [vmem:[%s3241_s0 + $0x5a0] sm:$0xff] }
  0xf7   :  { %v1527_v17 = vmax.f32 %v1162_v12, 0.0  ;;  %v1576_v18 = vmax.f32 %v1309_v13, 0.0 }
  0xf8   :  { %v870_v19 = vpop.f32.mrf.mxu0  ;;  %v1017_v20 = vpop.f32.mrf.mxu1 }
  0xf9   :  { %v1674_v23 = vmax.f32 %v1527_v17, %v1576_v18  ;;  %1942 = vmatmul.msk.f32.gmra.mxu2 %vm218_vm1, %v142_v14  ;;  %1991 = vmatmul.msk.f32.gmra.mxu3 %vm218_vm1, %v191_v15  ;;  %v871_v24 = vadd.f32 %v2316_v4, %v870_v19  ;;  %v1018_v25 = vadd.f32 %v2316_v4, %v1017_v20  ;;  %v47_v15 = vld [vmem:[%s3241_s0 + $0x108] sm:$0xff] }
  0xfb   :  { %v1723_v26 = vmax.f32 %v1625_v16, %v1674_v23  ;;  %v1430_v27 = vmax.f32 %v871_v24, 0.0  ;;  %v1479_v28 = vmax.f32 %v1018_v25, 0.0  ;;  %1844 = vmatmul.msk.f32.gmra.mxu0 %vm218_vm1, %v44_v21  ;;  %1893 = vmatmul.msk.f32.gmra.mxu1 %vm218_vm1, %v93_v22  ;;  %v96_v16 = vld [vmem:[%s3241_s0 + $0x290] sm:$0xff] }
  0xfc   :  { %v1164_v29 = vpop.f32.mrf.mxu2  ;;  %v1311_v30 = vpop.f32.mrf.mxu3 }
  0xfd   :  { %1773 = vst.msk [vmem:[%s3243_s3 + $0x68] sm:$0xff] %vm1759_vm2, %v1723_v26  ;;  %v1165_v31 = vadd.f32 %v2316_v4, %v1164_v29  ;;  %v1312_v32 = vadd.f32 %v2316_v4, %v1311_v30  ;;  %v1626_v35 = vmax.f32 %v1430_v27, %v1479_v28  ;;  %v146_v27 = vld [vmem:[%s3241_s0 + $0x420] sm:$0xff]  ;;  %v195_v28 = vld [vmem:[%s3241_s0 + $0x5a8] sm:$0xff] }
  0xff   :  { %v1528_v36 = vmax.f32 %v1165_v31, 0.0  ;;  %v1577_v37 = vmax.f32 %v1312_v32, 0.0 }
 0x100   :  { %v873_v38 = vpop.f32.mrf.mxu0  ;;  %v1020_v39 = vpop.f32.mrf.mxu1 }
 0x101   :  { %v1675_v42 = vmax.f32 %v1528_v36, %v1577_v37  ;;  %1943 = vmatmul.msk.f32.gmra.mxu2 %vm218_vm1, %v143_v33  ;;  %1992 = vmatmul.msk.f32.gmra.mxu3 %vm218_vm1, %v192_v34  ;;  %v874_v43 = vadd.f32 %v2316_v4, %v873_v38  ;;  %v1021_v44 = vadd.f32 %v2316_v4, %v1020_v39  ;;  %v48_v34 = vld [vmem:[%s3241_s0 + $0x110] sm:$0xff] }
 0x103   :  { %v1724_v45 = vmax.f32 %v1626_v35, %v1675_v42  ;;  %v1431_v46 = vmax.f32 %v874_v43, 0.0  ;;  %v1480_v47 = vmax.f32 %v1021_v44, 0.0  ;;  %1845 = vmatmul.msk.f32.gmra.mxu0 %vm218_vm1, %v45_v40  ;;  %1894 = vmatmul.msk.f32.gmra.mxu1 %vm218_vm1, %v94_v41  ;;  %v97_v35 = vld [vmem:[%s3241_s0 + $0x298] sm:$0xff] }
 0x104   :  { %v1167_v48 = vpop.f32.mrf.mxu2  ;;  %v1314_v49 = vpop.f32.mrf.mxu3 }
 0x105   :  { %1774 = vst.msk [vmem:[%s3243_s3 + $0x70] sm:$0xff] %vm1759_vm2, %v1724_v45  ;;  %v1168_v50 = vadd.f32 %v2316_v4, %v1167_v48  ;;  %v1315_v51 = vadd.f32 %v2316_v4, %v1314_v49  ;;  %v1627_v54 = vmax.f32 %v1431_v46, %v1480_v47  ;;  %v147_v46 = vld [vmem:[%s3241_s0 + $0x428] sm:$0xff]  ;;  %v196_v47 = vld [vmem:[%s3241_s0 + $0x5b0] sm:$0xff] }
 0x107   :  { %v1529_v55 = vmax.f32 %v1168_v50, 0.0  ;;  %v1578_v56 = vmax.f32 %v1315_v51, 0.0 }
 0x108   :  { %v876_v57 = vpop.f32.mrf.mxu0  ;;  %v1023_v58 = vpop.f32.mrf.mxu1 }
 0x109   :  { %v1676_v61 = vmax.f32 %v1529_v55, %v1578_v56  ;;  %1944 = vmatmul.msk.f32.gmra.mxu2 %vm218_vm1, %v144_v52  ;;  %1993 = vmatmul.msk.f32.gmra.mxu3 %vm218_vm1, %v193_v53  ;;  %v877_v62 = vadd.f32 %v2316_v4, %v876_v57  ;;  %v1024_v63 = vadd.f32 %v2316_v4, %v1023_v58  ;;  %v49_v53 = vld [vmem:[%s3241_s0 + $0x118] sm:$0xff] }
 0x10b   :  { %v1725_v0 = vmax.f32 %v1627_v54, %v1676_v61  ;;  %v1432_v1 = vmax.f32 %v877_v62, 0.0  ;;  %v1481_v2 = vmax.f32 %v1024_v63, 0.0  ;;  %1846 = vmatmul.msk.f32.gmra.mxu0 %vm218_vm1, %v46_v59  ;;  %1895 = vmatmul.msk.f32.gmra.mxu1 %vm218_vm1, %v95_v60  ;;  %v98_v54 = vld [vmem:[%s3241_s0 + $0x2a0] sm:$0xff] }
 0x10c   :  { %v1170_v3 = vpop.f32.mrf.mxu2  ;;  %v1317_v5 = vpop.f32.mrf.mxu3 }
 0x10d   :  { %1775 = vst.msk [vmem:[%s3243_s3 + $0x78] sm:$0xff] %vm1759_vm2, %v1725_v0  ;;  %v1171_v6 = vadd.f32 %v2316_v4, %v1170_v3  ;;  %v1318_v7 = vadd.f32 %v2316_v4, %v1317_v5  ;;  %v1628_v10 = vmax.f32 %v1432_v1, %v1481_v2  ;;  %v148_v1 = vld [vmem:[%s3241_s0 + $0x430] sm:$0xff]  ;;  %v197_v2 = vld [vmem:[%s3241_s0 + $0x5b8] sm:$0xff] }
 0x10f   :  { %v1530_v11 = vmax.f32 %v1171_v6, 0.0  ;;  %v1579_v12 = vmax.f32 %v1318_v7, 0.0 }
 0x110   :  { %v879_v13 = vpop.f32.mrf.mxu0  ;;  %v1026_v14 = vpop.f32.mrf.mxu1 }
 0x111   :  { %v1677_v17 = vmax.f32 %v1530_v11, %v1579_v12  ;;  %1945 = vmatmul.msk.f32.gmra.mxu2 %vm218_vm1, %v145_v8  ;;  %1994 = vmatmul.msk.f32.gmra.mxu3 %vm218_vm1, %v194_v9  ;;  %v880_v18 = vadd.f32 %v2316_v4, %v879_v13  ;;  %v1027_v19 = vadd.f32 %v2316_v4, %v1026_v14  ;;  %v50_v9 = vld [vmem:[%s3241_s0 + $0x120] sm:$0xff] }
 0x113   :  { %v1726_v20 = vmax.f32 %v1628_v10, %v1677_v17  ;;  %v1433_v21 = vmax.f32 %v880_v18, 0.0  ;;  %v1482_v22 = vmax.f32 %v1027_v19, 0.0  ;;  %1847 = vmatmul.msk.f32.gmra.mxu0 %vm218_vm1, %v47_v15  ;;  %1896 = vmatmul.msk.f32.gmra.mxu1 %vm218_vm1, %v96_v16  ;;  %v99_v10 = vld [vmem:[%s3241_s0 + $0x2a8] sm:$0xff] }
 0x114   :  { %v1173_v23 = vpop.f32.mrf.mxu2  ;;  %v1320_v24 = vpop.f32.mrf.mxu3 }
 0x115   :  { %1776 = vst.msk [vmem:[%s3243_s3 + $0x80] sm:$0xff] %vm1759_vm2, %v1726_v20  ;;  %v1174_v25 = vadd.f32 %v2316_v4, %v1173_v23  ;;  %v1321_v26 = vadd.f32 %v2316_v4, %v1320_v24  ;;  %v1629_v29 = vmax.f32 %v1433_v21, %v1482_v22  ;;  %v149_v21 = vld [vmem:[%s3241_s0 + $0x438] sm:$0xff]  ;;  %v198_v22 = vld [vmem:[%s3241_s0 + $0x5c0] sm:$0xff] }
 0x117   :  { %v1531_v30 = vmax.f32 %v1174_v25, 0.0  ;;  %v1580_v31 = vmax.f32 %v1321_v26, 0.0 }
 0x118   :  { %v882_v32 = vpop.f32.mrf.mxu0  ;;  %v1029_v33 = vpop.f32.mrf.mxu1 }
 0x119   :  { %v1678_v36 = vmax.f32 %v1531_v30, %v1580_v31  ;;  %1946 = vmatmul.msk.f32.gmra.mxu2 %vm218_vm1, %v146_v27  ;;  %1995 = vmatmul.msk.f32.gmra.mxu3 %vm218_vm1, %v195_v28  ;;  %v883_v37 = vadd.f32 %v2316_v4, %v882_v32  ;;  %v1030_v38 = vadd.f32 %v2316_v4, %v1029_v33  ;;  %v51_v28 = vld [vmem:[%s3241_s0 + $0x128] sm:$0xff]  ;;  %v2835_v30 = vld [vmem:[%s3242_s2] ss:$0 sm:$0xff] }
 0x11b   :  { %v1727_v39 = vmax.f32 %v1629_v29, %v1678_v36  ;;  %v1434_v40 = vmax.f32 %v883_v37, 0.0  ;;  %v1483_v41 = vmax.f32 %v1030_v38, 0.0  ;;  %1848 = vmatmul.msk.f32.gmra.mxu0 %vm218_vm1, %v48_v34  ;;  %1897 = vmatmul.msk.f32.gmra.mxu1 %vm218_vm1, %v97_v35 }
 0x11c   :  { %v1176_v42 = vpop.f32.mrf.mxu2  ;;  %v1323_v43 = vpop.f32.mrf.mxu3 }
 0x11d   :  { %1777 = vst.msk [vmem:[%s3243_s3 + $0x88] sm:$0xff] %vm1759_vm2, %v1727_v39  ;;  %v1177_v44 = vadd.f32 %v2316_v4, %v1176_v42  ;;  %v1324_v45 = vadd.f32 %v2316_v4, %v1323_v43  ;;  %v1630_v48 = vmax.f32 %v1434_v40, %v1483_v41  ;;  %v150_v40 = vld [vmem:[%s3241_s0 + $0x440] sm:$0xff]  ;;  %v199_v41 = vld [vmem:[%s3241_s0 + $0x5c8] sm:$0xff] }
 0x11f   :  { %v1532_v49 = vmax.f32 %v1177_v44, 0.0  ;;  %v1581_v50 = vmax.f32 %v1324_v45, 0.0 }
 0x120   :  { %v885_v51 = vpop.f32.mrf.mxu0  ;;  %v1032_v52 = vpop.f32.mrf.mxu1 }
 0x121   :  { %v1679_v55 = vmax.f32 %v1532_v49, %v1581_v50  ;;  %1947 = vmatmul.msk.f32.gmra.mxu2 %vm218_vm1, %v147_v46  ;;  %1996 = vmatmul.msk.f32.gmra.mxu3 %vm218_vm1, %v196_v47  ;;  %v886_v56 = vadd.f32 %v2316_v4, %v885_v51  ;;  %v1033_v57 = vadd.f32 %v2316_v4, %v1032_v52  ;;  %v52_v47 = vld [vmem:[%s3241_s0 + $0x130] sm:$0xff] }
 0x123   :  { %v1728_v58 = vmax.f32 %v1630_v48, %v1679_v55  ;;  %v1435_v59 = vmax.f32 %v886_v56, 0.0  ;;  %v1484_v60 = vmax.f32 %v1033_v57, 0.0  ;;  %1849 = vmatmul.msk.f32.gmra.mxu0 %vm218_vm1, %v49_v53  ;;  %1898 = vmatmul.msk.f32.gmra.mxu1 %vm218_vm1, %v98_v54  ;;  %v101_v48 = vld [vmem:[%s3241_s0 + $0x2b8] sm:$0xff] }
 0x124   :  { %v1179_v61 = vpop.f32.mrf.mxu2  ;;  %v1326_v62 = vpop.f32.mrf.mxu3 }
 0x125   :  { %1778 = vst.msk [vmem:[%s3243_s3 + $0x90] sm:$0xff] %vm1759_vm2, %v1728_v58  ;;  %v1180_v63 = vadd.f32 %v2316_v4, %v1179_v61  ;;  %v1327_v0 = vadd.f32 %v2316_v4, %v1326_v62  ;;  %v1631_v3 = vmax.f32 %v1435_v59, %v1484_v60  ;;  %v151_v59 = vld [vmem:[%s3241_s0 + $0x448] sm:$0xff]  ;;  %v200_v60 = vld [vmem:[%s3241_s0 + $0x5d0] sm:$0xff] }
 0x127   :  { %v1533_v5 = vmax.f32 %v1180_v63, 0.0  ;;  %v1582_v6 = vmax.f32 %v1327_v0, 0.0 }
 0x128   :  { %v888_v7 = vpop.f32.mrf.mxu0  ;;  %v1035_v8 = vpop.f32.mrf.mxu1 }
 0x129   :  { %v1680_v11 = vmax.f32 %v1533_v5, %v1582_v6  ;;  %1948 = vmatmul.msk.f32.gmra.mxu2 %vm218_vm1, %v148_v1  ;;  %1997 = vmatmul.msk.f32.gmra.mxu3 %vm218_vm1, %v197_v2  ;;  %v889_v12 = vadd.f32 %v2316_v4, %v888_v7  ;;  %v1036_v13 = vadd.f32 %v2316_v4, %v1035_v8  ;;  %v53_v2 = vld [vmem:[%s3241_s0 + $0x138] sm:$0xff] }
 0x12b   :  { %v1729_v14 = vmax.f32 %v1631_v3, %v1680_v11  ;;  %v1436_v15 = vmax.f32 %v889_v12, 0.0  ;;  %v1485_v16 = vmax.f32 %v1036_v13, 0.0  ;;  %1850 = vmatmul.msk.f32.gmra.mxu0 %vm218_vm1, %v50_v9  ;;  %1899 = vmatmul.msk.f32.gmra.mxu1 %vm218_vm1, %v99_v10  ;;  %v102_v3 = vld [vmem:[%s3241_s0 + $0x2c0] sm:$0xff] }
 0x12c   :  { %v1182_v17 = vpop.f32.mrf.mxu2  ;;  %v1329_v18 = vpop.f32.mrf.mxu3 }
 0x12d   :  { %1779 = vst.msk [vmem:[%s3243_s3 + $0x98] sm:$0xff] %vm1759_vm2, %v1729_v14  ;;  %v1183_v19 = vadd.f32 %v2316_v4, %v1182_v17  ;;  %v1330_v20 = vadd.f32 %v2316_v4, %v1329_v18  ;;  %v1632_v23 = vmax.f32 %v1436_v15, %v1485_v16  ;;  %v100_v4 = vld [vmem:[%s3241_s0 + $0x2b0] sm:$0xff]  ;;  %v201_v16 = vld [vmem:[%s3241_s0 + $0x5d8] sm:$0xff] }
 0x12e   :  { %v152_v15 = vld [vmem:[%s3241_s0 + $0x450] sm:$0xff] }
 0x12f   :  { %v1534_v24 = vmax.f32 %v1183_v19, 0.0  ;;  %v1583_v25 = vmax.f32 %v1330_v20, 0.0 }
 0x130   :  { %v891_v26 = vpop.f32.mrf.mxu0  ;;  %v1038_v27 = vpop.f32.mrf.mxu1 }
 0x131   :  { %v1681_v29 = vmax.f32 %v1534_v24, %v1583_v25  ;;  %1949 = vmatmul.msk.f32.gmra.mxu2 %vm218_vm1, %v149_v21  ;;  %1998 = vmatmul.msk.f32.gmra.mxu3 %vm218_vm1, %v198_v22  ;;  %v892_v31 = vadd.f32 %v2835_v30, %v891_v26  ;;  %v1039_v32 = vadd.f32 %v2835_v30, %v1038_v27  ;;  %v54_v22 = vld [vmem:[%s3241_s0 + $0x140] sm:$0xff] }
 0x133   :  { %v1730_v33 = vmax.f32 %v1632_v23, %v1681_v29  ;;  %v1437_v34 = vmax.f32 %v892_v31, 0.0  ;;  %v1486_v35 = vmax.f32 %v1039_v32, 0.0  ;;  %1851 = vmatmul.msk.f32.gmra.mxu0 %vm218_vm1, %v51_v28  ;;  %1900 = vmatmul.msk.f32.gmra.mxu1 %vm218_vm1, %v100_v4  ;;  %v103_v23 = vld [vmem:[%s3241_s0 + $0x2c8] sm:$0xff] }
 0x134   :  { %v1185_v36 = vpop.f32.mrf.mxu2  ;;  %v1332_v37 = vpop.f32.mrf.mxu3 }
 0x135   :  { %1780 = vst.msk [vmem:[%s3243_s3 + $0xa0] sm:$0xff] %vm1759_vm2, %v1730_v33  ;;  %v1186_v38 = vadd.f32 %v2835_v30, %v1185_v36  ;;  %v1333_v39 = vadd.f32 %v2835_v30, %v1332_v37  ;;  %v1633_v42 = vmax.f32 %v1437_v34, %v1486_v35  ;;  %v153_v34 = vld [vmem:[%s3241_s0 + $0x458] sm:$0xff]  ;;  %v202_v35 = vld [vmem:[%s3241_s0 + $0x5e0] sm:$0xff] }
 0x137   :  { %v1535_v43 = vmax.f32 %v1186_v38, 0.0  ;;  %v1584_v44 = vmax.f32 %v1333_v39, 0.0 }
 0x138   :  { %v894_v45 = vpop.f32.mrf.mxu0  ;;  %v1041_v46 = vpop.f32.mrf.mxu1 }
 0x139   :  { %v1682_v49 = vmax.f32 %v1535_v43, %v1584_v44  ;;  %1950 = vmatmul.msk.f32.gmra.mxu2 %vm218_vm1, %v150_v40  ;;  %1999 = vmatmul.msk.f32.gmra.mxu3 %vm218_vm1, %v199_v41  ;;  %v895_v50 = vadd.f32 %v2835_v30, %v894_v45  ;;  %v1042_v51 = vadd.f32 %v2835_v30, %v1041_v46  ;;  %v55_v41 = vld [vmem:[%s3241_s0 + $0x148] sm:$0xff] }
 0x13b   :  { %v1731_v52 = vmax.f32 %v1633_v42, %v1682_v49  ;;  %v1438_v53 = vmax.f32 %v895_v50, 0.0  ;;  %v1487_v54 = vmax.f32 %v1042_v51, 0.0  ;;  %1852 = vmatmul.msk.f32.gmra.mxu0 %vm218_vm1, %v52_v47  ;;  %1901 = vmatmul.msk.f32.gmra.mxu1 %vm218_vm1, %v101_v48  ;;  %v104_v42 = vld [vmem:[%s3241_s0 + $0x2d0] sm:$0xff] }
 0x13c   :  { %v1188_v55 = vpop.f32.mrf.mxu2  ;;  %v1335_v56 = vpop.f32.mrf.mxu3 }
 0x13d   :  { %1781 = vst.msk [vmem:[%s3243_s3 + $0xa8] sm:$0xff] %vm1759_vm2, %v1731_v52  ;;  %v1189_v57 = vadd.f32 %v2835_v30, %v1188_v55  ;;  %v1336_v58 = vadd.f32 %v2835_v30, %v1335_v56  ;;  %v1634_v61 = vmax.f32 %v1438_v53, %v1487_v54  ;;  %v154_v53 = vld [vmem:[%s3241_s0 + $0x460] sm:$0xff]  ;;  %v203_v54 = vld [vmem:[%s3241_s0 + $0x5e8] sm:$0xff] }
 0x13f   :  { %v1536_v62 = vmax.f32 %v1189_v57, 0.0  ;;  %v1585_v63 = vmax.f32 %v1336_v58, 0.0 }
 0x140   :  { %v897_v0 = vpop.f32.mrf.mxu0  ;;  %v1044_v1 = vpop.f32.mrf.mxu1 }
 0x141   :  { %v1683_v5 = vmax.f32 %v1536_v62, %v1585_v63  ;;  %1951 = vmatmul.msk.f32.gmra.mxu2 %vm218_vm1, %v151_v59  ;;  %2000 = vmatmul.msk.f32.gmra.mxu3 %vm218_vm1, %v200_v60  ;;  %v898_v6 = vadd.f32 %v2835_v30, %v897_v0  ;;  %v1045_v7 = vadd.f32 %v2835_v30, %v1044_v1  ;;  %v56_v60 = vld [vmem:[%s3241_s0 + $0x150] sm:$0xff] }
 0x143   :  { %v1732_v8 = vmax.f32 %v1634_v61, %v1683_v5  ;;  %v1439_v9 = vmax.f32 %v898_v6, 0.0  ;;  %v1488_v10 = vmax.f32 %v1045_v7, 0.0  ;;  %1853 = vmatmul.msk.f32.gmra.mxu0 %vm218_vm1, %v53_v2  ;;  %1902 = vmatmul.msk.f32.gmra.mxu1 %vm218_vm1, %v102_v3  ;;  %v105_v61 = vld [vmem:[%s3241_s0 + $0x2d8] sm:$0xff] }
 0x144   :  { %v1191_v11 = vpop.f32.mrf.mxu2  ;;  %v1338_v12 = vpop.f32.mrf.mxu3 }
 0x145   :  { %1782 = vst.msk [vmem:[%s3243_s3 + $0xb0] sm:$0xff] %vm1759_vm2, %v1732_v8  ;;  %v1192_v13 = vadd.f32 %v2835_v30, %v1191_v11  ;;  %v1339_v14 = vadd.f32 %v2835_v30, %v1338_v12  ;;  %v1635_v17 = vmax.f32 %v1439_v9, %v1488_v10  ;;  %v155_v9 = vld [vmem:[%s3241_s0 + $0x468] sm:$0xff]  ;;  %v204_v10 = vld [vmem:[%s3241_s0 + $0x5f0] sm:$0xff] }
 0x147   :  { %v1537_v18 = vmax.f32 %v1192_v13, 0.0  ;;  %v1586_v19 = vmax.f32 %v1339_v14, 0.0 }
 0x148   :  { %v900_v20 = vpop.f32.mrf.mxu0  ;;  %v1047_v21 = vpop.f32.mrf.mxu1 }
 0x149   :  { %v1684_v24 = vmax.f32 %v1537_v18, %v1586_v19  ;;  %1952 = vmatmul.msk.f32.gmra.mxu2 %vm218_vm1, %v152_v15  ;;  %2001 = vmatmul.msk.f32.gmra.mxu3 %vm218_vm1, %v201_v16  ;;  %v901_v25 = vadd.f32 %v2835_v30, %v900_v20  ;;  %v1048_v26 = vadd.f32 %v2835_v30, %v1047_v21  ;;  %v57_v16 = vld [vmem:[%s3241_s0 + $0x158] sm:$0xff] }
 0x14b   :  { %v1733_v27 = vmax.f32 %v1635_v17, %v1684_v24  ;;  %v1440_v28 = vmax.f32 %v901_v25, 0.0  ;;  %v1489_v4 = vmax.f32 %v1048_v26, 0.0  ;;  %1854 = vmatmul.msk.f32.gmra.mxu0 %vm218_vm1, %v54_v22  ;;  %1903 = vmatmul.msk.f32.gmra.mxu1 %vm218_vm1, %v103_v23  ;;  %v106_v17 = vld [vmem:[%s3241_s0 + $0x2e0] sm:$0xff] }
 0x14c   :  { %v1194_v29 = vpop.f32.mrf.mxu2  ;;  %v1341_v31 = vpop.f32.mrf.mxu3 }
 0x14d   :  { %1783 = vst.msk [vmem:[%s3243_s3 + $0xb8] sm:$0xff] %vm1759_vm2, %v1733_v27  ;;  %v1195_v32 = vadd.f32 %v2835_v30, %v1194_v29  ;;  %v1342_v33 = vadd.f32 %v2835_v30, %v1341_v31  ;;  %v1636_v36 = vmax.f32 %v1440_v28, %v1489_v4  ;;  %v156_v28 = vld [vmem:[%s3241_s0 + $0x470] sm:$0xff]  ;;  %v205_v4 = vld [vmem:[%s3241_s0 + $0x5f8] sm:$0xff] }
 0x14f   :  { %v1538_v37 = vmax.f32 %v1195_v32, 0.0  ;;  %v1587_v38 = vmax.f32 %v1342_v33, 0.0 }
 0x150   :  { %v903_v39 = vpop.f32.mrf.mxu0  ;;  %v1050_v40 = vpop.f32.mrf.mxu1 }
 0x151   :  { %v1685_v43 = vmax.f32 %v1538_v37, %v1587_v38  ;;  %1953 = vmatmul.msk.f32.gmra.mxu2 %vm218_vm1, %v153_v34  ;;  %2002 = vmatmul.msk.f32.gmra.mxu3 %vm218_vm1, %v202_v35  ;;  %v904_v44 = vadd.f32 %v2835_v30, %v903_v39  ;;  %v1051_v45 = vadd.f32 %v2835_v30, %v1050_v40  ;;  %v58_v35 = vld [vmem:[%s3241_s0 + $0x160] sm:$0xff] }
 0x153   :  { %v1734_v46 = vmax.f32 %v1636_v36, %v1685_v43  ;;  %v1441_v47 = vmax.f32 %v904_v44, 0.0  ;;  %v1490_v48 = vmax.f32 %v1051_v45, 0.0  ;;  %1855 = vmatmul.msk.f32.gmra.mxu0 %vm218_vm1, %v55_v41  ;;  %1904 = vmatmul.msk.f32.gmra.mxu1 %vm218_vm1, %v104_v42  ;;  %v107_v36 = vld [vmem:[%s3241_s0 + $0x2e8] sm:$0xff] }
 0x154   :  { %v1197_v49 = vpop.f32.mrf.mxu2  ;;  %v1344_v50 = vpop.f32.mrf.mxu3 }
 0x155   :  { %1784 = vst.msk [vmem:[%s3243_s3 + $0xc0] sm:$0xff] %vm1759_vm2, %v1734_v46  ;;  %v1198_v51 = vadd.f32 %v2835_v30, %v1197_v49  ;;  %v1345_v52 = vadd.f32 %v2835_v30, %v1344_v50  ;;  %v1637_v55 = vmax.f32 %v1441_v47, %v1490_v48  ;;  %v157_v47 = vld [vmem:[%s3241_s0 + $0x478] sm:$0xff]  ;;  %v206_v48 = vld [vmem:[%s3241_s0 + $0x600] sm:$0xff] }
 0x157   :  { %v1539_v56 = vmax.f32 %v1198_v51, 0.0  ;;  %v1588_v57 = vmax.f32 %v1345_v52, 0.0 }
 0x158   :  { %v906_v58 = vpop.f32.mrf.mxu0  ;;  %v1053_v59 = vpop.f32.mrf.mxu1 }
 0x159   :  { %v1686_v62 = vmax.f32 %v1539_v56, %v1588_v57  ;;  %1954 = vmatmul.msk.f32.gmra.mxu2 %vm218_vm1, %v154_v53  ;;  %2003 = vmatmul.msk.f32.gmra.mxu3 %vm218_vm1, %v203_v54  ;;  %v907_v63 = vadd.f32 %v2835_v30, %v906_v58  ;;  %v1054_v0 = vadd.f32 %v2835_v30, %v1053_v59  ;;  %v59_v54 = vld [vmem:[%s3241_s0 + $0x168] sm:$0xff] }
 0x15b   :  { %v1735_v1 = vmax.f32 %v1637_v55, %v1686_v62  ;;  %v1442_v2 = vmax.f32 %v907_v63, 0.0  ;;  %v1491_v3 = vmax.f32 %v1054_v0, 0.0  ;;  %1856 = vmatmul.msk.f32.gmra.mxu0 %vm218_vm1, %v56_v60  ;;  %1905 = vmatmul.msk.f32.gmra.mxu1 %vm218_vm1, %v105_v61  ;;  %v108_v55 = vld [vmem:[%s3241_s0 + $0x2f0] sm:$0xff] }
 0x15c   :  { %v1200_v5 = vpop.f32.mrf.mxu2  ;;  %v1347_v6 = vpop.f32.mrf.mxu3 }
 0x15d   :  { %1785 = vst.msk [vmem:[%s3243_s3 + $0xc8] sm:$0xff] %vm1759_vm2, %v1735_v1  ;;  %v1201_v7 = vadd.f32 %v2835_v30, %v1200_v5  ;;  %v1348_v8 = vadd.f32 %v2835_v30, %v1347_v6  ;;  %v1638_v11 = vmax.f32 %v1442_v2, %v1491_v3  ;;  %v158_v2 = vld [vmem:[%s3241_s0 + $0x480] sm:$0xff]  ;;  %v207_v3 = vld [vmem:[%s3241_s0 + $0x608] sm:$0xff] }
 0x15f   :  { %v1540_v12 = vmax.f32 %v1201_v7, 0.0  ;;  %v1589_v13 = vmax.f32 %v1348_v8, 0.0 }
 0x160   :  { %v909_v14 = vpop.f32.mrf.mxu0  ;;  %v1056_v15 = vpop.f32.mrf.mxu1 }
 0x161   :  { %v1687_v18 = vmax.f32 %v1540_v12, %v1589_v13  ;;  %1955 = vmatmul.msk.f32.gmra.mxu2 %vm218_vm1, %v155_v9  ;;  %2004 = vmatmul.msk.f32.gmra.mxu3 %vm218_vm1, %v204_v10  ;;  %v910_v19 = vadd.f32 %v2835_v30, %v909_v14  ;;  %v1057_v20 = vadd.f32 %v2835_v30, %v1056_v15  ;;  %v60_v10 = vld [vmem:[%s3241_s0 + $0x170] sm:$0xff] }
 0x163   :  { %v1736_v21 = vmax.f32 %v1638_v11, %v1687_v18  ;;  %v1443_v22 = vmax.f32 %v910_v19, 0.0  ;;  %v1492_v23 = vmax.f32 %v1057_v20, 0.0  ;;  %1857 = vmatmul.msk.f32.gmra.mxu0 %vm218_vm1, %v57_v16  ;;  %1906 = vmatmul.msk.f32.gmra.mxu1 %vm218_vm1, %v106_v17  ;;  %v109_v11 = vld [vmem:[%s3241_s0 + $0x2f8] sm:$0xff] }
 0x164   :  { %v1203_v24 = vpop.f32.mrf.mxu2  ;;  %v1350_v25 = vpop.f32.mrf.mxu3 }
 0x165   :  { %1786 = vst.msk [vmem:[%s3243_s3 + $0xd0] sm:$0xff] %vm1759_vm2, %v1736_v21  ;;  %v1204_v26 = vadd.f32 %v2835_v30, %v1203_v24  ;;  %v1351_v27 = vadd.f32 %v2835_v30, %v1350_v25  ;;  %v1639_v29 = vmax.f32 %v1443_v22, %v1492_v23  ;;  %v159_v22 = vld [vmem:[%s3241_s0 + $0x488] sm:$0xff]  ;;  %v208_v23 = vld [vmem:[%s3241_s0 + $0x610] sm:$0xff] }
 0x167   :  { %v1541_v31 = vmax.f32 %v1204_v26, 0.0  ;;  %v1590_v32 = vmax.f32 %v1351_v27, 0.0 }
 0x168   :  { %v912_v33 = vpop.f32.mrf.mxu0  ;;  %v1059_v34 = vpop.f32.mrf.mxu1 }
 0x169   :  { %v1688_v37 = vmax.f32 %v1541_v31, %v1590_v32  ;;  %1956 = vmatmul.msk.f32.gmra.mxu2 %vm218_vm1, %v156_v28  ;;  %2005 = vmatmul.msk.f32.gmra.mxu3 %vm218_vm1, %v205_v4  ;;  %v913_v38 = vadd.f32 %v2835_v30, %v912_v33  ;;  %v1060_v39 = vadd.f32 %v2835_v30, %v1059_v34  ;;  %v61_v4 = vld [vmem:[%s3241_s0 + $0x178] sm:$0xff] }
 0x16b   :  { %v1737_v40 = vmax.f32 %v1639_v29, %v1688_v37  ;;  %v1444_v41 = vmax.f32 %v913_v38, 0.0  ;;  %v1493_v42 = vmax.f32 %v1060_v39, 0.0  ;;  %1858 = vmatmul.msk.f32.gmra.mxu0 %vm218_vm1, %v58_v35  ;;  %1907 = vmatmul.msk.f32.gmra.mxu1 %vm218_vm1, %v107_v36  ;;  %v110_v29 = vld [vmem:[%s3241_s0 + $0x300] sm:$0xff] }
 0x16c   :  { %v1206_v43 = vpop.f32.mrf.mxu2  ;;  %v1353_v44 = vpop.f32.mrf.mxu3 }
 0x16d   :  { %1787 = vst.msk [vmem:[%s3243_s3 + $0xd8] sm:$0xff] %vm1759_vm2, %v1737_v40  ;;  %v1207_v45 = vadd.f32 %v2835_v30, %v1206_v43  ;;  %v1354_v46 = vadd.f32 %v2835_v30, %v1353_v44  ;;  %v1640_v49 = vmax.f32 %v1444_v41, %v1493_v42  ;;  %v160_v41 = vld [vmem:[%s3241_s0 + $0x490] sm:$0xff]  ;;  %v209_v42 = vld [vmem:[%s3241_s0 + $0x618] sm:$0xff] }
 0x16f   :  { %v1542_v50 = vmax.f32 %v1207_v45, 0.0  ;;  %v1591_v51 = vmax.f32 %v1354_v46, 0.0 }
 0x170   :  { %v915_v52 = vpop.f32.mrf.mxu0  ;;  %v1062_v53 = vpop.f32.mrf.mxu1 }
 0x171   :  { %v1689_v56 = vmax.f32 %v1542_v50, %v1591_v51  ;;  %1957 = vmatmul.msk.f32.gmra.mxu2 %vm218_vm1, %v157_v47  ;;  %2006 = vmatmul.msk.f32.gmra.mxu3 %vm218_vm1, %v206_v48  ;;  %v916_v57 = vadd.f32 %v2835_v30, %v915_v52  ;;  %v1063_v58 = vadd.f32 %v2835_v30, %v1062_v53  ;;  %v62_v48 = vld [vmem:[%s3241_s0 + $0x180] sm:$0xff] }
 0x173   :  { %v1738_v59 = vmax.f32 %v1640_v49, %v1689_v56  ;;  %v1445_v60 = vmax.f32 %v916_v57, 0.0  ;;  %v1494_v61 = vmax.f32 %v1063_v58, 0.0  ;;  %1859 = vmatmul.msk.f32.gmra.mxu0 %vm218_vm1, %v59_v54  ;;  %1908 = vmatmul.msk.f32.gmra.mxu1 %vm218_vm1, %v108_v55  ;;  %v111_v49 = vld [vmem:[%s3241_s0 + $0x308] sm:$0xff] }
 0x174   :  { %v1209_v62 = vpop.f32.mrf.mxu2  ;;  %v1356_v63 = vpop.f32.mrf.mxu3 }
 0x175   :  { %1788 = vst.msk [vmem:[%s3243_s3 + $0xe0] sm:$0xff] %vm1759_vm2, %v1738_v59  ;;  %v1210_v0 = vadd.f32 %v2835_v30, %v1209_v62  ;;  %v1357_v1 = vadd.f32 %v2835_v30, %v1356_v63  ;;  %v1641_v5 = vmax.f32 %v1445_v60, %v1494_v61 }
 0x177   :  { %v1543_v6 = vmax.f32 %v1210_v0, 0.0  ;;  %v1592_v7 = vmax.f32 %v1357_v1, 0.0 }
 0x178   :  { %v918_v8 = vpop.f32.mrf.mxu0  ;;  %v1065_v9 = vpop.f32.mrf.mxu1 }
 0x179   :  { %v1690_v12 = vmax.f32 %v1543_v6, %v1592_v7  ;;  %1958 = vmatmul.msk.f32.gmra.mxu2 %vm218_vm1, %v158_v2  ;;  %2007 = vmatmul.msk.f32.gmra.mxu3 %vm218_vm1, %v207_v3  ;;  %v919_v13 = vadd.f32 %v2835_v30, %v918_v8  ;;  %v1066_v14 = vadd.f32 %v2835_v30, %v1065_v9 }
 0x17b   :  { %v1739_v15 = vmax.f32 %v1641_v5, %v1690_v12  ;;  %v1446_v16 = vmax.f32 %v919_v13, 0.0  ;;  %v1495_v17 = vmax.f32 %v1066_v14, 0.0  ;;  %1860 = vmatmul.msk.f32.gmra.mxu0 %vm218_vm1, %v60_v10  ;;  %1909 = vmatmul.msk.f32.gmra.mxu1 %vm218_vm1, %v109_v11 }
 0x17c   :  { %v1212_v18 = vpop.f32.mrf.mxu2  ;;  %v1359_v19 = vpop.f32.mrf.mxu3 }
 0x17d   :  { %1789 = vst.msk [vmem:[%s3243_s3 + $0xe8] sm:$0xff] %vm1759_vm2, %v1739_v15  ;;  %v1213_v20 = vadd.f32 %v2835_v30, %v1212_v18  ;;  %v1360_v21 = vadd.f32 %v2835_v30, %v1359_v19  ;;  %v1642_v24 = vmax.f32 %v1446_v16, %v1495_v17 }
 0x17f   :  { %v1544_v25 = vmax.f32 %v1213_v20, 0.0  ;;  %v1593_v26 = vmax.f32 %v1360_v21, 0.0 }
 0x180   :  { %v921_v27 = vpop.f32.mrf.mxu0  ;;  %v1068_v28 = vpop.f32.mrf.mxu1 }
 0x181   :  { %v1691_v31 = vmax.f32 %v1544_v25, %v1593_v26  ;;  %1959 = vmatmul.msk.f32.gmra.mxu2 %vm218_vm1, %v159_v22  ;;  %2008 = vmatmul.msk.f32.gmra.mxu3 %vm218_vm1, %v208_v23  ;;  %v922_v32 = vadd.f32 %v2835_v30, %v921_v27  ;;  %v1069_v33 = vadd.f32 %v2835_v30, %v1068_v28 }
 0x183   :  { %v1740_v34 = vmax.f32 %v1642_v24, %v1691_v31  ;;  %v1447_v35 = vmax.f32 %v922_v32, 0.0  ;;  %v1496_v36 = vmax.f32 %v1069_v33, 0.0  ;;  %1861 = vmatmul.msk.f32.gmra.mxu0 %vm218_vm1, %v61_v4  ;;  %1910 = vmatmul.msk.f32.gmra.mxu1 %vm218_vm1, %v110_v29 }
 0x184   :  { %v1215_v37 = vpop.f32.mrf.mxu2  ;;  %v1362_v38 = vpop.f32.mrf.mxu3 }
 0x185   :  { %1790 = vst.msk [vmem:[%s3243_s3 + $0xf0] sm:$0xff] %vm1759_vm2, %v1740_v34  ;;  %v1216_v39 = vadd.f32 %v2835_v30, %v1215_v37  ;;  %v1363_v40 = vadd.f32 %v2835_v30, %v1362_v38  ;;  %v1643_v43 = vmax.f32 %v1447_v35, %v1496_v36 }
 0x187   :  { %v1545_v44 = vmax.f32 %v1216_v39, 0.0  ;;  %v1594_v45 = vmax.f32 %v1363_v40, 0.0 }
 0x188   :  { %v924_v46 = vpop.f32.mrf.mxu0  ;;  %v1071_v47 = vpop.f32.mrf.mxu1 }
 0x189   :  { %v1692_v50 = vmax.f32 %v1545_v44, %v1594_v45  ;;  %1960 = vmatmul.msk.f32.gmra.mxu2 %vm218_vm1, %v160_v41  ;;  %2009 = vmatmul.msk.f32.gmra.mxu3 %vm218_vm1, %v209_v42  ;;  %v925_v51 = vadd.f32 %v2835_v30, %v924_v46  ;;  %v1072_v52 = vadd.f32 %v2835_v30, %v1071_v47 }
 0x18b   :  { %v1741_v53 = vmax.f32 %v1643_v43, %v1692_v50  ;;  %v1448_v54 = vmax.f32 %v925_v51, 0.0  ;;  %v1497_v55 = vmax.f32 %v1072_v52, 0.0  ;;  %1862 = vmatmul.msk.f32.gmra.mxu0 %vm218_vm1, %v62_v48  ;;  %1911 = vmatmul.msk.f32.gmra.mxu1 %vm218_vm1, %v111_v49 }
 0x18c   :  { %v1218_v56 = vpop.f32.mrf.mxu2  ;;  %v1365_v57 = vpop.f32.mrf.mxu3 }
 0x18d   :  { %1791 = vst.msk [vmem:[%s3243_s3 + $0xf8] sm:$0xff] %vm1759_vm2, %v1741_v53  ;;  %v1219_v58 = vadd.f32 %v2835_v30, %v1218_v56  ;;  %v1366_v59 = vadd.f32 %v2835_v30, %v1365_v57  ;;  %v1644_v60 = vmax.f32 %v1448_v54, %v1497_v55 }
 0x18f   :  { %v1546_v61 = vmax.f32 %v1219_v58, 0.0  ;;  %v1595_v62 = vmax.f32 %v1366_v59, 0.0 }
 0x190   :  { %v927_v63 = vpop.f32.mrf.mxu0  ;;  %v1074_v0 = vpop.f32.mrf.mxu1 }
 0x191   :  { %v1693_v1 = vmax.f32 %v1546_v61, %v1595_v62  ;;  %v928_v2 = vadd.f32 %v2835_v30, %v927_v63  ;;  %v1075_v3 = vadd.f32 %v2835_v30, %v1074_v0 }
 0x193   :  { %v1742_v5 = vmax.f32 %v1644_v60, %v1693_v1  ;;  %v1449_v6 = vmax.f32 %v928_v2, 0.0  ;;  %v1498_v7 = vmax.f32 %v1075_v3, 0.0 }
 0x194   :  { %v1221_v8 = vpop.f32.mrf.mxu2  ;;  %v1368_v9 = vpop.f32.mrf.mxu3 }
 0x195   :  { %1792 = vst.msk [vmem:[%s3243_s3 + $0x100] sm:$0xff] %vm1759_vm2, %v1742_v5  ;;  %v1222_v10 = vadd.f32 %v2835_v30, %v1221_v8  ;;  %v1369_v11 = vadd.f32 %v2835_v30, %v1368_v9  ;;  %v1645_v12 = vmax.f32 %v1449_v6, %v1498_v7 }
 0x197   :  { %v1547_v13 = vmax.f32 %v1222_v10, 0.0  ;;  %v1596_v14 = vmax.f32 %v1369_v11, 0.0 }
 0x198   :  { %v930_v15 = vpop.f32.mrf.mxu0  ;;  %v1077_v16 = vpop.f32.mrf.mxu1 }
 0x199   :  { %v1694_v17 = vmax.f32 %v1547_v13, %v1596_v14  ;;  %v931_v18 = vadd.f32 %v2835_v30, %v930_v15  ;;  %v1078_v19 = vadd.f32 %v2835_v30, %v1077_v16 }
 0x19b   :  { %v1743_v20 = vmax.f32 %v1645_v12, %v1694_v17  ;;  %v1450_v21 = vmax.f32 %v931_v18, 0.0  ;;  %v1499_v22 = vmax.f32 %v1078_v19, 0.0 }
 0x19c   :  { %v1224_v23 = vpop.f32.mrf.mxu2  ;;  %v1371_v24 = vpop.f32.mrf.mxu3 }
 0x19d   :  { %1793 = vst.msk [vmem:[%s3243_s3 + $0x108] sm:$0xff] %vm1759_vm2, %v1743_v20  ;;  %v1225_v25 = vadd.f32 %v2835_v30, %v1224_v23  ;;  %v1372_v26 = vadd.f32 %v2835_v30, %v1371_v24  ;;  %v1646_v27 = vmax.f32 %v1450_v21, %v1499_v22 }
 0x19f   :  { %v1548_v28 = vmax.f32 %v1225_v25, 0.0  ;;  %v1597_v4 = vmax.f32 %v1372_v26, 0.0 }
 0x1a0   :  { %v933_v29 = vpop.f32.mrf.mxu0  ;;  %v1080_v31 = vpop.f32.mrf.mxu1 }
 0x1a1   :  { %v1695_v32 = vmax.f32 %v1548_v28, %v1597_v4  ;;  %v934_v33 = vadd.f32 %v2835_v30, %v933_v29  ;;  %v1081_v34 = vadd.f32 %v2835_v30, %v1080_v31 }
 0x1a3   :  { %v1744_v35 = vmax.f32 %v1646_v27, %v1695_v32  ;;  %v1451_v36 = vmax.f32 %v934_v33, 0.0  ;;  %v1500_v37 = vmax.f32 %v1081_v34, 0.0 }
 0x1a4   :  { %v1227_v38 = vpop.f32.mrf.mxu2  ;;  %v1374_v39 = vpop.f32.mrf.mxu3 }
 0x1a5   :  { %1794 = vst.msk [vmem:[%s3243_s3 + $0x110] sm:$0xff] %vm1759_vm2, %v1744_v35  ;;  %v1228_v40 = vadd.f32 %v2835_v30, %v1227_v38  ;;  %v1375_v41 = vadd.f32 %v2835_v30, %v1374_v39  ;;  %v1647_v42 = vmax.f32 %v1451_v36, %v1500_v37 }
 0x1a7   :  { %v1549_v43 = vmax.f32 %v1228_v40, 0.0  ;;  %v1598_v44 = vmax.f32 %v1375_v41, 0.0 }
 0x1a8   :  { %v936_v45 = vpop.f32.mrf.mxu0  ;;  %v1083_v46 = vpop.f32.mrf.mxu1 }
 0x1a9   :  { %v1696_v47 = vmax.f32 %v1549_v43, %v1598_v44  ;;  %v937_v48 = vadd.f32 %v2835_v30, %v936_v45  ;;  %v1084_v49 = vadd.f32 %v2835_v30, %v1083_v46 }
 0x1ab   :  { %v1745_v50 = vmax.f32 %v1647_v42, %v1696_v47  ;;  %v1452_v51 = vmax.f32 %v937_v48, 0.0  ;;  %v1501_v52 = vmax.f32 %v1084_v49, 0.0 }
 0x1ac   :  { %v1230_v53 = vpop.f32.mrf.mxu2  ;;  %v1377_v54 = vpop.f32.mrf.mxu3 }
 0x1ad   :  { %1795 = vst.msk [vmem:[%s3243_s3 + $0x118] sm:$0xff] %vm1759_vm2, %v1745_v50  ;;  %v1231_v55 = vadd.f32 %v2835_v30, %v1230_v53  ;;  %v1378_v56 = vadd.f32 %v2835_v30, %v1377_v54  ;;  %v1648_v57 = vmax.f32 %v1452_v51, %v1501_v52 }
 0x1af   :  { %v1550_v58 = vmax.f32 %v1231_v55, 0.0  ;;  %v1599_v59 = vmax.f32 %v1378_v56, 0.0 }
 0x1b0   :  { %v939_v60 = vpop.f32.mrf.mxu0  ;;  %v1086_v61 = vpop.f32.mrf.mxu1 }
 0x1b1   :  { %v1697_v62 = vmax.f32 %v1550_v58, %v1599_v59  ;;  %v940_v63 = vadd.f32 %v2835_v30, %v939_v60  ;;  %v1087_v0 = vadd.f32 %v2835_v30, %v1086_v61 }
 0x1b3   :  { %v1746_v1 = vmax.f32 %v1648_v57, %v1697_v62  ;;  %v1453_v2 = vmax.f32 %v940_v63, 0.0  ;;  %v1502_v3 = vmax.f32 %v1087_v0, 0.0 }
 0x1b4   :  { %v1233_v5 = vpop.f32.mrf.mxu2  ;;  %v1380_v6 = vpop.f32.mrf.mxu3 }
 0x1b5   :  { %1796 = vst.msk [vmem:[%s3243_s3 + $0x120] sm:$0xff] %vm1759_vm2, %v1746_v1  ;;  %v1234_v7 = vadd.f32 %v2835_v30, %v1233_v5  ;;  %v1381_v8 = vadd.f32 %v2835_v30, %v1380_v6  ;;  %v1649_v9 = vmax.f32 %v1453_v2, %v1502_v3 }
 0x1b7   :  { %v1551_v10 = vmax.f32 %v1234_v7, 0.0  ;;  %v1600_v11 = vmax.f32 %v1381_v8, 0.0 }
 0x1b8   :  { %v942_v12 = vpop.f32.mrf.mxu0  ;;  %v1089_v13 = vpop.f32.mrf.mxu1 }
 0x1b9   :  { %v1698_v14 = vmax.f32 %v1551_v10, %v1600_v11  ;;  %v943_v15 = vadd.f32 %v2835_v30, %v942_v12  ;;  %v1090_v16 = vadd.f32 %v2835_v30, %v1089_v13 }
 0x1bb   :  { %v1747_v17 = vmax.f32 %v1649_v9, %v1698_v14  ;;  %v1454_v18 = vmax.f32 %v943_v15, 0.0  ;;  %v1503_v19 = vmax.f32 %v1090_v16, 0.0 }
 0x1bc   :  { %v1236_v20 = vpop.f32.mrf.mxu2  ;;  %v1383_v21 = vpop.f32.mrf.mxu3 }
 0x1bd   :  { %1797 = vst.msk [vmem:[%s3243_s3 + $0x128] sm:$0xff] %vm1759_vm2, %v1747_v17  ;;  %v1237_v22 = vadd.f32 %v2835_v30, %v1236_v20  ;;  %v1384_v23 = vadd.f32 %v2835_v30, %v1383_v21  ;;  %v1650_v24 = vmax.f32 %v1454_v18, %v1503_v19 }
 0x1bf   :  { %v1552_v25 = vmax.f32 %v1237_v22, 0.0  ;;  %v1601_v26 = vmax.f32 %v1384_v23, 0.0 }
 0x1c0   :  { %v945_v27 = vpop.f32.mrf.mxu0  ;;  %v1092_v28 = vpop.f32.mrf.mxu1 }
 0x1c1   :  { %v1699_v4 = vmax.f32 %v1552_v25, %v1601_v26  ;;  %v946_v29 = vadd.f32 %v2835_v30, %v945_v27  ;;  %v1093_v31 = vadd.f32 %v2835_v30, %v1092_v28 }
 0x1c3   :  { %v1748_v32 = vmax.f32 %v1650_v24, %v1699_v4  ;;  %v1455_v33 = vmax.f32 %v946_v29, 0.0  ;;  %v1504_v34 = vmax.f32 %v1093_v31, 0.0 }
 0x1c4   :  { %v1239_v35 = vpop.f32.mrf.mxu2  ;;  %v1386_v36 = vpop.f32.mrf.mxu3 }
 0x1c5   :  { %1798 = vst.msk [vmem:[%s3243_s3 + $0x130] sm:$0xff] %vm1759_vm2, %v1748_v32  ;;  %v1240_v37 = vadd.f32 %v2835_v30, %v1239_v35  ;;  %v1387_v38 = vadd.f32 %v2835_v30, %v1386_v36  ;;  %v1651_v39 = vmax.f32 %v1455_v33, %v1504_v34 }
 0x1c7   :  { %v1553_v40 = vmax.f32 %v1240_v37, 0.0  ;;  %v1602_v41 = vmax.f32 %v1387_v38, 0.0 }
 0x1c8   :  { %v948_v42 = vpop.f32.mrf.mxu0  ;;  %v1095_v43 = vpop.f32.mrf.mxu1 }
 0x1c9   :  { %v1700_v44 = vmax.f32 %v1553_v40, %v1602_v41  ;;  %v949_v45 = vadd.f32 %v2835_v30, %v948_v42  ;;  %v1096_v46 = vadd.f32 %v2835_v30, %v1095_v43 }
 0x1cb   :  { %v1749_v47 = vmax.f32 %v1651_v39, %v1700_v44  ;;  %v1456_v48 = vmax.f32 %v949_v45, 0.0  ;;  %v1505_v49 = vmax.f32 %v1096_v46, 0.0 }
 0x1cc   :  { %v1242_v50 = vpop.f32.mrf.mxu2  ;;  %v1389_v51 = vpop.f32.mrf.mxu3 }
 0x1cd   :  { %1799 = vst.msk [vmem:[%s3243_s3 + $0x138] sm:$0xff] %vm1759_vm2, %v1749_v47  ;;  %v1243_v52 = vadd.f32 %v2835_v30, %v1242_v50  ;;  %v1390_v53 = vadd.f32 %v2835_v30, %v1389_v51  ;;  %v1652_v54 = vmax.f32 %v1456_v48, %v1505_v49 }
 0x1cf   :  { %v1554_v55 = vmax.f32 %v1243_v52, 0.0  ;;  %v1603_v56 = vmax.f32 %v1390_v53, 0.0 }
 0x1d0   :  { %v951_v57 = vpop.f32.mrf.mxu0  ;;  %v1098_v58 = vpop.f32.mrf.mxu1 }
 0x1d1   :  { %v1701_v59 = vmax.f32 %v1554_v55, %v1603_v56  ;;  %v952_v60 = vadd.f32 %v2835_v30, %v951_v57  ;;  %v1099_v61 = vadd.f32 %v2835_v30, %v1098_v58 }
 0x1d3   :  { %v1750_v62 = vmax.f32 %v1652_v54, %v1701_v59  ;;  %v1457_v63 = vmax.f32 %v952_v60, 0.0  ;;  %v1506_v0 = vmax.f32 %v1099_v61, 0.0 }
 0x1d4   :  { %v1245_v1 = vpop.f32.mrf.mxu2  ;;  %v1392_v2 = vpop.f32.mrf.mxu3 }
 0x1d5   :  { %1800 = vst.msk [vmem:[%s3243_s3 + $0x140] sm:$0xff] %vm1759_vm2, %v1750_v62  ;;  %v1246_v3 = vadd.f32 %v2835_v30, %v1245_v1  ;;  %v1393_v5 = vadd.f32 %v2835_v30, %v1392_v2  ;;  %v1653_v6 = vmax.f32 %v1457_v63, %v1506_v0 }
 0x1d7   :  { %v1555_v7 = vmax.f32 %v1246_v3, 0.0  ;;  %v1604_v8 = vmax.f32 %v1393_v5, 0.0 }
 0x1d8   :  { %v954_v9 = vpop.f32.mrf.mxu0  ;;  %v1101_v10 = vpop.f32.mrf.mxu1 }
 0x1d9   :  { %v1702_v11 = vmax.f32 %v1555_v7, %v1604_v8  ;;  %v955_v12 = vadd.f32 %v2835_v30, %v954_v9  ;;  %v1102_v13 = vadd.f32 %v2835_v30, %v1101_v10 }
 0x1db   :  { %v1751_v14 = vmax.f32 %v1653_v6, %v1702_v11  ;;  %v1458_v15 = vmax.f32 %v955_v12, 0.0  ;;  %v1507_v16 = vmax.f32 %v1102_v13, 0.0 }
 0x1dc   :  { %v1248_v17 = vpop.f32.mrf.mxu2  ;;  %v1395_v18 = vpop.f32.mrf.mxu3 }
 0x1dd   :  { %1801 = vst.msk [vmem:[%s3243_s3 + $0x148] sm:$0xff] %vm1759_vm2, %v1751_v14  ;;  %v1249_v19 = vadd.f32 %v2835_v30, %v1248_v17  ;;  %v1396_v20 = vadd.f32 %v2835_v30, %v1395_v18  ;;  %v1654_v21 = vmax.f32 %v1458_v15, %v1507_v16 }
 0x1df   :  { %v1556_v22 = vmax.f32 %v1249_v19, 0.0  ;;  %v1605_v23 = vmax.f32 %v1396_v20, 0.0 }
 0x1e0   :  { %v957_v24 = vpop.f32.mrf.mxu0  ;;  %v1104_v25 = vpop.f32.mrf.mxu1 }
 0x1e1   :  { %v1703_v26 = vmax.f32 %v1556_v22, %v1605_v23  ;;  %v958_v27 = vadd.f32 %v2835_v30, %v957_v24  ;;  %v1105_v28 = vadd.f32 %v2835_v30, %v1104_v25 }
 0x1e3   :  { %v1752_v4 = vmax.f32 %v1654_v21, %v1703_v26  ;;  %v1459_v29 = vmax.f32 %v958_v27, 0.0  ;;  %v1508_v31 = vmax.f32 %v1105_v28, 0.0 }
 0x1e4   :  { %v1251_v32 = vpop.f32.mrf.mxu2  ;;  %v1398_v33 = vpop.f32.mrf.mxu3 }
 0x1e5   :  { %1802 = vst.msk [vmem:[%s3243_s3 + $0x150] sm:$0xff] %vm1759_vm2, %v1752_v4  ;;  %v1252_v34 = vadd.f32 %v2835_v30, %v1251_v32  ;;  %v1399_v35 = vadd.f32 %v2835_v30, %v1398_v33  ;;  %v1655_v36 = vmax.f32 %v1459_v29, %v1508_v31  ;;  %v2024_v31 = vld [vmem:[%s3242_s2] ss:$0 sm:$0xff] }
 0x1e7   :  { %v1557_v37 = vmax.f32 %v1252_v34, 0.0  ;;  %v1606_v38 = vmax.f32 %v1399_v35, 0.0 }
 0x1e8   :  { %v960_v39 = vpop.f32.mrf.mxu0  ;;  %v1107_v40 = vpop.f32.mrf.mxu1 }
 0x1e9   :  { %v1704_v41 = vmax.f32 %v1557_v37, %v1606_v38  ;;  %v961_v42 = vadd.f32 %v2835_v30, %v960_v39  ;;  %v1108_v43 = vadd.f32 %v2835_v30, %v1107_v40 }
 0x1eb   :  { %v1753_v44 = vmax.f32 %v1655_v36, %v1704_v41  ;;  %v1460_v45 = vmax.f32 %v961_v42, 0.0  ;;  %v1509_v46 = vmax.f32 %v1108_v43, 0.0 }
 0x1ec   :  { %v1254_v47 = vpop.f32.mrf.mxu2  ;;  %v1401_v48 = vpop.f32.mrf.mxu3 }
 0x1ed   :  { %1803 = vst.msk [vmem:[%s3243_s3 + $0x158] sm:$0xff] %vm1759_vm2, %v1753_v44  ;;  %v1255_v49 = vadd.f32 %v2835_v30, %v1254_v47  ;;  %v1402_v50 = vadd.f32 %v2835_v30, %v1401_v48  ;;  %v1656_v51 = vmax.f32 %v1460_v45, %v1509_v46 }
 0x1ef   :  { %v1558_v52 = vmax.f32 %v1255_v49, 0.0  ;;  %v1607_v53 = vmax.f32 %v1402_v50, 0.0 }
 0x1f0   :  { %v963_v54 = vpop.f32.mrf.mxu0  ;;  %v1110_v55 = vpop.f32.mrf.mxu1 }
 0x1f1   :  { %v1705_v56 = vmax.f32 %v1558_v52, %v1607_v53  ;;  %v964_v57 = vadd.f32 %v2835_v30, %v963_v54  ;;  %v1111_v58 = vadd.f32 %v2835_v30, %v1110_v55 }
 0x1f3   :  { %v1754_v59 = vmax.f32 %v1656_v51, %v1705_v56  ;;  %v1461_v60 = vmax.f32 %v964_v57, 0.0  ;;  %v1510_v61 = vmax.f32 %v1111_v58, 0.0 }
 0x1f4   :  { %v1257_v62 = vpop.f32.mrf.mxu2  ;;  %v1404_v63 = vpop.f32.mrf.mxu3 }
 0x1f5   :  { %1804 = vst.msk [vmem:[%s3243_s3 + $0x160] sm:$0xff] %vm1759_vm2, %v1754_v59  ;;  %v1258_v0 = vadd.f32 %v2835_v30, %v1257_v62  ;;  %v1405_v1 = vadd.f32 %v2835_v30, %v1404_v63  ;;  %v1657_v2 = vmax.f32 %v1461_v60, %v1510_v61 }
 0x1f7   :  { %v1559_v3 = vmax.f32 %v1258_v0, 0.0  ;;  %v1608_v5 = vmax.f32 %v1405_v1, 0.0 }
 0x1f8   :  { %v966_v6 = vpop.f32.mrf.mxu0  ;;  %v1113_v7 = vpop.f32.mrf.mxu1 }
 0x1f9   :  { %v1706_v8 = vmax.f32 %v1559_v3, %v1608_v5  ;;  %v967_v9 = vadd.f32 %v2835_v30, %v966_v6  ;;  %v1114_v10 = vadd.f32 %v2835_v30, %v1113_v7 }
 0x1fb   :  { %v1755_v11 = vmax.f32 %v1657_v2, %v1706_v8  ;;  %v1462_v12 = vmax.f32 %v967_v9, 0.0  ;;  %v1511_v13 = vmax.f32 %v1114_v10, 0.0 }
 0x1fc   :  { %v1260_v14 = vpop.f32.mrf.mxu2  ;;  %v1407_v15 = vpop.f32.mrf.mxu3 }
 0x1fd   :  { %1805 = vst.msk [vmem:[%s3243_s3 + $0x168] sm:$0xff] %vm1759_vm2, %v1755_v11  ;;  %v1261_v16 = vadd.f32 %v2835_v30, %v1260_v14  ;;  %v1408_v17 = vadd.f32 %v2835_v30, %v1407_v15  ;;  %v1658_v18 = vmax.f32 %v1462_v12, %v1511_v13 }
 0x1ff   :  { %v1560_v19 = vmax.f32 %v1261_v16, 0.0  ;;  %v1609_v20 = vmax.f32 %v1408_v17, 0.0 }
 0x200   :  { %v969_v21 = vpop.f32.mrf.mxu0  ;;  %v1116_v22 = vpop.f32.mrf.mxu1 }
 0x201   :  { %v1707_v23 = vmax.f32 %v1560_v19, %v1609_v20  ;;  %v970_v24 = vadd.f32 %v2835_v30, %v969_v21  ;;  %v1117_v25 = vadd.f32 %v2835_v30, %v1116_v22 }
 0x203   :  { %v1756_v26 = vmax.f32 %v1658_v18, %v1707_v23  ;;  %v1463_v27 = vmax.f32 %v970_v24, 0.0  ;;  %v1512_v28 = vmax.f32 %v1117_v25, 0.0 }
 0x204   :  { %v1263_v4 = vpop.f32.mrf.mxu2  ;;  %v1410_v29 = vpop.f32.mrf.mxu3 }
 0x205   :  { %1806 = vst.msk [vmem:[%s3243_s3 + $0x170] sm:$0xff] %vm1759_vm2, %v1756_v26  ;;  %v1264_v32 = vadd.f32 %v2024_v31, %v1263_v4  ;;  %v1411_v33 = vadd.f32 %v2024_v31, %v1410_v29  ;;  %v1659_v34 = vmax.f32 %v1463_v27, %v1512_v28 }
 0x207   :  { %v1561_v35 = vmax.f32 %v1264_v32, 0.0  ;;  %v1610_v36 = vmax.f32 %v1411_v33, 0.0 }
 0x208   :  { %v972_v30 = vpop.f32.mrf.mxu0  ;;  %v1119_v37 = vpop.f32.mrf.mxu1 }
 0x209   :  { %v1708_v38 = vmax.f32 %v1561_v35, %v1610_v36  ;;  %v973_v39 = vadd.f32 %v2024_v31, %v972_v30  ;;  %v1120_v40 = vadd.f32 %v2024_v31, %v1119_v37 }
 0x20b   :  { %v1757_v41 = vmax.f32 %v1659_v34, %v1708_v38  ;;  %v1464_v42 = vmax.f32 %v973_v39, 0.0  ;;  %v1513_v43 = vmax.f32 %v1120_v40, 0.0 }
 0x20c   :  { %v1266_v44 = vpop.f32.mrf.mxu2  ;;  %v1413_v45 = vpop.f32.mrf.mxu3 }
 0x20d   :  { %1807 = vst.msk [vmem:[%s3243_s3 + $0x178] sm:$0xff] %vm1759_vm2, %v1757_v41  ;;  %v1267_v46 = vadd.f32 %v2024_v31, %v1266_v44  ;;  %v1414_v47 = vadd.f32 %v2024_v31, %v1413_v45  ;;  %v1660_v48 = vmax.f32 %v1464_v42, %v1513_v43 }
 0x20f   :  { %v1562_v49 = vmax.f32 %v1267_v46, 0.0  ;;  %v1611_v50 = vmax.f32 %v1414_v47, 0.0 }
 0x211   :  { %v1709_v51 = vmax.f32 %v1562_v49, %v1611_v50 }
 0x213   :  { %v1758_v52 = vmax.f32 %v1660_v48, %v1709_v51 }
 0x215   :  { %1808 = vst.msk [vmem:[%s3243_s3 + $0x180] sm:$0xff] %vm1759_vm2, %v1758_v52 }

// kernel: lenet_ensemble_forward.4
= control target key start
LH: loop header
LB: loop body
LE: loop exit
PB: predicated region body
PF: predicated region fallthrough
CT: control target
= control target key end

     0   :  { %vm365_vm0 = vcmask 1045504   ;;  %vm280_vm1 = vcmask 900096   ;;  %vm1024_vm2 = vcmask 654336   ;;  %s2203_s1 = inlined_call_operand.vmem [shape: f32[750,80], index: 1, kind: input, shape index: {}]   ;;  %s2204_s0 = inlined_call_operand.vmem [shape: f32[224,750], index: 0, kind: input, shape index: {}]   ;;  %s2205_s2 = inlined_call_operand.vmem [shape: f32[1,80], index: 2, kind: input, shape index: {}]   ;;  %s2206_s3 = inlined_call_operand.vmem [shape: f32[56,80], index: 3, kind: output, shape index: {}]  }
   0x1   :  { %v197_v0 = vld [vmem:[%s2203_s1 + $0x78] sm:$0xff]  ;;  %v196_v1 = vld [vmem:[%s2203_s1 + $0x70] sm:$0xff]  ;;  %v195_v4 = vld [vmem:[%s2203_s1 + $0x68] sm:$0xff] }
   0x2   :  { %v213_v2 = vld [vmem:[%s2203_s1 + $0xf8] sm:$0xff]  ;;  %1065 = vmatpush.msra.mxu2 %v197_v0  ;;  %v212_v3 = vld [vmem:[%s2203_s1 + $0xf0] sm:$0xff]  ;;  %v211_v5 = vld [vmem:[%s2203_s1 + $0xe8] sm:$0xff]  ;;  %369 = vmatpush.msra.mxu0 %v197_v0 }
   0x3   :  { %1081 = vmatpush.msra.mxu3 %v213_v2  ;;  %470 = vmatpush.msra.mxu1 %v213_v2  ;;  %v194_v6 = vld [vmem:[%s2203_s1 + $0x60] sm:$0xff]  ;;  %v193_v8 = vld [vmem:[%s2203_s1 + $0x58] sm:$0xff]  ;;  %v192_v10 = vld [vmem:[%s2203_s1 + $0x50] sm:$0xff] }
   0x4   :  { %1066 = vmatpush.msra.mxu2 %v196_v1  ;;  %v210_v7 = vld [vmem:[%s2203_s1 + $0xe0] sm:$0xff]  ;;  %370 = vmatpush.msra.mxu0 %v196_v1  ;;  %v209_v9 = vld [vmem:[%s2203_s1 + $0xd8] sm:$0xff]  ;;  %v208_v11 = vld [vmem:[%s2203_s1 + $0xd0] sm:$0xff] }
   0x5   :  { %1082 = vmatpush.msra.mxu3 %v212_v3  ;;  %471 = vmatpush.msra.mxu1 %v212_v3  ;;  %v191_v12 = vld [vmem:[%s2203_s1 + $0x48] sm:$0xff]  ;;  %v190_v14 = vld [vmem:[%s2203_s1 + $0x40] sm:$0xff]  ;;  %v189_v16 = vld [vmem:[%s2203_s1 + $0x38] sm:$0xff] }
   0x6   :  { %1067 = vmatpush.msra.mxu2 %v195_v4  ;;  %371 = vmatpush.msra.mxu0 %v195_v4  ;;  %v207_v13 = vld [vmem:[%s2203_s1 + $0xc8] sm:$0xff]  ;;  %v206_v15 = vld [vmem:[%s2203_s1 + $0xc0] sm:$0xff]  ;;  %v205_v17 = vld [vmem:[%s2203_s1 + $0xb8] sm:$0xff] }
   0x7   :  { %1083 = vmatpush.msra.mxu3 %v211_v5  ;;  %472 = vmatpush.msra.mxu1 %v211_v5  ;;  %v188_v18 = vld [vmem:[%s2203_s1 + $0x30] sm:$0xff]  ;;  %v187_v20 = vld [vmem:[%s2203_s1 + $0x28] sm:$0xff]  ;;  %v186_v22 = vld [vmem:[%s2203_s1 + $0x20] sm:$0xff] }
   0x8   :  { %1068 = vmatpush.msra.mxu2 %v194_v6  ;;  %372 = vmatpush.msra.mxu0 %v194_v6  ;;  %v204_v19 = vld [vmem:[%s2203_s1 + $0xb0] sm:$0xff]  ;;  %v203_v21 = vld [vmem:[%s2203_s1 + $0xa8] sm:$0xff]  ;;  %v202_v23 = vld [vmem:[%s2203_s1 + $0xa0] sm:$0xff] }
   0x9   :  { %1084 = vmatpush.msra.mxu3 %v210_v7  ;;  %473 = vmatpush.msra.mxu1 %v210_v7  ;;  %v185_v24 = vld [vmem:[%s2203_s1 + $0x18] sm:$0xff]  ;;  %v184_v26 = vld [vmem:[%s2203_s1 + $0x10] sm:$0xff]  ;;  %v183_v28 = vld [vmem:[%s2203_s1 + $0x8] sm:$0xff] }
   0xa   :  { %1069 = vmatpush.msra.mxu2 %v193_v8  ;;  %373 = vmatpush.msra.mxu0 %v193_v8  ;;  %v201_v25 = vld [vmem:[%s2203_s1 + $0x98] sm:$0xff]  ;;  %v200_v27 = vld [vmem:[%s2203_s1 + $0x90] sm:$0xff]  ;;  %v199_v29 = vld [vmem:[%s2203_s1 + $0x88] sm:$0xff] }
   0xb   :  { %1085 = vmatpush.msra.mxu3 %v209_v9  ;;  %474 = vmatpush.msra.mxu1 %v209_v9  ;;  %v182_v30 = vld [vmem:[%s2203_s1] sm:$0xff]  ;;  %v99_v33 = vld [vmem:[%s2204_s0 + $0x2a8] sm:$0xff]  ;;  %v229_v34 = vld [vmem:[%s2203_s1 + $0x178] sm:$0xff] }
   0xc   :  { %1070 = vmatpush.msra.mxu2 %v192_v10  ;;  %374 = vmatpush.msra.mxu0 %v192_v10  ;;  %v198_v31 = vld [vmem:[%s2203_s1 + $0x80] sm:$0xff]  ;;  %v245_v35 = vld [vmem:[%s2203_s1 + $0x1f8] sm:$0xff]  ;;  %v228_v36 = vld [vmem:[%s2203_s1 + $0x170] sm:$0xff] }
   0xd   :  { %1086 = vmatpush.msra.mxu3 %v208_v11  ;;  %475 = vmatpush.msra.mxu1 %v208_v11  ;;  %v98_v32 = vld [vmem:[%s2204_s0 + $0x2a0] sm:$0xff]  ;;  %v244_v37 = vld [vmem:[%s2203_s1 + $0x1f0] sm:$0xff]  ;;  %v15_v39 = vld [vmem:[%s2204_s0 + $0x8] sm:$0xff] }
   0xe   :  { %1071 = vmatpush.msra.mxu2 %v191_v12  ;;  %375 = vmatpush.msra.mxu0 %v191_v12  ;;  %v14_v38 = vld [vmem:[%s2204_s0] sm:$0xff]  ;;  %v261_v40 = vld [vmem:[%s2203_s1 + $0x278] sm:$0xff]  ;;  %v275_v41 = vld [vmem:[%s2203_s1 + $0x2e8] sm:$0x3f] }
   0xf   :  { %1087 = vmatpush.msra.mxu3 %v207_v13  ;;  %476 = vmatpush.msra.mxu1 %v207_v13  ;;  %v227_v42 = vld [vmem:[%s2203_s1 + $0x168] sm:$0xff]  ;;  %v260_v44 = vld [vmem:[%s2203_s1 + $0x270] sm:$0xff]  ;;  %v274_v45 = vld [vmem:[%s2203_s1 + $0x2e0] sm:$0xff] }
  0x10   :  { %1072 = vmatpush.msra.mxu2 %v190_v14  ;;  %376 = vmatpush.msra.mxu0 %v190_v14  ;;  %v243_v43 = vld [vmem:[%s2203_s1 + $0x1e8] sm:$0xff]  ;;  %v104_v46 = vld [vmem:[%s2204_s0 + $0x2d0] sm:$0xff]  ;;  %v105_v47 = vld [vmem:[%s2204_s0 + $0x2d8] sm:$0xff] }
  0x11   :  { %1088 = vmatpush.msra.mxu3 %v206_v15  ;;  %477 = vmatpush.msra.mxu1 %v206_v15  ;;  %v226_v48 = vld [vmem:[%s2203_s1 + $0x160] sm:$0xff]  ;;  %v259_v50 = vld [vmem:[%s2203_s1 + $0x268] sm:$0xff]  ;;  %v273_v51 = vld [vmem:[%s2203_s1 + $0x2d8] sm:$0xff] }
  0x12   :  { %1073 = vmatpush.msra.mxu2 %v189_v16  ;;  %377 = vmatpush.msra.mxu0 %v189_v16  ;;  %v242_v49 = vld [vmem:[%s2203_s1 + $0x1e0] sm:$0xff]  ;;  %v225_v52 = vld [vmem:[%s2203_s1 + $0x158] sm:$0xff]  ;;  %v20_v54 = vld [vmem:[%s2204_s0 + $0x30] sm:$0xff] }
  0x13   :  { %1089 = vmatpush.msra.mxu3 %v205_v17  ;;  %478 = vmatpush.msra.mxu1 %v205_v17  ;;  %v241_v53 = vld [vmem:[%s2203_s1 + $0x1d8] sm:$0xff]  ;;  %v258_v56 = vld [vmem:[%s2203_s1 + $0x260] sm:$0xff]  ;;  %v224_v57 = vld [vmem:[%s2203_s1 + $0x150] sm:$0xff] }
  0x14   :  { %1074 = vmatpush.msra.mxu2 %v188_v18  ;;  %378 = vmatpush.msra.mxu0 %v188_v18  ;;  %v21_v55 = vld [vmem:[%s2204_s0 + $0x38] sm:$0xff]  ;;  %v272_v58 = vld [vmem:[%s2203_s1 + $0x2d0] sm:$0xff]  ;;  %v223_v61 = vld [vmem:[%s2203_s1 + $0x148] sm:$0xff] }
  0x15   :  { %1090 = vmatpush.msra.mxu3 %v204_v19  ;;  %479 = vmatpush.msra.mxu1 %v204_v19  ;;  %v240_v59 = vld [vmem:[%s2203_s1 + $0x1d0] sm:$0xff]  ;;  %v257_v60 = vld [vmem:[%s2203_s1 + $0x258] sm:$0xff]  ;;  %v110_v62 = vld [vmem:[%s2204_s0 + $0x300] sm:$0xff] }
  0x16   :  { %1075 = vmatpush.msra.mxu2 %v187_v20  ;;  %379 = vmatpush.msra.mxu0 %v187_v20  ;;  %v111_v63 = vld [vmem:[%s2204_s0 + $0x308] sm:$0xff]  ;;  %v256_v2 = vld [vmem:[%s2203_s1 + $0x250] sm:$0xff]  ;;  %v222_v3 = vld [vmem:[%s2203_s1 + $0x140] sm:$0xff] }
  0x17   :  { %1091 = vmatpush.msra.mxu3 %v203_v21  ;;  %480 = vmatpush.msra.mxu1 %v203_v21  ;;  %v239_v0 = vld [vmem:[%s2203_s1 + $0x1c8] sm:$0xff]  ;;  %v26_v4 = vld [vmem:[%s2204_s0 + $0x60] sm:$0xff]  ;;  %v116_v9 = vld [vmem:[%s2204_s0 + $0x330] sm:$0xff] }
  0x18   :  { %1076 = vmatpush.msra.mxu2 %v186_v22  ;;  %380 = vmatpush.msra.mxu0 %v186_v22  ;;  %v271_v1 = vld [vmem:[%s2203_s1 + $0x2c8] sm:$0xff]  ;;  %v238_v6 = vld [vmem:[%s2203_s1 + $0x1c0] sm:$0xff]  ;;  %v117_v10 = vld [vmem:[%s2204_s0 + $0x338] sm:$0xff] }
  0x19   :  { %1092 = vmatpush.msra.mxu3 %v202_v23  ;;  %481 = vmatpush.msra.mxu1 %v202_v23  ;;  %v27_v5 = vld [vmem:[%s2204_s0 + $0x68] sm:$0xff]  ;;  %v270_v8 = vld [vmem:[%s2203_s1 + $0x2c0] sm:$0xff]  ;;  %v32_v11 = vld [vmem:[%s2204_s0 + $0x90] sm:$0xff] }
  0x1a   :  { %1077 = vmatpush.msra.mxu2 %v185_v24  ;;  %381 = vmatpush.msra.mxu0 %v185_v24  ;;  %v255_v7 = vld [vmem:[%s2203_s1 + $0x248] sm:$0xff]  ;;  %v221_v12 = vld [vmem:[%s2203_s1 + $0x138] sm:$0xff]  ;;  %v254_v15 = vld [vmem:[%s2203_s1 + $0x240] sm:$0xff] }
  0x1b   :  { %1093 = vmatpush.msra.mxu3 %v201_v25  ;;  %482 = vmatpush.msra.mxu1 %v201_v25  ;;  %v33_v13 = vld [vmem:[%s2204_s0 + $0x98] sm:$0xff]  ;;  %v220_v17 = vld [vmem:[%s2203_s1 + $0x130] sm:$0xff]  ;;  %v122_v18 = vld [vmem:[%s2204_s0 + $0x360] sm:$0xff] }
  0x1c   :  { %1078 = vmatpush.msra.mxu2 %v184_v26  ;;  %382 = vmatpush.msra.mxu0 %v184_v26  ;;  %v237_v14 = vld [vmem:[%s2203_s1 + $0x1b8] sm:$0xff]  ;;  %v123_v19 = vld [vmem:[%s2204_s0 + $0x368] sm:$0xff]  ;;  %v38_v20 = vld [vmem:[%s2204_s0 + $0xc0] sm:$0xff] }
  0x1d   :  { %1094 = vmatpush.msra.mxu3 %v200_v27  ;;  %483 = vmatpush.msra.mxu1 %v200_v27  ;;  %v269_v16 = vld [vmem:[%s2203_s1 + $0x2b8] sm:$0xff]  ;;  %v236_v21 = vld [vmem:[%s2203_s1 + $0x1b0] sm:$0xff]  ;;  %v39_v22 = vld [vmem:[%s2204_s0 + $0xc8] sm:$0xff] }
  0x1e   :  { %1079 = vmatpush.msra.mxu2 %v183_v28  ;;  %383 = vmatpush.msra.mxu0 %v183_v28  ;;  %v253_v23 = vld [vmem:[%s2203_s1 + $0x238] sm:$0xff]  ;;  %v268_v24 = vld [vmem:[%s2203_s1 + $0x2b0] sm:$0xff]  ;;  %v219_v25 = vld [vmem:[%s2203_s1 + $0x128] sm:$0xff] }
  0x1f   :  { %1095 = vmatpush.msra.mxu3 %v199_v29  ;;  %484 = vmatpush.msra.mxu1 %v199_v29  ;;  %v128_v26 = vld [vmem:[%s2204_s0 + $0x390] sm:$0xff]  ;;  %v129_v27 = vld [vmem:[%s2204_s0 + $0x398] sm:$0xff]  ;;  %v235_v28 = vld [vmem:[%s2203_s1 + $0x1a8] sm:$0xff] }
  0x20   :  { %1080 = vmatpush.msra.mxu2 %v182_v30  ;;  %384 = vmatpush.msra.mxu0 %v182_v30  ;;  %v252_v29 = vld [vmem:[%s2203_s1 + $0x230] sm:$0xff] }
  0x21   :  { %1096 = vmatpush.msra.mxu3 %v198_v31  ;;  %427 = vmatmul.f32.vlgmr.msra.gmra.mxu2 %v98_v32  ;;  %v44_v30 = vld [vmem:[%s2204_s0 + $0xf0] sm:$0xff]  ;;  %v267_v32 = vld [vmem:[%s2203_s1 + $0x2a8] sm:$0xff] }
  0x22   :  { %528 = vmatmul.f32.vlgmr.msra.gmra.mxu3 %v99_v33  ;;  %571 = vmatpush.msrb.mxu2 %v229_v34  ;;  %v218_v33 = vld [vmem:[%s2203_s1 + $0x120] sm:$0xff] }
  0x23   :  { %672 = vmatpush.msrb.mxu3 %v245_v35  ;;  %485 = vmatpush.msra.mxu1 %v198_v31  ;;  %v45_v31 = vld [vmem:[%s2204_s0 + $0xf8] sm:$0xff]  ;;  %v234_v34 = vld [vmem:[%s2203_s1 + $0x1a0] sm:$0xff] }
  0x24   :  { %572 = vmatpush.msrb.mxu2 %v228_v36  ;;  %385 = vmatmul.f32.vlgmr.msra.gmra.mxu0 %v14_v38  ;;  %v134_v35 = vld [vmem:[%s2204_s0 + $0x3c0] sm:$0xff]  ;;  %v135_v36 = vld [vmem:[%s2204_s0 + $0x3c8] sm:$0xff] }
  0x25   :  { %673 = vmatpush.msrb.mxu3 %v244_v37  ;;  %486 = vmatmul.f32.vlgmr.msra.gmra.mxu1 %v15_v39  ;;  %v50_v37 = vld [vmem:[%s2204_s0 + $0x120] sm:$0xff]  ;;  %v251_v38 = vld [vmem:[%s2203_s1 + $0x228] sm:$0xff] }
  0x26   :  { %773 = vmatpush.msrb.mxu0 %v261_v40  ;;  %1036 = vmatpush.msk.msrb.mxu1 %vm365_vm0, %v275_v41  ;;  %v51_v39 = vld [vmem:[%s2204_s0 + $0x128] sm:$0xff]  ;;  %v217_v40 = vld [vmem:[%s2203_s1 + $0x118] sm:$0xff]  ;;  %v266_v41 = vld [vmem:[%s2203_s1 + $0x2a0] sm:$0xff] }
  0x27   :  { %573 = vmatpush.msrb.mxu2 %v227_v42  ;;  %674 = vmatpush.msrb.mxu3 %v243_v43  ;;  %v233_v42 = vld [vmem:[%s2203_s1 + $0x198] sm:$0xff]  ;;  %v250_v43 = vld [vmem:[%s2203_s1 + $0x220] sm:$0xff] }
  0x28   :  { %774 = vmatpush.msrb.mxu0 %v260_v44  ;;  %877 = vmatpush.msrb.mxu1 %v274_v45  ;;  %v140_v44 = vld [vmem:[%s2204_s0 + $0x3f0] sm:$0xff]  ;;  %v141_v45 = vld [vmem:[%s2204_s0 + $0x3f8] sm:$0xff] }
  0x29   :  { %430 = vmatmul.f32.gmra.mxu2 %v104_v46  ;;  %675 = vmatpush.msrb.mxu3 %v242_v49  ;;  %v56_v46 = vld [vmem:[%s2204_s0 + $0x150] sm:$0xff]  ;;  %v265_v49 = vld [vmem:[%s2203_s1 + $0x298] sm:$0xff] }
  0x2a   :  { %531 = vmatmul.f32.gmra.mxu3 %v105_v47  ;;  %574 = vmatpush.msrb.mxu2 %v226_v48  ;;  %v216_v47 = vld [vmem:[%s2203_s1 + $0x110] sm:$0xff]  ;;  %v57_v48 = vld [vmem:[%s2204_s0 + $0x158] sm:$0xff] }
  0x2b   :  { %775 = vmatpush.msrb.mxu0 %v259_v50  ;;  %878 = vmatpush.msrb.mxu1 %v273_v51  ;;  %v232_v50 = vld [vmem:[%s2203_s1 + $0x190] sm:$0xff]  ;;  %v249_v51 = vld [vmem:[%s2203_s1 + $0x218] sm:$0xff] }
  0x2c   :  { %575 = vmatpush.msrb.mxu2 %v225_v52  ;;  %676 = vmatpush.msrb.mxu3 %v241_v53  ;;  %v146_v52 = vld [vmem:[%s2204_s0 + $0x420] sm:$0xff]  ;;  %v147_v53 = vld [vmem:[%s2204_s0 + $0x428] sm:$0xff] }
  0x2d   :  { %388 = vmatmul.f32.gmra.mxu0 %v20_v54  ;;  %489 = vmatmul.f32.gmra.mxu1 %v21_v55  ;;  %v62_v54 = vld [vmem:[%s2204_s0 + $0x180] sm:$0xff]  ;;  %v215_v55 = vld [vmem:[%s2203_s1 + $0x108] sm:$0xff] }
  0x2e   :  { %776 = vmatpush.msrb.mxu0 %v258_v56  ;;  %576 = vmatpush.msrb.mxu2 %v224_v57  ;;  %v63_v56 = vld [vmem:[%s2204_s0 + $0x188] sm:$0xff] }
  0x2f   :  { %879 = vmatpush.msrb.mxu1 %v272_v58  ;;  %677 = vmatpush.msrb.mxu3 %v240_v59  ;;  %v231_v57 = vld [vmem:[%s2203_s1 + $0x188] sm:$0xff]  ;;  %v264_v58 = vld [vmem:[%s2203_s1 + $0x290] sm:$0xff] }
  0x30   :  { %777 = vmatpush.msrb.mxu0 %v257_v60  ;;  %577 = vmatpush.msrb.mxu2 %v223_v61  ;;  %v248_v59 = vld [vmem:[%s2203_s1 + $0x210] sm:$0xff]  ;;  %v153_v61 = vld [vmem:[%s2204_s0 + $0x458] sm:$0xff] }
  0x31   :  { %433 = vmatmul.f32.gmra.mxu2 %v110_v62  ;;  %678 = vmatpush.msrb.mxu3 %v239_v0  ;;  %v152_v60 = vld [vmem:[%s2204_s0 + $0x450] sm:$0xff]  ;;  %v69_v0 = vld [vmem:[%s2204_s0 + $0x1b8] sm:$0xff] }
  0x32   :  { %534 = vmatmul.f32.gmra.mxu3 %v111_v63  ;;  %880 = vmatpush.msrb.mxu1 %v271_v1  ;;  %v68_v62 = vld [vmem:[%s2204_s0 + $0x1b0] sm:$0xff]  ;;  %v214_v63 = vld [vmem:[%s2203_s1 + $0x100] sm:$0xff] }
  0x33   :  { %778 = vmatpush.msrb.mxu0 %v256_v2  ;;  %578 = vmatpush.msrb.mxu2 %v222_v3  ;;  %v230_v1 = vld [vmem:[%s2203_s1 + $0x180] sm:$0xff]  ;;  %v247_v2 = vld [vmem:[%s2203_s1 + $0x208] sm:$0xff] }
  0x34   :  { %679 = vmatpush.msrb.mxu3 %v238_v6  ;;  %881 = vmatpush.msrb.mxu1 %v270_v8  ;;  %v263_v3 = vld [vmem:[%s2203_s1 + $0x288] sm:$0xff]  ;;  %v246_v6 = vld [vmem:[%s2203_s1 + $0x200] sm:$0xff] }
  0x35   :  { %391 = vmatmul.f32.gmra.mxu0 %v26_v4  ;;  %492 = vmatmul.f32.gmra.mxu1 %v27_v5  ;;  %v158_v4 = vld [vmem:[%s2204_s0 + $0x480] sm:$0xff]  ;;  %v159_v5 = vld [vmem:[%s2204_s0 + $0x488] sm:$0xff] }
  0x36   :  { %779 = vmatpush.msrb.mxu0 %v255_v7  ;;  %579 = vmatpush.msrb.mxu2 %v221_v12  ;;  %v74_v7 = vld [vmem:[%s2204_s0 + $0x1e0] sm:$0xff]  ;;  %v75_v8 = vld [vmem:[%s2204_s0 + $0x1e8] sm:$0xff]  ;;  %v80_v12 = vld [vmem:[%s2204_s0 + $0x210] sm:$0xff] }
  0x37   :  { %680 = vmatpush.msrb.mxu3 %v237_v14  ;;  %882 = vmatpush.msrb.mxu1 %v269_v16  ;;  %v170_v14 = vld [vmem:[%s2204_s0 + $0x4e0] sm:$0xff] }
  0x38   :  { %780 = vmatpush.msrb.mxu0 %v254_v15  ;;  %580 = vmatpush.msrb.mxu2 %v220_v17  ;;  %v171_v15 = vld [vmem:[%s2204_s0 + $0x4e8] sm:$0xff]  ;;  %v86_v16 = vld [vmem:[%s2204_s0 + $0x240] sm:$0xff] }
  0x39   :  { %436 = vmatmul.f32.gmra.mxu2 %v116_v9  ;;  %681 = vmatpush.msrb.mxu3 %v236_v21  ;;  %v262_v9 = vld [vmem:[%s2203_s1 + $0x280] sm:$0xff]  ;;  %v87_v17 = vld [vmem:[%s2204_s0 + $0x248] sm:$0xff]  ;;  %v93_v21 = vld [vmem:[%s2204_s0 + $0x278] sm:$0xff] }
  0x3a   :  { %537 = vmatmul.f32.gmra.mxu3 %v117_v10  ;;  %781 = vmatpush.msrb.mxu0 %v253_v23  ;;  %v164_v10 = vld [vmem:[%s2204_s0 + $0x4b0] sm:$0xff]  ;;  %v17_v23 = vld [vmem:[%s2204_s0 + $0x18] sm:$0xff] }
  0x3b   :  { %883 = vmatpush.msrb.mxu1 %v268_v24  ;;  %581 = vmatpush.msrb.mxu2 %v219_v25  ;;  %v18_v24 = vld [vmem:[%s2204_s0 + $0x20] sm:$0xff]  ;;  %v19_v25 = vld [vmem:[%s2204_s0 + $0x28] sm:$0xff] }
  0x3c   :  { %682 = vmatpush.msrb.mxu3 %v235_v28  ;;  %782 = vmatpush.msrb.mxu0 %v252_v29  ;;  %v24_v28 = vld [vmem:[%s2204_s0 + $0x50] sm:$0xff]  ;;  %v25_v29 = vld [vmem:[%s2204_s0 + $0x58] sm:$0xff] }
  0x3d   :  { %394 = vmatmul.f32.gmra.mxu0 %v32_v11  ;;  %495 = vmatmul.f32.gmra.mxu1 %v33_v13  ;;  %v165_v11 = vld [vmem:[%s2204_s0 + $0x4b8] sm:$0xff] }
  0x3e   :  { %884 = vmatpush.msrb.mxu1 %v267_v32  ;;  %582 = vmatpush.msrb.mxu2 %v218_v33  ;;  %v81_v13 = vld [vmem:[%s2204_s0 + $0x218] sm:$0xff]  ;;  %v1603_v32 = vld [vmem:[%s2205_s2] ss:$0 sm:$0xff] }
  0x3f   :  { %683 = vmatpush.msrb.mxu3 %v234_v34  ;;  %783 = vmatpush.msrb.mxu0 %v251_v38 }
  0x40   :  { %583 = vmatpush.msrb.mxu2 %v217_v40  ;;  %885 = vmatpush.msrb.mxu1 %v266_v41  ;;  %v34_v40 = vld [vmem:[%s2204_s0 + $0xa0] sm:$0xff]  ;;  %v35_v41 = vld [vmem:[%s2204_s0 + $0xa8] sm:$0xff] }
  0x41   :  { %439 = vmatmul.f32.gmra.mxu2 %v122_v18  ;;  %684 = vmatpush.msrb.mxu3 %v233_v42  ;;  %v176_v18 = vld [vmem:[%s2204_s0 + $0x510] sm:$0xff] }
  0x42   :  { %540 = vmatmul.f32.gmra.mxu3 %v123_v19  ;;  %784 = vmatpush.msrb.mxu0 %v250_v43  ;;  %v177_v19 = vld [vmem:[%s2204_s0 + $0x518] sm:$0xff] }
  0x43   :  { %584 = vmatpush.msrb.mxu2 %v216_v47  ;;  %886 = vmatpush.msrb.mxu1 %v265_v49 }
  0x44   :  { %685 = vmatpush.msrb.mxu3 %v232_v50  ;;  %785 = vmatpush.msrb.mxu0 %v249_v51  ;;  %v40_v50 = vld [vmem:[%s2204_s0 + $0xd0] sm:$0xff]  ;;  %v41_v51 = vld [vmem:[%s2204_s0 + $0xd8] sm:$0xff] }
  0x45   :  { %397 = vmatmul.f32.gmra.mxu0 %v38_v20  ;;  %498 = vmatmul.f32.gmra.mxu1 %v39_v22  ;;  %v92_v20 = vld [vmem:[%s2204_s0 + $0x270] sm:$0xff] }
  0x46   :  { %585 = vmatpush.msrb.mxu2 %v215_v55  ;;  %686 = vmatpush.msrb.mxu3 %v231_v57  ;;  %v16_v22 = vld [vmem:[%s2204_s0 + $0x10] sm:$0xff]  ;;  %v42_v55 = vld [vmem:[%s2204_s0 + $0xe0] sm:$0xff] }
  0x47   :  { %887 = vmatpush.msrb.mxu1 %v264_v58  ;;  %786 = vmatpush.msrb.mxu0 %v248_v59 }
  0x48   :  { %586 = vmatpush.msrb.mxu2 %v214_v63  ;;  %687 = vmatpush.msrb.mxu3 %v230_v1  ;;  %v48_v1 = vld [vmem:[%s2204_s0 + $0x110] sm:$0xff] }
  0x49   :  { %442 = vmatmul.f32.gmra.mxu2 %v128_v26  ;;  %787 = vmatpush.msrb.mxu0 %v247_v2  ;;  %v22_v26 = vld [vmem:[%s2204_s0 + $0x40] sm:$0xff]  ;;  %v49_v2 = vld [vmem:[%s2204_s0 + $0x118] sm:$0xff] }
  0x4a   :  { %543 = vmatmul.f32.gmra.mxu3 %v129_v27  ;;  %888 = vmatpush.msrb.mxu1 %v263_v3  ;;  %v23_v27 = vld [vmem:[%s2204_s0 + $0x48] sm:$0xff] }
  0x4b   :  { %788 = vmatpush.msrb.mxu0 %v246_v6  ;;  %v52_v6 = vld [vmem:[%s2204_s0 + $0x130] sm:$0xff] }
  0x4c   :  { %889 = vmatpush.msrb.mxu1 %v262_v9 }
  0x4d   :  { %400 = vmatmul.f32.gmra.mxu0 %v44_v30  ;;  %501 = vmatmul.f32.gmra.mxu1 %v45_v31  ;;  %v28_v30 = vld [vmem:[%s2204_s0 + $0x70] sm:$0xff]  ;;  %v29_v31 = vld [vmem:[%s2204_s0 + $0x78] sm:$0xff] }
  0x51   :  { %445 = vmatmul.f32.gmra.mxu2 %v134_v35  ;;  %v30_v35 = vld [vmem:[%s2204_s0 + $0x80] sm:$0xff] }
  0x52   :  { %546 = vmatmul.f32.gmra.mxu3 %v135_v36  ;;  %v31_v36 = vld [vmem:[%s2204_s0 + $0x88] sm:$0xff] }
  0x55   :  { %403 = vmatmul.f32.gmra.mxu0 %v50_v37  ;;  %504 = vmatmul.f32.gmra.mxu1 %v51_v39 }
  0x59   :  { %448 = vmatmul.f32.gmra.mxu2 %v140_v44 }
  0x5a   :  { %549 = vmatmul.f32.gmra.mxu3 %v141_v45  ;;  %v36_v45 = vld [vmem:[%s2204_s0 + $0xb0] sm:$0xff] }
  0x5d   :  { %406 = vmatmul.f32.gmra.mxu0 %v56_v46  ;;  %507 = vmatmul.f32.gmra.mxu1 %v57_v48  ;;  %v37_v46 = vld [vmem:[%s2204_s0 + $0xb8] sm:$0xff] }
  0x61   :  { %451 = vmatmul.f32.gmra.mxu2 %v146_v52 }
  0x62   :  { %552 = vmatmul.f32.gmra.mxu3 %v147_v53 }
  0x65   :  { %409 = vmatmul.f32.gmra.mxu0 %v62_v54  ;;  %510 = vmatmul.f32.gmra.mxu1 %v63_v56  ;;  %v43_v56 = vld [vmem:[%s2204_s0 + $0xe8] sm:$0xff] }
  0x69   :  { %454 = vmatmul.f32.gmra.mxu2 %v152_v60  ;;  %v46_v60 = vld [vmem:[%s2204_s0 + $0x100] sm:$0xff] }
  0x6a   :  { %555 = vmatmul.f32.gmra.mxu3 %v153_v61  ;;  %v47_v61 = vld [vmem:[%s2204_s0 + $0x108] sm:$0xff] }
  0x6d   :  { %412 = vmatmul.f32.gmra.mxu0 %v68_v62  ;;  %513 = vmatmul.f32.gmra.mxu1 %v69_v0 }
  0x71   :  { %457 = vmatmul.f32.gmra.mxu2 %v158_v4 }
  0x72   :  { %558 = vmatmul.f32.gmra.mxu3 %v159_v5 }
  0x75   :  { %415 = vmatmul.f32.gmra.mxu0 %v74_v7  ;;  %516 = vmatmul.f32.gmra.mxu1 %v75_v8  ;;  %v53_v7 = vld [vmem:[%s2204_s0 + $0x138] sm:$0xff] }
  0x79   :  { %460 = vmatmul.f32.gmra.mxu2 %v164_v10 }
  0x7a   :  { %561 = vmatmul.f32.gmra.mxu3 %v165_v11  ;;  %v54_v11 = vld [vmem:[%s2204_s0 + $0x140] sm:$0xff] }
  0x7d   :  { %418 = vmatmul.f32.gmra.mxu0 %v80_v12  ;;  %519 = vmatmul.f32.gmra.mxu1 %v81_v13  ;;  %v55_v12 = vld [vmem:[%s2204_s0 + $0x148] sm:$0xff] }
  0x81   :  { %463 = vmatmul.f32.gmra.mxu2 %v170_v14 }
  0x82   :  { %564 = vmatmul.f32.gmra.mxu3 %v171_v15 }
  0x85   :  { %421 = vmatmul.f32.gmra.mxu0 %v86_v16  ;;  %522 = vmatmul.f32.gmra.mxu1 %v87_v17  ;;  %v58_v16 = vld [vmem:[%s2204_s0 + $0x160] sm:$0xff]  ;;  %v59_v17 = vld [vmem:[%s2204_s0 + $0x168] sm:$0xff] }
  0x89   :  { %466 = vmatmul.f32.gmra.mxu2 %v176_v18 }
  0x8a   :  { %567 = vmatmul.f32.gmra.mxu3 %v177_v19 }
  0x8d   :  { %424 = vmatmul.f32.gmra.mxu0 %v92_v20  ;;  %525 = vmatmul.f32.gmra.mxu1 %v93_v21  ;;  %v60_v21 = vld [vmem:[%s2204_s0 + $0x170] sm:$0xff] }
  0x91   :  { %587 = vmatmul.f32.vlgmr.msrb.gmra.mxu2 %v16_v22  ;;  %v61_v22 = vld [vmem:[%s2204_s0 + $0x178] sm:$0xff] }
  0x92   :  { %688 = vmatmul.f32.vlgmr.msrb.gmra.mxu3 %v17_v23 }
  0x95   :  { %789 = vmatmul.f32.vlgmr.msrb.gmra.mxu0 %v18_v24  ;;  %1037 = vmatmul.msk.f32.vlgmr.msrb.gmra.mxu1 %vm280_vm1, %v19_v25 }
  0x99   :  { %590 = vmatmul.f32.gmra.mxu2 %v22_v26  ;;  %v64_v26 = vld [vmem:[%s2204_s0 + $0x190] sm:$0xff] }
  0x9a   :  { %691 = vmatmul.f32.gmra.mxu3 %v23_v27  ;;  %v65_v27 = vld [vmem:[%s2204_s0 + $0x198] sm:$0xff] }
  0x9d   :  { %792 = vmatmul.f32.gmra.mxu0 %v24_v28  ;;  %1038 = vmatmul.msk.f32.gmra.mxu1 %vm280_vm1, %v25_v29 }
  0xa1   :  { %593 = vmatmul.f32.gmra.mxu2 %v28_v30  ;;  %v1605_v33 = vpop.f32.mrf.mxu0 }
  0xa2   :  { %694 = vmatmul.f32.gmra.mxu3 %v29_v31  ;;  %v1607_v34 = vpop.f32.mrf.mxu1  ;;  %v66_v31 = vld [vmem:[%s2204_s0 + $0x1a0] sm:$0xff] }
  0xa4   :  { %v428_v37 = vpop.f32.mrf.mxu2 }
  0xa5   :  { %v529_v38 = vpop.f32.mrf.mxu3  ;;  %v429_v39 = vadd.f32 %v1603_v32, %v428_v37  ;;  %795 = vmatmul.f32.gmra.mxu0 %v30_v35  ;;  %1039 = vmatmul.msk.f32.gmra.mxu1 %vm280_vm1, %v31_v36  ;;  %v67_v35 = vld [vmem:[%s2204_s0 + $0x1a8] sm:$0xff] }
  0xa7   :  { %v1623_v42 = vadd.f32 %v529_v38, %v429_v39  ;;  %v70_v39 = vld [vmem:[%s2204_s0 + $0x1c0] sm:$0xff] }
  0xa9   :  { %596 = vmatmul.f32.gmra.mxu2 %v34_v40  ;;  %v71_v40 = vld [vmem:[%s2204_s0 + $0x1c8] sm:$0xff] }
  0xaa   :  { %697 = vmatmul.f32.gmra.mxu3 %v35_v41  ;;  %v1625_v43 = vpop.f32.mrf.mxu0  ;;  %v1627_v44 = vpop.f32.mrf.mxu1 }
  0xac   :  { %v431_v47 = vpop.f32.mrf.mxu2 }
  0xad   :  { %v532_v48 = vpop.f32.mrf.mxu3  ;;  %v432_v49 = vadd.f32 %v1603_v32, %v431_v47  ;;  %798 = vmatmul.f32.gmra.mxu0 %v36_v45  ;;  %1040 = vmatmul.msk.f32.gmra.mxu1 %vm280_vm1, %v37_v46  ;;  %v72_v47 = vld [vmem:[%s2204_s0 + $0x1d0] sm:$0xff] }
  0xaf   :  { %v1643_v52 = vadd.f32 %v532_v48, %v432_v49  ;;  %v73_v48 = vld [vmem:[%s2204_s0 + $0x1d8] sm:$0xff] }
  0xb1   :  { %599 = vmatmul.f32.gmra.mxu2 %v40_v50 }
  0xb2   :  { %700 = vmatmul.f32.gmra.mxu3 %v41_v51  ;;  %v1645_v53 = vpop.f32.mrf.mxu0  ;;  %v1647_v54 = vpop.f32.mrf.mxu1 }
  0xb4   :  { %v434_v57 = vpop.f32.mrf.mxu2 }
  0xb5   :  { %v535_v58 = vpop.f32.mrf.mxu3  ;;  %v435_v59 = vadd.f32 %v1603_v32, %v434_v57  ;;  %801 = vmatmul.f32.gmra.mxu0 %v42_v55  ;;  %1041 = vmatmul.msk.f32.gmra.mxu1 %vm280_vm1, %v43_v56  ;;  %v76_v55 = vld [vmem:[%s2204_s0 + $0x1f0] sm:$0xff]  ;;  %v77_v56 = vld [vmem:[%s2204_s0 + $0x1f8] sm:$0xff] }
  0xb7   :  { %v1663_v62 = vadd.f32 %v535_v58, %v435_v59 }
  0xb9   :  { %602 = vmatmul.f32.gmra.mxu2 %v46_v60  ;;  %v78_v60 = vld [vmem:[%s2204_s0 + $0x200] sm:$0xff] }
  0xba   :  { %703 = vmatmul.f32.gmra.mxu3 %v47_v61  ;;  %v1665_v63 = vpop.f32.mrf.mxu0  ;;  %v1667_v0 = vpop.f32.mrf.mxu1  ;;  %v79_v61 = vld [vmem:[%s2204_s0 + $0x208] sm:$0xff] }
  0xbc   :  { %v437_v3 = vpop.f32.mrf.mxu2 }
  0xbd   :  { %v538_v4 = vpop.f32.mrf.mxu3  ;;  %v438_v5 = vadd.f32 %v1603_v32, %v437_v3  ;;  %804 = vmatmul.f32.gmra.mxu0 %v48_v1  ;;  %1042 = vmatmul.msk.f32.gmra.mxu1 %vm280_vm1, %v49_v2 }
  0xbf   :  { %v1683_v8 = vadd.f32 %v538_v4, %v438_v5  ;;  %v82_v4 = vld [vmem:[%s2204_s0 + $0x220] sm:$0xff]  ;;  %v83_v5 = vld [vmem:[%s2204_s0 + $0x228] sm:$0xff] }
  0xc1   :  { %605 = vmatmul.f32.gmra.mxu2 %v52_v6 }
  0xc2   :  { %706 = vmatmul.f32.gmra.mxu3 %v53_v7  ;;  %v1685_v9 = vpop.f32.mrf.mxu0  ;;  %v1687_v10 = vpop.f32.mrf.mxu1 }
  0xc4   :  { %v440_v13 = vpop.f32.mrf.mxu2 }
  0xc5   :  { %v541_v14 = vpop.f32.mrf.mxu3  ;;  %v441_v15 = vadd.f32 %v1603_v32, %v440_v13  ;;  %807 = vmatmul.f32.gmra.mxu0 %v54_v11  ;;  %1043 = vmatmul.msk.f32.gmra.mxu1 %vm280_vm1, %v55_v12  ;;  %v84_v12 = vld [vmem:[%s2204_s0 + $0x230] sm:$0xff]  ;;  %v85_v13 = vld [vmem:[%s2204_s0 + $0x238] sm:$0xff] }
  0xc7   :  { %v1703_v18 = vadd.f32 %v541_v14, %v441_v15 }
  0xc9   :  { %608 = vmatmul.f32.gmra.mxu2 %v58_v16 }
  0xca   :  { %709 = vmatmul.f32.gmra.mxu3 %v59_v17  ;;  %v1705_v19 = vpop.f32.mrf.mxu0  ;;  %v1707_v20 = vpop.f32.mrf.mxu1  ;;  %v88_v17 = vld [vmem:[%s2204_s0 + $0x250] sm:$0xff] }
  0xcc   :  { %v443_v23 = vpop.f32.mrf.mxu2 }
  0xcd   :  { %v544_v24 = vpop.f32.mrf.mxu3  ;;  %v444_v25 = vadd.f32 %v1603_v32, %v443_v23  ;;  %810 = vmatmul.f32.gmra.mxu0 %v60_v21  ;;  %1044 = vmatmul.msk.f32.gmra.mxu1 %vm280_vm1, %v61_v22  ;;  %v89_v21 = vld [vmem:[%s2204_s0 + $0x258] sm:$0xff] }
  0xcf   :  { %v1723_v28 = vadd.f32 %v544_v24, %v444_v25  ;;  %v90_v25 = vld [vmem:[%s2204_s0 + $0x260] sm:$0xff] }
  0xd1   :  { %611 = vmatmul.f32.gmra.mxu2 %v64_v26  ;;  %v91_v26 = vld [vmem:[%s2204_s0 + $0x268] sm:$0xff] }
  0xd2   :  { %712 = vmatmul.f32.gmra.mxu3 %v65_v27  ;;  %v1725_v29 = vpop.f32.mrf.mxu0  ;;  %v1727_v30 = vpop.f32.mrf.mxu1 }
  0xd4   :  { %v446_v36 = vpop.f32.mrf.mxu2 }
  0xd5   :  { %v547_v37 = vpop.f32.mrf.mxu3  ;;  %v447_v38 = vadd.f32 %v1603_v32, %v446_v36  ;;  %813 = vmatmul.f32.gmra.mxu0 %v66_v31  ;;  %1045 = vmatmul.msk.f32.gmra.mxu1 %vm280_vm1, %v67_v35  ;;  %v94_v36 = vld [vmem:[%s2204_s0 + $0x280] sm:$0xff] }
  0xd7   :  { %v1743_v41 = vadd.f32 %v547_v37, %v447_v38  ;;  %v95_v37 = vld [vmem:[%s2204_s0 + $0x288] sm:$0xff] }
  0xd9   :  { %614 = vmatmul.f32.gmra.mxu2 %v70_v39 }
  0xda   :  { %715 = vmatmul.f32.gmra.mxu3 %v71_v40  ;;  %v1745_v45 = vpop.f32.mrf.mxu0  ;;  %v1747_v46 = vpop.f32.mrf.mxu1 }
  0xdc   :  { %v449_v49 = vpop.f32.mrf.mxu2 }
  0xdd   :  { %v550_v50 = vpop.f32.mrf.mxu3  ;;  %v450_v51 = vadd.f32 %v1603_v32, %v449_v49  ;;  %816 = vmatmul.f32.gmra.mxu0 %v72_v47  ;;  %1046 = vmatmul.msk.f32.gmra.mxu1 %vm280_vm1, %v73_v48  ;;  %v96_v47 = vld [vmem:[%s2204_s0 + $0x290] sm:$0xff]  ;;  %v97_v48 = vld [vmem:[%s2204_s0 + $0x298] sm:$0xff] }
  0xdf   :  { %v1763_v57 = vadd.f32 %v550_v50, %v450_v51 }
  0xe1   :  { %617 = vmatmul.f32.gmra.mxu2 %v76_v55  ;;  %v100_v55 = vld [vmem:[%s2204_s0 + $0x2b0] sm:$0xff] }
  0xe2   :  { %718 = vmatmul.f32.gmra.mxu3 %v77_v56  ;;  %v1765_v58 = vpop.f32.mrf.mxu0  ;;  %v1767_v59 = vpop.f32.mrf.mxu1  ;;  %v101_v56 = vld [vmem:[%s2204_s0 + $0x2b8] sm:$0xff] }
  0xe4   :  { %v452_v1 = vpop.f32.mrf.mxu2 }
  0xe5   :  { %v553_v2 = vpop.f32.mrf.mxu3  ;;  %v453_v3 = vadd.f32 %v1603_v32, %v452_v1  ;;  %819 = vmatmul.f32.gmra.mxu0 %v78_v60  ;;  %1047 = vmatmul.msk.f32.gmra.mxu1 %vm280_vm1, %v79_v61 }
  0xe7   :  { %v1783_v6 = vadd.f32 %v553_v2, %v453_v3  ;;  %v102_v2 = vld [vmem:[%s2204_s0 + $0x2c0] sm:$0xff]  ;;  %v103_v3 = vld [vmem:[%s2204_s0 + $0x2c8] sm:$0xff] }
  0xe9   :  { %620 = vmatmul.f32.gmra.mxu2 %v82_v4 }
  0xea   :  { %721 = vmatmul.f32.gmra.mxu3 %v83_v5  ;;  %v1785_v7 = vpop.f32.mrf.mxu0  ;;  %v1787_v11 = vpop.f32.mrf.mxu1 }
  0xec   :  { %v455_v14 = vpop.f32.mrf.mxu2 }
  0xed   :  { %v556_v15 = vpop.f32.mrf.mxu3  ;;  %v456_v16 = vadd.f32 %v1603_v32, %v455_v14  ;;  %822 = vmatmul.f32.gmra.mxu0 %v84_v12  ;;  %1048 = vmatmul.msk.f32.gmra.mxu1 %vm280_vm1, %v85_v13  ;;  %v106_v13 = vld [vmem:[%s2204_s0 + $0x2e0] sm:$0xff]  ;;  %v107_v14 = vld [vmem:[%s2204_s0 + $0x2e8] sm:$0xff] }
  0xef   :  { %v1803_v22 = vadd.f32 %v556_v15, %v456_v16 }
  0xf1   :  { %623 = vmatmul.f32.gmra.mxu2 %v88_v17 }
  0xf2   :  { %724 = vmatmul.f32.gmra.mxu3 %v89_v21  ;;  %v1805_v23 = vpop.f32.mrf.mxu0  ;;  %v1807_v24 = vpop.f32.mrf.mxu1  ;;  %v108_v21 = vld [vmem:[%s2204_s0 + $0x2f0] sm:$0xff] }
  0xf4   :  { %v458_v27 = vpop.f32.mrf.mxu2 }
  0xf5   :  { %v559_v31 = vpop.f32.mrf.mxu3  ;;  %v459_v35 = vadd.f32 %v1603_v32, %v458_v27  ;;  %825 = vmatmul.f32.gmra.mxu0 %v90_v25  ;;  %1049 = vmatmul.msk.f32.gmra.mxu1 %vm280_vm1, %v91_v26  ;;  %v109_v25 = vld [vmem:[%s2204_s0 + $0x2f8] sm:$0xff] }
  0xf7   :  { %v1823_v38 = vadd.f32 %v559_v31, %v459_v35  ;;  %v112_v35 = vld [vmem:[%s2204_s0 + $0x310] sm:$0xff] }
  0xf9   :  { %626 = vmatmul.f32.gmra.mxu2 %v94_v36  ;;  %v113_v36 = vld [vmem:[%s2204_s0 + $0x318] sm:$0xff] }
  0xfa   :  { %727 = vmatmul.f32.gmra.mxu3 %v95_v37  ;;  %v1825_v39 = vpop.f32.mrf.mxu0  ;;  %v1827_v40 = vpop.f32.mrf.mxu1  ;;  %v387_v37 = vadd.f32 %v1603_v32, %v1605_v33  ;;  %v118_v33 = vld [vmem:[%s2204_s0 + $0x340] sm:$0xff] }
  0xfc   :  { %v461_v49 = vpop.f32.mrf.mxu2 }
  0xfd   :  { %v562_v50 = vpop.f32.mrf.mxu3  ;;  %v462_v51 = vadd.f32 %v1603_v32, %v461_v49  ;;  %828 = vmatmul.f32.gmra.mxu0 %v96_v47  ;;  %1050 = vmatmul.msk.f32.gmra.mxu1 %vm280_vm1, %v97_v48 }
  0xff   :  { %v1843_v60 = vadd.f32 %v562_v50, %v462_v51  ;;  %v114_v50 = vld [vmem:[%s2204_s0 + $0x320] sm:$0xff]  ;;  %v115_v51 = vld [vmem:[%s2204_s0 + $0x328] sm:$0xff] }
 0x101   :  { %629 = vmatmul.f32.gmra.mxu2 %v100_v55  ;;  %v488_v55 = vadd.f32 %v1607_v34, %v387_v37  ;;  %v125_v37 = vld [vmem:[%s2204_s0 + $0x378] sm:$0xff] }
 0x102   :  { %730 = vmatmul.f32.gmra.mxu3 %v101_v56  ;;  %v1845_v61 = vpop.f32.mrf.mxu0  ;;  %v1847_v1 = vpop.f32.mrf.mxu1 }
 0x104   :  { %v464_v4 = vpop.f32.mrf.mxu2 }
 0x105   :  { %v565_v5 = vpop.f32.mrf.mxu3  ;;  %v465_v12 = vadd.f32 %v1603_v32, %v464_v4  ;;  %831 = vmatmul.f32.gmra.mxu0 %v102_v2  ;;  %1051 = vmatmul.msk.f32.gmra.mxu1 %vm280_vm1, %v103_v3  ;;  %v119_v4 = vld [vmem:[%s2204_s0 + $0x348] sm:$0xff] }
 0x107   :  { %v1863_v15 = vadd.f32 %v565_v5, %v465_v12  ;;  %v390_v5 = vadd.f32 %v1603_v32, %v1625_v43 }
 0x109   :  { %632 = vmatmul.f32.gmra.mxu2 %v106_v13 }
 0x10a   :  { %733 = vmatmul.f32.gmra.mxu3 %v107_v14  ;;  %v1865_v16 = vpop.f32.mrf.mxu0  ;;  %v1867_v17 = vpop.f32.mrf.mxu1 }
 0x10c   :  { %v467_v26 = vpop.f32.mrf.mxu2 }
 0x10d   :  { %v568_v27 = vpop.f32.mrf.mxu3  ;;  %v468_v31 = vadd.f32 %v1603_v32, %v467_v26  ;;  %834 = vmatmul.f32.gmra.mxu0 %v108_v21  ;;  %1052 = vmatmul.msk.f32.gmra.mxu1 %vm280_vm1, %v109_v25  ;;  %v120_v21 = vld [vmem:[%s2204_s0 + $0x350] sm:$0xff]  ;;  %v121_v25 = vld [vmem:[%s2204_s0 + $0x358] sm:$0xff]  ;;  %v491_v26 = vadd.f32 %v1627_v44, %v390_v5  ;;  %v130_v5 = vld [vmem:[%s2204_s0 + $0x3a0] sm:$0xff] }
 0x10f   :  { %v1885_v47 = vadd.f32 %v568_v27, %v468_v31 }
 0x111   :  { %635 = vmatmul.f32.gmra.mxu2 %v112_v35 }
 0x112   :  { %736 = vmatmul.f32.gmra.mxu3 %v113_v36  ;;  %v790_v48 = vpop.f32.mrf.mxu0  ;;  %v891_v49 = vpop.f32.mrf.mxu1  ;;  %v124_v36 = vld [vmem:[%s2204_s0 + $0x370] sm:$0xff] }
 0x114   :  { %v588_v56 = vpop.f32.mrf.mxu2 }
 0x115   :  { %v689_v2 = vpop.f32.mrf.mxu3  ;;  %v589_v3 = vadd.f32 %v588_v56, %v488_v55  ;;  %837 = vmatmul.f32.gmra.mxu0 %v114_v50  ;;  %1053 = vmatmul.msk.f32.gmra.mxu1 %vm280_vm1, %v115_v51  ;;  %v126_v55 = vld [vmem:[%s2204_s0 + $0x380] sm:$0xff]  ;;  %v127_v56 = vld [vmem:[%s2204_s0 + $0x388] sm:$0xff] }
 0x117   :  { %v690_v12 = vadd.f32 %v689_v2, %v589_v3 }
 0x119   :  { %v791_v13 = vadd.f32 %v790_v48, %v690_v12  ;;  %638 = vmatmul.f32.gmra.mxu2 %v118_v33  ;;  %v393_v48 = vadd.f32 %v1603_v32, %v1645_v53  ;;  %v131_v12 = vld [vmem:[%s2204_s0 + $0x3a8] sm:$0xff] }
 0x11a   :  { %739 = vmatmul.f32.gmra.mxu3 %v119_v4  ;;  %v793_v34 = vpop.f32.mrf.mxu0  ;;  %v894_v14 = vpop.f32.mrf.mxu1 }
 0x11b   :  { %v1910_v27 = vadd.f32 %v891_v49, %v791_v13  ;;  %v494_v2 = vadd.f32 %v1647_v54, %v393_v48  ;;  %v396_v13 = vadd.f32 %v1603_v32, %v1665_v63  ;;  %v137_v48 = vld [vmem:[%s2204_s0 + $0x3d8] sm:$0xff] }
 0x11c   :  { %v591_v31 = vpop.f32.mrf.mxu2 }
 0x11d   :  { %v692_v43 = vpop.f32.mrf.mxu3  ;;  %v592_v35 = vadd.f32 %v591_v31, %v491_v26  ;;  %840 = vmatmul.f32.gmra.mxu0 %v120_v21  ;;  %1054 = vmatmul.msk.f32.gmra.mxu1 %vm280_vm1, %v121_v25  ;;  %v132_v25 = vld [vmem:[%s2204_s0 + $0x3b0] sm:$0xff]  ;;  %v133_v26 = vld [vmem:[%s2204_s0 + $0x3b8] sm:$0xff]  ;;  %v497_v31 = vadd.f32 %v1667_v0, %v396_v13  ;;  %v402_v13 = vadd.f32 %v1603_v32, %v1705_v19 }
 0x11f   :  { %v693_v44 = vadd.f32 %v692_v43, %v592_v35 }
 0x121   :  { %v794_v49 = vadd.f32 %v793_v34, %v693_v44  ;;  %641 = vmatmul.f32.gmra.mxu2 %v124_v36  ;;  %v399_v44 = vadd.f32 %v1603_v32, %v1685_v9 }
 0x122   :  { %742 = vmatmul.f32.gmra.mxu3 %v125_v37  ;;  %v796_v50 = vpop.f32.mrf.mxu0  ;;  %v897_v51 = vpop.f32.mrf.mxu1  ;;  %v136_v37 = vld [vmem:[%s2204_s0 + $0x3d0] sm:$0xff] }
 0x123   :  { %v1928_v3 = vadd.f32 %v894_v14, %v794_v49 }
 0x124   :  { %v594_v33 = vpop.f32.mrf.mxu2 }
 0x125   :  { %v695_v53 = vpop.f32.mrf.mxu3  ;;  %v595_v4 = vadd.f32 %v594_v33, %v494_v2  ;;  %843 = vmatmul.f32.gmra.mxu0 %v126_v55  ;;  %1055 = vmatmul.msk.f32.gmra.mxu1 %vm280_vm1, %v127_v56  ;;  %v138_v55 = vld [vmem:[%s2204_s0 + $0x3e0] sm:$0xff]  ;;  %v139_v56 = vld [vmem:[%s2204_s0 + $0x3e8] sm:$0xff]  ;;  %v500_v2 = vadd.f32 %v1687_v10, %v399_v44 }
 0x127   :  { %v696_v54 = vadd.f32 %v695_v53, %v595_v4 }
 0x129   :  { %v797_v34 = vadd.f32 %v796_v50, %v696_v54  ;;  %644 = vmatmul.f32.gmra.mxu2 %v130_v5  ;;  %v142_v5 = vld [vmem:[%s2204_s0 + $0x400] sm:$0xff] }
 0x12a   :  { %745 = vmatmul.f32.gmra.mxu3 %v131_v12  ;;  %v799_v14 = vpop.f32.mrf.mxu0  ;;  %v900_v21 = vpop.f32.mrf.mxu1  ;;  %v143_v12 = vld [vmem:[%s2204_s0 + $0x408] sm:$0xff] }
 0x12b   :  { %v1946_v43 = vadd.f32 %v897_v51, %v797_v34 }
 0x12c   :  { %v597_v35 = vpop.f32.mrf.mxu2 }
 0x12d   :  { %v698_v63 = vpop.f32.mrf.mxu3  ;;  %v598_v36 = vadd.f32 %v597_v35, %v497_v31  ;;  %846 = vmatmul.f32.gmra.mxu0 %v132_v25  ;;  %1056 = vmatmul.msk.f32.gmra.mxu1 %vm280_vm1, %v133_v26  ;;  %v145_v25 = vld [vmem:[%s2204_s0 + $0x418] sm:$0xff]  ;;  %v503_v26 = vadd.f32 %v1707_v20, %v402_v13 }
 0x12f   :  { %v699_v0 = vadd.f32 %v698_v63, %v598_v36  ;;  %v148_v36 = vld [vmem:[%s2204_s0 + $0x430] sm:$0xff] }
 0x131   :  { %v800_v49 = vadd.f32 %v799_v14, %v699_v0  ;;  %647 = vmatmul.f32.gmra.mxu2 %v136_v37  ;;  %v149_v37 = vld [vmem:[%s2204_s0 + $0x438] sm:$0xff] }
 0x132   :  { %748 = vmatmul.f32.gmra.mxu3 %v137_v48  ;;  %v802_v50 = vpop.f32.mrf.mxu0  ;;  %v903_v51 = vpop.f32.mrf.mxu1  ;;  %v405_v48 = vadd.f32 %v1603_v32, %v1725_v29 }
 0x133   :  { %v1964_v33 = vadd.f32 %v900_v21, %v800_v49  ;;  %v144_v21 = vld [vmem:[%s2204_s0 + $0x410] sm:$0xff] }
 0x134   :  { %v600_v53 = vpop.f32.mrf.mxu2 }
 0x135   :  { %v701_v9 = vpop.f32.mrf.mxu3  ;;  %v601_v4 = vadd.f32 %v600_v53, %v500_v2  ;;  %849 = vmatmul.f32.gmra.mxu0 %v138_v55  ;;  %1057 = vmatmul.msk.f32.gmra.mxu1 %vm280_vm1, %v139_v56  ;;  %v506_v55 = vadd.f32 %v1727_v30, %v405_v48 }
 0x137   :  { %v702_v10 = vadd.f32 %v701_v9, %v601_v4  ;;  %v154_v9 = vld [vmem:[%s2204_s0 + $0x460] sm:$0xff]  ;;  %v155_v4 = vld [vmem:[%s2204_s0 + $0x468] sm:$0xff] }
 0x139   :  { %v803_v54 = vadd.f32 %v802_v50, %v702_v10  ;;  %650 = vmatmul.f32.gmra.mxu2 %v142_v5  ;;  %v150_v50 = vld [vmem:[%s2204_s0 + $0x440] sm:$0xff]  ;;  %v408_v5 = vadd.f32 %v1603_v32, %v1745_v45 }
 0x13a   :  { %751 = vmatmul.f32.gmra.mxu3 %v143_v12  ;;  %v805_v34 = vpop.f32.mrf.mxu0  ;;  %v906_v14 = vpop.f32.mrf.mxu1 }
 0x13b   :  { %v1982_v31 = vadd.f32 %v903_v51, %v803_v54  ;;  %v151_v51 = vld [vmem:[%s2204_s0 + $0x448] sm:$0xff]  ;;  %v156_v54 = vld [vmem:[%s2204_s0 + $0x470] sm:$0xff] }
 0x13c   :  { %v603_v35 = vpop.f32.mrf.mxu2 }
 0x13d   :  { %v704_v19 = vpop.f32.mrf.mxu3  ;;  %v604_v63 = vadd.f32 %v603_v35, %v503_v26  ;;  %852 = vmatmul.f32.gmra.mxu0 %v144_v21  ;;  %1058 = vmatmul.msk.f32.gmra.mxu1 %vm280_vm1, %v145_v25  ;;  %v160_v35 = vld [vmem:[%s2204_s0 + $0x490] sm:$0xff] }
 0x13f   :  { %v705_v20 = vadd.f32 %v704_v19, %v604_v63  ;;  %v161_v19 = vld [vmem:[%s2204_s0 + $0x498] sm:$0xff]  ;;  %v411_v63 = vadd.f32 %v1603_v32, %v1765_v58  ;;  %v975_v58 = vmax.f32 %v1910_v27, 0.0 }
 0x141   :  { %v806_v44 = vadd.f32 %v805_v34, %v705_v20  ;;  %653 = vmatmul.f32.gmra.mxu2 %v148_v36  ;;  %v157_v34 = vld [vmem:[%s2204_s0 + $0x478] sm:$0xff]  ;;  %v162_v20 = vld [vmem:[%s2204_s0 + $0x4a0] sm:$0xff] }
 0x142   :  { %754 = vmatmul.f32.gmra.mxu3 %v149_v37  ;;  %v808_v0 = vpop.f32.mrf.mxu0  ;;  %v909_v49 = vpop.f32.mrf.mxu1 }
 0x143   :  { %v2000_v56 = vadd.f32 %v906_v14, %v806_v44  ;;  %v509_v14 = vadd.f32 %v1747_v46, %v408_v5  ;;  %v163_v44 = vld [vmem:[%s2204_s0 + $0x4a8] sm:$0xff] }
 0x144   :  { %v606_v2 = vpop.f32.mrf.mxu2 }
 0x145   :  { %v707_v29 = vpop.f32.mrf.mxu3  ;;  %v607_v53 = vadd.f32 %v606_v2, %v506_v55  ;;  %855 = vmatmul.f32.gmra.mxu0 %v150_v50  ;;  %1059 = vmatmul.msk.f32.gmra.mxu1 %vm280_vm1, %v151_v51 }
 0x147   :  { %v708_v30 = vadd.f32 %v707_v29, %v607_v53  ;;  %v166_v29 = vld [vmem:[%s2204_s0 + $0x4c0] sm:$0xff]  ;;  %v167_v53 = vld [vmem:[%s2204_s0 + $0x4c8] sm:$0xff] }
 0x149   :  { %v809_v12 = vadd.f32 %v808_v0, %v708_v30  ;;  %656 = vmatmul.f32.gmra.mxu2 %v154_v9  ;;  %v512_v0 = vadd.f32 %v1767_v59, %v411_v63  ;;  %v414_v59 = vadd.f32 %v1603_v32, %v1785_v7 }
 0x14a   :  { %757 = vmatmul.f32.gmra.mxu3 %v155_v4  ;;  %v811_v13 = vpop.f32.mrf.mxu0  ;;  %v912_v10 = vpop.f32.mrf.mxu1 }
 0x14b   :  { %v2018_v21 = vadd.f32 %v909_v49, %v809_v12  ;;  %v168_v12 = vld [vmem:[%s2204_s0 + $0x4d0] sm:$0xff] }
 0x14c   :  { %v609_v25 = vpop.f32.mrf.mxu2 }
 0x14d   :  { %v710_v45 = vpop.f32.mrf.mxu3  ;;  %v610_v26 = vadd.f32 %v609_v25, %v509_v14  ;;  %858 = vmatmul.f32.gmra.mxu0 %v156_v54  ;;  %1060 = vmatmul.msk.f32.gmra.mxu1 %vm280_vm1, %v157_v34  ;;  %v976_v14 = vmax.f32 %v1928_v3, 0.0 }
 0x14f   :  { %v711_v46 = vadd.f32 %v710_v45, %v610_v26  ;;  %v172_v26 = vld [vmem:[%s2204_s0 + $0x4f0] sm:$0xff] }
 0x151   :  { %v812_v36 = vadd.f32 %v811_v13, %v711_v46  ;;  %659 = vmatmul.f32.gmra.mxu2 %v160_v35  ;;  %v169_v13 = vld [vmem:[%s2204_s0 + $0x4d8] sm:$0xff] }
 0x152   :  { %760 = vmatmul.f32.gmra.mxu3 %v161_v19  ;;  %v814_v37 = vpop.f32.mrf.mxu0  ;;  %v915_v48 = vpop.f32.mrf.mxu1  ;;  %v173_v35 = vld [vmem:[%s2204_s0 + $0x4f8] sm:$0xff] }
 0x153   :  { %v913_v49 = vadd.f32 %v912_v10, %v812_v36  ;;  %v515_v10 = vadd.f32 %v1787_v11, %v414_v59  ;;  %v417_v11 = vadd.f32 %v1603_v32, %v1805_v23 }
 0x154   :  { %v612_v50 = vpop.f32.mrf.mxu2 }
 0x155   :  { %v713_v51 = vpop.f32.mrf.mxu3  ;;  %v982_v55 = vmax.f32 %v913_v49, 0.0  ;;  %v613_v2 = vadd.f32 %v612_v50, %v512_v0  ;;  %861 = vmatmul.f32.gmra.mxu0 %v162_v20  ;;  %1061 = vmatmul.msk.f32.gmra.mxu1 %vm280_vm1, %v163_v44  ;;  %v518_v20 = vadd.f32 %v1807_v24, %v417_v11  ;;  %v977_v49 = vmax.f32 %v1946_v43, 0.0 }
 0x156   :  { %v420_v24 = vadd.f32 %v1603_v32, %v1825_v39 }
 0x157   :  { %v2046_v9 = vmax.f32 %v975_v58, %v982_v55  ;;  %v714_v4 = vadd.f32 %v713_v51, %v613_v2  ;;  %v178_v58 = vld [vmem:[%s2204_s0 + $0x520] sm:$0xff]  ;;  %v179_v55 = vld [vmem:[%s2204_s0 + $0x528] sm:$0xff] }
 0x159   :  { %v815_v27 = vadd.f32 %v814_v37, %v714_v4  ;;  %662 = vmatmul.f32.gmra.mxu2 %v166_v29  ;;  %v174_v37 = vld [vmem:[%s2204_s0 + $0x500] sm:$0xff]  ;;  %v180_v4 = vld [vmem:[%s2204_s0 + $0x530] sm:$0xff] }
 0x15a   :  { %763 = vmatmul.f32.gmra.mxu3 %v167_v53  ;;  %v817_v5 = vpop.f32.mrf.mxu0  ;;  %v918_v30 = vpop.f32.mrf.mxu1 }
 0x15b   :  { %v916_v54 = vadd.f32 %v915_v48, %v815_v27  ;;  %v175_v48 = vld [vmem:[%s2204_s0 + $0x508] sm:$0xff]  ;;  %v181_v27 = vld [vmem:[%s2204_s0 + $0x538] sm:$0xff] }
 0x15c   :  { %v615_v7 = vpop.f32.mrf.mxu2 }
 0x15d   :  { %v716_v34 = vpop.f32.mrf.mxu3  ;;  %v983_v25 = vmax.f32 %v916_v54, 0.0  ;;  %v616_v45 = vadd.f32 %v615_v7, %v515_v10  ;;  %864 = vmatmul.f32.gmra.mxu0 %v168_v12  ;;  %1062 = vmatmul.msk.f32.gmra.mxu1 %vm280_vm1, %v169_v13  ;;  %v978_v13 = vmax.f32 %v1964_v33, 0.0  ;;  %v423_v7 = vadd.f32 %v1603_v32, %v1845_v61 }
 0x15e   :  { %v979_v33 = vmax.f32 %v1982_v31, 0.0 }
 0x15f   :  { %v2065_v19 = vmax.f32 %v976_v14, %v983_v25  ;;  %v717_v63 = vadd.f32 %v716_v34, %v616_v45 }
 0x161   :  { %v818_v3 = vadd.f32 %v817_v5, %v717_v63  ;;  %665 = vmatmul.f32.gmra.mxu2 %v172_v26  ;;  %v521_v5 = vadd.f32 %v1827_v40, %v420_v24  ;;  %v524_v40 = vadd.f32 %v1847_v1, %v423_v7 }
 0x162   :  { %766 = vmatmul.f32.gmra.mxu3 %v173_v35  ;;  %v820_v46 = vpop.f32.mrf.mxu0  ;;  %v921_v36 = vpop.f32.mrf.mxu1 }
 0x163   :  { %v919_v44 = vadd.f32 %v918_v30, %v818_v3 }
 0x164   :  { %v618_v23 = vpop.f32.mrf.mxu2 }
 0x165   :  { %v719_v0 = vpop.f32.mrf.mxu3  ;;  %v984_v50 = vmax.f32 %v919_v44, 0.0  ;;  %v619_v51 = vadd.f32 %v618_v23, %v518_v20  ;;  %867 = vmatmul.f32.gmra.mxu0 %v174_v37  ;;  %1063 = vmatmul.msk.f32.gmra.mxu1 %vm280_vm1, %v175_v48 }
 0x167   :  { %v2084_v2 = vmax.f32 %v977_v49, %v984_v50  ;;  %v720_v29 = vadd.f32 %v719_v0, %v619_v51  ;;  %v980_v50 = vmax.f32 %v2000_v56, 0.0 }
 0x169   :  { %v821_v43 = vadd.f32 %v820_v46, %v720_v29  ;;  %668 = vmatmul.f32.gmra.mxu2 %v178_v58 }
 0x16a   :  { %769 = vmatmul.f32.gmra.mxu3 %v179_v55  ;;  %v823_v53 = vpop.f32.mrf.mxu0  ;;  %v924_v59 = vpop.f32.mrf.mxu1 }
 0x16b   :  { %v922_v30 = vadd.f32 %v921_v36, %v821_v43  ;;  %v426_v36 = vadd.f32 %v1603_v32, %v1865_v16 }
 0x16c   :  { %v621_v39 = vpop.f32.mrf.mxu2 }
 0x16d   :  { %v722_v12 = vpop.f32.mrf.mxu3  ;;  %v985_v10 = vmax.f32 %v922_v30, 0.0  ;;  %v622_v54 = vadd.f32 %v621_v39, %v521_v5  ;;  %870 = vmatmul.f32.gmra.mxu0 %v180_v4  ;;  %1064 = vmatmul.msk.f32.gmra.mxu1 %vm280_vm1, %v181_v27  ;;  %v527_v23 = vadd.f32 %v1867_v17, %v426_v36 }
 0x16f   :  { %v2097_v34 = vmax.f32 %v978_v13, %v985_v10  ;;  %v723_v14 = vadd.f32 %v722_v12, %v622_v54 }
 0x171   :  { %v824_v25 = vadd.f32 %v823_v53, %v723_v14 }
 0x172   :  { %v826_v45 = vpop.f32.mrf.mxu0  ;;  %v927_v26 = vpop.f32.mrf.mxu1 }
 0x173   :  { %v925_v35 = vadd.f32 %v924_v59, %v824_v25  ;;  %v981_v59 = vmax.f32 %v2018_v21, 0.0 }
 0x174   :  { %v624_v11 = vpop.f32.mrf.mxu2 }
 0x175   :  { %v725_v63 = vpop.f32.mrf.mxu3  ;;  %v986_v3 = vmax.f32 %v925_v35, 0.0  ;;  %v625_v46 = vadd.f32 %v624_v11, %v524_v40 }
 0x177   :  { %v2103_v37 = vmax.f32 %v979_v33, %v986_v3  ;;  %v726_v61 = vadd.f32 %v725_v63, %v625_v46 }
 0x179   :  { %v827_v48 = vadd.f32 %v826_v45, %v726_v61 }
 0x17a   :  { %v829_v20 = vpop.f32.mrf.mxu0  ;;  %v930_v44 = vpop.f32.mrf.mxu1 }
 0x17b   :  { %v928_v0 = vadd.f32 %v927_v26, %v827_v48 }
 0x17c   :  { %v627_v1 = vpop.f32.mrf.mxu2 }
 0x17d   :  { %v728_v49 = vpop.f32.mrf.mxu3  ;;  %v987_v51 = vmax.f32 %v928_v0, 0.0  ;;  %v628_v31 = vadd.f32 %v627_v1, %v527_v23 }
 0x17f   :  { %v2107_v58 = vmax.f32 %v980_v50, %v987_v51  ;;  %v729_v55 = vadd.f32 %v728_v49, %v628_v31 }
 0x181   :  { %2207 = vst [vmem:[#allocation2_spill] sm:$0xff] %v2107_v58  ;;  %v830_v24 = vadd.f32 %v829_v20, %v729_v55 }
 0x182   :  { %v832_v32 = vpop.f32.mrf.mxu0  ;;  %v933_v16 = vpop.f32.mrf.mxu1 }
 0x183   :  { %v931_v29 = vadd.f32 %v930_v44, %v830_v24 }
 0x184   :  { %v630_v43 = vpop.f32.mrf.mxu2 }
 0x185   :  { %v731_v53 = vpop.f32.mrf.mxu3  ;;  %v988_v4 = vmax.f32 %v931_v29, 0.0  ;;  %v631_v48 = vadd.f32 %v630_v43, %v1623_v42 }
 0x187   :  { %v2110_v17 = vmax.f32 %v981_v59, %v988_v4  ;;  %v732_v20 = vadd.f32 %v731_v53, %v631_v48 }
 0x189   :  { %2208 = vst [vmem:[#allocation3_spill] sm:$0xff] %v2110_v17  ;;  %v833_v50 = vadd.f32 %v832_v32, %v732_v20 }
 0x18a   :  { %v835_v27 = vpop.f32.mrf.mxu0  ;;  %v936_v5 = vpop.f32.mrf.mxu1 }
 0x18b   :  { %v934_v24 = vadd.f32 %v933_v16, %v833_v50 }
 0x18c   :  { %v633_v30 = vpop.f32.mrf.mxu2 }
 0x18d   :  { %v734_v56 = vpop.f32.mrf.mxu3  ;;  %v634_v0 = vadd.f32 %v633_v30, %v1643_v52  ;;  %v989_v43 = vmax.f32 %v934_v24, 0.0 }
 0x18f   :  { %v735_v55 = vadd.f32 %v734_v56, %v634_v0 }
 0x191   :  { %v836_v58 = vadd.f32 %v835_v27, %v735_v55 }
 0x192   :  { %v838_v39 = vpop.f32.mrf.mxu0  ;;  %v2112_v12 = vpop.f32.mrf.mxu1 }
 0x193   :  { %v937_v20 = vadd.f32 %v936_v5, %v836_v58 }
 0x194   :  { %v636_v13 = vpop.f32.mrf.mxu2 }
 0x195   :  { %v737_v10 = vpop.f32.mrf.mxu3  ;;  %v637_v53 = vadd.f32 %v636_v13, %v1663_v62  ;;  %v990_v62 = vmax.f32 %v937_v20, 0.0 }
 0x19a   :  { %v2114_v54 = vpop.f32.mrf.mxu0  ;;  %v2116_v7 = vpop.f32.mrf.mxu1 }
 0x19c   :  { %v639_v14 = vpop.f32.mrf.mxu2 }
 0x19d   :  { %v740_v25 = vpop.f32.mrf.mxu3 }
 0x1a2   :  { %v2118_v45 = vpop.f32.mrf.mxu0  ;;  %v2120_v21 = vpop.f32.mrf.mxu1 }
 0x1a4   :  { %v642_v26 = vpop.f32.mrf.mxu2 }
 0x1a5   :  { %v2122_v40 = vpop.f32.mrf.mxu3 }
 0x1aa   :  { %v2124_v35 = vpop.f32.mrf.mxu0  ;;  %v2126_v11 = vpop.f32.mrf.mxu1 }
 0x1ac   :  { %v2128_v63 = vpop.f32.mrf.mxu2 }
 0x1ad   :  { %v2130_v33 = vpop.f32.mrf.mxu3 }
 0x1b2   :  { %v2132_v3 = vpop.f32.mrf.mxu0  ;;  %v2134_v46 = vpop.f32.mrf.mxu1 }
 0x1b3   :  { %2209 = vst [vmem:[#allocation4_spill] sm:$0xff] %v2134_v46 }
 0x1b4   :  { %v2136_v36 = vpop.f32.mrf.mxu2 }
 0x1b5   :  { %v2138_v61 = vpop.f32.mrf.mxu3 }
 0x1ba   :  { %v853_v44 = vpop.f32.mrf.mxu0  ;;  %v954_v23 = vpop.f32.mrf.mxu1 }
 0x1bc   :  { %v651_v1 = vpop.f32.mrf.mxu2 }
 0x1bd   :  { %v752_v49 = vpop.f32.mrf.mxu3  ;;  %v652_v51 = vadd.f32 %v651_v1, %v1763_v57  ;;  %v738_v57 = vadd.f32 %v737_v10, %v637_v53 }
 0x1bf   :  { %v753_v31 = vadd.f32 %v752_v49, %v652_v51 }
 0x1c1   :  { %v854_v29 = vadd.f32 %v853_v44, %v753_v31 }
 0x1c2   :  { %v856_v59 = vpop.f32.mrf.mxu0  ;;  %v957_v4 = vpop.f32.mrf.mxu1 }
 0x1c3   :  { %v955_v17 = vadd.f32 %v954_v23, %v854_v29 }
 0x1c4   :  { %v654_v46 = vpop.f32.mrf.mxu2 }
 0x1c5   :  { %v755_v42 = vpop.f32.mrf.mxu3  ;;  %v996_v48 = vmax.f32 %v955_v17, 0.0  ;;  %v655_v52 = vadd.f32 %v654_v46, %v1783_v6  ;;  %v839_v6 = vadd.f32 %v838_v39, %v738_v57  ;;  %v640_v46 = vadd.f32 %v639_v14, %v1683_v8 }
 0x1c6   :  { %v643_v8 = vadd.f32 %v642_v26, %v1703_v18 }
 0x1c7   :  { %v1010_v30 = vmax.f32 %v989_v43, %v996_v48  ;;  %v756_v32 = vadd.f32 %v755_v42, %v655_v52  ;;  %v940_v23 = vadd.f32 %v2112_v12, %v839_v6  ;;  %v741_v1 = vadd.f32 %v740_v25, %v640_v46 }
 0x1c9   :  { %v1017_v16 = vmax.f32 %v2046_v9, %v1010_v30  ;;  %v857_v56 = vadd.f32 %v856_v59, %v756_v32  ;;  %v991_v55 = vmax.f32 %v940_v23, 0.0  ;;  %v842_v24 = vadd.f32 %v2114_v54, %v741_v1 }
 0x1ca   :  { %v859_v44 = vpop.f32.mrf.mxu0  ;;  %v960_v0 = vpop.f32.mrf.mxu1  ;;  %v744_v59 = vadd.f32 %v2122_v40, %v643_v8  ;;  %v646_v40 = vadd.f32 %v2128_v63, %v1723_v28 }
 0x1cb   :  { %1025 = vst.msk [vmem:[%s2206_s3] sm:$0xff] %vm1024_vm2, %v1017_v16  ;;  %v958_v27 = vadd.f32 %v957_v4, %v857_v56  ;;  %v943_v4 = vadd.f32 %v2116_v7, %v842_v24 }
 0x1cc   :  { %v657_v17 = vpop.f32.mrf.mxu2  ;;  %v845_v26 = vadd.f32 %v2118_v45, %v744_v59  ;;  %v747_v57 = vadd.f32 %v2130_v33, %v646_v40 }
 0x1cd   :  { %v758_v13 = vpop.f32.mrf.mxu3  ;;  %v997_v58 = vmax.f32 %v958_v27, 0.0  ;;  %v658_v5 = vadd.f32 %v657_v17, %v1803_v22  ;;  %v992_v52 = vmax.f32 %v943_v4, 0.0 }
 0x1ce   :  { %v946_v20 = vadd.f32 %v2120_v21, %v845_v26  ;;  %v649_v21 = vadd.f32 %v2136_v36, %v1743_v41 }
 0x1cf   :  { %v1011_v10 = vmax.f32 %v990_v62, %v997_v58  ;;  %v759_v9 = vadd.f32 %v758_v13, %v658_v5 }
 0x1d0   :  { %v993_v28 = vmax.f32 %v946_v20, 0.0  ;;  %v750_v6 = vadd.f32 %v2138_v61, %v649_v21 }
 0x1d1   :  { %v1018_v49 = vmax.f32 %v2065_v19, %v1011_v10  ;;  %v860_v50 = vadd.f32 %v859_v44, %v759_v9 }
 0x1d2   :  { %v862_v51 = vpop.f32.mrf.mxu0  ;;  %v963_v31 = vpop.f32.mrf.mxu1 }
 0x1d3   :  { %1026 = vst.msk [vmem:[%s2206_s3 + $0x8] sm:$0xff] %vm1024_vm2, %v1018_v49  ;;  %v961_v39 = vadd.f32 %v960_v0, %v860_v50  ;;  %v2211_v50 = vld [vmem:[#allocation2_spill] sm:$0xff] }
 0x1d4   :  { %v660_v14 = vpop.f32.mrf.mxu2 }
 0x1d5   :  { %v761_v22 = vpop.f32.mrf.mxu3  ;;  %v998_v12 = vmax.f32 %v961_v39, 0.0  ;;  %v661_v25 = vadd.f32 %v660_v14, %v1823_v38 }
 0x1d7   :  { %v1012_v19 = vmax.f32 %v991_v55, %v998_v12  ;;  %v762_v29 = vadd.f32 %v761_v22, %v661_v25  ;;  %v2212_v22 = vld [vmem:[#allocation3_spill] sm:$0xff] }
 0x1d9   :  { %v1019_v42 = vmax.f32 %v2084_v2, %v1012_v19  ;;  %v863_v43 = vadd.f32 %v862_v51, %v762_v29 }
 0x1da   :  { %v865_v53 = vpop.f32.mrf.mxu0  ;;  %v966_v54 = vpop.f32.mrf.mxu1 }
 0x1db   :  { %1027 = vst.msk [vmem:[%s2206_s3 + $0x10] sm:$0xff] %vm1024_vm2, %v1019_v42  ;;  %v964_v18 = vadd.f32 %v963_v31, %v863_v43 }
 0x1dc   :  { %v663_v38 = vpop.f32.mrf.mxu2 }
 0x1dd   :  { %v764_v48 = vpop.f32.mrf.mxu3  ;;  %v999_v7 = vmax.f32 %v964_v18, 0.0  ;;  %v664_v2 = vadd.f32 %v663_v38, %v1843_v60  ;;  %v848_v60 = vadd.f32 %v2124_v35, %v747_v57 }
 0x1df   :  { %v1013_v30 = vmax.f32 %v992_v52, %v999_v7  ;;  %v765_v32 = vadd.f32 %v764_v48, %v664_v2  ;;  %v949_v13 = vadd.f32 %v2126_v11, %v848_v60 }
 0x1e1   :  { %v1020_v16 = vmax.f32 %v2097_v34, %v1013_v30  ;;  %v866_v56 = vadd.f32 %v865_v53, %v765_v32  ;;  %v994_v5 = vmax.f32 %v949_v13, 0.0 }
 0x1e2   :  { %v868_v44 = vpop.f32.mrf.mxu0  ;;  %v969_v34 = vpop.f32.mrf.mxu1 }
 0x1e3   :  { %1028 = vst.msk [vmem:[%s2206_s3 + $0x18] sm:$0xff] %vm1024_vm2, %v1020_v16  ;;  %v967_v45 = vadd.f32 %v966_v54, %v866_v56 }
 0x1e4   :  { %v666_v63 = vpop.f32.mrf.mxu2 }
 0x1e5   :  { %v767_v0 = vpop.f32.mrf.mxu3  ;;  %v1000_v27 = vmax.f32 %v967_v45, 0.0  ;;  %v667_v33 = vadd.f32 %v666_v63, %v1863_v15  ;;  %v851_v15 = vadd.f32 %v2132_v3, %v750_v6 }
 0x1e7   :  { %v1014_v62 = vmax.f32 %v993_v28, %v1000_v27  ;;  %v768_v17 = vadd.f32 %v767_v0, %v667_v33 }
 0x1e9   :  { %v1021_v46 = vmax.f32 %v2103_v37, %v1014_v62  ;;  %v869_v58 = vadd.f32 %v868_v44, %v768_v17  ;;  %v2210_v37 = vld [vmem:[#allocation4_spill] sm:$0xff] }
 0x1ea   :  { %v871_v11 = vpop.f32.mrf.mxu0  ;;  %v972_v1 = vpop.f32.mrf.mxu1  ;;  %v952_v49 = vadd.f32 %v2210_v37, %v851_v15 }
 0x1eb   :  { %1029 = vst.msk [vmem:[%s2206_s3 + $0x20] sm:$0xff] %vm1024_vm2, %v1021_v46  ;;  %v970_v35 = vadd.f32 %v969_v34, %v869_v58 }
 0x1ec   :  { %v669_v41 = vpop.f32.mrf.mxu2  ;;  %v995_v8 = vmax.f32 %v952_v49, 0.0 }
 0x1ed   :  { %v770_v36 = vpop.f32.mrf.mxu3  ;;  %v1001_v10 = vmax.f32 %v970_v35, 0.0  ;;  %v670_v9 = vadd.f32 %v669_v41, %v1885_v47 }
 0x1ef   :  { %v1015_v23 = vmax.f32 %v994_v5, %v1001_v10  ;;  %v771_v61 = vadd.f32 %v770_v36, %v670_v9 }
 0x1f1   :  { %v1022_v51 = vmax.f32 %v2211_v50, %v1015_v23  ;;  %v872_v31 = vadd.f32 %v871_v11, %v771_v61 }
 0x1f3   :  { %1030 = vst.msk [vmem:[%s2206_s3 + $0x28] sm:$0xff] %vm1024_vm2, %v1022_v51  ;;  %v973_v39 = vadd.f32 %v972_v1, %v872_v31 }
 0x1f5   :  { %v1002_v3 = vmax.f32 %v973_v39, 0.0 }
 0x1f7   :  { %v1016_v14 = vmax.f32 %v995_v8, %v1002_v3 }
 0x1f9   :  { %v1023_v47 = vmax.f32 %v2212_v22, %v1016_v14 }
 0x1fb   :  { %1031 = vst.msk [vmem:[%s2206_s3 + $0x30] sm:$0xff] %vm1024_vm2, %v1023_v47 }

// kernel: lenet_ensemble_forward.5
= control target key start
LH: loop header
LB: loop body
LE: loop exit
PB: predicated region body
PF: predicated region fallthrough
CT: control target
= control target key end

     0   :  { %s8980_s0 = inlined_call_operand.vmem [shape: f32[2,2000], index: 0, kind: input, shape index: {}]   ;;  %s8981_s1 = inlined_call_operand.vmem [shape: f32[2000,600], index: 1, kind: input, shape index: {}]   ;;  %s8982_s2 = inlined_call_operand.vmem [shape: f32[1,600], index: 2, kind: input, shape index: {}]   ;;  %s8983_s3 = inlined_call_operand.vmem [shape: f32[600,420], index: 3, kind: input, shape index: {}]   ;;  %s8984_s4 = inlined_call_operand.vmem [shape: f32[1,420], index: 4, kind: input, shape index: {}]   ;;  %s8985_s5 = inlined_call_operand.vmem [shape: f32[420,10], index: 5, kind: input, shape index: {}]   ;;  %s8986_s6 = inlined_call_operand.vmem [shape: f32[1,10], index: 6, kind: input, shape index: {}]   ;;  %s8987_s7 = inlined_call_operand.hbm [shape: f32[2,10], index: 7, kind: output, shape index: {}]  }
   0x1   :  { %v106_v0 = vld [vmem:[%s8981_s1 + $0x258] sm:$0xff]  ;;  %v101_v4 = vld [vmem:[%s8981_s1 + $0x230] sm:$0xff]  ;;  %v96_v8 = vld [vmem:[%s8981_s1 + $0x208] sm:$0xff] }
   0x2   :  { %v186_v1 = vld [vmem:[%s8981_s1 + $0x4d8] sm:$0xff]  ;;  %1336 = vmatpush.msra.mxu0 %v106_v0  ;;  %v181_v5 = vld [vmem:[%s8981_s1 + $0x4b0] sm:$0xff]  ;;  %v176_v9 = vld [vmem:[%s8981_s1 + $0x488] sm:$0xff] }
   0x3   :  { %v266_v2 = vld [vmem:[%s8981_s1 + $0x758] sm:$0xff]  ;;  %1356 = vmatpush.msra.mxu1 %v186_v1  ;;  %v261_v6 = vld [vmem:[%s8981_s1 + $0x730] sm:$0xff]  ;;  %v256_v10 = vld [vmem:[%s8981_s1 + $0x708] sm:$0xff] }
   0x4   :  { %v346_v3 = vld [vmem:[%s8981_s1 + $0x9d8] sm:$0xff]  ;;  %1376 = vmatpush.msra.mxu2 %v266_v2  ;;  %v341_v7 = vld [vmem:[%s8981_s1 + $0x9b0] sm:$0xff]  ;;  %1337 = vmatpush.msra.mxu0 %v101_v4  ;;  %v336_v11 = vld [vmem:[%s8981_s1 + $0x988] sm:$0xff] }
   0x5   :  { %1396 = vmatpush.msra.mxu3 %v346_v3  ;;  %1357 = vmatpush.msra.mxu1 %v181_v5  ;;  %v91_v12 = vld [vmem:[%s8981_s1 + $0x1e0] sm:$0xff]  ;;  %v86_v16 = vld [vmem:[%s8981_s1 + $0x1b8] sm:$0xff]  ;;  %v81_v20 = vld [vmem:[%s8981_s1 + $0x190] sm:$0xff] }
   0x6   :  { %1377 = vmatpush.msra.mxu2 %v261_v6  ;;  %v171_v13 = vld [vmem:[%s8981_s1 + $0x460] sm:$0xff]  ;;  %1338 = vmatpush.msra.mxu0 %v96_v8  ;;  %v166_v17 = vld [vmem:[%s8981_s1 + $0x438] sm:$0xff]  ;;  %v161_v21 = vld [vmem:[%s8981_s1 + $0x410] sm:$0xff] }
   0x7   :  { %1397 = vmatpush.msra.mxu3 %v341_v7  ;;  %1358 = vmatpush.msra.mxu1 %v176_v9  ;;  %v251_v14 = vld [vmem:[%s8981_s1 + $0x6e0] sm:$0xff]  ;;  %v246_v18 = vld [vmem:[%s8981_s1 + $0x6b8] sm:$0xff]  ;;  %v241_v22 = vld [vmem:[%s8981_s1 + $0x690] sm:$0xff] }
   0x8   :  { %v331_v15 = vld [vmem:[%s8981_s1 + $0x960] sm:$0xff]  ;;  %1378 = vmatpush.msra.mxu2 %v256_v10  ;;  %1339 = vmatpush.msra.mxu0 %v91_v12  ;;  %v326_v19 = vld [vmem:[%s8981_s1 + $0x938] sm:$0xff]  ;;  %v321_v23 = vld [vmem:[%s8981_s1 + $0x910] sm:$0xff] }
   0x9   :  { %1398 = vmatpush.msra.mxu3 %v336_v11  ;;  %1359 = vmatpush.msra.mxu1 %v171_v13  ;;  %v76_v24 = vld [vmem:[%s8981_s1 + $0x168] sm:$0xff]  ;;  %v71_v28 = vld [vmem:[%s8981_s1 + $0x140] sm:$0xff]  ;;  %v66_v32 = vld [vmem:[%s8981_s1 + $0x118] sm:$0xff] }
   0xa   :  { %1379 = vmatpush.msra.mxu2 %v251_v14  ;;  %1340 = vmatpush.msra.mxu0 %v86_v16  ;;  %v156_v25 = vld [vmem:[%s8981_s1 + $0x3e8] sm:$0xff]  ;;  %v151_v29 = vld [vmem:[%s8981_s1 + $0x3c0] sm:$0xff]  ;;  %v146_v33 = vld [vmem:[%s8981_s1 + $0x398] sm:$0xff] }
   0xb   :  { %1399 = vmatpush.msra.mxu3 %v331_v15  ;;  %1360 = vmatpush.msra.mxu1 %v166_v17  ;;  %v236_v26 = vld [vmem:[%s8981_s1 + $0x668] sm:$0xff]  ;;  %v231_v30 = vld [vmem:[%s8981_s1 + $0x640] sm:$0xff]  ;;  %v226_v34 = vld [vmem:[%s8981_s1 + $0x618] sm:$0xff] }
   0xc   :  { %1380 = vmatpush.msra.mxu2 %v246_v18  ;;  %1341 = vmatpush.msra.mxu0 %v81_v20  ;;  %v316_v27 = vld [vmem:[%s8981_s1 + $0x8e8] sm:$0xff]  ;;  %v311_v31 = vld [vmem:[%s8981_s1 + $0x8c0] sm:$0xff]  ;;  %v306_v35 = vld [vmem:[%s8981_s1 + $0x898] sm:$0xff] }
   0xd   :  { %1400 = vmatpush.msra.mxu3 %v326_v19  ;;  %1361 = vmatpush.msra.mxu1 %v161_v21  ;;  %v61_v36 = vld [vmem:[%s8981_s1 + $0xf0] sm:$0xff]  ;;  %v56_v40 = vld [vmem:[%s8981_s1 + $0xc8] sm:$0xff]  ;;  %v51_v44 = vld [vmem:[%s8981_s1 + $0xa0] sm:$0xff] }
   0xe   :  { %1381 = vmatpush.msra.mxu2 %v241_v22  ;;  %1342 = vmatpush.msra.mxu0 %v76_v24  ;;  %v141_v37 = vld [vmem:[%s8981_s1 + $0x370] sm:$0xff]  ;;  %v136_v41 = vld [vmem:[%s8981_s1 + $0x348] sm:$0xff]  ;;  %v131_v45 = vld [vmem:[%s8981_s1 + $0x320] sm:$0xff] }
   0xf   :  { %1401 = vmatpush.msra.mxu3 %v321_v23  ;;  %1362 = vmatpush.msra.mxu1 %v156_v25  ;;  %v221_v38 = vld [vmem:[%s8981_s1 + $0x5f0] sm:$0xff]  ;;  %v216_v42 = vld [vmem:[%s8981_s1 + $0x5c8] sm:$0xff]  ;;  %v211_v46 = vld [vmem:[%s8981_s1 + $0x5a0] sm:$0xff] }
  0x10   :  { %1382 = vmatpush.msra.mxu2 %v236_v26  ;;  %1343 = vmatpush.msra.mxu0 %v71_v28  ;;  %v301_v39 = vld [vmem:[%s8981_s1 + $0x870] sm:$0xff]  ;;  %v296_v43 = vld [vmem:[%s8981_s1 + $0x848] sm:$0xff]  ;;  %v291_v47 = vld [vmem:[%s8981_s1 + $0x820] sm:$0xff] }
  0x11   :  { %1402 = vmatpush.msra.mxu3 %v316_v27  ;;  %1363 = vmatpush.msra.mxu1 %v151_v29  ;;  %v46_v48 = vld [vmem:[%s8981_s1 + $0x78] sm:$0xff]  ;;  %v41_v52 = vld [vmem:[%s8981_s1 + $0x50] sm:$0xff]  ;;  %v36_v56 = vld [vmem:[%s8981_s1 + $0x28] sm:$0xff] }
  0x12   :  { %1383 = vmatpush.msra.mxu2 %v231_v30  ;;  %1344 = vmatpush.msra.mxu0 %v66_v32  ;;  %v126_v49 = vld [vmem:[%s8981_s1 + $0x2f8] sm:$0xff]  ;;  %v121_v53 = vld [vmem:[%s8981_s1 + $0x2d0] sm:$0xff]  ;;  %v116_v57 = vld [vmem:[%s8981_s1 + $0x2a8] sm:$0xff] }
  0x13   :  { %1403 = vmatpush.msra.mxu3 %v311_v31  ;;  %1364 = vmatpush.msra.mxu1 %v146_v33  ;;  %v206_v50 = vld [vmem:[%s8981_s1 + $0x578] sm:$0xff]  ;;  %v201_v54 = vld [vmem:[%s8981_s1 + $0x550] sm:$0xff]  ;;  %v196_v58 = vld [vmem:[%s8981_s1 + $0x528] sm:$0xff] }
  0x14   :  { %1384 = vmatpush.msra.mxu2 %v226_v34  ;;  %1345 = vmatpush.msra.mxu0 %v61_v36  ;;  %v286_v51 = vld [vmem:[%s8981_s1 + $0x7f8] sm:$0xff]  ;;  %v281_v55 = vld [vmem:[%s8981_s1 + $0x7d0] sm:$0xff]  ;;  %v276_v59 = vld [vmem:[%s8981_s1 + $0x7a8] sm:$0xff] }
  0x15   :  { %1404 = vmatpush.msra.mxu3 %v306_v35  ;;  %1365 = vmatpush.msra.mxu1 %v141_v37  ;;  %v31_v60 = vld [vmem:[%s8981_s1] sm:$0xff]  ;;  %v426_v0 = vld [vmem:[%s8981_s1 + $0xc58] sm:$0xff]  ;;  %v421_v4 = vld [vmem:[%s8981_s1 + $0xc30] sm:$0xff] }
  0x16   :  { %1385 = vmatpush.msra.mxu2 %v221_v38  ;;  %1346 = vmatpush.msra.mxu0 %v56_v40  ;;  %v111_v61 = vld [vmem:[%s8981_s1 + $0x280] sm:$0xff]  ;;  %v506_v1 = vld [vmem:[%s8981_s1 + $0xed8] sm:$0xff]  ;;  %v501_v5 = vld [vmem:[%s8981_s1 + $0xeb0] sm:$0xff] }
  0x17   :  { %1405 = vmatpush.msra.mxu3 %v301_v39  ;;  %1366 = vmatpush.msra.mxu1 %v136_v41  ;;  %v191_v62 = vld [vmem:[%s8981_s1 + $0x500] sm:$0xff]  ;;  %v586_v2 = vld [vmem:[%s8981_s1 + $0x1158] sm:$0xff]  ;;  %v581_v6 = vld [vmem:[%s8981_s1 + $0x1130] sm:$0xff] }
  0x18   :  { %1386 = vmatpush.msra.mxu2 %v216_v42  ;;  %1347 = vmatpush.msra.mxu0 %v51_v44  ;;  %v271_v63 = vld [vmem:[%s8981_s1 + $0x780] sm:$0xff]  ;;  %v666_v3 = vld [vmem:[%s8981_s1 + $0x13d8] sm:$0xff]  ;;  %v661_v7 = vld [vmem:[%s8981_s1 + $0x13b0] sm:$0xff] }
  0x19   :  { %1406 = vmatpush.msra.mxu3 %v296_v43  ;;  %1367 = vmatpush.msra.mxu1 %v131_v45  ;;  %v416_v8 = vld [vmem:[%s8981_s1 + $0xc08] sm:$0xff]  ;;  %v411_v12 = vld [vmem:[%s8981_s1 + $0xbe0] sm:$0xff]  ;;  %v406_v16 = vld [vmem:[%s8981_s1 + $0xbb8] sm:$0xff] }
  0x1a   :  { %1387 = vmatpush.msra.mxu2 %v211_v46  ;;  %1348 = vmatpush.msra.mxu0 %v46_v48  ;;  %v496_v9 = vld [vmem:[%s8981_s1 + $0xe88] sm:$0xff]  ;;  %v491_v13 = vld [vmem:[%s8981_s1 + $0xe60] sm:$0xff]  ;;  %v486_v17 = vld [vmem:[%s8981_s1 + $0xe38] sm:$0xff] }
  0x1b   :  { %1407 = vmatpush.msra.mxu3 %v291_v47  ;;  %1368 = vmatpush.msra.mxu1 %v126_v49  ;;  %v576_v10 = vld [vmem:[%s8981_s1 + $0x1108] sm:$0xff]  ;;  %v571_v14 = vld [vmem:[%s8981_s1 + $0x10e0] sm:$0xff]  ;;  %v566_v18 = vld [vmem:[%s8981_s1 + $0x10b8] sm:$0xff] }
  0x1c   :  { %1388 = vmatpush.msra.mxu2 %v206_v50  ;;  %1349 = vmatpush.msra.mxu0 %v41_v52  ;;  %v656_v11 = vld [vmem:[%s8981_s1 + $0x1388] sm:$0xff]  ;;  %v651_v15 = vld [vmem:[%s8981_s1 + $0x1360] sm:$0xff]  ;;  %v646_v19 = vld [vmem:[%s8981_s1 + $0x1338] sm:$0xff] }
  0x1d   :  { %1408 = vmatpush.msra.mxu3 %v286_v51  ;;  %1369 = vmatpush.msra.mxu1 %v121_v53  ;;  %v401_v20 = vld [vmem:[%s8981_s1 + $0xb90] sm:$0xff]  ;;  %v396_v24 = vld [vmem:[%s8981_s1 + $0xb68] sm:$0xff]  ;;  %v27_v26 = vld [vmem:[%s8980_s0] sm:$0xff] }
  0x1e   :  { %1389 = vmatpush.msra.mxu2 %v201_v54  ;;  %1350 = vmatpush.msra.mxu0 %v36_v56  ;;  %v481_v21 = vld [vmem:[%s8981_s1 + $0xe10] sm:$0xff]  ;;  %v476_v25 = vld [vmem:[%s8981_s1 + $0xde8] sm:$0xff]  ;;  %1297 = vst [vmem:[#allocation1] ss:$4 sm:$0xff] %v27_v26  ;;  %v391_v29 = vld [vmem:[%s8981_s1 + $0xb40] sm:$0xff] }
  0x1f   :  { %1409 = vmatpush.msra.mxu3 %v281_v55  ;;  %1370 = vmatpush.msra.mxu1 %v116_v57  ;;  %v561_v22 = vld [vmem:[%s8981_s1 + $0x1090] sm:$0xff]  ;;  %v556_v27 = vld [vmem:[%s8981_s1 + $0x1068] sm:$0xff]  ;;  %v471_v30 = vld [vmem:[%s8981_s1 + $0xdc0] sm:$0xff] }
  0x20   :  { %1390 = vmatpush.msra.mxu2 %v196_v58  ;;  %1351 = vmatpush.msra.mxu0 %v31_v60  ;;  %v641_v23 = vld [vmem:[%s8981_s1 + $0x1310] sm:$0xff]  ;;  %v636_v28 = vld [vmem:[%s8981_s1 + $0x12e8] sm:$0xff]  ;;  %v551_v31 = vld [vmem:[%s8981_s1 + $0x1040] sm:$0xff] }
  0x21   :  { %1410 = vmatpush.msra.mxu3 %v276_v59  ;;  %1371 = vmatpush.msra.mxu1 %v111_v61  ;;  %v631_v32 = vld [vmem:[%s8981_s1 + $0x12c0] sm:$0xff]  ;;  %v386_v33 = vld [vmem:[%s8981_s1 + $0xb18] sm:$0xff]  ;;  %v381_v37 = vld [vmem:[%s8981_s1 + $0xaf0] sm:$0xff] }
  0x22   :  { %1391 = vmatpush.msra.mxu2 %v191_v62  ;;  %1416 = vmatpush.msrb.mxu0 %v426_v0  ;;  %v466_v34 = vld [vmem:[%s8981_s1 + $0xd98] sm:$0xff]  ;;  %v461_v38 = vld [vmem:[%s8981_s1 + $0xd70] sm:$0xff]  ;;  %v376_v41 = vld [vmem:[%s8981_s1 + $0xac8] sm:$0xff] }
  0x23   :  { %1411 = vmatpush.msra.mxu3 %v271_v63  ;;  %1436 = vmatpush.msrb.mxu1 %v506_v1  ;;  %v546_v35 = vld [vmem:[%s8981_s1 + $0x1018] sm:$0xff]  ;;  %v541_v39 = vld [vmem:[%s8981_s1 + $0xff0] sm:$0xff]  ;;  %v456_v42 = vld [vmem:[%s8981_s1 + $0xd48] sm:$0xff] }
  0x24   :  { %1456 = vmatpush.msrb.mxu2 %v586_v2  ;;  %1417 = vmatpush.msrb.mxu0 %v421_v4  ;;  %v626_v36 = vld [vmem:[%s8981_s1 + $0x1298] sm:$0xff]  ;;  %v621_v40 = vld [vmem:[%s8981_s1 + $0x1270] sm:$0xff]  ;;  %v28_v43 = vld [vmem:[%s8980_s0 + $0x8] sm:$0xff] }
  0x25   :  { %1476 = vmatpush.msrb.mxu3 %v666_v3  ;;  %1437 = vmatpush.msrb.mxu1 %v501_v5  ;;  %v536_v44 = vld [vmem:[%s8981_s1 + $0xfc8] sm:$0xff]  ;;  %v29_v46 = vld [vmem:[%s8980_s0 + $0x10] sm:$0xff]  ;;  %1299 = vst [vmem:[#allocation1 + $0x20] ss:$4 sm:$0xff] %v28_v43  ;;  %v371_v47 = vld [vmem:[%s8981_s1 + $0xaa0] sm:$0xff] }
  0x26   :  { %1457 = vmatpush.msrb.mxu2 %v581_v6  ;;  %1418 = vmatpush.msrb.mxu0 %v416_v8  ;;  %v616_v45 = vld [vmem:[%s8981_s1 + $0x1248] sm:$0xff]  ;;  %v4268_v48 = vld.sshfl [vmem:[#allocation1] sm:$0xff pattern:$0x73625140]  ;;  %v366_v55 = vld [vmem:[%s8981_s1 + $0xa78] sm:$0xff] }
  0x27   :  { %1477 = vmatpush.msrb.mxu3 %v661_v7  ;;  %1438 = vmatpush.msrb.mxu1 %v496_v9  ;;  %v4270_v49 = vld.sshfl [vmem:[#allocation1 + $0x8] sm:$0xff pattern:$0x73625140]  ;;  %v4272_v50 = vld.sshfl [vmem:[#allocation1 + $0x10] sm:$0xff pattern:$0x73625140] }
  0x28   :  { %1458 = vmatpush.msrb.mxu2 %v576_v10  ;;  %1419 = vmatpush.msrb.mxu0 %v411_v12  ;;  %v4274_v51 = vld.sshfl [vmem:[#allocation1 + $0x18] sm:$0xff pattern:$0x73625140]  ;;  %v451_v52 = vld [vmem:[%s8981_s1 + $0xd20] sm:$0xff]  ;;  %v361_v59 = vld [vmem:[%s8981_s1 + $0xa50] sm:$0xff] }
  0x29   :  { %1478 = vmatpush.msrb.mxu3 %v656_v11  ;;  %1439 = vmatpush.msrb.mxu1 %v491_v13  ;;  %v531_v53 = vld [vmem:[%s8981_s1 + $0xfa0] sm:$0xff]  ;;  %1308 = vst [vmem:[#allocation1] ss:$4 sm:$0xff] %v29_v46  ;;  %v446_v56 = vld [vmem:[%s8981_s1 + $0xcf8] sm:$0xff]  ;;  %v441_v60 = vld [vmem:[%s8981_s1 + $0xcd0] sm:$0xff] }
  0x2a   :  { %1459 = vmatpush.msrb.mxu2 %v571_v14  ;;  %1420 = vmatpush.msrb.mxu0 %v406_v16  ;;  %v611_v54 = vld [vmem:[%s8981_s1 + $0x1220] sm:$0xff]  ;;  %v526_v57 = vld [vmem:[%s8981_s1 + $0xf78] sm:$0xff]  ;;  %v521_v61 = vld [vmem:[%s8981_s1 + $0xf50] sm:$0xff] }
  0x2b   :  { %1479 = vmatpush.msrb.mxu3 %v651_v15  ;;  %1440 = vmatpush.msrb.mxu1 %v486_v17  ;;  %v606_v58 = vld [vmem:[%s8981_s1 + $0x11f8] sm:$0xff]  ;;  %v601_v62 = vld [vmem:[%s8981_s1 + $0x11d0] sm:$0xff]  ;;  %v356_v4 = vld [vmem:[%s8981_s1 + $0xa28] sm:$0xff] }
  0x2c   :  { %1460 = vmatpush.msrb.mxu2 %v566_v18  ;;  %1421 = vmatpush.msrb.mxu0 %v401_v20  ;;  %v30_v63 = vld [vmem:[%s8980_s0 + $0x18] sm:$0xff]  ;;  %v4312_v0 = vld.sshfl [vmem:[#allocation1 + $0x30] sm:$0xff pattern:$0x73625140]  ;;  %v436_v5 = vld [vmem:[%s8981_s1 + $0xca8] sm:$0xff] }
  0x2d   :  { %1480 = vmatpush.msrb.mxu3 %v646_v19  ;;  %1441 = vmatpush.msrb.mxu1 %v481_v21  ;;  %v4314_v1 = vld.sshfl [vmem:[#allocation1 + $0x20] sm:$0xff pattern:$0x73625140]  ;;  %v4316_v2 = vld.sshfl [vmem:[#allocation1 + $0x38] sm:$0xff pattern:$0x73625140] }
  0x2e   :  { %1461 = vmatpush.msrb.mxu2 %v561_v22  ;;  %1422 = vmatpush.msrb.mxu0 %v396_v24  ;;  %v4318_v3 = vld.sshfl [vmem:[#allocation1 + $0x28] sm:$0xff pattern:$0x73625140]  ;;  %v351_v8 = vld [vmem:[%s8981_s1 + $0xa00] sm:$0xff]  ;;  %v746_v12 = vld [vmem:[%s8981_s1 + $0x1658] sm:$0xff] }
  0x2f   :  { %1481 = vmatpush.msrb.mxu3 %v641_v23  ;;  %1442 = vmatpush.msrb.mxu1 %v476_v25  ;;  %1309 = vst [vmem:[#allocation1 + $0x20] ss:$4 sm:$0xff] %v30_v63  ;;  %v516_v6 = vld [vmem:[%s8981_s1 + $0xf28] sm:$0xff]  ;;  %v431_v9 = vld [vmem:[%s8981_s1 + $0xc80] sm:$0xff]  ;;  %v826_v13 = vld [vmem:[%s8981_s1 + $0x18d8] sm:$0xff] }
  0x30   :  { %1462 = vmatpush.msrb.mxu2 %v556_v27  ;;  %1423 = vmatpush.msrb.mxu0 %v391_v29  ;;  %v596_v7 = vld [vmem:[%s8981_s1 + $0x11a8] sm:$0xff]  ;;  %v511_v10 = vld [vmem:[%s8981_s1 + $0xf00] sm:$0xff]  ;;  %v906_v14 = vld [vmem:[%s8981_s1 + $0x1b58] sm:$0xff] }
  0x31   :  { %1482 = vmatpush.msrb.mxu3 %v636_v28  ;;  %1443 = vmatpush.msrb.mxu1 %v471_v30  ;;  %v591_v11 = vld [vmem:[%s8981_s1 + $0x1180] sm:$0xff]  ;;  %v986_v15 = vld [vmem:[%s8981_s1 + $0x1dd8] sm:$0xff]  ;;  %v741_v16 = vld [vmem:[%s8981_s1 + $0x1630] sm:$0xff] }
  0x32   :  { %1463 = vmatpush.msrb.mxu2 %v551_v31  ;;  %1424 = vmatpush.msrb.mxu0 %v386_v33  ;;  %v821_v17 = vld [vmem:[%s8981_s1 + $0x18b0] sm:$0xff]  ;;  %v736_v20 = vld [vmem:[%s8981_s1 + $0x1608] sm:$0xff]  ;;  %v731_v24 = vld [vmem:[%s8981_s1 + $0x15e0] sm:$0xff] }
  0x33   :  { %1483 = vmatpush.msrb.mxu3 %v631_v32  ;;  %1444 = vmatpush.msrb.mxu1 %v466_v34  ;;  %v901_v18 = vld [vmem:[%s8981_s1 + $0x1b30] sm:$0xff]  ;;  %v816_v21 = vld [vmem:[%s8981_s1 + $0x1888] sm:$0xff]  ;;  %v811_v25 = vld [vmem:[%s8981_s1 + $0x1860] sm:$0xff] }
  0x34   :  { %1464 = vmatpush.msrb.mxu2 %v546_v35  ;;  %1425 = vmatpush.msrb.mxu0 %v381_v37  ;;  %v981_v19 = vld [vmem:[%s8981_s1 + $0x1db0] sm:$0xff]  ;;  %v896_v22 = vld [vmem:[%s8981_s1 + $0x1b08] sm:$0xff]  ;;  %v891_v26 = vld [vmem:[%s8981_s1 + $0x1ae0] sm:$0xff] }
  0x35   :  { %1484 = vmatpush.msrb.mxu3 %v626_v36  ;;  %1445 = vmatpush.msrb.mxu1 %v461_v38  ;;  %v976_v23 = vld [vmem:[%s8981_s1 + $0x1d88] sm:$0xff]  ;;  %v971_v27 = vld [vmem:[%s8981_s1 + $0x1d60] sm:$0xff]  ;;  %v726_v28 = vld [vmem:[%s8981_s1 + $0x15b8] sm:$0xff] }
  0x36   :  { %1465 = vmatpush.msrb.mxu2 %v541_v39  ;;  %1426 = vmatpush.msrb.mxu0 %v376_v41  ;;  %v806_v29 = vld [vmem:[%s8981_s1 + $0x1838] sm:$0xff] }
  0x37   :  { %1485 = vmatpush.msrb.mxu3 %v621_v40  ;;  %1446 = vmatpush.msrb.mxu1 %v456_v42  ;;  %v886_v30 = vld [vmem:[%s8981_s1 + $0x1ab8] sm:$0xff] }
  0x38   :  { %1466 = vmatpush.msrb.mxu2 %v536_v44  ;;  %1427 = vmatpush.msrb.mxu0 %v371_v47 }
  0x39   :  { %1486 = vmatpush.msrb.mxu3 %v616_v45  ;;  %1447 = vmatpush.msrb.mxu1 %v451_v52 }
  0x3a   :  { %1467 = vmatpush.msrb.mxu2 %v531_v53  ;;  %1428 = vmatpush.msrb.mxu0 %v366_v55 }
  0x3b   :  { %1487 = vmatpush.msrb.mxu3 %v611_v54  ;;  %1448 = vmatpush.msrb.mxu1 %v446_v56 }
  0x3c   :  { %1468 = vmatpush.msrb.mxu2 %v526_v57  ;;  %1429 = vmatpush.msrb.mxu0 %v361_v59 }
  0x3d   :  { %1488 = vmatpush.msrb.mxu3 %v606_v58  ;;  %1449 = vmatpush.msrb.mxu1 %v441_v60 }
  0x3e   :  { %1469 = vmatpush.msrb.mxu2 %v521_v61  ;;  %1430 = vmatpush.msrb.mxu0 %v356_v4 }
  0x3f   :  { %1489 = vmatpush.msrb.mxu3 %v601_v62  ;;  %1450 = vmatpush.msrb.mxu1 %v436_v5 }
  0x40   :  { %1470 = vmatpush.msrb.mxu2 %v516_v6  ;;  %1431 = vmatpush.msrb.mxu0 %v351_v8 }
  0x41   :  { %1490 = vmatpush.msrb.mxu3 %v596_v7  ;;  %1451 = vmatpush.msrb.mxu1 %v431_v9 }
  0x42   :  { %1471 = vmatpush.msrb.mxu2 %v511_v10  ;;  %1352 = vmatmul.f32.vlgmr.msra.gmra.mxu0 %v4268_v48 }
  0x43   :  { %1491 = vmatpush.msrb.mxu3 %v591_v11  ;;  %1372 = vmatmul.f32.vlgmr.msra.gmra.mxu1 %v4270_v49 }
  0x44   :  { %1392 = vmatmul.f32.vlgmr.msra.gmra.mxu2 %v4272_v50  ;;  %1412 = vmatmul.f32.vlgmr.msra.gmra.mxu3 %v4274_v51 }
  0x45   :  { %1496 = vmatpush.msra.mxu0 %v746_v12  ;;  %1516 = vmatpush.msra.mxu1 %v826_v13 }
  0x46   :  { %1536 = vmatpush.msra.mxu2 %v906_v14  ;;  %1556 = vmatpush.msra.mxu3 %v986_v15 }
  0x47   :  { %1497 = vmatpush.msra.mxu0 %v741_v16  ;;  %1517 = vmatpush.msra.mxu1 %v821_v17 }
  0x48   :  { %1537 = vmatpush.msra.mxu2 %v901_v18  ;;  %1557 = vmatpush.msra.mxu3 %v981_v19 }
  0x49   :  { %1498 = vmatpush.msra.mxu0 %v736_v20  ;;  %1518 = vmatpush.msra.mxu1 %v816_v21 }
  0x4a   :  { %1538 = vmatpush.msra.mxu2 %v896_v22  ;;  %1558 = vmatpush.msra.mxu3 %v976_v23 }
  0x4b   :  { %1499 = vmatpush.msra.mxu0 %v731_v24  ;;  %1519 = vmatpush.msra.mxu1 %v811_v25 }
  0x4c   :  { %12 = vsyncpa [#allocation3], 0  ;;  %1539 = vmatpush.msra.mxu2 %v891_v26  ;;  %1559 = vmatpush.msra.mxu3 %v971_v27  ;;  %v966_v31 = vld [vmem:[%s8981_s1 + $0x1d38] sm:$0xff]  ;;  %v721_v32 = vld [vmem:[%s8981_s1 + $0x1590] sm:$0xff]  ;;  %vm1333_vm0 = vcmask 654336   ;;  %vm3251_vm1 = vcmask 719872  }
  0x4d   :  { %1472 = vmatmul.f32.vlgmr.msrb.gmra.mxu2 %v4312_v0  ;;  %1500 = vmatpush.msra.mxu0 %v726_v28  ;;  %v801_v33 = vld [vmem:[%s8981_s1 + $0x1810] sm:$0xff]  ;;  %v716_v36 = vld [vmem:[%s8981_s1 + $0x1568] sm:$0xff]  ;;  %v711_v40 = vld [vmem:[%s8981_s1 + $0x1540] sm:$0xff]  ;;  %vm3720_vm2 = vcmask 1043456   ;;  %vm3716_vm3 = vcmask 293888   ;;  %s3813_s23 = sshll.u32 %s8987_s7, 4  ;;  %s3814_s23 = int_to_ptr.hbm [resolvable:$true] %s3813_s23 }
  0x4e   :  { %1520 = vmatpush.msra.mxu1 %v806_v29  ;;  %1540 = vmatpush.msra.mxu2 %v886_v30  ;;  %v881_v34 = vld [vmem:[%s8981_s1 + $0x1a90] sm:$0xff]  ;;  %v796_v37 = vld [vmem:[%s8981_s1 + $0x17e8] sm:$0xff]  ;;  %v791_v41 = vld [vmem:[%s8981_s1 + $0x17c0] sm:$0xff]  ;;  %vm3804_vm4 = vcmask 74752  }
  0x4f   :  { %1560 = vmatpush.msra.mxu3 %v966_v31  ;;  %1432 = vmatmul.f32.vlgmr.msrb.gmra.mxu0 %v4314_v1  ;;  %v961_v35 = vld [vmem:[%s8981_s1 + $0x1d10] sm:$0xff]  ;;  %v876_v38 = vld [vmem:[%s8981_s1 + $0x1a68] sm:$0xff]  ;;  %v871_v42 = vld [vmem:[%s8981_s1 + $0x1a40] sm:$0xff] }
  0x50   :  { %1492 = vmatmul.f32.vlgmr.msrb.gmra.mxu3 %v4316_v2  ;;  %1501 = vmatpush.msra.mxu0 %v721_v32  ;;  %v956_v39 = vld [vmem:[%s8981_s1 + $0x1ce8] sm:$0xff]  ;;  %v951_v43 = vld [vmem:[%s8981_s1 + $0x1cc0] sm:$0xff]  ;;  %v706_v44 = vld [vmem:[%s8981_s1 + $0x1518] sm:$0xff] }
  0x51   :  { %1521 = vmatpush.msra.mxu1 %v801_v33  ;;  %1541 = vmatpush.msra.mxu2 %v881_v34  ;;  %v786_v45 = vld [vmem:[%s8981_s1 + $0x1798] sm:$0xff]  ;;  %v701_v52 = vld [vmem:[%s8981_s1 + $0x14f0] sm:$0xff]  ;;  %v696_v56 = vld [vmem:[%s8981_s1 + $0x14c8] sm:$0xff] }
  0x52   :  { %1561 = vmatpush.msra.mxu3 %v961_v35  ;;  %1452 = vmatmul.f32.vlgmr.msrb.gmra.mxu1 %v4318_v3  ;;  %v866_v46 = vld [vmem:[%s8981_s1 + $0x1a18] sm:$0xff]  ;;  %v781_v53 = vld [vmem:[%s8981_s1 + $0x1770] sm:$0xff]  ;;  %v776_v57 = vld [vmem:[%s8981_s1 + $0x1748] sm:$0xff] }
  0x53   :  { %1502 = vmatpush.msra.mxu0 %v716_v36  ;;  %1522 = vmatpush.msra.mxu1 %v796_v37  ;;  %v946_v47 = vld [vmem:[%s8981_s1 + $0x1c98] sm:$0xff]  ;;  %v861_v54 = vld [vmem:[%s8981_s1 + $0x19f0] sm:$0xff]  ;;  %v856_v58 = vld [vmem:[%s8981_s1 + $0x19c8] sm:$0xff] }
  0x54   :  { %1542 = vmatpush.msra.mxu2 %v876_v38  ;;  %1562 = vmatpush.msra.mxu3 %v956_v39  ;;  %v941_v55 = vld [vmem:[%s8981_s1 + $0x1c70] sm:$0xff]  ;;  %v936_v59 = vld [vmem:[%s8981_s1 + $0x1c48] sm:$0xff]  ;;  %v691_v60 = vld [vmem:[%s8981_s1 + $0x14a0] sm:$0xff] }
  0x55   :  { %1503 = vmatpush.msra.mxu0 %v711_v40  ;;  %1523 = vmatpush.msra.mxu1 %v791_v41  ;;  %v771_v61 = vld [vmem:[%s8981_s1 + $0x1720] sm:$0xff]  ;;  %v686_v4 = vld [vmem:[%s8981_s1 + $0x1478] sm:$0xff]  ;;  %v681_v8 = vld [vmem:[%s8981_s1 + $0x1450] sm:$0xff] }
  0x56   :  { %1543 = vmatpush.msra.mxu2 %v871_v42  ;;  %1563 = vmatpush.msra.mxu3 %v951_v43  ;;  %v851_v62 = vld [vmem:[%s8981_s1 + $0x19a0] sm:$0xff]  ;;  %v766_v5 = vld [vmem:[%s8981_s1 + $0x16f8] sm:$0xff]  ;;  %v761_v9 = vld [vmem:[%s8981_s1 + $0x16d0] sm:$0xff] }
  0x57   :  { %1504 = vmatpush.msra.mxu0 %v706_v44  ;;  %1524 = vmatpush.msra.mxu1 %v786_v45  ;;  %v931_v63 = vld [vmem:[%s8981_s1 + $0x1c20] sm:$0xff]  ;;  %v846_v6 = vld [vmem:[%s8981_s1 + $0x1978] sm:$0xff]  ;;  %v841_v10 = vld [vmem:[%s8981_s1 + $0x1950] sm:$0xff] }
  0x58   :  { %1544 = vmatpush.msra.mxu2 %v866_v46  ;;  %1564 = vmatpush.msra.mxu3 %v946_v47  ;;  %v926_v7 = vld [vmem:[%s8981_s1 + $0x1bf8] sm:$0xff]  ;;  %v921_v11 = vld [vmem:[%s8981_s1 + $0x1bd0] sm:$0xff]  ;;  %v676_v12 = vld [vmem:[%s8981_s1 + $0x1428] sm:$0xff] }
  0x59   :  { %1505 = vmatpush.msra.mxu0 %v701_v52  ;;  %1525 = vmatpush.msra.mxu1 %v781_v53  ;;  %v756_v13 = vld [vmem:[%s8981_s1 + $0x16a8] sm:$0xff]  ;;  %v671_v16 = vld [vmem:[%s8981_s1 + $0x1400] sm:$0xff]  ;;  %v1312_v21 = vld.sshfl [vmem:[#allocation1 + $0x10] sm:$0xff pattern:$0x73625140] }
  0x5a   :  { %1545 = vmatpush.msra.mxu2 %v861_v54  ;;  %1565 = vmatpush.msra.mxu3 %v941_v55  ;;  %v836_v14 = vld [vmem:[%s8981_s1 + $0x1928] sm:$0xff]  ;;  %v751_v17 = vld [vmem:[%s8981_s1 + $0x1680] sm:$0xff]  ;;  %v1066_v22 = vld [vmem:[%s8981_s1 + $0x2058] sm:$0xff] }
  0x5b   :  { %1506 = vmatpush.msra.mxu0 %v696_v56  ;;  %1526 = vmatpush.msra.mxu1 %v776_v57  ;;  %v916_v15 = vld [vmem:[%s8981_s1 + $0x1ba8] sm:$0xff]  ;;  %v831_v18 = vld [vmem:[%s8981_s1 + $0x1900] sm:$0xff]  ;;  %v1146_v23 = vld [vmem:[%s8981_s1 + $0x22d8] sm:$0xff] }
  0x5c   :  { %1546 = vmatpush.msra.mxu2 %v856_v58  ;;  %1566 = vmatpush.msra.mxu3 %v936_v59  ;;  %v911_v19 = vld [vmem:[%s8981_s1 + $0x1b80] sm:$0xff]  ;;  %v1226_v24 = vld [vmem:[%s8981_s1 + $0x2558] sm:$0xff]  ;;  %v1276_v25 = vld [vmem:[%s8981_s1 + $0x26e8] sm:$0xff] }
  0x5d   :  { %1507 = vmatpush.msra.mxu0 %v691_v60  ;;  %1527 = vmatpush.msra.mxu1 %v771_v61  ;;  %v1310_v20 = vld.sshfl [vmem:[#allocation1] sm:$0xff pattern:$0x73625140]  ;;  %v1311_v26 = vld.sshfl [vmem:[#allocation1 + $0x8] sm:$0xff pattern:$0x73625140] }
  0x5e   :  { %1547 = vmatpush.msra.mxu2 %v851_v62  ;;  %1567 = vmatpush.msra.mxu3 %v931_v63  ;;  %v1313_v27 = vld.sshfl [vmem:[#allocation1 + $0x18] sm:$0xff pattern:$0x73625140]  ;;  %v1061_v28 = vld [vmem:[%s8981_s1 + $0x2030] sm:$0xff]  ;;  %v1271_v31 = vld [vmem:[%s8981_s1 + $0x26c0] sm:$0xff] }
  0x5f   :  { %1508 = vmatpush.msra.mxu0 %v686_v4  ;;  %1528 = vmatpush.msra.mxu1 %v766_v5  ;;  %v1141_v29 = vld [vmem:[%s8981_s1 + $0x22b0] sm:$0xff]  ;;  %v1056_v32 = vld [vmem:[%s8981_s1 + $0x2008] sm:$0xff]  ;;  %v1266_v35 = vld [vmem:[%s8981_s1 + $0x2698] sm:$0xff] }
  0x60   :  { %1548 = vmatpush.msra.mxu2 %v846_v6  ;;  %1568 = vmatpush.msra.mxu3 %v926_v7  ;;  %v1221_v30 = vld [vmem:[%s8981_s1 + $0x2530] sm:$0xff]  ;;  %v1136_v33 = vld [vmem:[%s8981_s1 + $0x2288] sm:$0xff]  ;;  %v1051_v36 = vld [vmem:[%s8981_s1 + $0x1fe0] sm:$0xff] }
  0x61   :  { %1509 = vmatpush.msra.mxu0 %v681_v8  ;;  %1529 = vmatpush.msra.mxu1 %v761_v9  ;;  %v1216_v34 = vld [vmem:[%s8981_s1 + $0x2508] sm:$0xff]  ;;  %v1131_v37 = vld [vmem:[%s8981_s1 + $0x2260] sm:$0xff]  ;;  %v1261_v39 = vld [vmem:[%s8981_s1 + $0x2670] sm:$0xff] }
  0x62   :  { %1549 = vmatpush.msra.mxu2 %v841_v10  ;;  %1569 = vmatpush.msra.mxu3 %v921_v11  ;;  %v1211_v38 = vld [vmem:[%s8981_s1 + $0x24e0] sm:$0xff]  ;;  %v1046_v40 = vld [vmem:[%s8981_s1 + $0x1fb8] sm:$0xff]  ;;  %v1256_v43 = vld [vmem:[%s8981_s1 + $0x2648] sm:$0xff] }
  0x63   :  { %1510 = vmatpush.msra.mxu0 %v676_v12  ;;  %1530 = vmatpush.msra.mxu1 %v756_v13  ;;  %v1126_v41 = vld [vmem:[%s8981_s1 + $0x2238] sm:$0xff]  ;;  %v1041_v44 = vld [vmem:[%s8981_s1 + $0x1f90] sm:$0xff]  ;;  %v1251_v47 = vld [vmem:[%s8981_s1 + $0x2620] sm:$0xff] }
  0x64   :  { %1550 = vmatpush.msra.mxu2 %v836_v14  ;;  %1570 = vmatpush.msra.mxu3 %v916_v15  ;;  %v1206_v42 = vld [vmem:[%s8981_s1 + $0x24b8] sm:$0xff]  ;;  %v1121_v45 = vld [vmem:[%s8981_s1 + $0x2210] sm:$0xff]  ;;  %v1036_v52 = vld [vmem:[%s8981_s1 + $0x1f68] sm:$0xff] }
  0x65   :  { %1511 = vmatpush.msra.mxu0 %v671_v16  ;;  %1531 = vmatpush.msra.mxu1 %v751_v17  ;;  %v1201_v46 = vld [vmem:[%s8981_s1 + $0x2490] sm:$0xff]  ;;  %v1116_v53 = vld [vmem:[%s8981_s1 + $0x21e8] sm:$0xff]  ;;  %v1246_v55 = vld [vmem:[%s8981_s1 + $0x25f8] sm:$0xff] }
  0x66   :  { %1551 = vmatpush.msra.mxu2 %v831_v18  ;;  %1571 = vmatpush.msra.mxu3 %v911_v19  ;;  %v1196_v54 = vld [vmem:[%s8981_s1 + $0x2468] sm:$0xff]  ;;  %v1031_v56 = vld [vmem:[%s8981_s1 + $0x1f40] sm:$0xff]  ;;  %v1241_v59 = vld [vmem:[%s8981_s1 + $0x25d0] sm:$0xff] }
  0x67   :  { %1512 = vmatmul.f32.vlgmr.msra.gmra.mxu0 %v1310_v20  ;;  %1552 = vmatmul.f32.vlgmr.msra.gmra.mxu2 %v1312_v21  ;;  %v1111_v57 = vld [vmem:[%s8981_s1 + $0x21c0] sm:$0xff]  ;;  %v1026_v60 = vld [vmem:[%s8981_s1 + $0x1f18] sm:$0xff]  ;;  %v1236_v63 = vld [vmem:[%s8981_s1 + $0x25a8] sm:$0xff] }
  0x68   :  { %1576 = vmatpush.msrb.mxu0 %v1066_v22  ;;  %1596 = vmatpush.msrb.mxu1 %v1146_v23  ;;  %v1191_v58 = vld [vmem:[%s8981_s1 + $0x2440] sm:$0xff]  ;;  %v1106_v61 = vld [vmem:[%s8981_s1 + $0x2198] sm:$0xff]  ;;  %v1021_v4 = vld [vmem:[%s8981_s1 + $0x1ef0] sm:$0xff] }
  0x69   :  { %1616 = vmatpush.msrb.mxu2 %v1226_v24  ;;  %1642 = vmatpush.msrb.mxu3 %v1276_v25  ;;  %v1186_v62 = vld [vmem:[%s8981_s1 + $0x2418] sm:$0xff]  ;;  %v1101_v5 = vld [vmem:[%s8981_s1 + $0x2170] sm:$0xff]  ;;  %v1231_v7 = vld [vmem:[%s8981_s1 + $0x2580] sm:$0xff] }
  0x6a   :  { %1532 = vmatmul.f32.vlgmr.msra.gmra.mxu1 %v1311_v26  ;;  %1572 = vmatmul.f32.vlgmr.msra.gmra.mxu3 %v1313_v27  ;;  %v1181_v6 = vld [vmem:[%s8981_s1 + $0x23f0] sm:$0xff]  ;;  %v107_v8 = vld [vmem:[%s8981_s1 + $0x260] sm:$0xff]  ;;  %v1016_v9 = vld [vmem:[%s8981_s1 + $0x1ec8] sm:$0xff] }
  0x6b   :  { %1577 = vmatpush.msrb.mxu0 %v1061_v28  ;;  %1597 = vmatpush.msrb.mxu1 %v1141_v29  ;;  %v1096_v10 = vld [vmem:[%s8981_s1 + $0x2148] sm:$0xff]  ;;  %v102_v12 = vld [vmem:[%s8981_s1 + $0x238] sm:$0xff]  ;;  %v1011_v13 = vld [vmem:[%s8981_s1 + $0x1ea0] sm:$0xff] }
  0x6c   :  { %1617 = vmatpush.msrb.mxu2 %v1221_v30  ;;  %1643 = vmatpush.msrb.mxu3 %v1271_v31  ;;  %v1176_v11 = vld [vmem:[%s8981_s1 + $0x23c8] sm:$0xff]  ;;  %v1091_v14 = vld [vmem:[%s8981_s1 + $0x2120] sm:$0xff]  ;;  %v97_v16 = vld [vmem:[%s8981_s1 + $0x210] sm:$0xff] }
  0x6d   :  { %1578 = vmatpush.msrb.mxu0 %v1056_v32  ;;  %1598 = vmatpush.msrb.mxu1 %v1136_v33  ;;  %v1171_v15 = vld [vmem:[%s8981_s1 + $0x23a0] sm:$0xff]  ;;  %v1006_v17 = vld [vmem:[%s8981_s1 + $0x1e78] sm:$0xff]  ;;  %v92_v20 = vld [vmem:[%s8981_s1 + $0x1e8] sm:$0xff] }
  0x6e   :  { %1618 = vmatpush.msrb.mxu2 %v1216_v34  ;;  %1644 = vmatpush.msrb.mxu3 %v1266_v35  ;;  %v1086_v18 = vld [vmem:[%s8981_s1 + $0x20f8] sm:$0xff]  ;;  %v1001_v21 = vld [vmem:[%s8981_s1 + $0x1e50] sm:$0xff]  ;;  %v87_v24 = vld [vmem:[%s8981_s1 + $0x1c0] sm:$0xff] }
  0x6f   :  { %1579 = vmatpush.msrb.mxu0 %v1051_v36  ;;  %1599 = vmatpush.msrb.mxu1 %v1131_v37  ;;  %v1166_v19 = vld [vmem:[%s8981_s1 + $0x2378] sm:$0xff]  ;;  %v1081_v22 = vld [vmem:[%s8981_s1 + $0x20d0] sm:$0xff]  ;;  %v996_v25 = vld [vmem:[%s8981_s1 + $0x1e28] sm:$0xff] }
  0x70   :  { %1619 = vmatpush.msrb.mxu2 %v1211_v38  ;;  %1645 = vmatpush.msrb.mxu3 %v1261_v39  ;;  %v1161_v23 = vld [vmem:[%s8981_s1 + $0x2350] sm:$0xff]  ;;  %v1076_v26 = vld [vmem:[%s8981_s1 + $0x20a8] sm:$0xff]  ;;  %v82_v28 = vld [vmem:[%s8981_s1 + $0x198] sm:$0xff] }
  0x71   :  { %1580 = vmatpush.msrb.mxu0 %v1046_v40  ;;  %1600 = vmatpush.msrb.mxu1 %v1126_v41  ;;  %v1156_v27 = vld [vmem:[%s8981_s1 + $0x2328] sm:$0xff]  ;;  %v991_v29 = vld [vmem:[%s8981_s1 + $0x1e00] sm:$0xff]  ;;  %v1316_v33 = vld.sshfl [vmem:[#allocation1 + $0x30] sm:$0xff pattern:$0x73625140] }
  0x72   :  { %1620 = vmatpush.msrb.mxu2 %v1206_v42  ;;  %1646 = vmatpush.msrb.mxu3 %v1256_v43  ;;  %v1071_v30 = vld [vmem:[%s8981_s1 + $0x2080] sm:$0xff]  ;;  %v77_v34 = vld [vmem:[%s8981_s1 + $0x170] sm:$0xff]  ;;  %v1315_v38 = vld.sshfl [vmem:[#allocation1 + $0x28] sm:$0xff pattern:$0x73625140] }
  0x73   :  { %1581 = vmatpush.msrb.mxu0 %v1041_v44  ;;  %1601 = vmatpush.msrb.mxu1 %v1121_v45  ;;  %v1151_v31 = vld [vmem:[%s8981_s1 + $0x2300] sm:$0xff]  ;;  %v1317_v39 = vld.sshfl [vmem:[#allocation1 + $0x38] sm:$0xff pattern:$0x73625140]  ;;  %v72_v40 = vld [vmem:[%s8981_s1 + $0x148] sm:$0xff] }
  0x74   :  { %1621 = vmatpush.msrb.mxu2 %v1201_v46  ;;  %1647 = vmatpush.msrb.mxu3 %v1251_v47  ;;  %v1314_v32 = vld.sshfl [vmem:[#allocation1 + $0x20] sm:$0xff pattern:$0x73625140]  ;;  %v182_v41 = vld [vmem:[%s8981_s1 + $0x4b8] sm:$0xff]  ;;  %v177_v45 = vld [vmem:[%s8981_s1 + $0x490] sm:$0xff] }
  0x75   :  { %1582 = vmatpush.msrb.mxu0 %v1036_v52  ;;  %1602 = vmatpush.msrb.mxu1 %v1116_v53  ;;  %v187_v35 = vld [vmem:[%s8981_s1 + $0x4e0] sm:$0xff]  ;;  %v262_v42 = vld [vmem:[%s8981_s1 + $0x738] sm:$0xff]  ;;  %v257_v46 = vld [vmem:[%s8981_s1 + $0x710] sm:$0xff] }
  0x76   :  { %1622 = vmatpush.msrb.mxu2 %v1196_v54  ;;  %1648 = vmatpush.msrb.mxu3 %v1246_v55  ;;  %v267_v36 = vld [vmem:[%s8981_s1 + $0x760] sm:$0xff]  ;;  %v342_v43 = vld [vmem:[%s8981_s1 + $0x9b8] sm:$0xff]  ;;  %v337_v47 = vld [vmem:[%s8981_s1 + $0x990] sm:$0xff] }
  0x77   :  { %1583 = vmatpush.msrb.mxu0 %v1031_v56  ;;  %1603 = vmatpush.msrb.mxu1 %v1111_v57  ;;  %v347_v37 = vld [vmem:[%s8981_s1 + $0x9e0] sm:$0xff]  ;;  %v62_v52 = vld [vmem:[%s8981_s1 + $0xf8] sm:$0xff]  ;;  %v172_v53 = vld [vmem:[%s8981_s1 + $0x468] sm:$0xff] }
  0x78   :  { %1623 = vmatpush.msrb.mxu2 %v1191_v58  ;;  %1649 = vmatpush.msrb.mxu3 %v1241_v59  ;;  %v67_v44 = vld [vmem:[%s8981_s1 + $0x120] sm:$0xff]  ;;  %v252_v54 = vld [vmem:[%s8981_s1 + $0x6e8] sm:$0xff]  ;;  %v57_v56 = vld [vmem:[%s8981_s1 + $0xd0] sm:$0xff] }
  0x79   :  { %1584 = vmatpush.msrb.mxu0 %v1026_v60  ;;  %1604 = vmatpush.msrb.mxu1 %v1106_v61  ;;  %v332_v55 = vld [vmem:[%s8981_s1 + $0x968] sm:$0xff]  ;;  %v167_v57 = vld [vmem:[%s8981_s1 + $0x440] sm:$0xff]  ;;  %v162_v61 = vld [vmem:[%s8981_s1 + $0x418] sm:$0xff] }
  0x7a   :  { %1624 = vmatpush.msrb.mxu2 %v1186_v62  ;;  %1650 = vmatpush.msrb.mxu3 %v1236_v63  ;;  %v247_v58 = vld [vmem:[%s8981_s1 + $0x6c0] sm:$0xff]  ;;  %v52_v60 = vld [vmem:[%s8981_s1 + $0xa8] sm:$0xff]  ;;  %v242_v62 = vld [vmem:[%s8981_s1 + $0x698] sm:$0xff] }
  0x7b   :  { %1585 = vmatpush.msrb.mxu0 %v1021_v4  ;;  %1605 = vmatpush.msrb.mxu1 %v1101_v5  ;;  %v327_v59 = vld [vmem:[%s8981_s1 + $0x940] sm:$0xff]  ;;  %v322_v63 = vld [vmem:[%s8981_s1 + $0x918] sm:$0xff]  ;;  %v157_v5 = vld [vmem:[%s8981_s1 + $0x3f0] sm:$0xff] }
  0x7c   :  { %1625 = vmatpush.msrb.mxu2 %v1181_v6  ;;  %1651 = vmatpush.msrb.mxu3 %v1231_v7  ;;  %v47_v4 = vld [vmem:[%s8981_s1 + $0x80] sm:$0xff]  ;;  %v237_v6 = vld [vmem:[%s8981_s1 + $0x670] sm:$0xff] }
  0x7d   :  { %1586 = vmatpush.msrb.mxu0 %v1016_v9  ;;  %1606 = vmatpush.msrb.mxu1 %v1096_v10  ;;  %v317_v7 = vld [vmem:[%s8981_s1 + $0x8f0] sm:$0xff]  ;;  %v152_v9 = vld [vmem:[%s8981_s1 + $0x3c8] sm:$0xff] }
  0x7e   :  { %1656 = vmatpush.msra.mxu3 %v107_v8  ;;  %1626 = vmatpush.msrb.mxu2 %v1176_v11  ;;  %v42_v8 = vld [vmem:[%s8981_s1 + $0x58] sm:$0xff]  ;;  %v232_v10 = vld [vmem:[%s8981_s1 + $0x648] sm:$0xff] }
  0x7f   :  { %1587 = vmatpush.msrb.mxu0 %v1011_v13  ;;  %1607 = vmatpush.msrb.mxu1 %v1091_v14  ;;  %v312_v11 = vld [vmem:[%s8981_s1 + $0x8c8] sm:$0xff]  ;;  %v147_v13 = vld [vmem:[%s8981_s1 + $0x3a0] sm:$0xff] }
  0x80   :  { %1657 = vmatpush.msra.mxu3 %v102_v12  ;;  %1627 = vmatpush.msrb.mxu2 %v1171_v15  ;;  %v37_v12 = vld [vmem:[%s8981_s1 + $0x30] sm:$0xff]  ;;  %v227_v14 = vld [vmem:[%s8981_s1 + $0x620] sm:$0xff] }
  0x81   :  { %1588 = vmatpush.msrb.mxu0 %v1006_v17  ;;  %1608 = vmatpush.msrb.mxu1 %v1086_v18  ;;  %v307_v15 = vld [vmem:[%s8981_s1 + $0x8a0] sm:$0xff]  ;;  %v142_v17 = vld [vmem:[%s8981_s1 + $0x378] sm:$0xff] }
  0x82   :  { %1658 = vmatpush.msra.mxu3 %v97_v16  ;;  %1628 = vmatpush.msrb.mxu2 %v1166_v19  ;;  %v32_v16 = vld [vmem:[%s8981_s1 + $0x8] sm:$0xff]  ;;  %v222_v18 = vld [vmem:[%s8981_s1 + $0x5f8] sm:$0xff] }
  0x83   :  { %1589 = vmatpush.msrb.mxu0 %v1001_v21  ;;  %1609 = vmatpush.msrb.mxu1 %v1081_v22  ;;  %v302_v19 = vld [vmem:[%s8981_s1 + $0x878] sm:$0xff]  ;;  %v137_v21 = vld [vmem:[%s8981_s1 + $0x350] sm:$0xff] }
  0x84   :  { %1659 = vmatpush.msra.mxu3 %v92_v20  ;;  %1629 = vmatpush.msrb.mxu2 %v1161_v23  ;;  %v427_v20 = vld [vmem:[%s8981_s1 + $0xc60] sm:$0xff]  ;;  %v217_v22 = vld [vmem:[%s8981_s1 + $0x5d0] sm:$0xff] }
  0x85   :  { %1590 = vmatpush.msrb.mxu0 %v996_v25  ;;  %1610 = vmatpush.msrb.mxu1 %v1076_v26  ;;  %v297_v23 = vld [vmem:[%s8981_s1 + $0x850] sm:$0xff]  ;;  %v132_v25 = vld [vmem:[%s8981_s1 + $0x328] sm:$0xff] }
  0x86   :  { %1660 = vmatpush.msra.mxu3 %v87_v24  ;;  %1630 = vmatpush.msrb.mxu2 %v1156_v27  ;;  %v422_v24 = vld [vmem:[%s8981_s1 + $0xc38] sm:$0xff]  ;;  %v212_v26 = vld [vmem:[%s8981_s1 + $0x5a8] sm:$0xff] }
  0x87   :  { %1591 = vmatpush.msrb.mxu0 %v991_v29  ;;  %1611 = vmatpush.msrb.mxu1 %v1071_v30  ;;  %v292_v27 = vld [vmem:[%s8981_s1 + $0x828] sm:$0xff]  ;;  %v127_v29 = vld [vmem:[%s8981_s1 + $0x300] sm:$0xff] }
  0x88   :  { %1661 = vmatpush.msra.mxu3 %v82_v28  ;;  %1631 = vmatpush.msrb.mxu2 %v1151_v31  ;;  %v417_v28 = vld [vmem:[%s8981_s1 + $0xc10] sm:$0xff]  ;;  %v207_v30 = vld [vmem:[%s8981_s1 + $0x580] sm:$0xff] }
  0x89   :  { %1592 = vmatmul.f32.vlgmr.msrb.gmra.mxu0 %v1314_v32  ;;  %1632 = vmatmul.f32.vlgmr.msrb.gmra.mxu2 %v1316_v33  ;;  %v287_v31 = vld [vmem:[%s8981_s1 + $0x800] sm:$0xff]  ;;  %v412_v32 = vld [vmem:[%s8981_s1 + $0xbe8] sm:$0xff]  ;;  %v122_v33 = vld [vmem:[%s8981_s1 + $0x2d8] sm:$0xff] }
  0x8a   :  { %1662 = vmatpush.msra.mxu3 %v77_v34  ;;  %1676 = vmatpush.msra.mxu0 %v187_v35  ;;  %v202_v34 = vld [vmem:[%s8981_s1 + $0x558] sm:$0xff] }
  0x8b   :  { %1696 = vmatpush.msra.mxu1 %v267_v36  ;;  %1716 = vmatpush.msra.mxu2 %v347_v37  ;;  %v282_v35 = vld [vmem:[%s8981_s1 + $0x7d8] sm:$0xff]  ;;  %v407_v36 = vld [vmem:[%s8981_s1 + $0xbc0] sm:$0xff]  ;;  %v117_v37 = vld [vmem:[%s8981_s1 + $0x2b0] sm:$0xff] }
  0x8c   :  { %1612 = vmatmul.f32.vlgmr.msrb.gmra.mxu1 %v1315_v38  ;;  %3822 = vmatmul.msk.f32.vlgmr.msrb.gmra.mxu3 %vm1333_vm0, %v1317_v39  ;;  %v197_v38 = vld [vmem:[%s8981_s1 + $0x530] sm:$0xff] }
  0x8d   :  { %1663 = vmatpush.msra.mxu3 %v72_v40  ;;  %1677 = vmatpush.msra.mxu0 %v182_v41  ;;  %v277_v39 = vld [vmem:[%s8981_s1 + $0x7b0] sm:$0xff]  ;;  %v402_v40 = vld [vmem:[%s8981_s1 + $0xb98] sm:$0xff]  ;;  %v112_v41 = vld [vmem:[%s8981_s1 + $0x288] sm:$0xff] }
  0x8e   :  { %1697 = vmatpush.msra.mxu1 %v262_v42  ;;  %1717 = vmatpush.msra.mxu2 %v342_v43  ;;  %v192_v42 = vld [vmem:[%s8981_s1 + $0x508] sm:$0xff] }
  0x8f   :  { %1664 = vmatpush.msra.mxu3 %v67_v44  ;;  %1678 = vmatpush.msra.mxu0 %v177_v45  ;;  %v272_v43 = vld [vmem:[%s8981_s1 + $0x788] sm:$0xff]  ;;  %v397_v44 = vld [vmem:[%s8981_s1 + $0xb70] sm:$0xff]  ;;  %v507_v45 = vld [vmem:[%s8981_s1 + $0xee0] sm:$0xff] }
  0x90   :  { %1698 = vmatpush.msra.mxu1 %v257_v46  ;;  %1718 = vmatpush.msra.mxu2 %v337_v47  ;;  %v587_v46 = vld [vmem:[%s8981_s1 + $0x1160] sm:$0xff] }
  0x91   :  { %1665 = vmatpush.msra.mxu3 %v62_v52  ;;  %1679 = vmatpush.msra.mxu0 %v172_v53  ;;  %v667_v47 = vld [vmem:[%s8981_s1 + $0x13e0] sm:$0xff]  ;;  %v392_v52 = vld [vmem:[%s8981_s1 + $0xb48] sm:$0xff]  ;;  %v502_v53 = vld [vmem:[%s8981_s1 + $0xeb8] sm:$0xff] }
  0x92   :  { %1699 = vmatpush.msra.mxu1 %v252_v54  ;;  %1719 = vmatpush.msra.mxu2 %v332_v55  ;;  %v582_v54 = vld [vmem:[%s8981_s1 + $0x1138] sm:$0xff] }
  0x93   :  { %1666 = vmatpush.msra.mxu3 %v57_v56  ;;  %1680 = vmatpush.msra.mxu0 %v167_v57  ;;  %v662_v55 = vld [vmem:[%s8981_s1 + $0x13b8] sm:$0xff]  ;;  %v387_v56 = vld [vmem:[%s8981_s1 + $0xb20] sm:$0xff]  ;;  %v497_v57 = vld [vmem:[%s8981_s1 + $0xe90] sm:$0xff] }
  0x94   :  { %1700 = vmatpush.msra.mxu1 %v247_v58  ;;  %1720 = vmatpush.msra.mxu2 %v327_v59  ;;  %v577_v58 = vld [vmem:[%s8981_s1 + $0x1110] sm:$0xff] }
  0x95   :  { %1667 = vmatpush.msra.mxu3 %v52_v60  ;;  %1681 = vmatpush.msra.mxu0 %v162_v61  ;;  %v657_v59 = vld [vmem:[%s8981_s1 + $0x1390] sm:$0xff]  ;;  %v382_v60 = vld [vmem:[%s8981_s1 + $0xaf8] sm:$0xff]  ;;  %v492_v61 = vld [vmem:[%s8981_s1 + $0xe68] sm:$0xff] }
  0x96   :  { %1701 = vmatpush.msra.mxu1 %v242_v62  ;;  %1721 = vmatpush.msra.mxu2 %v322_v63  ;;  %v572_v62 = vld [vmem:[%s8981_s1 + $0x10e8] sm:$0xff] }
  0x97   :  { %1668 = vmatpush.msra.mxu3 %v47_v4  ;;  %1682 = vmatpush.msra.mxu0 %v157_v5  ;;  %v652_v63 = vld [vmem:[%s8981_s1 + $0x1368] sm:$0xff]  ;;  %v377_v4 = vld [vmem:[%s8981_s1 + $0xad0] sm:$0xff]  ;;  %v487_v5 = vld [vmem:[%s8981_s1 + $0xe40] sm:$0xff] }
  0x98   :  { %1702 = vmatpush.msra.mxu1 %v237_v6  ;;  %1722 = vmatpush.msra.mxu2 %v317_v7  ;;  %v567_v6 = vld [vmem:[%s8981_s1 + $0x10c0] sm:$0xff] }
  0x99   :  { %1669 = vmatpush.msra.mxu3 %v42_v8  ;;  %1683 = vmatpush.msra.mxu0 %v152_v9  ;;  %v647_v7 = vld [vmem:[%s8981_s1 + $0x1340] sm:$0xff]  ;;  %v372_v8 = vld [vmem:[%s8981_s1 + $0xaa8] sm:$0xff]  ;;  %v482_v9 = vld [vmem:[%s8981_s1 + $0xe18] sm:$0xff] }
  0x9a   :  { %1703 = vmatpush.msra.mxu1 %v232_v10  ;;  %1723 = vmatpush.msra.mxu2 %v312_v11  ;;  %v562_v10 = vld [vmem:[%s8981_s1 + $0x1098] sm:$0xff] }
  0x9b   :  { %1670 = vmatpush.msra.mxu3 %v37_v12  ;;  %1684 = vmatpush.msra.mxu0 %v147_v13  ;;  %v642_v11 = vld [vmem:[%s8981_s1 + $0x1318] sm:$0xff]  ;;  %v367_v12 = vld [vmem:[%s8981_s1 + $0xa80] sm:$0xff]  ;;  %v477_v13 = vld [vmem:[%s8981_s1 + $0xdf0] sm:$0xff] }
  0x9c   :  { %1704 = vmatpush.msra.mxu1 %v227_v14  ;;  %1724 = vmatpush.msra.mxu2 %v307_v15  ;;  %v557_v14 = vld [vmem:[%s8981_s1 + $0x1070] sm:$0xff] }
  0x9d   :  { %1671 = vmatpush.msra.mxu3 %v32_v16  ;;  %1685 = vmatpush.msra.mxu0 %v142_v17  ;;  %v637_v15 = vld [vmem:[%s8981_s1 + $0x12f0] sm:$0xff]  ;;  %v362_v16 = vld [vmem:[%s8981_s1 + $0xa58] sm:$0xff]  ;;  %v472_v17 = vld [vmem:[%s8981_s1 + $0xdc8] sm:$0xff] }
  0x9e   :  { %1705 = vmatpush.msra.mxu1 %v222_v18  ;;  %1725 = vmatpush.msra.mxu2 %v302_v19  ;;  %v552_v18 = vld [vmem:[%s8981_s1 + $0x1048] sm:$0xff] }
  0x9f   :  { %1736 = vmatpush.msrb.mxu3 %v427_v20  ;;  %1686 = vmatpush.msra.mxu0 %v137_v21  ;;  %v632_v19 = vld [vmem:[%s8981_s1 + $0x12c8] sm:$0xff]  ;;  %v357_v20 = vld [vmem:[%s8981_s1 + $0xa30] sm:$0xff]  ;;  %v467_v21 = vld [vmem:[%s8981_s1 + $0xda0] sm:$0xff] }
  0xa0   :  { %1706 = vmatpush.msra.mxu1 %v217_v22  ;;  %1726 = vmatpush.msra.mxu2 %v297_v23  ;;  %v547_v22 = vld [vmem:[%s8981_s1 + $0x1020] sm:$0xff] }
  0xa1   :  { %1737 = vmatpush.msrb.mxu3 %v422_v24  ;;  %1687 = vmatpush.msra.mxu0 %v132_v25  ;;  %v627_v23 = vld [vmem:[%s8981_s1 + $0x12a0] sm:$0xff]  ;;  %v352_v24 = vld [vmem:[%s8981_s1 + $0xa08] sm:$0xff]  ;;  %v462_v25 = vld [vmem:[%s8981_s1 + $0xd78] sm:$0xff] }
  0xa2   :  { %1707 = vmatpush.msra.mxu1 %v212_v26  ;;  %1727 = vmatpush.msra.mxu2 %v292_v27  ;;  %v542_v26 = vld [vmem:[%s8981_s1 + $0xff8] sm:$0xff] }
  0xa3   :  { %1738 = vmatpush.msrb.mxu3 %v417_v28  ;;  %1688 = vmatpush.msra.mxu0 %v127_v29  ;;  %v622_v27 = vld [vmem:[%s8981_s1 + $0x1278] sm:$0xff]  ;;  %v457_v28 = vld [vmem:[%s8981_s1 + $0xd50] sm:$0xff]  ;;  %v747_v29 = vld [vmem:[%s8981_s1 + $0x1660] sm:$0xff] }
  0xa4   :  { %1708 = vmatpush.msra.mxu1 %v207_v30  ;;  %1728 = vmatpush.msra.mxu2 %v287_v31  ;;  %v537_v30 = vld [vmem:[%s8981_s1 + $0xfd0] sm:$0xff] }
  0xa5   :  { %1739 = vmatpush.msrb.mxu3 %v412_v32  ;;  %1689 = vmatpush.msra.mxu0 %v122_v33  ;;  %v617_v31 = vld [vmem:[%s8981_s1 + $0x1250] sm:$0xff]  ;;  %v452_v32 = vld [vmem:[%s8981_s1 + $0xd28] sm:$0xff]  ;;  %v742_v33 = vld [vmem:[%s8981_s1 + $0x1638] sm:$0xff] }
  0xa6   :  { %1709 = vmatpush.msra.mxu1 %v202_v34  ;;  %1729 = vmatpush.msra.mxu2 %v282_v35  ;;  %v532_v34 = vld [vmem:[%s8981_s1 + $0xfa8] sm:$0xff] }
  0xa7   :  { %1740 = vmatpush.msrb.mxu3 %v407_v36  ;;  %1690 = vmatpush.msra.mxu0 %v117_v37  ;;  %v612_v35 = vld [vmem:[%s8981_s1 + $0x1228] sm:$0xff]  ;;  %v447_v36 = vld [vmem:[%s8981_s1 + $0xd00] sm:$0xff] }
  0xa8   :  { %1710 = vmatpush.msra.mxu1 %v197_v38  ;;  %1730 = vmatpush.msra.mxu2 %v277_v39  ;;  %v1281_v37 = vld [vmem:[%s8982_s2] sm:$0x1f]  ;;  %v737_v38 = vld [vmem:[%s8981_s1 + $0x1610] sm:$0xff] }
  0xa9   :  { %1741 = vmatpush.msrb.mxu3 %v402_v40  ;;  %1691 = vmatpush.msra.mxu0 %v112_v41  ;;  %v527_v39 = vld [vmem:[%s8981_s1 + $0xf80] sm:$0xff]  ;;  %v442_v41 = vld [vmem:[%s8981_s1 + $0xcd8] sm:$0xff] }
  0xaa   :  { %1711 = vmatpush.msra.mxu1 %v192_v42  ;;  %1731 = vmatpush.msra.mxu2 %v272_v43  ;;  %v607_v40 = vld [vmem:[%s8981_s1 + $0x1200] sm:$0xff]  ;;  %v732_v42 = vld [vmem:[%s8981_s1 + $0x15e8] sm:$0xff]  ;;  %v522_v43 = vld [vmem:[%s8981_s1 + $0xf58] sm:$0xff] }
  0xab   :  { %1742 = vmatpush.msrb.mxu3 %v397_v44  ;;  %1756 = vmatpush.msrb.mxu0 %v507_v45  ;;  %v1283_v44 = vperm.slane %v1281_v37, 0  ;;  %v602_v45 = vld [vmem:[%s8981_s1 + $0x11d8] sm:$0xff] }
  0xac   :  { %1776 = vmatpush.msrb.mxu1 %v587_v46  ;;  %1796 = vmatpush.msrb.mxu2 %v667_v47  ;;  %v437_v46 = vld [vmem:[%s8981_s1 + $0xcb0] sm:$0xff]  ;;  %v682_v37 = vld [vmem:[%s8981_s1 + $0x1458] sm:$0xff] }
  0xad   :  { %1743 = vmatpush.msrb.mxu3 %v392_v52  ;;  %1757 = vmatpush.msrb.mxu0 %v502_v53  ;;  %v727_v52 = vld [vmem:[%s8981_s1 + $0x15c0] sm:$0xff]  ;;  %v517_v53 = vld [vmem:[%s8981_s1 + $0xf30] sm:$0xff] }
  0xae   :  { %1777 = vmatpush.msrb.mxu1 %v582_v54  ;;  %1797 = vmatpush.msrb.mxu2 %v662_v55  ;;  %v597_v54 = vld [vmem:[%s8981_s1 + $0x11b0] sm:$0xff]  ;;  %v432_v55 = vld [vmem:[%s8981_s1 + $0xc88] sm:$0xff] }
  0xaf   :  { %1744 = vmatpush.msrb.mxu3 %v387_v56  ;;  %1758 = vmatpush.msrb.mxu0 %v497_v57  ;;  %v722_v56 = vld [vmem:[%s8981_s1 + $0x1598] sm:$0xff]  ;;  %v512_v57 = vld [vmem:[%s8981_s1 + $0xf08] sm:$0xff] }
  0xb0   :  { %1778 = vmatpush.msrb.mxu1 %v577_v58  ;;  %1798 = vmatpush.msrb.mxu2 %v657_v59  ;;  %v592_v59 = vld [vmem:[%s8981_s1 + $0x1188] sm:$0xff] }
  0xb1   :  { %1745 = vmatpush.msrb.mxu3 %v382_v60  ;;  %1759 = vmatpush.msrb.mxu0 %v492_v61  ;;  %v717_v61 = vld [vmem:[%s8981_s1 + $0x1570] sm:$0xff] }
  0xb2   :  { %1779 = vmatpush.msrb.mxu1 %v572_v62  ;;  %1799 = vmatpush.msrb.mxu2 %v652_v63  ;;  %v827_v62 = vld [vmem:[%s8981_s1 + $0x18e0] sm:$0xff] }
  0xb3   :  { %1746 = vmatpush.msrb.mxu3 %v377_v4  ;;  %1760 = vmatpush.msrb.mxu0 %v487_v5  ;;  %v907_v63 = vld [vmem:[%s8981_s1 + $0x1b60] sm:$0xff] }
  0xb4   :  { %1780 = vmatpush.msrb.mxu1 %v567_v6  ;;  %1800 = vmatpush.msrb.mxu2 %v647_v7  ;;  %v987_v4 = vld [vmem:[%s8981_s1 + $0x1de0] sm:$0xff]  ;;  %v822_v6 = vld [vmem:[%s8981_s1 + $0x18b8] sm:$0xff] }
  0xb5   :  { %1747 = vmatpush.msrb.mxu3 %v372_v8  ;;  %1761 = vmatpush.msrb.mxu0 %v482_v9  ;;  %v712_v8 = vld [vmem:[%s8981_s1 + $0x1548] sm:$0xff]  ;;  %v902_v9 = vld [vmem:[%s8981_s1 + $0x1b38] sm:$0xff] }
  0xb6   :  { %1781 = vmatpush.msrb.mxu1 %v562_v10  ;;  %1801 = vmatpush.msrb.mxu2 %v642_v11  ;;  %v982_v10 = vld [vmem:[%s8981_s1 + $0x1db8] sm:$0xff]  ;;  %v817_v11 = vld [vmem:[%s8981_s1 + $0x1890] sm:$0xff] }
  0xb7   :  { %1748 = vmatpush.msrb.mxu3 %v367_v12  ;;  %1762 = vmatpush.msrb.mxu0 %v477_v13  ;;  %v707_v12 = vld [vmem:[%s8981_s1 + $0x1520] sm:$0xff]  ;;  %v897_v13 = vld [vmem:[%s8981_s1 + $0x1b10] sm:$0xff] }
  0xb8   :  { %1782 = vmatpush.msrb.mxu1 %v557_v14  ;;  %1802 = vmatpush.msrb.mxu2 %v637_v15  ;;  %v977_v15 = vld [vmem:[%s8981_s1 + $0x1d90] sm:$0xff] }
  0xb9   :  { %1749 = vmatpush.msrb.mxu3 %v362_v16  ;;  %1763 = vmatpush.msrb.mxu0 %v472_v17  ;;  %v812_v16 = vld [vmem:[%s8981_s1 + $0x1868] sm:$0xff] }
  0xba   :  { %1783 = vmatpush.msrb.mxu1 %v552_v18  ;;  %1803 = vmatpush.msrb.mxu2 %v632_v19  ;;  %v702_v18 = vld [vmem:[%s8981_s1 + $0x14f8] sm:$0xff]  ;;  %v892_v19 = vld [vmem:[%s8981_s1 + $0x1ae8] sm:$0xff] }
  0xbb   :  { %1750 = vmatpush.msrb.mxu3 %v357_v20  ;;  %1764 = vmatpush.msrb.mxu0 %v467_v21  ;;  %v972_v20 = vld [vmem:[%s8981_s1 + $0x1d68] sm:$0xff]  ;;  %v807_v21 = vld [vmem:[%s8981_s1 + $0x1840] sm:$0xff] }
  0xbc   :  { %1784 = vmatpush.msrb.mxu1 %v547_v22  ;;  %1804 = vmatpush.msrb.mxu2 %v627_v23  ;;  %v697_v22 = vld [vmem:[%s8981_s1 + $0x14d0] sm:$0xff] }
  0xbd   :  { %1751 = vmatpush.msrb.mxu3 %v352_v24  ;;  %1765 = vmatpush.msrb.mxu0 %v462_v25  ;;  %v887_v24 = vld [vmem:[%s8981_s1 + $0x1ac0] sm:$0xff] }
  0xbe   :  { %1785 = vmatpush.msrb.mxu1 %v542_v26  ;;  %1805 = vmatpush.msrb.mxu2 %v622_v27  ;;  %v967_v25 = vld [vmem:[%s8981_s1 + $0x1d40] sm:$0xff]  ;;  %v692_v27 = vld [vmem:[%s8981_s1 + $0x14a8] sm:$0xff] }
  0xbf   :  { %1672 = vmatmul.f32.vlgmr.msra.gmra.mxu3 %v4268_v48  ;;  %1766 = vmatpush.msrb.mxu0 %v457_v28  ;;  %v1353_v47 = vpop.f32.mrf.mxu0  ;;  %v802_v28 = vld [vmem:[%s8981_s1 + $0x1818] sm:$0xff] }
  0xc0   :  { %1816 = vmatpush.msra.mxu3 %v747_v29  ;;  %1786 = vmatpush.msrb.mxu1 %v537_v30  ;;  %v1354_v58 = vadd.f32 %v1353_v47, %v1283_v44  ;;  %v1373_v60 = vpop.f32.mrf.mxu1  ;;  %v882_v29 = vld [vmem:[%s8981_s1 + $0x1a98] sm:$0xff]  ;;  %v787_v44 = vld [vmem:[%s8981_s1 + $0x17a0] sm:$0xff]  ;;  %v672_v47 = vld [vmem:[%s8981_s1 + $0x1408] sm:$0xff] }
  0xc1   :  { %1806 = vmatpush.msrb.mxu2 %v617_v31  ;;  %1767 = vmatpush.msrb.mxu0 %v452_v32  ;;  %v962_v30 = vld [vmem:[%s8981_s1 + $0x1d18] sm:$0xff]  ;;  %v687_v32 = vld [vmem:[%s8981_s1 + $0x1480] sm:$0xff] }
  0xc2   :  { %1817 = vmatpush.msra.mxu3 %v742_v33  ;;  %1787 = vmatpush.msrb.mxu1 %v532_v34  ;;  %v1374_v5 = vadd.f32 %v1373_v60, %v1354_v58  ;;  %v797_v33 = vld [vmem:[%s8981_s1 + $0x17f0] sm:$0xff]  ;;  %v1067_v58 = vld [vmem:[%s8981_s1 + $0x2060] sm:$0xff] }
  0xc3   :  { %1807 = vmatpush.msrb.mxu2 %v612_v35  ;;  %1768 = vmatpush.msrb.mxu0 %v447_v36  ;;  %v877_v35 = vld [vmem:[%s8981_s1 + $0x1a70] sm:$0xff] }
  0xc4   :  { %1818 = vmatpush.msra.mxu3 %v737_v38  ;;  %1788 = vmatpush.msrb.mxu1 %v527_v39  ;;  %v957_v36 = vld [vmem:[%s8981_s1 + $0x1cf0] sm:$0xff]  ;;  %v792_v38 = vld [vmem:[%s8981_s1 + $0x17c8] sm:$0xff] }
  0xc5   :  { %1808 = vmatpush.msrb.mxu2 %v607_v40  ;;  %1769 = vmatpush.msrb.mxu0 %v442_v41  ;;  %v872_v40 = vld [vmem:[%s8981_s1 + $0x1a48] sm:$0xff]  ;;  %v937_v60 = vld [vmem:[%s8981_s1 + $0x1c50] sm:$0xff] }
  0xc6   :  { %1819 = vmatpush.msra.mxu3 %v732_v42  ;;  %1789 = vmatpush.msrb.mxu1 %v522_v43  ;;  %v952_v41 = vld [vmem:[%s8981_s1 + $0x1cc8] sm:$0xff]  ;;  %v677_v43 = vld [vmem:[%s8981_s1 + $0x1430] sm:$0xff] }
  0xc7   :  { %1809 = vmatpush.msrb.mxu2 %v602_v45  ;;  %1770 = vmatpush.msrb.mxu0 %v437_v46  ;;  %v1393_v7 = vpop.f32.mrf.mxu2  ;;  %v1413_v17 = vpop.f32.mrf.mxu3  ;;  %v867_v45 = vld [vmem:[%s8981_s1 + $0x1a20] sm:$0xff] }
  0xc8   :  { %1820 = vmatpush.msra.mxu3 %v727_v52  ;;  %1790 = vmatpush.msrb.mxu1 %v517_v53  ;;  %v1394_v14 = vadd.f32 %v1393_v7, %v1374_v5  ;;  %v947_v46 = vld [vmem:[%s8981_s1 + $0x1ca0] sm:$0xff]  ;;  %v782_v52 = vld [vmem:[%s8981_s1 + $0x1778] sm:$0xff]  ;;  %v852_v5 = vld [vmem:[%s8981_s1 + $0x19a8] sm:$0xff] }
  0xc9   :  { %1810 = vmatpush.msrb.mxu2 %v597_v54  ;;  %1771 = vmatpush.msrb.mxu0 %v432_v55  ;;  %v862_v54 = vld [vmem:[%s8981_s1 + $0x19f8] sm:$0xff]  ;;  %v767_v7 = vld [vmem:[%s8981_s1 + $0x1700] sm:$0xff] }
  0xca   :  { %1821 = vmatpush.msra.mxu3 %v722_v56  ;;  %1791 = vmatpush.msrb.mxu1 %v512_v57  ;;  %v1414_v23 = vadd.f32 %v1413_v17, %v1394_v14  ;;  %v942_v55 = vld [vmem:[%s8981_s1 + $0x1c78] sm:$0xff]  ;;  %v777_v57 = vld [vmem:[%s8981_s1 + $0x1750] sm:$0xff]  ;;  %v1052_v14 = vld [vmem:[%s8981_s1 + $0x1fe8] sm:$0xff] }
  0xcb   :  { %1811 = vmatpush.msrb.mxu2 %v592_v59  ;;  %1692 = vmatmul.f32.vlgmr.msra.gmra.mxu0 %v4270_v49  ;;  %v857_v59 = vld [vmem:[%s8981_s1 + $0x19d0] sm:$0xff]  ;;  %v922_v17 = vld [vmem:[%s8981_s1 + $0x1bd8] sm:$0xff] }
  0xcc   :  { %1712 = vmatmul.f32.vlgmr.msra.gmra.mxu1 %v4272_v50  ;;  %1732 = vmatmul.f32.vlgmr.msra.gmra.mxu2 %v4274_v51  ;;  %v1433_v26 = vpop.f32.mrf.mxu0 }
  0xcd   :  { %1822 = vmatpush.msra.mxu3 %v717_v61  ;;  %1836 = vmatpush.msra.mxu0 %v827_v62  ;;  %v1434_v31 = vadd.f32 %v1433_v26, %v1414_v23  ;;  %v772_v61 = vld [vmem:[%s8981_s1 + $0x1728] sm:$0xff] }
  0xce   :  { %1856 = vmatpush.msra.mxu1 %v907_v63  ;;  %1876 = vmatpush.msra.mxu2 %v987_v4  ;;  %v3835_v63 = vld.sshfl [vmem:[#allocation1] sm:$0xff pattern:$0x73625140]  ;;  %v1062_v4 = vld [vmem:[%s8981_s1 + $0x2038] sm:$0xff]  ;;  %v752_v23 = vld [vmem:[%s8981_s1 + $0x1688] sm:$0xff] }
  0xcf   :  { %1752 = vmatmul.f32.vlgmr.msrb.gmra.mxu3 %v4314_v1  ;;  %1837 = vmatpush.msra.mxu0 %v822_v6  ;;  %v1453_v34 = vpop.f32.mrf.mxu1  ;;  %v932_v6 = vld [vmem:[%s8981_s1 + $0x1c28] sm:$0xff] }
  0xd0   :  { %1823 = vmatpush.msra.mxu3 %v712_v8  ;;  %1857 = vmatpush.msra.mxu1 %v902_v9  ;;  %v1454_v39 = vadd.f32 %v1453_v34, %v1434_v31  ;;  %v1473_v42 = vpop.f32.mrf.mxu2  ;;  %v1057_v9 = vld [vmem:[%s8981_s1 + $0x2010] sm:$0xff]  ;;  %v832_v26 = vld [vmem:[%s8981_s1 + $0x1908] sm:$0xff]  ;;  %v1147_v31 = vld [vmem:[%s8981_s1 + $0x22e0] sm:$0xff] }
  0xd1   :  { %1877 = vmatpush.msra.mxu2 %v982_v10  ;;  %1838 = vmatpush.msra.mxu0 %v817_v11  ;;  %v847_v10 = vld [vmem:[%s8981_s1 + $0x1980] sm:$0xff]  ;;  %v5335_v34 = vld.sshfl [vmem:[#allocation1 + $0x8] sm:$0xff pattern:$0x73625140] }
  0xd2   :  { %1824 = vmatpush.msra.mxu3 %v707_v12  ;;  %1858 = vmatpush.msra.mxu1 %v897_v13  ;;  %v1474_v53 = vadd.f32 %v1473_v42, %v1454_v39  ;;  %v927_v12 = vld [vmem:[%s8981_s1 + $0x1c00] sm:$0xff]  ;;  %v762_v13 = vld [vmem:[%s8981_s1 + $0x16d8] sm:$0xff] }
  0xd3   :  { %1878 = vmatpush.msra.mxu2 %v977_v15  ;;  %1839 = vmatpush.msra.mxu0 %v812_v16  ;;  %v1493_v56 = vpop.f32.mrf.mxu3  ;;  %v842_v15 = vld [vmem:[%s8981_s1 + $0x1958] sm:$0xff]  ;;  %v1027_v42 = vld [vmem:[%s8981_s1 + $0x1f20] sm:$0xff] }
  0xd4   :  { %1825 = vmatpush.msra.mxu3 %v702_v18  ;;  %1859 = vmatpush.msra.mxu1 %v892_v19  ;;  %v1494_v62 = vadd.f32 %v1493_v56, %v1474_v53  ;;  %v757_v18 = vld [vmem:[%s8981_s1 + $0x16b0] sm:$0xff]  ;;  %v1047_v19 = vld [vmem:[%s8981_s1 + $0x1fc0] sm:$0xff]  ;;  %v1222_v39 = vld [vmem:[%s8981_s1 + $0x2538] sm:$0xff] }
  0xd5   :  { %1879 = vmatpush.msra.mxu2 %v972_v20  ;;  %1840 = vmatpush.msra.mxu0 %v807_v21  ;;  %v837_v20 = vld [vmem:[%s8981_s1 + $0x1930] sm:$0xff]  ;;  %v1262_v53 = vld [vmem:[%s8981_s1 + $0x2678] sm:$0xff]  ;;  %v1207_v56 = vld [vmem:[%s8981_s1 + $0x24c0] sm:$0xff] }
  0xd6   :  { %1812 = vmatmul.f32.vlgmr.msrb.gmra.mxu2 %v4316_v2  ;;  %1826 = vmatpush.msra.mxu3 %v697_v22  ;;  %v917_v22 = vld [vmem:[%s8981_s1 + $0x1bb0] sm:$0xff] }
  0xd7   :  { %1860 = vmatpush.msra.mxu1 %v887_v24  ;;  %1880 = vmatpush.msra.mxu2 %v967_v25  ;;  %v1042_v25 = vld [vmem:[%s8981_s1 + $0x1f98] sm:$0xff] }
  0xd8   :  { %1772 = vmatmul.f32.vlgmr.msrb.gmra.mxu0 %v4318_v3  ;;  %1827 = vmatpush.msra.mxu3 %v692_v27 }
  0xd9   :  { %1841 = vmatpush.msra.mxu0 %v802_v28  ;;  %1861 = vmatpush.msra.mxu1 %v882_v29  ;;  %v912_v28 = vld [vmem:[%s8981_s1 + $0x1b88] sm:$0xff]  ;;  %v1037_v29 = vld [vmem:[%s8981_s1 + $0x1f70] sm:$0xff] }
  0xda   :  { %1881 = vmatpush.msra.mxu2 %v962_v30  ;;  %1792 = vmatmul.f32.vlgmr.msrb.gmra.mxu1 %v4312_v0 }
  0xdb   :  { %1828 = vmatpush.msra.mxu3 %v687_v32  ;;  %1842 = vmatpush.msra.mxu0 %v797_v33  ;;  %v1227_v32 = vld [vmem:[%s8981_s1 + $0x2560] sm:$0xff] }
  0xdc   :  { %1862 = vmatpush.msra.mxu1 %v877_v35  ;;  %1882 = vmatpush.msra.mxu2 %v957_v36  ;;  %v1277_v35 = vld [vmem:[%s8981_s1 + $0x26f0] sm:$0xff]  ;;  %v3837_v36 = vld.sshfl [vmem:[#allocation1 + $0x18] sm:$0xff pattern:$0x73625140] }
  0xdd   :  { %1829 = vmatpush.msra.mxu3 %v682_v37  ;;  %1843 = vmatpush.msra.mxu0 %v792_v38  ;;  %v1032_v37 = vld [vmem:[%s8981_s1 + $0x1f48] sm:$0xff]  ;;  %v1142_v38 = vld [vmem:[%s8981_s1 + $0x22b8] sm:$0xff] }
  0xde   :  { %1863 = vmatpush.msra.mxu1 %v872_v40  ;;  %1883 = vmatpush.msra.mxu2 %v952_v41  ;;  %v1272_v40 = vld [vmem:[%s8981_s1 + $0x26c8] sm:$0xff]  ;;  %v3838_v41 = vld.sshfl [vmem:[#allocation1 + $0x10] sm:$0xff pattern:$0x73625140] }
  0xdf   :  { %1830 = vmatpush.msra.mxu3 %v677_v43  ;;  %1844 = vmatpush.msra.mxu0 %v787_v44  ;;  %v1137_v43 = vld [vmem:[%s8981_s1 + $0x2290] sm:$0xff] }
  0xe0   :  { %1864 = vmatpush.msra.mxu1 %v867_v45  ;;  %1884 = vmatpush.msra.mxu2 %v947_v46  ;;  %v1217_v44 = vld [vmem:[%s8981_s1 + $0x2510] sm:$0xff]  ;;  %v1267_v45 = vld [vmem:[%s8981_s1 + $0x26a0] sm:$0xff]  ;;  %v1022_v46 = vld [vmem:[%s8981_s1 + $0x1ef8] sm:$0xff] }
  0xe1   :  { %1831 = vmatpush.msra.mxu3 %v672_v47  ;;  %1845 = vmatpush.msra.mxu0 %v782_v52  ;;  %v1132_v47 = vld [vmem:[%s8981_s1 + $0x2268] sm:$0xff] }
  0xe2   :  { %1865 = vmatpush.msra.mxu1 %v862_v54  ;;  %1885 = vmatpush.msra.mxu2 %v942_v55  ;;  %v1212_v52 = vld [vmem:[%s8981_s1 + $0x24e8] sm:$0xff]  ;;  %v1017_v54 = vld [vmem:[%s8981_s1 + $0x1ed0] sm:$0xff]  ;;  %v1127_v55 = vld [vmem:[%s8981_s1 + $0x2240] sm:$0xff] }
  0xe3   :  { %1832 = vmatmul.f32.vlgmr.msra.gmra.mxu3 %v3835_v63  ;;  %1846 = vmatpush.msra.mxu0 %v777_v57  ;;  %v1257_v57 = vld [vmem:[%s8981_s1 + $0x2650] sm:$0xff] }
  0xe4   :  { %1896 = vmatpush.msrb.mxu3 %v1067_v58  ;;  %1866 = vmatpush.msra.mxu1 %v857_v59  ;;  %v1513_v8 = vpop.f32.mrf.mxu0  ;;  %v1012_v58 = vld [vmem:[%s8981_s1 + $0x1ea8] sm:$0xff]  ;;  %v1122_v59 = vld [vmem:[%s8981_s1 + $0x2218] sm:$0xff]  ;;  %v1117_v63 = vld [vmem:[%s8981_s1 + $0x21f0] sm:$0xff] }
  0xe5   :  { %1886 = vmatpush.msra.mxu2 %v937_v60  ;;  %1847 = vmatpush.msra.mxu0 %v772_v61  ;;  %v1514_v11 = vadd.f32 %v1513_v8, %v1494_v62  ;;  %v1202_v60 = vld [vmem:[%s8981_s1 + $0x2498] sm:$0xff]  ;;  %v1252_v61 = vld [vmem:[%s8981_s1 + $0x2628] sm:$0xff]  ;;  %v1007_v62 = vld [vmem:[%s8981_s1 + $0x1e80] sm:$0xff] }
  0xe6   :  { %1897 = vmatpush.msrb.mxu3 %v1062_v4  ;;  %1867 = vmatpush.msra.mxu1 %v852_v5  ;;  %v1197_v4 = vld [vmem:[%s8981_s1 + $0x2470] sm:$0xff]  ;;  %v1247_v5 = vld [vmem:[%s8981_s1 + $0x2600] sm:$0xff]  ;;  %v1192_v8 = vld [vmem:[%s8981_s1 + $0x2448] sm:$0xff] }
  0xe7   :  { %1887 = vmatpush.msra.mxu2 %v932_v6  ;;  %1848 = vmatpush.msra.mxu0 %v767_v7  ;;  %v1533_v16 = vpop.f32.mrf.mxu1  ;;  %v1002_v6 = vld [vmem:[%s8981_s1 + $0x1e58] sm:$0xff]  ;;  %v1112_v7 = vld [vmem:[%s8981_s1 + $0x21c8] sm:$0xff] }
  0xe8   :  { %1898 = vmatpush.msrb.mxu3 %v1057_v9  ;;  %1868 = vmatpush.msra.mxu1 %v847_v10  ;;  %v1534_v21 = vadd.f32 %v1533_v16, %v1514_v11  ;;  %v1242_v9 = vld [vmem:[%s8981_s1 + $0x25d8] sm:$0xff]  ;;  %v997_v10 = vld [vmem:[%s8981_s1 + $0x1e30] sm:$0xff]  ;;  %v1107_v11 = vld [vmem:[%s8981_s1 + $0x21a0] sm:$0xff] }
  0xe9   :  { %1888 = vmatpush.msra.mxu2 %v927_v12  ;;  %1849 = vmatpush.msra.mxu0 %v762_v13  ;;  %v1187_v12 = vld [vmem:[%s8981_s1 + $0x2420] sm:$0xff]  ;;  %v1237_v13 = vld [vmem:[%s8981_s1 + $0x25b0] sm:$0xff]  ;;  %v1182_v16 = vld [vmem:[%s8981_s1 + $0x23f8] sm:$0xff] }
  0xea   :  { %1899 = vmatpush.msrb.mxu3 %v1052_v14  ;;  %1869 = vmatpush.msra.mxu1 %v842_v15  ;;  %v1553_v24 = vpop.f32.mrf.mxu2  ;;  %v992_v14 = vld [vmem:[%s8981_s1 + $0x1e08] sm:$0xff]  ;;  %v1102_v15 = vld [vmem:[%s8981_s1 + $0x2178] sm:$0xff] }
  0xeb   :  { %1889 = vmatpush.msra.mxu2 %v922_v17  ;;  %1850 = vmatpush.msra.mxu0 %v757_v18  ;;  %v1554_v27 = vadd.f32 %v1553_v24, %v1534_v21  ;;  %v1232_v17 = vld [vmem:[%s8981_s1 + $0x2588] sm:$0xff]  ;;  %v1177_v21 = vld [vmem:[%s8981_s1 + $0x23d0] sm:$0xff]  ;;  %v183_v24 = vld [vmem:[%s8981_s1 + $0x4c0] sm:$0xff] }
  0xec   :  { %1900 = vmatpush.msrb.mxu3 %v1047_v19  ;;  %1870 = vmatpush.msra.mxu1 %v837_v20  ;;  %v108_v18 = vld [vmem:[%s8981_s1 + $0x268] sm:$0xff]  ;;  %v1097_v20 = vld [vmem:[%s8981_s1 + $0x2150] sm:$0xff] }
  0xed   :  { %1890 = vmatpush.msra.mxu2 %v917_v22  ;;  %1851 = vmatpush.msra.mxu0 %v752_v23  ;;  %v1573_v30 = vpop.f32.mrf.mxu3  ;;  %v188_v19 = vld [vmem:[%s8981_s1 + $0x4e8] sm:$0xff]  ;;  %v103_v22 = vld [vmem:[%s8981_s1 + $0x240] sm:$0xff] }
  0xee   :  { %1901 = vmatpush.msrb.mxu3 %v1042_v25  ;;  %1871 = vmatpush.msra.mxu1 %v832_v26  ;;  %v5333_v33 = vadd.f32 %v1573_v30, %v1554_v27  ;;  %v3839_v23 = vld.sshfl [vmem:[#allocation1 + $0x20] sm:$0xff pattern:$0x73625140]  ;;  %v1092_v25 = vld [vmem:[%s8981_s1 + $0x2128] sm:$0xff]  ;;  %v98_v27 = vld [vmem:[%s8981_s1 + $0x218] sm:$0xff] }
  0xef   :  { %1891 = vmatpush.msra.mxu2 %v912_v28  ;;  %1852 = vmatmul.f32.vlgmr.msra.gmra.mxu0 %v5335_v34  ;;  %v1172_v26 = vld [vmem:[%s8981_s1 + $0x23a8] sm:$0xff]  ;;  %v1087_v30 = vld [vmem:[%s8981_s1 + $0x2100] sm:$0xff] }
  0xf0   :  { %1892 = vmatmul.f32.vlgmr.msra.gmra.mxu2 %v3837_v36  ;;  %1902 = vmatpush.msrb.mxu3 %v1037_v29  ;;  %v178_v29 = vld [vmem:[%s8981_s1 + $0x498] sm:$0xff]  ;;  %v173_v36 = vld [vmem:[%s8981_s1 + $0x470] sm:$0xff] }
  0xf1   :  { %1916 = vmatpush.msrb.mxu0 %v1147_v31  ;;  %1936 = vmatpush.msrb.mxu1 %v1227_v32  ;;  %v1167_v32 = vld [vmem:[%s8981_s1 + $0x2380] sm:$0xff] }
  0xf2   :  { %1962 = vmatpush.msrb.mxu2 %v1277_v35  ;;  %1872 = vmatmul.f32.vlgmr.msra.gmra.mxu1 %v3838_v41  ;;  %v93_v35 = vld [vmem:[%s8981_s1 + $0x1f0] sm:$0xff]  ;;  %v168_v41 = vld [vmem:[%s8981_s1 + $0x448] sm:$0xff] }
  0xf3   :  { %1903 = vmatpush.msrb.mxu3 %v1032_v37  ;;  %1917 = vmatpush.msrb.mxu0 %v1142_v38  ;;  %v1162_v38 = vld [vmem:[%s8981_s1 + $0x2358] sm:$0xff] }
  0xf4   :  { %1937 = vmatpush.msrb.mxu1 %v1222_v39  ;;  %1963 = vmatpush.msrb.mxu2 %v1272_v40  ;;  %v88_v39 = vld [vmem:[%s8981_s1 + $0x1c8] sm:$0xff] }
  0xf5   :  { %1904 = vmatpush.msrb.mxu3 %v1027_v42  ;;  %1918 = vmatpush.msrb.mxu0 %v1137_v43  ;;  %v1077_v42 = vld [vmem:[%s8981_s1 + $0x20b0] sm:$0xff] }
  0xf6   :  { %1938 = vmatpush.msrb.mxu1 %v1217_v44  ;;  %1964 = vmatpush.msrb.mxu2 %v1267_v45  ;;  %v1157_v43 = vld [vmem:[%s8981_s1 + $0x2330] sm:$0xff]  ;;  %v83_v45 = vld [vmem:[%s8981_s1 + $0x1a0] sm:$0xff] }
  0xf7   :  { %1905 = vmatpush.msrb.mxu3 %v1022_v46  ;;  %1919 = vmatpush.msrb.mxu0 %v1132_v47  ;;  %v163_v46 = vld [vmem:[%s8981_s1 + $0x420] sm:$0xff] }
  0xf8   :  { %1939 = vmatpush.msrb.mxu1 %v1212_v52  ;;  %1965 = vmatpush.msrb.mxu2 %v1262_v53  ;;  %v1072_v52 = vld [vmem:[%s8981_s1 + $0x2088] sm:$0xff] }
  0xf9   :  { %1906 = vmatpush.msrb.mxu3 %v1017_v54  ;;  %1920 = vmatpush.msrb.mxu0 %v1127_v55  ;;  %v1152_v53 = vld [vmem:[%s8981_s1 + $0x2308] sm:$0xff]  ;;  %v3840_v54 = vld.sshfl [vmem:[#allocation1 + $0x38] sm:$0xff pattern:$0x73625140] }
  0xfa   :  { %1940 = vmatpush.msrb.mxu1 %v1207_v56  ;;  %1966 = vmatpush.msrb.mxu2 %v1257_v57  ;;  %v78_v55 = vld [vmem:[%s8981_s1 + $0x178] sm:$0xff] }
  0xfb   :  { %1907 = vmatpush.msrb.mxu3 %v1012_v58  ;;  %1921 = vmatpush.msrb.mxu0 %v1122_v59  ;;  %v158_v57 = vld [vmem:[%s8981_s1 + $0x3f8] sm:$0xff]  ;;  %v268_v58 = vld [vmem:[%s8981_s1 + $0x768] sm:$0xff] }
  0xfc   :  { %1941 = vmatpush.msrb.mxu1 %v1202_v60  ;;  %1967 = vmatpush.msrb.mxu2 %v1252_v61  ;;  %v348_v60 = vld [vmem:[%s8981_s1 + $0x9e8] sm:$0xff]  ;;  %v73_v61 = vld [vmem:[%s8981_s1 + $0x150] sm:$0xff] }
  0xfd   :  { %1908 = vmatpush.msrb.mxu3 %v1007_v62  ;;  %1922 = vmatpush.msrb.mxu0 %v1117_v63  ;;  %v5540_v62 = vld.sshfl [vmem:[#allocation1 + $0x28] sm:$0xff pattern:$0x73625140]  ;;  %v153_v63 = vld [vmem:[%s8981_s1 + $0x3d0] sm:$0xff] }
  0xfe   :  { %1942 = vmatpush.msrb.mxu1 %v1197_v4  ;;  %1968 = vmatpush.msrb.mxu2 %v1247_v5  ;;  %v263_v4 = vld [vmem:[%s8981_s1 + $0x740] sm:$0xff] }
  0xff   :  { %1909 = vmatpush.msrb.mxu3 %v1002_v6  ;;  %1923 = vmatpush.msrb.mxu0 %v1112_v7  ;;  %v343_v5 = vld [vmem:[%s8981_s1 + $0x9c0] sm:$0xff]  ;;  %v68_v6 = vld [vmem:[%s8981_s1 + $0x128] sm:$0xff] }
 0x100   :  { %1943 = vmatpush.msrb.mxu1 %v1192_v8  ;;  %1969 = vmatpush.msrb.mxu2 %v1242_v9  ;;  %v148_v7 = vld [vmem:[%s8981_s1 + $0x3a8] sm:$0xff]  ;;  %v3842_v8 = vld.sshfl [vmem:[#allocation1 + $0x30] sm:$0xff pattern:$0x73625140]  ;;  %v258_v9 = vld [vmem:[%s8981_s1 + $0x718] sm:$0xff] }
 0x101   :  { %1910 = vmatpush.msrb.mxu3 %v997_v10  ;;  %1924 = vmatpush.msrb.mxu0 %v1107_v11  ;;  %v338_v10 = vld [vmem:[%s8981_s1 + $0x998] sm:$0xff]  ;;  %v63_v11 = vld [vmem:[%s8981_s1 + $0x100] sm:$0xff] }
 0x102   :  { %1944 = vmatpush.msrb.mxu1 %v1187_v12  ;;  %1970 = vmatpush.msrb.mxu2 %v1237_v13  ;;  %v143_v12 = vld [vmem:[%s8981_s1 + $0x380] sm:$0xff]  ;;  %v253_v13 = vld [vmem:[%s8981_s1 + $0x6f0] sm:$0xff] }
 0x103   :  { %1911 = vmatpush.msrb.mxu3 %v992_v14  ;;  %1925 = vmatpush.msrb.mxu0 %v1102_v15  ;;  %v333_v14 = vld [vmem:[%s8981_s1 + $0x970] sm:$0xff]  ;;  %v58_v15 = vld [vmem:[%s8981_s1 + $0xd8] sm:$0xff] }
 0x104   :  { %1945 = vmatpush.msrb.mxu1 %v1182_v16  ;;  %1971 = vmatpush.msrb.mxu2 %v1232_v17  ;;  %v138_v16 = vld [vmem:[%s8981_s1 + $0x358] sm:$0xff]  ;;  %v248_v17 = vld [vmem:[%s8981_s1 + $0x6c8] sm:$0xff] }
 0x105   :  { %1912 = vmatmul.f32.vlgmr.msrb.gmra.mxu3 %v3839_v23  ;;  %1926 = vmatpush.msrb.mxu0 %v1097_v20  ;;  %v133_v20 = vld [vmem:[%s8981_s1 + $0x330] sm:$0xff]  ;;  %v48_v23 = vld [vmem:[%s8981_s1 + $0x88] sm:$0xff] }
 0x106   :  { %1976 = vmatpush.msra.mxu2 %v108_v18  ;;  %1996 = vmatpush.msra.mxu3 %v188_v19  ;;  %v1593_v28 = vpop.f32.mrf.mxu0  ;;  %v328_v18 = vld [vmem:[%s8981_s1 + $0x948] sm:$0xff]  ;;  %v53_v19 = vld [vmem:[%s8981_s1 + $0xb0] sm:$0xff] }
 0x107   :  { %1946 = vmatpush.msrb.mxu1 %v1177_v21  ;;  %v1594_v31 = vadd.f32 %v1593_v28, %v5333_v33  ;;  %1927 = vmatpush.msrb.mxu0 %v1092_v25  ;;  %v1082_v33 = vld [vmem:[%s8981_s1 + $0x20d8] sm:$0xff]  ;;  %v243_v21 = vld [vmem:[%s8981_s1 + $0x6a0] sm:$0xff] }
 0x108   :  { %1977 = vmatpush.msra.mxu2 %v103_v22  ;;  %1997 = vmatpush.msra.mxu3 %v183_v24  ;;  %v323_v22 = vld [vmem:[%s8981_s1 + $0x920] sm:$0xff]  ;;  %v128_v24 = vld [vmem:[%s8981_s1 + $0x308] sm:$0xff]  ;;  %v238_v25 = vld [vmem:[%s8981_s1 + $0x678] sm:$0xff] }
 0x109   :  { %1947 = vmatpush.msrb.mxu1 %v1172_v26  ;;  %v1613_v37 = vpop.f32.mrf.mxu1  ;;  %1928 = vmatpush.msrb.mxu0 %v1087_v30  ;;  %v318_v26 = vld [vmem:[%s8981_s1 + $0x8f8] sm:$0xff]  ;;  %v123_v28 = vld [vmem:[%s8981_s1 + $0x2e0] sm:$0xff]  ;;  %v313_v30 = vld [vmem:[%s8981_s1 + $0x8d0] sm:$0xff] }
 0x10a   :  { %1978 = vmatpush.msra.mxu2 %v98_v27  ;;  %1998 = vmatpush.msra.mxu3 %v178_v29  ;;  %v1614_v40 = vadd.f32 %v1613_v37, %v1594_v31  ;;  %v43_v27 = vld [vmem:[%s8981_s1 + $0x60] sm:$0xff]  ;;  %v233_v29 = vld [vmem:[%s8981_s1 + $0x650] sm:$0xff]  ;;  %v38_v31 = vld [vmem:[%s8981_s1 + $0x38] sm:$0xff] }
 0x10b   :  { %1948 = vmatpush.msrb.mxu1 %v1167_v32  ;;  %1929 = vmatpush.msrb.mxu0 %v1082_v33  ;;  %v118_v32 = vld [vmem:[%s8981_s1 + $0x2b8] sm:$0xff]  ;;  %v33_v33 = vld [vmem:[%s8981_s1 + $0x10] sm:$0xff] }
 0x10c   :  { %1979 = vmatpush.msra.mxu2 %v93_v35  ;;  %1999 = vmatpush.msra.mxu3 %v173_v36  ;;  %v1633_v44 = vpop.f32.mrf.mxu2  ;;  %v228_v35 = vld [vmem:[%s8981_s1 + $0x628] sm:$0xff]  ;;  %v113_v37 = vld [vmem:[%s8981_s1 + $0x290] sm:$0xff] }
 0x10d   :  { %1949 = vmatpush.msrb.mxu1 %v1162_v38  ;;  %v1634_v47 = vadd.f32 %v1633_v44, %v1614_v40  ;;  %1930 = vmatpush.msrb.mxu0 %v1077_v42  ;;  %v308_v36 = vld [vmem:[%s8981_s1 + $0x8a8] sm:$0xff]  ;;  %v223_v38 = vld [vmem:[%s8981_s1 + $0x600] sm:$0xff]  ;;  %v218_v42 = vld [vmem:[%s8981_s1 + $0x5d8] sm:$0xff] }
 0x10e   :  { %1980 = vmatpush.msra.mxu2 %v88_v39  ;;  %2000 = vmatpush.msra.mxu3 %v168_v41  ;;  %v303_v39 = vld [vmem:[%s8981_s1 + $0x880] sm:$0xff]  ;;  %v428_v40 = vld [vmem:[%s8981_s1 + $0xc68] sm:$0xff] }
 0x10f   :  { %1950 = vmatpush.msrb.mxu1 %v1157_v43  ;;  %3823 = vmatmul.msk.f32.vlgmr.msrb.gmra.mxu2 %vm1333_vm0, %v3840_v54  ;;  %v1653_v56 = vpop.f32.mrf.mxu3  ;;  %v508_v41 = vld [vmem:[%s8981_s1 + $0xee8] sm:$0xff]  ;;  %v298_v43 = vld [vmem:[%s8981_s1 + $0x858] sm:$0xff]  ;;  %v423_v44 = vld [vmem:[%s8981_s1 + $0xc40] sm:$0xff] }
 0x110   :  { %1981 = vmatpush.msra.mxu2 %v83_v45  ;;  %2001 = vmatpush.msra.mxu3 %v163_v46  ;;  %v5532_v59 = vadd.f32 %v1653_v56, %v1634_v47  ;;  %v503_v45 = vld [vmem:[%s8981_s1 + $0xec0] sm:$0xff]  ;;  %v213_v46 = vld [vmem:[%s8981_s1 + $0x5b0] sm:$0xff]  ;;  %v208_v54 = vld [vmem:[%s8981_s1 + $0x588] sm:$0xff] }
 0x111   :  { %1931 = vmatpush.msrb.mxu0 %v1072_v52  ;;  %1951 = vmatpush.msrb.mxu1 %v1152_v53  ;;  %v293_v47 = vld [vmem:[%s8981_s1 + $0x830] sm:$0xff]  ;;  %v418_v52 = vld [vmem:[%s8981_s1 + $0xc18] sm:$0xff] }
 0x112   :  { %1932 = vmatmul.f32.vlgmr.msrb.gmra.mxu0 %v5540_v62  ;;  %1982 = vmatpush.msra.mxu2 %v78_v55  ;;  %v498_v53 = vld [vmem:[%s8981_s1 + $0xe98] sm:$0xff]  ;;  %v288_v55 = vld [vmem:[%s8981_s1 + $0x808] sm:$0xff]  ;;  %v413_v56 = vld [vmem:[%s8981_s1 + $0xbf0] sm:$0xff] }
 0x113   :  { %2002 = vmatpush.msra.mxu3 %v158_v57  ;;  %2016 = vmatpush.msra.mxu0 %v268_v58  ;;  %v493_v57 = vld [vmem:[%s8981_s1 + $0xe70] sm:$0xff]  ;;  %v203_v58 = vld [vmem:[%s8981_s1 + $0x560] sm:$0xff] }
 0x114   :  { %2036 = vmatpush.msra.mxu1 %v348_v60  ;;  %1983 = vmatpush.msra.mxu2 %v73_v61  ;;  %v283_v60 = vld [vmem:[%s8981_s1 + $0x7e0] sm:$0xff]  ;;  %v408_v61 = vld [vmem:[%s8981_s1 + $0xbc8] sm:$0xff] }
 0x115   :  { %1952 = vmatmul.f32.vlgmr.msrb.gmra.mxu1 %v3842_v8  ;;  %2003 = vmatpush.msra.mxu3 %v153_v63  ;;  %v488_v63 = vld [vmem:[%s8981_s1 + $0xe48] sm:$0xff]  ;;  %v193_v8 = vld [vmem:[%s8981_s1 + $0x510] sm:$0xff] }
 0x116   :  { %2017 = vmatpush.msra.mxu0 %v263_v4  ;;  %2037 = vmatpush.msra.mxu1 %v343_v5  ;;  %v198_v4 = vld [vmem:[%s8981_s1 + $0x538] sm:$0xff] }
 0x117   :  { %1984 = vmatpush.msra.mxu2 %v68_v6  ;;  %2004 = vmatpush.msra.mxu3 %v148_v7  ;;  %v278_v5 = vld [vmem:[%s8981_s1 + $0x7b8] sm:$0xff]  ;;  %v403_v6 = vld [vmem:[%s8981_s1 + $0xba0] sm:$0xff] }
 0x118   :  { %2018 = vmatpush.msra.mxu0 %v258_v9  ;;  %2038 = vmatpush.msra.mxu1 %v338_v10  ;;  %v483_v7 = vld [vmem:[%s8981_s1 + $0xe20] sm:$0xff]  ;;  %v273_v9 = vld [vmem:[%s8981_s1 + $0x790] sm:$0xff]  ;;  %v398_v10 = vld [vmem:[%s8981_s1 + $0xb78] sm:$0xff] }
 0x119   :  { %1985 = vmatpush.msra.mxu2 %v63_v11  ;;  %2005 = vmatpush.msra.mxu3 %v143_v12  ;;  %v478_v11 = vld [vmem:[%s8981_s1 + $0xdf8] sm:$0xff]  ;;  %v588_v12 = vld [vmem:[%s8981_s1 + $0x1168] sm:$0xff] }
 0x11a   :  { %2019 = vmatpush.msra.mxu0 %v253_v13  ;;  %2039 = vmatpush.msra.mxu1 %v333_v14  ;;  %v668_v13 = vld [vmem:[%s8981_s1 + $0x13e8] sm:$0xff]  ;;  %v393_v14 = vld [vmem:[%s8981_s1 + $0xb50] sm:$0xff] }
 0x11b   :  { %1986 = vmatpush.msra.mxu2 %v58_v15  ;;  %2006 = vmatpush.msra.mxu3 %v138_v16  ;;  %v473_v15 = vld [vmem:[%s8981_s1 + $0xdd0] sm:$0xff]  ;;  %v583_v16 = vld [vmem:[%s8981_s1 + $0x1140] sm:$0xff] }
 0x11c   :  { %2020 = vmatpush.msra.mxu0 %v248_v17  ;;  %2040 = vmatpush.msra.mxu1 %v328_v18  ;;  %v663_v17 = vld [vmem:[%s8981_s1 + $0x13c0] sm:$0xff]  ;;  %v388_v18 = vld [vmem:[%s8981_s1 + $0xb28] sm:$0xff] }
 0x11d   :  { %1987 = vmatpush.msra.mxu2 %v53_v19  ;;  %2007 = vmatpush.msra.mxu3 %v133_v20  ;;  %v468_v19 = vld [vmem:[%s8981_s1 + $0xda8] sm:$0xff]  ;;  %v578_v20 = vld [vmem:[%s8981_s1 + $0x1118] sm:$0xff] }
 0x11e   :  { %2021 = vmatpush.msra.mxu0 %v243_v21  ;;  %2041 = vmatpush.msra.mxu1 %v323_v22  ;;  %v658_v21 = vld [vmem:[%s8981_s1 + $0x1398] sm:$0xff]  ;;  %v383_v22 = vld [vmem:[%s8981_s1 + $0xb00] sm:$0xff] }
 0x11f   :  { %1988 = vmatpush.msra.mxu2 %v48_v23  ;;  %2008 = vmatpush.msra.mxu3 %v128_v24  ;;  %v463_v23 = vld [vmem:[%s8981_s1 + $0xd80] sm:$0xff]  ;;  %v573_v24 = vld [vmem:[%s8981_s1 + $0x10f0] sm:$0xff] }
 0x120   :  { %2022 = vmatpush.msra.mxu0 %v238_v25  ;;  %2042 = vmatpush.msra.mxu1 %v318_v26  ;;  %v653_v25 = vld [vmem:[%s8981_s1 + $0x1370] sm:$0xff]  ;;  %v378_v26 = vld [vmem:[%s8981_s1 + $0xad8] sm:$0xff] }
 0x121   :  { %1989 = vmatpush.msra.mxu2 %v43_v27  ;;  %2009 = vmatpush.msra.mxu3 %v123_v28  ;;  %v458_v27 = vld [vmem:[%s8981_s1 + $0xd58] sm:$0xff]  ;;  %v568_v28 = vld [vmem:[%s8981_s1 + $0x10c8] sm:$0xff] }
 0x122   :  { %2023 = vmatpush.msra.mxu0 %v233_v29  ;;  %2043 = vmatpush.msra.mxu1 %v313_v30  ;;  %v648_v29 = vld [vmem:[%s8981_s1 + $0x1348] sm:$0xff]  ;;  %v373_v30 = vld [vmem:[%s8981_s1 + $0xab0] sm:$0xff] }
 0x123   :  { %1990 = vmatpush.msra.mxu2 %v38_v31  ;;  %2010 = vmatpush.msra.mxu3 %v118_v32  ;;  %v453_v31 = vld [vmem:[%s8981_s1 + $0xd30] sm:$0xff]  ;;  %v563_v32 = vld [vmem:[%s8981_s1 + $0x10a0] sm:$0xff] }
 0x124   :  { %2024 = vmatpush.msra.mxu0 %v228_v35  ;;  %2044 = vmatpush.msra.mxu1 %v308_v36  ;;  %v643_v35 = vld [vmem:[%s8981_s1 + $0x1320] sm:$0xff]  ;;  %v368_v36 = vld [vmem:[%s8981_s1 + $0xa88] sm:$0xff] }
 0x125   :  { %1991 = vmatpush.msra.mxu2 %v33_v33  ;;  %2011 = vmatpush.msra.mxu3 %v113_v37  ;;  %v448_v33 = vld [vmem:[%s8981_s1 + $0xd08] sm:$0xff]  ;;  %v558_v37 = vld [vmem:[%s8981_s1 + $0x1078] sm:$0xff] }
 0x126   :  { %2025 = vmatpush.msra.mxu0 %v223_v38  ;;  %2045 = vmatpush.msra.mxu1 %v303_v39  ;;  %v638_v38 = vld [vmem:[%s8981_s1 + $0x12f8] sm:$0xff]  ;;  %v363_v39 = vld [vmem:[%s8981_s1 + $0xa60] sm:$0xff] }
 0x127   :  { %2056 = vmatpush.msrb.mxu2 %v428_v40  ;;  %2076 = vmatpush.msrb.mxu3 %v508_v41  ;;  %v443_v40 = vld [vmem:[%s8981_s1 + $0xce0] sm:$0xff]  ;;  %v553_v41 = vld [vmem:[%s8981_s1 + $0x1050] sm:$0xff] }
 0x128   :  { %2026 = vmatpush.msra.mxu0 %v218_v42  ;;  %2046 = vmatpush.msra.mxu1 %v298_v43  ;;  %v633_v42 = vld [vmem:[%s8981_s1 + $0x12d0] sm:$0xff]  ;;  %v358_v43 = vld [vmem:[%s8981_s1 + $0xa38] sm:$0xff] }
 0x129   :  { %2057 = vmatpush.msrb.mxu2 %v423_v44  ;;  %2077 = vmatpush.msrb.mxu3 %v503_v45  ;;  %v438_v44 = vld [vmem:[%s8981_s1 + $0xcb8] sm:$0xff]  ;;  %v548_v45 = vld [vmem:[%s8981_s1 + $0x1028] sm:$0xff] }
 0x12a   :  { %2027 = vmatpush.msra.mxu0 %v213_v46  ;;  %2047 = vmatpush.msra.mxu1 %v293_v47  ;;  %v628_v46 = vld [vmem:[%s8981_s1 + $0x12a8] sm:$0xff]  ;;  %v353_v47 = vld [vmem:[%s8981_s1 + $0xa10] sm:$0xff] }
 0x12b   :  { %2058 = vmatpush.msrb.mxu2 %v418_v52  ;;  %2078 = vmatpush.msrb.mxu3 %v498_v53  ;;  %v433_v52 = vld [vmem:[%s8981_s1 + $0xc90] sm:$0xff]  ;;  %v543_v53 = vld [vmem:[%s8981_s1 + $0x1000] sm:$0xff] }
 0x12c   :  { %2028 = vmatpush.msra.mxu0 %v208_v54  ;;  %2048 = vmatpush.msra.mxu1 %v288_v55  ;;  %v623_v54 = vld [vmem:[%s8981_s1 + $0x1280] sm:$0xff]  ;;  %v748_v55 = vld [vmem:[%s8981_s1 + $0x1668] sm:$0xff] }
 0x12d   :  { %2059 = vmatpush.msrb.mxu2 %v413_v56  ;;  %2079 = vmatpush.msrb.mxu3 %v493_v57  ;;  %v828_v56 = vld [vmem:[%s8981_s1 + $0x18e8] sm:$0xff]  ;;  %v538_v57 = vld [vmem:[%s8981_s1 + $0xfd8] sm:$0xff] }
 0x12e   :  { %2029 = vmatpush.msra.mxu0 %v203_v58  ;;  %2049 = vmatpush.msra.mxu1 %v283_v60  ;;  %v618_v58 = vld [vmem:[%s8981_s1 + $0x1258] sm:$0xff]  ;;  %v743_v60 = vld [vmem:[%s8981_s1 + $0x1640] sm:$0xff] }
 0x12f   :  { %2060 = vmatpush.msrb.mxu2 %v408_v61  ;;  %2080 = vmatpush.msrb.mxu3 %v488_v63  ;;  %v823_v61 = vld [vmem:[%s8981_s1 + $0x18c0] sm:$0xff]  ;;  %v533_v63 = vld [vmem:[%s8981_s1 + $0xfb0] sm:$0xff] }
 0x130   :  { %2030 = vmatpush.msra.mxu0 %v198_v4  ;;  %2050 = vmatpush.msra.mxu1 %v278_v5  ;;  %v613_v4 = vld [vmem:[%s8981_s1 + $0x1230] sm:$0xff]  ;;  %v738_v5 = vld [vmem:[%s8981_s1 + $0x1618] sm:$0xff] }
 0x131   :  { %2061 = vmatpush.msrb.mxu2 %v403_v6  ;;  %2081 = vmatpush.msrb.mxu3 %v483_v7  ;;  %v818_v6 = vld [vmem:[%s8981_s1 + $0x1898] sm:$0xff]  ;;  %v528_v7 = vld [vmem:[%s8981_s1 + $0xf88] sm:$0xff] }
 0x132   :  { %2031 = vmatpush.msra.mxu0 %v193_v8  ;;  %2051 = vmatpush.msra.mxu1 %v273_v9  ;;  %v608_v8 = vld [vmem:[%s8981_s1 + $0x1208] sm:$0xff]  ;;  %v733_v9 = vld [vmem:[%s8981_s1 + $0x15f0] sm:$0xff] }
 0x133   :  { %2062 = vmatpush.msrb.mxu2 %v398_v10  ;;  %2082 = vmatpush.msrb.mxu3 %v478_v11  ;;  %v813_v10 = vld [vmem:[%s8981_s1 + $0x1870] sm:$0xff]  ;;  %v523_v11 = vld [vmem:[%s8981_s1 + $0xf60] sm:$0xff] }
 0x134   :  { %2096 = vmatpush.msrb.mxu0 %v588_v12  ;;  %2116 = vmatpush.msrb.mxu1 %v668_v13  ;;  %v603_v12 = vld [vmem:[%s8981_s1 + $0x11e0] sm:$0xff]  ;;  %v808_v13 = vld [vmem:[%s8981_s1 + $0x1848] sm:$0xff] }
 0x135   :  { %2063 = vmatpush.msrb.mxu2 %v393_v14  ;;  %2083 = vmatpush.msrb.mxu3 %v473_v15  ;;  %v728_v14 = vld [vmem:[%s8981_s1 + $0x15c8] sm:$0xff]  ;;  %v518_v15 = vld [vmem:[%s8981_s1 + $0xf38] sm:$0xff] }
 0x136   :  { %2097 = vmatpush.msrb.mxu0 %v583_v16  ;;  %2117 = vmatpush.msrb.mxu1 %v663_v17  ;;  %v598_v16 = vld [vmem:[%s8981_s1 + $0x11b8] sm:$0xff]  ;;  %v723_v17 = vld [vmem:[%s8981_s1 + $0x15a0] sm:$0xff] }
 0x137   :  { %2064 = vmatpush.msrb.mxu2 %v388_v18  ;;  %2084 = vmatpush.msrb.mxu3 %v468_v19  ;;  %v803_v18 = vld [vmem:[%s8981_s1 + $0x1820] sm:$0xff]  ;;  %v513_v19 = vld [vmem:[%s8981_s1 + $0xf10] sm:$0xff] }
 0x138   :  { %2098 = vmatpush.msrb.mxu0 %v578_v20  ;;  %2118 = vmatpush.msrb.mxu1 %v658_v21  ;;  %v593_v20 = vld [vmem:[%s8981_s1 + $0x1190] sm:$0xff]  ;;  %v718_v21 = vld [vmem:[%s8981_s1 + $0x1578] sm:$0xff] }
 0x139   :  { %2065 = vmatpush.msrb.mxu2 %v383_v22  ;;  %2085 = vmatpush.msrb.mxu3 %v463_v23  ;;  %v798_v22 = vld [vmem:[%s8981_s1 + $0x17f8] sm:$0xff]  ;;  %v908_v23 = vld [vmem:[%s8981_s1 + $0x1b68] sm:$0xff] }
 0x13a   :  { %2099 = vmatpush.msrb.mxu0 %v573_v24  ;;  %2119 = vmatpush.msrb.mxu1 %v653_v25  ;;  %v988_v24 = vld [vmem:[%s8981_s1 + $0x1de8] sm:$0xff]  ;;  %v713_v25 = vld [vmem:[%s8981_s1 + $0x1550] sm:$0xff] }
 0x13b   :  { %2066 = vmatpush.msrb.mxu2 %v378_v26  ;;  %2086 = vmatpush.msrb.mxu3 %v458_v27  ;;  %v793_v26 = vld [vmem:[%s8981_s1 + $0x17d0] sm:$0xff]  ;;  %v903_v27 = vld [vmem:[%s8981_s1 + $0x1b40] sm:$0xff] }
 0x13c   :  { %2100 = vmatpush.msrb.mxu0 %v568_v28  ;;  %2120 = vmatpush.msrb.mxu1 %v648_v29  ;;  %v983_v28 = vld [vmem:[%s8981_s1 + $0x1dc0] sm:$0xff]  ;;  %v708_v29 = vld [vmem:[%s8981_s1 + $0x1528] sm:$0xff] }
 0x13d   :  { %2067 = vmatpush.msrb.mxu2 %v373_v30  ;;  %2087 = vmatpush.msrb.mxu3 %v453_v31  ;;  %v788_v30 = vld [vmem:[%s8981_s1 + $0x17a8] sm:$0xff]  ;;  %v898_v31 = vld [vmem:[%s8981_s1 + $0x1b18] sm:$0xff] }
 0x13e   :  { %2101 = vmatpush.msrb.mxu0 %v563_v32  ;;  %2121 = vmatpush.msrb.mxu1 %v643_v35  ;;  %v978_v32 = vld [vmem:[%s8981_s1 + $0x1d98] sm:$0xff]  ;;  %v703_v35 = vld [vmem:[%s8981_s1 + $0x1500] sm:$0xff] }
 0x13f   :  { %2068 = vmatpush.msrb.mxu2 %v368_v36  ;;  %2088 = vmatpush.msrb.mxu3 %v448_v33  ;;  %v783_v36 = vld [vmem:[%s8981_s1 + $0x1780] sm:$0xff]  ;;  %v893_v33 = vld [vmem:[%s8981_s1 + $0x1af0] sm:$0xff] }
 0x140   :  { %2102 = vmatpush.msrb.mxu0 %v558_v37  ;;  %2122 = vmatpush.msrb.mxu1 %v638_v38  ;;  %v973_v37 = vld [vmem:[%s8981_s1 + $0x1d70] sm:$0xff]  ;;  %v698_v38 = vld [vmem:[%s8981_s1 + $0x14d8] sm:$0xff] }
 0x141   :  { %2069 = vmatpush.msrb.mxu2 %v363_v39  ;;  %2089 = vmatpush.msrb.mxu3 %v443_v40  ;;  %v778_v39 = vld [vmem:[%s8981_s1 + $0x1758] sm:$0xff]  ;;  %v888_v40 = vld [vmem:[%s8981_s1 + $0x1ac8] sm:$0xff] }
 0x142   :  { %2103 = vmatpush.msrb.mxu0 %v553_v41  ;;  %2123 = vmatpush.msrb.mxu1 %v633_v42  ;;  %v968_v41 = vld [vmem:[%s8981_s1 + $0x1d48] sm:$0xff]  ;;  %v693_v42 = vld [vmem:[%s8981_s1 + $0x14b0] sm:$0xff] }
 0x143   :  { %2070 = vmatpush.msrb.mxu2 %v358_v43  ;;  %2090 = vmatpush.msrb.mxu3 %v438_v44  ;;  %v773_v43 = vld [vmem:[%s8981_s1 + $0x1730] sm:$0xff]  ;;  %v883_v44 = vld [vmem:[%s8981_s1 + $0x1aa0] sm:$0xff] }
 0x144   :  { %2104 = vmatpush.msrb.mxu0 %v548_v45  ;;  %2124 = vmatpush.msrb.mxu1 %v628_v46  ;;  %v963_v45 = vld [vmem:[%s8981_s1 + $0x1d20] sm:$0xff]  ;;  %v688_v46 = vld [vmem:[%s8981_s1 + $0x1488] sm:$0xff] }
 0x145   :  { %2071 = vmatpush.msrb.mxu2 %v353_v47  ;;  %2091 = vmatpush.msrb.mxu3 %v433_v52  ;;  %v768_v47 = vld [vmem:[%s8981_s1 + $0x1708] sm:$0xff]  ;;  %v878_v52 = vld [vmem:[%s8981_s1 + $0x1a78] sm:$0xff] }
 0x146   :  { %2105 = vmatpush.msrb.mxu0 %v543_v53  ;;  %2125 = vmatpush.msrb.mxu1 %v623_v54  ;;  %v958_v53 = vld [vmem:[%s8981_s1 + $0x1cf8] sm:$0xff]  ;;  %v683_v54 = vld [vmem:[%s8981_s1 + $0x1460] sm:$0xff] }
 0x147   :  { %1992 = vmatmul.f32.vlgmr.msra.gmra.mxu2 %v4268_v48  ;;  %2012 = vmatmul.f32.vlgmr.msra.gmra.mxu3 %v4270_v49 }
 0x148   :  { %2136 = vmatpush.msra.mxu2 %v748_v55  ;;  %2156 = vmatpush.msra.mxu3 %v828_v56  ;;  %v763_v55 = vld [vmem:[%s8981_s1 + $0x16e0] sm:$0xff]  ;;  %v873_v56 = vld [vmem:[%s8981_s1 + $0x1a50] sm:$0xff] }
 0x149   :  { %2106 = vmatpush.msrb.mxu0 %v538_v57  ;;  %2126 = vmatpush.msrb.mxu1 %v618_v58  ;;  %v953_v57 = vld [vmem:[%s8981_s1 + $0x1cd0] sm:$0xff]  ;;  %v678_v58 = vld [vmem:[%s8981_s1 + $0x1438] sm:$0xff] }
 0x14a   :  { %2137 = vmatpush.msra.mxu2 %v743_v60  ;;  %2157 = vmatpush.msra.mxu3 %v823_v61  ;;  %v758_v60 = vld [vmem:[%s8981_s1 + $0x16b8] sm:$0xff]  ;;  %v868_v61 = vld [vmem:[%s8981_s1 + $0x1a28] sm:$0xff] }
 0x14b   :  { %2107 = vmatpush.msrb.mxu0 %v533_v63  ;;  %2127 = vmatpush.msrb.mxu1 %v613_v4  ;;  %v948_v63 = vld [vmem:[%s8981_s1 + $0x1ca8] sm:$0xff]  ;;  %v673_v4 = vld [vmem:[%s8981_s1 + $0x1410] sm:$0xff] }
 0x14c   :  { %2138 = vmatpush.msra.mxu2 %v738_v5  ;;  %2158 = vmatpush.msra.mxu3 %v818_v6  ;;  %v753_v5 = vld [vmem:[%s8981_s1 + $0x1690] sm:$0xff]  ;;  %v863_v6 = vld [vmem:[%s8981_s1 + $0x1a00] sm:$0xff] }
 0x14d   :  { %2108 = vmatpush.msrb.mxu0 %v528_v7  ;;  %2128 = vmatpush.msrb.mxu1 %v608_v8  ;;  %v943_v7 = vld [vmem:[%s8981_s1 + $0x1c80] sm:$0xff]  ;;  %v1148_v8 = vld [vmem:[%s8981_s1 + $0x22e8] sm:$0xff] }
 0x14e   :  { %2139 = vmatpush.msra.mxu2 %v733_v9  ;;  %2159 = vmatpush.msra.mxu3 %v813_v10  ;;  %v1068_v9 = vld [vmem:[%s8981_s1 + $0x2068] sm:$0xff]  ;;  %v858_v10 = vld [vmem:[%s8981_s1 + $0x19d8] sm:$0xff] }
 0x14f   :  { %2109 = vmatpush.msrb.mxu0 %v523_v11  ;;  %2129 = vmatpush.msrb.mxu1 %v603_v12  ;;  %v938_v11 = vld [vmem:[%s8981_s1 + $0x1c58] sm:$0xff]  ;;  %v3843_v12 = vld.sshfl [vmem:[#allocation1] sm:$0xff pattern:$0x73625140] }
 0x150   :  { %2072 = vmatmul.f32.vlgmr.msrb.gmra.mxu2 %v4314_v1  ;;  %2160 = vmatpush.msra.mxu3 %v808_v13  ;;  %v1063_v13 = vld [vmem:[%s8981_s1 + $0x2040] sm:$0xff] }
 0x151   :  { %2140 = vmatpush.msra.mxu2 %v728_v14  ;;  %2110 = vmatpush.msrb.mxu0 %v518_v15  ;;  %v1143_v14 = vld [vmem:[%s8981_s1 + $0x22c0] sm:$0xff]  ;;  %v853_v15 = vld [vmem:[%s8981_s1 + $0x19b0] sm:$0xff] }
 0x152   :  { %2130 = vmatpush.msrb.mxu1 %v598_v16  ;;  %2032 = vmatmul.f32.vlgmr.msra.gmra.mxu0 %v4272_v50  ;;  %v933_v16 = vld [vmem:[%s8981_s1 + $0x1c30] sm:$0xff] }
 0x153   :  { %2092 = vmatmul.f32.vlgmr.msrb.gmra.mxu3 %v4318_v3  ;;  %2141 = vmatpush.msra.mxu2 %v723_v17  ;;  %v1058_v17 = vld [vmem:[%s8981_s1 + $0x2018] sm:$0xff] }
 0x154   :  { %2161 = vmatpush.msra.mxu3 %v803_v18  ;;  %2111 = vmatpush.msrb.mxu0 %v513_v19  ;;  %v1138_v18 = vld [vmem:[%s8981_s1 + $0x2298] sm:$0xff]  ;;  %v848_v19 = vld [vmem:[%s8981_s1 + $0x1988] sm:$0xff] }
 0x155   :  { %2131 = vmatpush.msrb.mxu1 %v593_v20  ;;  %2142 = vmatpush.msra.mxu2 %v718_v21  ;;  %v928_v20 = vld [vmem:[%s8981_s1 + $0x1c08] sm:$0xff]  ;;  %v1133_v21 = vld [vmem:[%s8981_s1 + $0x2270] sm:$0xff] }
 0x156   :  { %2052 = vmatmul.f32.vlgmr.msra.gmra.mxu1 %v4274_v51  ;;  %2162 = vmatpush.msra.mxu3 %v798_v22  ;;  %v843_v22 = vld [vmem:[%s8981_s1 + $0x1960] sm:$0xff] }
 0x157   :  { %2176 = vmatpush.msra.mxu0 %v908_v23  ;;  %2196 = vmatpush.msra.mxu1 %v988_v24  ;;  %v923_v23 = vld [vmem:[%s8981_s1 + $0x1be0] sm:$0xff]  ;;  %v1048_v24 = vld [vmem:[%s8981_s1 + $0x1fc8] sm:$0xff] }
 0x158   :  { %2143 = vmatpush.msra.mxu2 %v713_v25  ;;  %2163 = vmatpush.msra.mxu3 %v793_v26  ;;  %v1128_v25 = vld [vmem:[%s8981_s1 + $0x2248] sm:$0xff]  ;;  %v838_v26 = vld [vmem:[%s8981_s1 + $0x1938] sm:$0xff] }
 0x159   :  { %2177 = vmatpush.msra.mxu0 %v903_v27  ;;  %2197 = vmatpush.msra.mxu1 %v983_v28  ;;  %v918_v27 = vld [vmem:[%s8981_s1 + $0x1bb8] sm:$0xff]  ;;  %v1043_v28 = vld [vmem:[%s8981_s1 + $0x1fa0] sm:$0xff] }
 0x15a   :  { %2144 = vmatpush.msra.mxu2 %v708_v29  ;;  %2164 = vmatpush.msra.mxu3 %v788_v30  ;;  %v1123_v29 = vld [vmem:[%s8981_s1 + $0x2220] sm:$0xff]  ;;  %v833_v30 = vld [vmem:[%s8981_s1 + $0x1910] sm:$0xff] }
 0x15b   :  { %2178 = vmatpush.msra.mxu0 %v898_v31  ;;  %2198 = vmatpush.msra.mxu1 %v978_v32  ;;  %v913_v31 = vld [vmem:[%s8981_s1 + $0x1b90] sm:$0xff]  ;;  %v1038_v32 = vld [vmem:[%s8981_s1 + $0x1f78] sm:$0xff] }
 0x15c   :  { %2112 = vmatmul.f32.vlgmr.msrb.gmra.mxu0 %v4312_v0  ;;  %2145 = vmatpush.msra.mxu2 %v703_v35  ;;  %v1118_v35 = vld [vmem:[%s8981_s1 + $0x21f8] sm:$0xff] }
 0x15d   :  { %2165 = vmatpush.msra.mxu3 %v783_v36  ;;  %2179 = vmatpush.msra.mxu0 %v893_v33  ;;  %v1228_v36 = vld [vmem:[%s8981_s1 + $0x2568] sm:$0xff]  ;;  %v1278_v33 = vld [vmem:[%s8981_s1 + $0x26f8] sm:$0xff] }
 0x15e   :  { %2199 = vmatpush.msra.mxu1 %v973_v37  ;;  %2146 = vmatpush.msra.mxu2 %v698_v38  ;;  %v1033_v37 = vld [vmem:[%s8981_s1 + $0x1f50] sm:$0xff] }
 0x15f   :  { %2132 = vmatmul.f32.vlgmr.msrb.gmra.mxu1 %v4316_v2  ;;  %2166 = vmatpush.msra.mxu3 %v778_v39  ;;  %v6128_v38 = vld.sshfl [vmem:[#allocation1 + $0x10] sm:$0xff pattern:$0x73625140] }
 0x160   :  { %2180 = vmatpush.msra.mxu0 %v888_v40  ;;  %2200 = vmatpush.msra.mxu1 %v968_v41  ;;  %v1113_v39 = vld [vmem:[%s8981_s1 + $0x21d0] sm:$0xff]  ;;  %v1223_v40 = vld [vmem:[%s8981_s1 + $0x2540] sm:$0xff] }
 0x161   :  { %2147 = vmatpush.msra.mxu2 %v693_v42  ;;  %2167 = vmatpush.msra.mxu3 %v773_v43  ;;  %v1273_v41 = vld [vmem:[%s8981_s1 + $0x26d0] sm:$0xff]  ;;  %v1028_v42 = vld [vmem:[%s8981_s1 + $0x1f28] sm:$0xff] }
 0x162   :  { %2181 = vmatpush.msra.mxu0 %v883_v44  ;;  %2201 = vmatpush.msra.mxu1 %v963_v45  ;;  %v1108_v43 = vld [vmem:[%s8981_s1 + $0x21a8] sm:$0xff]  ;;  %v3845_v44 = vld.sshfl [vmem:[#allocation1 + $0x18] sm:$0xff pattern:$0x73625140] }
 0x163   :  { %2148 = vmatpush.msra.mxu2 %v688_v46  ;;  %2168 = vmatpush.msra.mxu3 %v768_v47  ;;  %v1218_v45 = vld [vmem:[%s8981_s1 + $0x2518] sm:$0xff]  ;;  %v1268_v46 = vld [vmem:[%s8981_s1 + $0x26a8] sm:$0xff]  ;;  %v1023_v47 = vld [vmem:[%s8981_s1 + $0x1f00] sm:$0xff] }
 0x164   :  { %2182 = vmatpush.msra.mxu0 %v878_v52  ;;  %2202 = vmatpush.msra.mxu1 %v958_v53  ;;  %v1103_v52 = vld [vmem:[%s8981_s1 + $0x2180] sm:$0xff]  ;;  %v1213_v53 = vld [vmem:[%s8981_s1 + $0x24f0] sm:$0xff] }
 0x165   :  { %2149 = vmatpush.msra.mxu2 %v683_v54  ;;  %2169 = vmatpush.msra.mxu3 %v763_v55  ;;  %v1263_v54 = vld [vmem:[%s8981_s1 + $0x2680] sm:$0xff]  ;;  %v1018_v55 = vld [vmem:[%s8981_s1 + $0x1ed8] sm:$0xff] }
 0x166   :  { %2183 = vmatpush.msra.mxu0 %v873_v56  ;;  %2203 = vmatpush.msra.mxu1 %v953_v57  ;;  %v1098_v56 = vld [vmem:[%s8981_s1 + $0x2158] sm:$0xff]  ;;  %v1208_v57 = vld [vmem:[%s8981_s1 + $0x24c8] sm:$0xff] }
 0x167   :  { %2150 = vmatpush.msra.mxu2 %v678_v58  ;;  %2170 = vmatpush.msra.mxu3 %v758_v60  ;;  %v1258_v58 = vld [vmem:[%s8981_s1 + $0x2658] sm:$0xff]  ;;  %v1013_v60 = vld [vmem:[%s8981_s1 + $0x1eb0] sm:$0xff] }
 0x168   :  { %2184 = vmatpush.msra.mxu0 %v868_v61  ;;  %2204 = vmatpush.msra.mxu1 %v948_v63  ;;  %v1093_v61 = vld [vmem:[%s8981_s1 + $0x2130] sm:$0xff]  ;;  %v1203_v63 = vld [vmem:[%s8981_s1 + $0x24a0] sm:$0xff] }
 0x169   :  { %2151 = vmatpush.msra.mxu2 %v673_v4  ;;  %2171 = vmatpush.msra.mxu3 %v753_v5  ;;  %v1253_v4 = vld [vmem:[%s8981_s1 + $0x2630] sm:$0xff]  ;;  %v1008_v5 = vld [vmem:[%s8981_s1 + $0x1e88] sm:$0xff] }
 0x16a   :  { %2185 = vmatpush.msra.mxu0 %v863_v6  ;;  %2205 = vmatpush.msra.mxu1 %v943_v7  ;;  %v1088_v6 = vld [vmem:[%s8981_s1 + $0x2108] sm:$0xff]  ;;  %v1198_v7 = vld [vmem:[%s8981_s1 + $0x2478] sm:$0xff] }
 0x16b   :  { %2152 = vmatmul.f32.vlgmr.msra.gmra.mxu2 %v3843_v12  ;;  %2236 = vmatpush.msrb.mxu3 %v1148_v8  ;;  %v1248_v8 = vld [vmem:[%s8981_s1 + $0x2608] sm:$0xff]  ;;  %v1243_v12 = vld [vmem:[%s8981_s1 + $0x25e0] sm:$0xff] }
 0x16c   :  { %2216 = vmatpush.msrb.mxu2 %v1068_v9  ;;  %2186 = vmatpush.msra.mxu0 %v858_v10  ;;  %v1003_v9 = vld [vmem:[%s8981_s1 + $0x1e60] sm:$0xff] }
 0x16d   :  { %2206 = vmatpush.msra.mxu1 %v938_v11  ;;  %2172 = vmatmul.f32.vlgmr.msra.gmra.mxu3 %v5335_v34  ;;  %v1053_v34 = vld [vmem:[%s8981_s1 + $0x1ff0] sm:$0xff]  ;;  %v1083_v10 = vld [vmem:[%s8981_s1 + $0x20e0] sm:$0xff] }
 0x16e   :  { %2217 = vmatpush.msrb.mxu2 %v1063_v13  ;;  %2237 = vmatpush.msrb.mxu3 %v1143_v14  ;;  %v1193_v11 = vld [vmem:[%s8981_s1 + $0x2450] sm:$0xff]  ;;  %v998_v13 = vld [vmem:[%s8981_s1 + $0x1e38] sm:$0xff] }
 0x16f   :  { %2187 = vmatpush.msra.mxu0 %v853_v15  ;;  %2207 = vmatpush.msra.mxu1 %v933_v16  ;;  %v1078_v14 = vld [vmem:[%s8981_s1 + $0x20b8] sm:$0xff]  ;;  %v1188_v15 = vld [vmem:[%s8981_s1 + $0x2428] sm:$0xff] }
 0x170   :  { %2218 = vmatpush.msrb.mxu2 %v1058_v17  ;;  %2238 = vmatpush.msrb.mxu3 %v1138_v18  ;;  %v1238_v16 = vld [vmem:[%s8981_s1 + $0x25b8] sm:$0xff]  ;;  %v993_v17 = vld [vmem:[%s8981_s1 + $0x1e10] sm:$0xff] }
 0x171   :  { %2188 = vmatpush.msra.mxu0 %v848_v19  ;;  %2208 = vmatpush.msra.mxu1 %v928_v20  ;;  %v1073_v18 = vld [vmem:[%s8981_s1 + $0x2090] sm:$0xff]  ;;  %v1183_v19 = vld [vmem:[%s8981_s1 + $0x2400] sm:$0xff] }
 0x172   :  { %2219 = vmatpush.msrb.mxu2 %v1053_v34  ;;  %2239 = vmatpush.msrb.mxu3 %v1133_v21  ;;  %v1233_v20 = vld [vmem:[%s8981_s1 + $0x2590] sm:$0xff] }
 0x173   :  { %2189 = vmatpush.msra.mxu0 %v843_v22  ;;  %2209 = vmatpush.msra.mxu1 %v923_v23  ;;  %v109_v34 = vld [vmem:[%s8981_s1 + $0x270] sm:$0xff]  ;;  %v1178_v23 = vld [vmem:[%s8981_s1 + $0x23d8] sm:$0xff] }
 0x174   :  { %2220 = vmatpush.msrb.mxu2 %v1048_v24  ;;  %2240 = vmatpush.msrb.mxu3 %v1128_v25  ;;  %v189_v21 = vld [vmem:[%s8981_s1 + $0x4f0] sm:$0xff]  ;;  %v3846_v24 = vld.sshfl [vmem:[#allocation1 + $0x20] sm:$0xff pattern:$0x73625140]  ;;  %v104_v25 = vld [vmem:[%s8981_s1 + $0x248] sm:$0xff] }
 0x175   :  { %2190 = vmatpush.msra.mxu0 %v838_v26  ;;  %2210 = vmatpush.msra.mxu1 %v918_v27  ;;  %v269_v22 = vld [vmem:[%s8981_s1 + $0x770] sm:$0xff]  ;;  %v184_v26 = vld [vmem:[%s8981_s1 + $0x4c8] sm:$0xff] }
 0x176   :  { %2221 = vmatpush.msrb.mxu2 %v1043_v28  ;;  %2241 = vmatpush.msrb.mxu3 %v1123_v29  ;;  %v264_v27 = vld [vmem:[%s8981_s1 + $0x748] sm:$0xff]  ;;  %v1173_v28 = vld [vmem:[%s8981_s1 + $0x23b0] sm:$0xff]  ;;  %v99_v29 = vld [vmem:[%s8981_s1 + $0x220] sm:$0xff] }
 0x177   :  { %2191 = vmatpush.msra.mxu0 %v833_v30  ;;  %2211 = vmatpush.msra.mxu1 %v913_v31  ;;  %v179_v30 = vld [vmem:[%s8981_s1 + $0x4a0] sm:$0xff] }
 0x178   :  { %2192 = vmatmul.f32.vlgmr.msra.gmra.mxu0 %v6128_v38  ;;  %2222 = vmatpush.msrb.mxu2 %v1038_v32  ;;  %v259_v31 = vld [vmem:[%s8981_s1 + $0x720] sm:$0xff]  ;;  %v1168_v32 = vld [vmem:[%s8981_s1 + $0x2388] sm:$0xff] }
 0x179   :  { %2242 = vmatpush.msrb.mxu3 %v1118_v35  ;;  %2256 = vmatpush.msrb.mxu0 %v1228_v36  ;;  %v174_v35 = vld [vmem:[%s8981_s1 + $0x478] sm:$0xff] }
 0x17a   :  { %2282 = vmatpush.msrb.mxu1 %v1278_v33  ;;  %2223 = vmatpush.msrb.mxu2 %v1033_v37  ;;  %v254_v36 = vld [vmem:[%s8981_s1 + $0x6f8] sm:$0xff]  ;;  %v1163_v33 = vld [vmem:[%s8981_s1 + $0x2360] sm:$0xff]  ;;  %v89_v37 = vld [vmem:[%s8981_s1 + $0x1d0] sm:$0xff] }
 0x17b   :  { %2212 = vmatmul.f32.vlgmr.msra.gmra.mxu1 %v3845_v44  ;;  %2243 = vmatpush.msrb.mxu3 %v1113_v39  ;;  %v169_v39 = vld [vmem:[%s8981_s1 + $0x450] sm:$0xff]  ;;  %v244_v44 = vld [vmem:[%s8981_s1 + $0x6a8] sm:$0xff] }
 0x17c   :  { %2257 = vmatpush.msrb.mxu0 %v1223_v40  ;;  %2283 = vmatpush.msrb.mxu1 %v1273_v41  ;;  %v249_v40 = vld [vmem:[%s8981_s1 + $0x6d0] sm:$0xff]  ;;  %v1158_v41 = vld [vmem:[%s8981_s1 + $0x2338] sm:$0xff] }
 0x17d   :  { %2224 = vmatpush.msrb.mxu2 %v1028_v42  ;;  %2244 = vmatpush.msrb.mxu3 %v1108_v43  ;;  %v84_v42 = vld [vmem:[%s8981_s1 + $0x1a8] sm:$0xff] }
 0x17e   :  { %2258 = vmatpush.msrb.mxu0 %v1218_v45  ;;  %2284 = vmatpush.msrb.mxu1 %v1268_v46  ;;  %v164_v43 = vld [vmem:[%s8981_s1 + $0x428] sm:$0xff]  ;;  %v1153_v45 = vld [vmem:[%s8981_s1 + $0x2310] sm:$0xff]  ;;  %v79_v46 = vld [vmem:[%s8981_s1 + $0x180] sm:$0xff] }
 0x17f   :  { %2225 = vmatpush.msrb.mxu2 %v1023_v47  ;;  %2245 = vmatpush.msrb.mxu3 %v1103_v52  ;;  %v159_v47 = vld [vmem:[%s8981_s1 + $0x400] sm:$0xff] }
 0x180   :  { %2259 = vmatpush.msrb.mxu0 %v1213_v53  ;;  %2285 = vmatpush.msrb.mxu1 %v1263_v54  ;;  %v239_v52 = vld [vmem:[%s8981_s1 + $0x680] sm:$0xff]  ;;  %v349_v53 = vld [vmem:[%s8981_s1 + $0x9f0] sm:$0xff] }
 0x181   :  { %2226 = vmatpush.msrb.mxu2 %v1018_v55  ;;  %2246 = vmatpush.msrb.mxu3 %v1098_v56  ;;  %v6321_v54 = vld.sshfl [vmem:[#allocation1 + $0x30] sm:$0xff pattern:$0x73625140]  ;;  %v74_v55 = vld [vmem:[%s8981_s1 + $0x158] sm:$0xff] }
 0x182   :  { %2260 = vmatpush.msrb.mxu0 %v1208_v57  ;;  %2286 = vmatpush.msrb.mxu1 %v1258_v58  ;;  %v154_v56 = vld [vmem:[%s8981_s1 + $0x3d8] sm:$0xff]  ;;  %v344_v58 = vld [vmem:[%s8981_s1 + $0x9c8] sm:$0xff] }
 0x183   :  { %2227 = vmatpush.msrb.mxu2 %v1013_v60  ;;  %2247 = vmatpush.msrb.mxu3 %v1093_v61  ;;  %v234_v57 = vld [vmem:[%s8981_s1 + $0x658] sm:$0xff]  ;;  %v69_v61 = vld [vmem:[%s8981_s1 + $0x130] sm:$0xff] }
 0x184   :  { %2261 = vmatpush.msrb.mxu0 %v1203_v63  ;;  %2287 = vmatpush.msrb.mxu1 %v1253_v4  ;;  %v3848_v60 = vld.sshfl [vmem:[#allocation1 + $0x38] sm:$0xff pattern:$0x73625140]  ;;  %v149_v63 = vld [vmem:[%s8981_s1 + $0x3b0] sm:$0xff] }
 0x185   :  { %2228 = vmatpush.msrb.mxu2 %v1008_v5  ;;  %2248 = vmatpush.msrb.mxu3 %v1088_v6  ;;  %v229_v4 = vld [vmem:[%s8981_s1 + $0x630] sm:$0xff]  ;;  %v339_v5 = vld [vmem:[%s8981_s1 + $0x9a0] sm:$0xff]  ;;  %v64_v6 = vld [vmem:[%s8981_s1 + $0x108] sm:$0xff] }
 0x186   :  { %2262 = vmatpush.msrb.mxu0 %v1198_v7  ;;  %2288 = vmatpush.msrb.mxu1 %v1248_v8  ;;  %v144_v7 = vld [vmem:[%s8981_s1 + $0x388] sm:$0xff] }
 0x187   :  { %2229 = vmatpush.msrb.mxu2 %v1003_v9  ;;  %2249 = vmatpush.msrb.mxu3 %v1083_v10  ;;  %v224_v8 = vld [vmem:[%s8981_s1 + $0x608] sm:$0xff]  ;;  %v334_v9 = vld [vmem:[%s8981_s1 + $0x978] sm:$0xff]  ;;  %v59_v10 = vld [vmem:[%s8981_s1 + $0xe0] sm:$0xff] }
 0x188   :  { %2263 = vmatpush.msrb.mxu0 %v1193_v11  ;;  %2289 = vmatpush.msrb.mxu1 %v1243_v12  ;;  %v139_v11 = vld [vmem:[%s8981_s1 + $0x360] sm:$0xff] }
 0x189   :  { %2230 = vmatpush.msrb.mxu2 %v998_v13  ;;  %2250 = vmatpush.msrb.mxu3 %v1078_v14  ;;  %v219_v12 = vld [vmem:[%s8981_s1 + $0x5e0] sm:$0xff]  ;;  %v329_v13 = vld [vmem:[%s8981_s1 + $0x950] sm:$0xff]  ;;  %v54_v14 = vld [vmem:[%s8981_s1 + $0xb8] sm:$0xff] }
 0x18a   :  { %2264 = vmatpush.msrb.mxu0 %v1188_v15  ;;  %2290 = vmatpush.msrb.mxu1 %v1238_v16  ;;  %v134_v15 = vld [vmem:[%s8981_s1 + $0x338] sm:$0xff] }
 0x18b   :  { %2231 = vmatpush.msrb.mxu2 %v993_v17  ;;  %2251 = vmatpush.msrb.mxu3 %v1073_v18  ;;  %v214_v16 = vld [vmem:[%s8981_s1 + $0x5b8] sm:$0xff]  ;;  %v324_v17 = vld [vmem:[%s8981_s1 + $0x928] sm:$0xff]  ;;  %v49_v18 = vld [vmem:[%s8981_s1 + $0x90] sm:$0xff] }
 0x18c   :  { %2265 = vmatpush.msrb.mxu0 %v1183_v19  ;;  %2291 = vmatpush.msrb.mxu1 %v1233_v20  ;;  %v129_v19 = vld [vmem:[%s8981_s1 + $0x310] sm:$0xff] }
 0x18d   :  { %2232 = vmatmul.f32.vlgmr.msrb.gmra.mxu2 %v3846_v24  ;;  %2336 = vmatpush.msra.mxu3 %v269_v22  ;;  %v209_v20 = vld [vmem:[%s8981_s1 + $0x590] sm:$0xff]  ;;  %v124_v22 = vld [vmem:[%s8981_s1 + $0x2e8] sm:$0xff]  ;;  %v314_v24 = vld [vmem:[%s8981_s1 + $0x8d8] sm:$0xff] }
 0x18e   :  { %2296 = vmatpush.msra.mxu1 %v109_v34  ;;  %2316 = vmatpush.msra.mxu2 %v189_v21  ;;  %v319_v34 = vld [vmem:[%s8981_s1 + $0x900] sm:$0xff]  ;;  %v44_v21 = vld [vmem:[%s8981_s1 + $0x68] sm:$0xff] }
 0x18f   :  { %2266 = vmatpush.msrb.mxu0 %v1178_v23  ;;  %2252 = vmatmul.f32.vlgmr.msrb.gmra.mxu3 %v5540_v62  ;;  %v94_v62 = vld [vmem:[%s8981_s1 + $0x1f8] sm:$0xff]  ;;  %v204_v23 = vld [vmem:[%s8981_s1 + $0x568] sm:$0xff] }
 0x190   :  { %2297 = vmatpush.msra.mxu1 %v104_v25  ;;  %2317 = vmatpush.msra.mxu2 %v184_v26  ;;  %v39_v25 = vld [vmem:[%s8981_s1 + $0x40] sm:$0xff] }
 0x191   :  { %2337 = vmatpush.msra.mxu3 %v264_v27  ;;  %2267 = vmatpush.msrb.mxu0 %v1173_v28  ;;  %v119_v26 = vld [vmem:[%s8981_s1 + $0x2c0] sm:$0xff]  ;;  %v309_v28 = vld [vmem:[%s8981_s1 + $0x8b0] sm:$0xff] }
 0x192   :  { %2298 = vmatpush.msra.mxu1 %v99_v29  ;;  %2318 = vmatpush.msra.mxu2 %v179_v30  ;;  %v199_v27 = vld [vmem:[%s8981_s1 + $0x540] sm:$0xff]  ;;  %v34_v29 = vld [vmem:[%s8981_s1 + $0x18] sm:$0xff] }
 0x193   :  { %2338 = vmatpush.msra.mxu3 %v259_v31  ;;  %2268 = vmatpush.msrb.mxu0 %v1168_v32  ;;  %v114_v30 = vld [vmem:[%s8981_s1 + $0x298] sm:$0xff]  ;;  %v304_v32 = vld [vmem:[%s8981_s1 + $0x888] sm:$0xff] }
 0x194   :  { %2299 = vmatpush.msra.mxu1 %v94_v62  ;;  %2319 = vmatpush.msra.mxu2 %v174_v35  ;;  %v194_v31 = vld [vmem:[%s8981_s1 + $0x518] sm:$0xff]  ;;  %v429_v62 = vld [vmem:[%s8981_s1 + $0xc70] sm:$0xff] }
 0x195   :  { %2339 = vmatpush.msra.mxu3 %v254_v36  ;;  %2269 = vmatpush.msrb.mxu0 %v1163_v33  ;;  %v509_v35 = vld [vmem:[%s8981_s1 + $0xef0] sm:$0xff]  ;;  %v299_v33 = vld [vmem:[%s8981_s1 + $0x860] sm:$0xff] }
 0x196   :  { %2300 = vmatpush.msra.mxu1 %v89_v37  ;;  %2320 = vmatpush.msra.mxu2 %v169_v39  ;;  %v589_v36 = vld [vmem:[%s8981_s1 + $0x1170] sm:$0xff]  ;;  %v424_v37 = vld [vmem:[%s8981_s1 + $0xc48] sm:$0xff] }
 0x197   :  { %2340 = vmatpush.msra.mxu3 %v249_v40  ;;  %2270 = vmatpush.msrb.mxu0 %v1158_v41  ;;  %v504_v39 = vld [vmem:[%s8981_s1 + $0xec8] sm:$0xff]  ;;  %v294_v41 = vld [vmem:[%s8981_s1 + $0x838] sm:$0xff] }
 0x198   :  { %2301 = vmatpush.msra.mxu1 %v84_v42  ;;  %2321 = vmatpush.msra.mxu2 %v164_v43  ;;  %v584_v40 = vld [vmem:[%s8981_s1 + $0x1148] sm:$0xff]  ;;  %v419_v42 = vld [vmem:[%s8981_s1 + $0xc20] sm:$0xff] }
 0x199   :  { %2341 = vmatpush.msra.mxu3 %v244_v44  ;;  %2271 = vmatpush.msrb.mxu0 %v1153_v45  ;;  %v499_v43 = vld [vmem:[%s8981_s1 + $0xea0] sm:$0xff]  ;;  %v289_v45 = vld [vmem:[%s8981_s1 + $0x810] sm:$0xff] }
 0x19a   :  { %2272 = vmatmul.f32.vlgmr.msrb.gmra.mxu0 %v6321_v54  ;;  %2302 = vmatpush.msra.mxu1 %v79_v46  ;;  %v579_v44 = vld [vmem:[%s8981_s1 + $0x1120] sm:$0xff]  ;;  %v414_v46 = vld [vmem:[%s8981_s1 + $0xbf8] sm:$0xff] }
 0x19b   :  { %2322 = vmatpush.msra.mxu2 %v159_v47  ;;  %2342 = vmatpush.msra.mxu3 %v239_v52  ;;  %v494_v47 = vld [vmem:[%s8981_s1 + $0xe78] sm:$0xff] }
 0x19c   :  { %2356 = vmatpush.msra.mxu0 %v349_v53  ;;  %3824 = vmatmul.msk.f32.vlgmr.msrb.gmra.mxu1 %vm1333_vm0, %v3848_v60  ;;  %v574_v52 = vld [vmem:[%s8981_s1 + $0x10f8] sm:$0xff]  ;;  %v284_v53 = vld [vmem:[%s8981_s1 + $0x7e8] sm:$0xff] }
 0x19d   :  { %2303 = vmatpush.msra.mxu1 %v74_v55  ;;  %2323 = vmatpush.msra.mxu2 %v154_v56  ;;  %v409_v55 = vld [vmem:[%s8981_s1 + $0xbd0] sm:$0xff]  ;;  %v404_v60 = vld [vmem:[%s8981_s1 + $0xba8] sm:$0xff] }
 0x19e   :  { %2343 = vmatpush.msra.mxu3 %v234_v57  ;;  %2357 = vmatpush.msra.mxu0 %v344_v58  ;;  %v489_v56 = vld [vmem:[%s8981_s1 + $0xe50] sm:$0xff]  ;;  %v279_v58 = vld [vmem:[%s8981_s1 + $0x7c0] sm:$0xff] }
 0x19f   :  { %2304 = vmatpush.msra.mxu1 %v69_v61  ;;  %2324 = vmatpush.msra.mxu2 %v149_v63  ;;  %v569_v57 = vld [vmem:[%s8981_s1 + $0x10d0] sm:$0xff]  ;;  %v484_v61 = vld [vmem:[%s8981_s1 + $0xe28] sm:$0xff] }
 0x1a0   :  { %2344 = vmatpush.msra.mxu3 %v229_v4  ;;  %2358 = vmatpush.msra.mxu0 %v339_v5  ;;  %v564_v63 = vld [vmem:[%s8981_s1 + $0x10a8] sm:$0xff]  ;;  %v274_v4 = vld [vmem:[%s8981_s1 + $0x798] sm:$0xff]  ;;  %v399_v5 = vld [vmem:[%s8981_s1 + $0xb80] sm:$0xff] }
 0x1a1   :  { %2305 = vmatpush.msra.mxu1 %v64_v6  ;;  %2325 = vmatpush.msra.mxu2 %v144_v7  ;;  %v479_v6 = vld [vmem:[%s8981_s1 + $0xe00] sm:$0xff] }
 0x1a2   :  { %2345 = vmatpush.msra.mxu3 %v224_v8  ;;  %2359 = vmatpush.msra.mxu0 %v334_v9  ;;  %v559_v7 = vld [vmem:[%s8981_s1 + $0x1080] sm:$0xff]  ;;  %v669_v8 = vld [vmem:[%s8981_s1 + $0x13f0] sm:$0xff]  ;;  %v394_v9 = vld [vmem:[%s8981_s1 + $0xb58] sm:$0xff] }
 0x1a3   :  { %2306 = vmatpush.msra.mxu1 %v59_v10  ;;  %2326 = vmatpush.msra.mxu2 %v139_v11  ;;  %v474_v10 = vld [vmem:[%s8981_s1 + $0xdd8] sm:$0xff] }
 0x1a4   :  { %2346 = vmatpush.msra.mxu3 %v219_v12  ;;  %2360 = vmatpush.msra.mxu0 %v329_v13  ;;  %v554_v11 = vld [vmem:[%s8981_s1 + $0x1058] sm:$0xff]  ;;  %v664_v12 = vld [vmem:[%s8981_s1 + $0x13c8] sm:$0xff]  ;;  %v389_v13 = vld [vmem:[%s8981_s1 + $0xb30] sm:$0xff] }
 0x1a5   :  { %2307 = vmatpush.msra.mxu1 %v54_v14  ;;  %2327 = vmatpush.msra.mxu2 %v134_v15  ;;  %v469_v14 = vld [vmem:[%s8981_s1 + $0xdb0] sm:$0xff] }
 0x1a6   :  { %2347 = vmatpush.msra.mxu3 %v214_v16  ;;  %2361 = vmatpush.msra.mxu0 %v324_v17  ;;  %v549_v15 = vld [vmem:[%s8981_s1 + $0x1030] sm:$0xff]  ;;  %v659_v16 = vld [vmem:[%s8981_s1 + $0x13a0] sm:$0xff]  ;;  %v384_v17 = vld [vmem:[%s8981_s1 + $0xb08] sm:$0xff] }
 0x1a7   :  { %2308 = vmatpush.msra.mxu1 %v49_v18  ;;  %2328 = vmatpush.msra.mxu2 %v129_v19  ;;  %v464_v18 = vld [vmem:[%s8981_s1 + $0xd88] sm:$0xff] }
 0x1a8   :  { %2348 = vmatpush.msra.mxu3 %v209_v20  ;;  %2362 = vmatpush.msra.mxu0 %v319_v34  ;;  %v544_v19 = vld [vmem:[%s8981_s1 + $0x1008] sm:$0xff]  ;;  %v654_v20 = vld [vmem:[%s8981_s1 + $0x1378] sm:$0xff]  ;;  %v379_v34 = vld [vmem:[%s8981_s1 + $0xae0] sm:$0xff] }
 0x1a9   :  { %2309 = vmatpush.msra.mxu1 %v44_v21  ;;  %2329 = vmatpush.msra.mxu2 %v124_v22  ;;  %v459_v21 = vld [vmem:[%s8981_s1 + $0xd60] sm:$0xff] }
 0x1aa   :  { %2349 = vmatpush.msra.mxu3 %v204_v23  ;;  %2363 = vmatpush.msra.mxu0 %v314_v24  ;;  %v539_v22 = vld [vmem:[%s8981_s1 + $0xfe0] sm:$0xff]  ;;  %v649_v23 = vld [vmem:[%s8981_s1 + $0x1350] sm:$0xff]  ;;  %v374_v24 = vld [vmem:[%s8981_s1 + $0xab8] sm:$0xff] }
 0x1ab   :  { %2310 = vmatpush.msra.mxu1 %v39_v25  ;;  %2330 = vmatpush.msra.mxu2 %v119_v26  ;;  %v454_v25 = vld [vmem:[%s8981_s1 + $0xd38] sm:$0xff] }
 0x1ac   :  { %2350 = vmatpush.msra.mxu3 %v199_v27  ;;  %2364 = vmatpush.msra.mxu0 %v309_v28  ;;  %v534_v26 = vld [vmem:[%s8981_s1 + $0xfb8] sm:$0xff]  ;;  %v644_v27 = vld [vmem:[%s8981_s1 + $0x1328] sm:$0xff]  ;;  %v369_v28 = vld [vmem:[%s8981_s1 + $0xa90] sm:$0xff] }
 0x1ad   :  { %2311 = vmatpush.msra.mxu1 %v34_v29  ;;  %2331 = vmatpush.msra.mxu2 %v114_v30  ;;  %v449_v29 = vld [vmem:[%s8981_s1 + $0xd10] sm:$0xff] }
 0x1ae   :  { %2351 = vmatpush.msra.mxu3 %v194_v31  ;;  %2365 = vmatpush.msra.mxu0 %v304_v32  ;;  %v529_v30 = vld [vmem:[%s8981_s1 + $0xf90] sm:$0xff]  ;;  %v639_v31 = vld [vmem:[%s8981_s1 + $0x1300] sm:$0xff]  ;;  %v364_v32 = vld [vmem:[%s8981_s1 + $0xa68] sm:$0xff] }
 0x1af   :  { %2376 = vmatpush.msrb.mxu1 %v429_v62  ;;  %2396 = vmatpush.msrb.mxu2 %v509_v35  ;;  %v444_v62 = vld [vmem:[%s8981_s1 + $0xce8] sm:$0xff] }
 0x1b0   :  { %2416 = vmatpush.msrb.mxu3 %v589_v36  ;;  %2366 = vmatpush.msra.mxu0 %v299_v33  ;;  %v524_v35 = vld [vmem:[%s8981_s1 + $0xf68] sm:$0xff]  ;;  %v634_v36 = vld [vmem:[%s8981_s1 + $0x12d8] sm:$0xff]  ;;  %v359_v33 = vld [vmem:[%s8981_s1 + $0xa40] sm:$0xff] }
 0x1b1   :  { %2377 = vmatpush.msrb.mxu1 %v424_v37  ;;  %2397 = vmatpush.msrb.mxu2 %v504_v39  ;;  %v439_v37 = vld [vmem:[%s8981_s1 + $0xcc0] sm:$0xff] }
 0x1b2   :  { %2417 = vmatpush.msrb.mxu3 %v584_v40  ;;  %2367 = vmatpush.msra.mxu0 %v294_v41  ;;  %v519_v39 = vld [vmem:[%s8981_s1 + $0xf40] sm:$0xff]  ;;  %v629_v40 = vld [vmem:[%s8981_s1 + $0x12b0] sm:$0xff]  ;;  %v354_v41 = vld [vmem:[%s8981_s1 + $0xa18] sm:$0xff] }
 0x1b3   :  { %2378 = vmatpush.msrb.mxu1 %v419_v42  ;;  %2398 = vmatpush.msrb.mxu2 %v499_v43  ;;  %v434_v42 = vld [vmem:[%s8981_s1 + $0xc98] sm:$0xff] }
 0x1b4   :  { %2418 = vmatpush.msrb.mxu3 %v579_v44  ;;  %2368 = vmatpush.msra.mxu0 %v289_v45  ;;  %v514_v43 = vld [vmem:[%s8981_s1 + $0xf18] sm:$0xff]  ;;  %v624_v44 = vld [vmem:[%s8981_s1 + $0x1288] sm:$0xff]  ;;  %v749_v45 = vld [vmem:[%s8981_s1 + $0x1670] sm:$0xff] }
 0x1b5   :  { %2379 = vmatpush.msrb.mxu1 %v414_v46  ;;  %2399 = vmatpush.msrb.mxu2 %v494_v47  ;;  %v829_v46 = vld [vmem:[%s8981_s1 + $0x18f0] sm:$0xff] }
 0x1b6   :  { %2419 = vmatpush.msrb.mxu3 %v574_v52  ;;  %2369 = vmatpush.msra.mxu0 %v284_v53  ;;  %v909_v47 = vld [vmem:[%s8981_s1 + $0x1b70] sm:$0xff]  ;;  %v619_v52 = vld [vmem:[%s8981_s1 + $0x1260] sm:$0xff]  ;;  %v744_v53 = vld [vmem:[%s8981_s1 + $0x1648] sm:$0xff] }
 0x1b7   :  { %2380 = vmatpush.msrb.mxu1 %v409_v55  ;;  %2400 = vmatpush.msrb.mxu2 %v489_v56  ;;  %v824_v55 = vld [vmem:[%s8981_s1 + $0x18c8] sm:$0xff] }
 0x1b8   :  { %2420 = vmatpush.msrb.mxu3 %v569_v57  ;;  %2370 = vmatpush.msra.mxu0 %v279_v58  ;;  %v904_v56 = vld [vmem:[%s8981_s1 + $0x1b48] sm:$0xff]  ;;  %v614_v57 = vld [vmem:[%s8981_s1 + $0x1238] sm:$0xff]  ;;  %v739_v58 = vld [vmem:[%s8981_s1 + $0x1620] sm:$0xff] }
 0x1b9   :  { %2381 = vmatpush.msrb.mxu1 %v404_v60  ;;  %2401 = vmatpush.msrb.mxu2 %v484_v61  ;;  %v819_v60 = vld [vmem:[%s8981_s1 + $0x18a0] sm:$0xff] }
 0x1ba   :  { %2421 = vmatpush.msrb.mxu3 %v564_v63  ;;  %2371 = vmatpush.msra.mxu0 %v274_v4  ;;  %v899_v61 = vld [vmem:[%s8981_s1 + $0x1b20] sm:$0xff]  ;;  %v609_v63 = vld [vmem:[%s8981_s1 + $0x1210] sm:$0xff]  ;;  %v734_v4 = vld [vmem:[%s8981_s1 + $0x15f8] sm:$0xff] }
 0x1bb   :  { %2382 = vmatpush.msrb.mxu1 %v399_v5  ;;  %2402 = vmatpush.msrb.mxu2 %v479_v6  ;;  %v814_v5 = vld [vmem:[%s8981_s1 + $0x1878] sm:$0xff] }
 0x1bc   :  { %2422 = vmatpush.msrb.mxu3 %v559_v7  ;;  %2436 = vmatpush.msrb.mxu0 %v669_v8  ;;  %v894_v6 = vld [vmem:[%s8981_s1 + $0x1af8] sm:$0xff]  ;;  %v604_v7 = vld [vmem:[%s8981_s1 + $0x11e8] sm:$0xff]  ;;  %v729_v8 = vld [vmem:[%s8981_s1 + $0x15d0] sm:$0xff] }
 0x1bd   :  { %2383 = vmatpush.msrb.mxu1 %v394_v9  ;;  %2403 = vmatpush.msrb.mxu2 %v474_v10  ;;  %v809_v9 = vld [vmem:[%s8981_s1 + $0x1850] sm:$0xff] }
 0x1be   :  { %2423 = vmatpush.msrb.mxu3 %v554_v11  ;;  %2437 = vmatpush.msrb.mxu0 %v664_v12  ;;  %v889_v10 = vld [vmem:[%s8981_s1 + $0x1ad0] sm:$0xff]  ;;  %v599_v11 = vld [vmem:[%s8981_s1 + $0x11c0] sm:$0xff]  ;;  %v724_v12 = vld [vmem:[%s8981_s1 + $0x15a8] sm:$0xff] }
 0x1bf   :  { %2384 = vmatpush.msrb.mxu1 %v389_v13  ;;  %2404 = vmatpush.msrb.mxu2 %v469_v14  ;;  %v804_v13 = vld [vmem:[%s8981_s1 + $0x1828] sm:$0xff] }
 0x1c0   :  { %2424 = vmatpush.msrb.mxu3 %v549_v15  ;;  %2438 = vmatpush.msrb.mxu0 %v659_v16  ;;  %v884_v14 = vld [vmem:[%s8981_s1 + $0x1aa8] sm:$0xff]  ;;  %v594_v15 = vld [vmem:[%s8981_s1 + $0x1198] sm:$0xff]  ;;  %v799_v16 = vld [vmem:[%s8981_s1 + $0x1800] sm:$0xff] }
 0x1c1   :  { %2385 = vmatpush.msrb.mxu1 %v384_v17  ;;  %2405 = vmatpush.msrb.mxu2 %v464_v18  ;;  %v719_v17 = vld [vmem:[%s8981_s1 + $0x1580] sm:$0xff] }
 0x1c2   :  { %2425 = vmatpush.msrb.mxu3 %v544_v19  ;;  %2439 = vmatpush.msrb.mxu0 %v654_v20  ;;  %v879_v18 = vld [vmem:[%s8981_s1 + $0x1a80] sm:$0xff]  ;;  %v989_v19 = vld [vmem:[%s8981_s1 + $0x1df0] sm:$0xff]  ;;  %v794_v20 = vld [vmem:[%s8981_s1 + $0x17d8] sm:$0xff] }
 0x1c3   :  { %2386 = vmatpush.msrb.mxu1 %v379_v34  ;;  %2406 = vmatpush.msrb.mxu2 %v459_v21  ;;  %v714_v34 = vld [vmem:[%s8981_s1 + $0x1558] sm:$0xff] }
 0x1c4   :  { %2426 = vmatpush.msrb.mxu3 %v539_v22  ;;  %2440 = vmatpush.msrb.mxu0 %v649_v23  ;;  %v874_v21 = vld [vmem:[%s8981_s1 + $0x1a58] sm:$0xff]  ;;  %v984_v22 = vld [vmem:[%s8981_s1 + $0x1dc8] sm:$0xff]  ;;  %v789_v23 = vld [vmem:[%s8981_s1 + $0x17b0] sm:$0xff] }
 0x1c5   :  { %2387 = vmatpush.msrb.mxu1 %v374_v24  ;;  %2407 = vmatpush.msrb.mxu2 %v454_v25  ;;  %v709_v24 = vld [vmem:[%s8981_s1 + $0x1530] sm:$0xff] }
 0x1c6   :  { %2427 = vmatpush.msrb.mxu3 %v534_v26  ;;  %2441 = vmatpush.msrb.mxu0 %v644_v27  ;;  %v869_v25 = vld [vmem:[%s8981_s1 + $0x1a30] sm:$0xff]  ;;  %v979_v26 = vld [vmem:[%s8981_s1 + $0x1da0] sm:$0xff]  ;;  %v784_v27 = vld [vmem:[%s8981_s1 + $0x1788] sm:$0xff] }
 0x1c7   :  { %2388 = vmatpush.msrb.mxu1 %v369_v28  ;;  %2408 = vmatpush.msrb.mxu2 %v449_v29  ;;  %v704_v28 = vld [vmem:[%s8981_s1 + $0x1508] sm:$0xff] }
 0x1c8   :  { %2428 = vmatpush.msrb.mxu3 %v529_v30  ;;  %2442 = vmatpush.msrb.mxu0 %v639_v31  ;;  %v864_v29 = vld [vmem:[%s8981_s1 + $0x1a08] sm:$0xff]  ;;  %v974_v30 = vld [vmem:[%s8981_s1 + $0x1d78] sm:$0xff]  ;;  %v699_v31 = vld [vmem:[%s8981_s1 + $0x14e0] sm:$0xff] }
 0x1c9   :  { %2389 = vmatpush.msrb.mxu1 %v364_v32  ;;  %2409 = vmatpush.msrb.mxu2 %v444_v62  ;;  %v779_v32 = vld [vmem:[%s8981_s1 + $0x1760] sm:$0xff] }
 0x1ca   :  { %2429 = vmatpush.msrb.mxu3 %v524_v35  ;;  %2443 = vmatpush.msrb.mxu0 %v634_v36  ;;  %v859_v62 = vld [vmem:[%s8981_s1 + $0x19e0] sm:$0xff]  ;;  %v969_v35 = vld [vmem:[%s8981_s1 + $0x1d50] sm:$0xff]  ;;  %v694_v36 = vld [vmem:[%s8981_s1 + $0x14b8] sm:$0xff] }
 0x1cb   :  { %2390 = vmatpush.msrb.mxu1 %v359_v33  ;;  %2410 = vmatpush.msrb.mxu2 %v439_v37  ;;  %v774_v33 = vld [vmem:[%s8981_s1 + $0x1738] sm:$0xff] }
 0x1cc   :  { %2430 = vmatpush.msrb.mxu3 %v519_v39  ;;  %2444 = vmatpush.msrb.mxu0 %v629_v40  ;;  %v854_v37 = vld [vmem:[%s8981_s1 + $0x19b8] sm:$0xff]  ;;  %v964_v39 = vld [vmem:[%s8981_s1 + $0x1d28] sm:$0xff]  ;;  %v689_v40 = vld [vmem:[%s8981_s1 + $0x1490] sm:$0xff] }
 0x1cd   :  { %2391 = vmatpush.msrb.mxu1 %v354_v41  ;;  %2411 = vmatpush.msrb.mxu2 %v434_v42  ;;  %v769_v41 = vld [vmem:[%s8981_s1 + $0x1710] sm:$0xff] }
 0x1ce   :  { %2431 = vmatpush.msrb.mxu3 %v514_v43  ;;  %2445 = vmatpush.msrb.mxu0 %v624_v44  ;;  %v849_v42 = vld [vmem:[%s8981_s1 + $0x1990] sm:$0xff]  ;;  %v959_v43 = vld [vmem:[%s8981_s1 + $0x1d00] sm:$0xff]  ;;  %v684_v44 = vld [vmem:[%s8981_s1 + $0x1468] sm:$0xff] }
 0x1cf   :  { %2312 = vmatmul.f32.vlgmr.msra.gmra.mxu1 %v4268_v48  ;;  %2332 = vmatmul.f32.vlgmr.msra.gmra.mxu2 %v4270_v49 }
 0x1d0   :  { %2352 = vmatmul.f32.vlgmr.msra.gmra.mxu3 %v4272_v50  ;;  %2456 = vmatpush.msra.mxu1 %v749_v45  ;;  %v764_v45 = vld [vmem:[%s8981_s1 + $0x16e8] sm:$0xff] }
 0x1d1   :  { %2476 = vmatpush.msra.mxu2 %v829_v46  ;;  %2496 = vmatpush.msra.mxu3 %v909_v47  ;;  %v844_v46 = vld [vmem:[%s8981_s1 + $0x1968] sm:$0xff]  ;;  %v954_v47 = vld [vmem:[%s8981_s1 + $0x1cd8] sm:$0xff] }
 0x1d2   :  { %2446 = vmatpush.msrb.mxu0 %v619_v52  ;;  %2457 = vmatpush.msra.mxu1 %v744_v53  ;;  %v679_v52 = vld [vmem:[%s8981_s1 + $0x1440] sm:$0xff] }
 0x1d3   :  { %2477 = vmatpush.msra.mxu2 %v824_v55  ;;  %2497 = vmatpush.msra.mxu3 %v904_v56  ;;  %v759_v53 = vld [vmem:[%s8981_s1 + $0x16c0] sm:$0xff]  ;;  %v949_v56 = vld [vmem:[%s8981_s1 + $0x1cb0] sm:$0xff] }
 0x1d4   :  { %2447 = vmatpush.msrb.mxu0 %v614_v57  ;;  %2458 = vmatpush.msra.mxu1 %v739_v58  ;;  %v839_v55 = vld [vmem:[%s8981_s1 + $0x1940] sm:$0xff]  ;;  %v674_v57 = vld [vmem:[%s8981_s1 + $0x1418] sm:$0xff] }
 0x1d5   :  { %2478 = vmatpush.msra.mxu2 %v819_v60  ;;  %2498 = vmatpush.msra.mxu3 %v899_v61  ;;  %v754_v58 = vld [vmem:[%s8981_s1 + $0x1698] sm:$0xff]  ;;  %v944_v61 = vld [vmem:[%s8981_s1 + $0x1c88] sm:$0xff] }
 0x1d6   :  { %2448 = vmatpush.msrb.mxu0 %v609_v63  ;;  %2459 = vmatpush.msra.mxu1 %v734_v4  ;;  %v834_v60 = vld [vmem:[%s8981_s1 + $0x1918] sm:$0xff]  ;;  %v1069_v63 = vld [vmem:[%s8981_s1 + $0x2070] sm:$0xff] }
 0x1d7   :  { %2479 = vmatpush.msra.mxu2 %v814_v5  ;;  %2499 = vmatpush.msra.mxu3 %v894_v6  ;;  %v1149_v4 = vld [vmem:[%s8981_s1 + $0x22f0] sm:$0xff]  ;;  %v939_v6 = vld [vmem:[%s8981_s1 + $0x1c60] sm:$0xff] }
 0x1d8   :  { %2449 = vmatpush.msrb.mxu0 %v604_v7  ;;  %2412 = vmatmul.f32.vlgmr.msrb.gmra.mxu2 %v4318_v3  ;;  %v1229_v5 = vld [vmem:[%s8981_s1 + $0x2570] sm:$0xff]  ;;  %v3849_v7 = vld.sshfl [vmem:[#allocation1] sm:$0xff pattern:$0x73625140] }
 0x1d9   :  { %2460 = vmatpush.msra.mxu1 %v729_v8  ;;  %2480 = vmatpush.msra.mxu2 %v809_v9  ;;  %v3850_v8 = vld.sshfl [vmem:[#allocation1 + $0x8] sm:$0xff pattern:$0x73625140] }
 0x1da   :  { %2500 = vmatpush.msra.mxu3 %v889_v10  ;;  %2450 = vmatpush.msrb.mxu0 %v599_v11  ;;  %v1064_v9 = vld [vmem:[%s8981_s1 + $0x2048] sm:$0xff] }
 0x1db   :  { %2372 = vmatmul.f32.vlgmr.msra.gmra.mxu0 %v4274_v51  ;;  %2432 = vmatmul.f32.vlgmr.msrb.gmra.mxu3 %v4312_v0  ;;  %v1144_v10 = vld [vmem:[%s8981_s1 + $0x22c8] sm:$0xff] }
 0x1dc   :  { %2461 = vmatpush.msra.mxu1 %v724_v12  ;;  %2481 = vmatpush.msra.mxu2 %v804_v13  ;;  %v1224_v11 = vld [vmem:[%s8981_s1 + $0x2548] sm:$0xff]  ;;  %v934_v12 = vld [vmem:[%s8981_s1 + $0x1c38] sm:$0xff]  ;;  %v1059_v13 = vld [vmem:[%s8981_s1 + $0x2020] sm:$0xff] }
 0x1dd   :  { %2501 = vmatpush.msra.mxu3 %v884_v14  ;;  %2451 = vmatpush.msrb.mxu0 %v594_v15  ;;  %v1139_v14 = vld [vmem:[%s8981_s1 + $0x22a0] sm:$0xff] }
 0x1de   :  { %2392 = vmatmul.f32.vlgmr.msrb.gmra.mxu1 %v4314_v1  ;;  %2482 = vmatpush.msra.mxu2 %v799_v16  ;;  %v1219_v15 = vld [vmem:[%s8981_s1 + $0x2520] sm:$0xff]  ;;  %v929_v16 = vld [vmem:[%s8981_s1 + $0x1c10] sm:$0xff] }
 0x1df   :  { %2462 = vmatpush.msra.mxu1 %v719_v17  ;;  %2502 = vmatpush.msra.mxu3 %v879_v18  ;;  %v1054_v17 = vld [vmem:[%s8981_s1 + $0x1ff8] sm:$0xff] }
 0x1e0   :  { %2516 = vmatpush.msra.mxu0 %v989_v19  ;;  %2483 = vmatpush.msra.mxu2 %v794_v20  ;;  %v1214_v18 = vld [vmem:[%s8981_s1 + $0x24f8] sm:$0xff]  ;;  %v924_v19 = vld [vmem:[%s8981_s1 + $0x1be8] sm:$0xff]  ;;  %v1049_v20 = vld [vmem:[%s8981_s1 + $0x1fd0] sm:$0xff] }
 0x1e1   :  { %2463 = vmatpush.msra.mxu1 %v714_v34  ;;  %2503 = vmatpush.msra.mxu3 %v874_v21  ;;  %v1129_v34 = vld [vmem:[%s8981_s1 + $0x2250] sm:$0xff] }
 0x1e2   :  { %2517 = vmatpush.msra.mxu0 %v984_v22  ;;  %2484 = vmatpush.msra.mxu2 %v789_v23  ;;  %v1209_v21 = vld [vmem:[%s8981_s1 + $0x24d0] sm:$0xff]  ;;  %v919_v22 = vld [vmem:[%s8981_s1 + $0x1bc0] sm:$0xff]  ;;  %v1044_v23 = vld [vmem:[%s8981_s1 + $0x1fa8] sm:$0xff] }
 0x1e3   :  { %2464 = vmatpush.msra.mxu1 %v709_v24  ;;  %2504 = vmatpush.msra.mxu3 %v869_v25  ;;  %v1124_v24 = vld [vmem:[%s8981_s1 + $0x2228] sm:$0xff] }
 0x1e4   :  { %2518 = vmatpush.msra.mxu0 %v979_v26  ;;  %2485 = vmatpush.msra.mxu2 %v784_v27  ;;  %v1204_v25 = vld [vmem:[%s8981_s1 + $0x24a8] sm:$0xff]  ;;  %v914_v26 = vld [vmem:[%s8981_s1 + $0x1b98] sm:$0xff]  ;;  %v1039_v27 = vld [vmem:[%s8981_s1 + $0x1f80] sm:$0xff] }
 0x1e5   :  { %2452 = vmatmul.f32.vlgmr.msrb.gmra.mxu0 %v4316_v2  ;;  %2465 = vmatpush.msra.mxu1 %v704_v28  ;;  %v1119_v28 = vld [vmem:[%s8981_s1 + $0x2200] sm:$0xff] }
 0x1e6   :  { %2505 = vmatpush.msra.mxu3 %v864_v29  ;;  %2519 = vmatpush.msra.mxu0 %v974_v30  ;;  %v1199_v29 = vld [vmem:[%s8981_s1 + $0x2480] sm:$0xff]  ;;  %v110_v30 = vld [vmem:[%s8981_s1 + $0x278] sm:$0xff] }
 0x1e7   :  { %2466 = vmatpush.msra.mxu1 %v699_v31  ;;  %2486 = vmatpush.msra.mxu2 %v779_v32  ;;  %v1034_v31 = vld [vmem:[%s8981_s1 + $0x1f58] sm:$0xff] }
 0x1e8   :  { %2506 = vmatpush.msra.mxu3 %v859_v62  ;;  %2520 = vmatpush.msra.mxu0 %v969_v35  ;;  %v1114_v32 = vld [vmem:[%s8981_s1 + $0x21d8] sm:$0xff] }
 0x1e9   :  { %2467 = vmatpush.msra.mxu1 %v694_v36  ;;  %2487 = vmatpush.msra.mxu2 %v774_v33  ;;  %v3851_v62 = vld.sshfl [vmem:[#allocation1 + $0x18] sm:$0xff pattern:$0x73625140]  ;;  %v105_v36 = vld [vmem:[%s8981_s1 + $0x250] sm:$0xff] }
 0x1ea   :  { %2507 = vmatpush.msra.mxu3 %v854_v37  ;;  %2521 = vmatpush.msra.mxu0 %v964_v39  ;;  %v1194_v35 = vld [vmem:[%s8981_s1 + $0x2458] sm:$0xff]  ;;  %v1029_v33 = vld [vmem:[%s8981_s1 + $0x1f30] sm:$0xff] }
 0x1eb   :  { %2468 = vmatpush.msra.mxu1 %v689_v40  ;;  %2488 = vmatpush.msra.mxu2 %v769_v41  ;;  %v1109_v37 = vld [vmem:[%s8981_s1 + $0x21b0] sm:$0xff]  ;;  %v100_v40 = vld [vmem:[%s8981_s1 + $0x228] sm:$0xff] }
 0x1ec   :  { %2508 = vmatpush.msra.mxu3 %v849_v42  ;;  %2522 = vmatpush.msra.mxu0 %v959_v43  ;;  %v1189_v39 = vld [vmem:[%s8981_s1 + $0x2430] sm:$0xff]  ;;  %v1024_v41 = vld [vmem:[%s8981_s1 + $0x1f08] sm:$0xff] }
 0x1ed   :  { %2469 = vmatpush.msra.mxu1 %v684_v44  ;;  %2489 = vmatpush.msra.mxu2 %v764_v45  ;;  %v1104_v42 = vld [vmem:[%s8981_s1 + $0x2188] sm:$0xff]  ;;  %v95_v44 = vld [vmem:[%s8981_s1 + $0x200] sm:$0xff] }
 0x1ee   :  { %2509 = vmatpush.msra.mxu3 %v844_v46  ;;  %2523 = vmatpush.msra.mxu0 %v954_v47  ;;  %v1184_v43 = vld [vmem:[%s8981_s1 + $0x2408] sm:$0xff]  ;;  %v1019_v45 = vld [vmem:[%s8981_s1 + $0x1ee0] sm:$0xff] }
 0x1ef   :  { %2470 = vmatpush.msra.mxu1 %v679_v52  ;;  %2490 = vmatpush.msra.mxu2 %v759_v53  ;;  %v1099_v46 = vld [vmem:[%s8981_s1 + $0x2160] sm:$0xff]  ;;  %v90_v52 = vld [vmem:[%s8981_s1 + $0x1d8] sm:$0xff] }
 0x1f0   :  { %2510 = vmatpush.msra.mxu3 %v839_v55  ;;  %2524 = vmatpush.msra.mxu0 %v949_v56  ;;  %v1179_v47 = vld [vmem:[%s8981_s1 + $0x23e0] sm:$0xff]  ;;  %v1014_v53 = vld [vmem:[%s8981_s1 + $0x1eb8] sm:$0xff] }
 0x1f1   :  { %2471 = vmatpush.msra.mxu1 %v674_v57  ;;  %2491 = vmatpush.msra.mxu2 %v754_v58  ;;  %v1094_v55 = vld [vmem:[%s8981_s1 + $0x2138] sm:$0xff]  ;;  %v85_v57 = vld [vmem:[%s8981_s1 + $0x1b0] sm:$0xff] }
 0x1f2   :  { %2511 = vmatpush.msra.mxu3 %v834_v60  ;;  %2525 = vmatpush.msra.mxu0 %v944_v61  ;;  %v1174_v56 = vld [vmem:[%s8981_s1 + $0x23b8] sm:$0xff]  ;;  %v1009_v58 = vld [vmem:[%s8981_s1 + $0x1e90] sm:$0xff] }
 0x1f3   :  { %2472 = vmatmul.f32.vlgmr.msra.gmra.mxu1 %v3849_v7  ;;  %2492 = vmatmul.f32.vlgmr.msra.gmra.mxu2 %v3850_v8  ;;  %v1089_v60 = vld [vmem:[%s8981_s1 + $0x2110] sm:$0xff]  ;;  %v75_v7 = vld [vmem:[%s8981_s1 + $0x160] sm:$0xff] }
 0x1f4   :  { %2536 = vmatpush.msrb.mxu1 %v1069_v63  ;;  %2556 = vmatpush.msrb.mxu2 %v1149_v4  ;;  %v1169_v61 = vld [vmem:[%s8981_s1 + $0x2390] sm:$0xff]  ;;  %v80_v63 = vld [vmem:[%s8981_s1 + $0x188] sm:$0xff]  ;;  %v999_v8 = vld [vmem:[%s8981_s1 + $0x1e40] sm:$0xff] }
 0x1f5   :  { %2576 = vmatpush.msrb.mxu3 %v1229_v5  ;;  %2526 = vmatpush.msra.mxu0 %v939_v6  ;;  %v1004_v4 = vld [vmem:[%s8981_s1 + $0x1e68] sm:$0xff] }
 0x1f6   :  { %2512 = vmatmul.f32.vlgmr.msra.gmra.mxu3 %v6128_v38  ;;  %2537 = vmatpush.msrb.mxu1 %v1064_v9  ;;  %v1134_v38 = vld [vmem:[%s8981_s1 + $0x2278] sm:$0xff]  ;;  %v1084_v5 = vld [vmem:[%s8981_s1 + $0x20e8] sm:$0xff]  ;;  %v1079_v9 = vld [vmem:[%s8981_s1 + $0x20c0] sm:$0xff] }
 0x1f7   :  { %2557 = vmatpush.msrb.mxu2 %v1144_v10  ;;  %2577 = vmatpush.msrb.mxu3 %v1224_v11  ;;  %v1164_v6 = vld [vmem:[%s8981_s1 + $0x2368] sm:$0xff]  ;;  %v1159_v10 = vld [vmem:[%s8981_s1 + $0x2340] sm:$0xff]  ;;  %v70_v11 = vld [vmem:[%s8981_s1 + $0x138] sm:$0xff] }
 0x1f8   :  { %2527 = vmatpush.msra.mxu0 %v934_v12  ;;  %2538 = vmatpush.msrb.mxu1 %v1059_v13  ;;  %v994_v12 = vld [vmem:[%s8981_s1 + $0x1e18] sm:$0xff] }
 0x1f9   :  { %2558 = vmatpush.msrb.mxu2 %v1139_v14  ;;  %2578 = vmatpush.msrb.mxu3 %v1219_v15  ;;  %v1074_v13 = vld [vmem:[%s8981_s1 + $0x2098] sm:$0xff]  ;;  %v65_v15 = vld [vmem:[%s8981_s1 + $0x110] sm:$0xff] }
 0x1fa   :  { %2528 = vmatpush.msra.mxu0 %v929_v16  ;;  %2539 = vmatpush.msrb.mxu1 %v1054_v17  ;;  %v1154_v14 = vld [vmem:[%s8981_s1 + $0x2318] sm:$0xff]  ;;  %v1279_v16 = vld [vmem:[%s8981_s1 + $0x2700] sm:$0xff] }
 0x1fb   :  { %2559 = vmatpush.msrb.mxu2 %v1134_v38  ;;  %2579 = vmatpush.msrb.mxu3 %v1214_v18  ;;  %v190_v17 = vld [vmem:[%s8981_s1 + $0x4f8] sm:$0xff]  ;;  %v60_v18 = vld [vmem:[%s8981_s1 + $0xe8] sm:$0xff] }
 0x1fc   :  { %2529 = vmatpush.msra.mxu0 %v924_v19  ;;  %2540 = vmatpush.msrb.mxu1 %v1049_v20  ;;  %v350_v38 = vld [vmem:[%s8981_s1 + $0x9f8] sm:$0xff]  ;;  %v3852_v19 = vld.sshfl [vmem:[#allocation1 + $0x20] sm:$0xff pattern:$0x73625140] }
 0x1fd   :  { %2560 = vmatpush.msrb.mxu2 %v1129_v34  ;;  %2580 = vmatpush.msrb.mxu3 %v1209_v21  ;;  %v3853_v20 = vld.sshfl [vmem:[#allocation1 + $0x28] sm:$0xff pattern:$0x73625140]  ;;  %v1274_v34 = vld [vmem:[%s8981_s1 + $0x26d8] sm:$0xff]  ;;  %v185_v21 = vld [vmem:[%s8981_s1 + $0x4d0] sm:$0xff] }
 0x1fe   :  { %2530 = vmatpush.msra.mxu0 %v919_v22  ;;  %2541 = vmatpush.msrb.mxu1 %v1044_v23  ;;  %v345_v22 = vld [vmem:[%s8981_s1 + $0x9d0] sm:$0xff]  ;;  %v55_v23 = vld [vmem:[%s8981_s1 + $0xc0] sm:$0xff] }
 0x1ff   :  { %2561 = vmatpush.msrb.mxu2 %v1124_v24  ;;  %2581 = vmatpush.msrb.mxu3 %v1204_v25  ;;  %v1269_v24 = vld [vmem:[%s8981_s1 + $0x26b0] sm:$0xff]  ;;  %v180_v25 = vld [vmem:[%s8981_s1 + $0x4a8] sm:$0xff] }
 0x200   :  { %2531 = vmatpush.msra.mxu0 %v914_v26  ;;  %2542 = vmatpush.msrb.mxu1 %v1039_v27  ;;  %v340_v26 = vld [vmem:[%s8981_s1 + $0x9a8] sm:$0xff]  ;;  %v50_v27 = vld [vmem:[%s8981_s1 + $0x98] sm:$0xff] }
 0x201   :  { %2532 = vmatmul.f32.vlgmr.msra.gmra.mxu0 %v3851_v62  ;;  %2562 = vmatpush.msrb.mxu2 %v1119_v28  ;;  %v1264_v28 = vld [vmem:[%s8981_s1 + $0x2688] sm:$0xff]  ;;  %v330_v62 = vld [vmem:[%s8981_s1 + $0x958] sm:$0xff] }
 0x202   :  { %2582 = vmatpush.msrb.mxu3 %v1199_v29  ;;  %2616 = vmatpush.msrb.mxu0 %v110_v30  ;;  %v335_v29 = vld [vmem:[%s8981_s1 + $0x980] sm:$0xff]  ;;  %v45_v30 = vld [vmem:[%s8981_s1 + $0x70] sm:$0xff] }
 0x203   :  { %2543 = vmatpush.msrb.mxu1 %v1034_v31  ;;  %2563 = vmatpush.msrb.mxu2 %v1114_v32  ;;  %v1259_v31 = vld [vmem:[%s8981_s1 + $0x2660] sm:$0xff]  ;;  %v170_v32 = vld [vmem:[%s8981_s1 + $0x458] sm:$0xff] }
 0x204   :  { %2583 = vmatpush.msrb.mxu3 %v1194_v35  ;;  %2617 = vmatpush.msrb.mxu0 %v105_v36  ;;  %v40_v35 = vld [vmem:[%s8981_s1 + $0x48] sm:$0xff]  ;;  %v1254_v36 = vld [vmem:[%s8981_s1 + $0x2638] sm:$0xff] }
 0x205   :  { %2544 = vmatpush.msrb.mxu1 %v1029_v33  ;;  %2564 = vmatpush.msrb.mxu2 %v1109_v37  ;;  %v165_v33 = vld [vmem:[%s8981_s1 + $0x430] sm:$0xff] }
 0x206   :  { %2584 = vmatpush.msrb.mxu3 %v1189_v39  ;;  %2618 = vmatpush.msrb.mxu0 %v100_v40  ;;  %v325_v37 = vld [vmem:[%s8981_s1 + $0x930] sm:$0xff]  ;;  %v35_v39 = vld [vmem:[%s8981_s1 + $0x20] sm:$0xff] }
 0x207   :  { %2545 = vmatpush.msrb.mxu1 %v1024_v41  ;;  %2565 = vmatpush.msrb.mxu2 %v1104_v42  ;;  %v1249_v40 = vld [vmem:[%s8981_s1 + $0x2610] sm:$0xff]  ;;  %v160_v41 = vld [vmem:[%s8981_s1 + $0x408] sm:$0xff] }
 0x208   :  { %2585 = vmatpush.msrb.mxu3 %v1184_v43  ;;  %2619 = vmatpush.msrb.mxu0 %v95_v44  ;;  %v320_v42 = vld [vmem:[%s8981_s1 + $0x908] sm:$0xff]  ;;  %v430_v43 = vld [vmem:[%s8981_s1 + $0xc78] sm:$0xff] }
 0x209   :  { %2546 = vmatpush.msrb.mxu1 %v1019_v45  ;;  %2566 = vmatpush.msrb.mxu2 %v1099_v46  ;;  %v1244_v44 = vld [vmem:[%s8981_s1 + $0x25e8] sm:$0xff]  ;;  %v155_v45 = vld [vmem:[%s8981_s1 + $0x3e0] sm:$0xff] }
 0x20a   :  { %2586 = vmatpush.msrb.mxu3 %v1179_v47  ;;  %2620 = vmatpush.msrb.mxu0 %v90_v52  ;;  %v315_v46 = vld [vmem:[%s8981_s1 + $0x8e0] sm:$0xff]  ;;  %v425_v47 = vld [vmem:[%s8981_s1 + $0xc50] sm:$0xff] }
 0x20b   :  { %2547 = vmatpush.msrb.mxu1 %v1014_v53  ;;  %2567 = vmatpush.msrb.mxu2 %v1094_v55  ;;  %v1239_v52 = vld [vmem:[%s8981_s1 + $0x25c0] sm:$0xff]  ;;  %v150_v53 = vld [vmem:[%s8981_s1 + $0x3b8] sm:$0xff] }
 0x20c   :  { %2587 = vmatpush.msrb.mxu3 %v1174_v56  ;;  %2621 = vmatpush.msrb.mxu0 %v85_v57  ;;  %v310_v55 = vld [vmem:[%s8981_s1 + $0x8b8] sm:$0xff]  ;;  %v420_v56 = vld [vmem:[%s8981_s1 + $0xc28] sm:$0xff] }
 0x20d   :  { %2548 = vmatpush.msrb.mxu1 %v1009_v58  ;;  %2568 = vmatpush.msrb.mxu2 %v1089_v60  ;;  %v1234_v57 = vld [vmem:[%s8981_s1 + $0x2598] sm:$0xff]  ;;  %v145_v58 = vld [vmem:[%s8981_s1 + $0x390] sm:$0xff] }
 0x20e   :  { %2588 = vmatpush.msrb.mxu3 %v1169_v61  ;;  %2622 = vmatpush.msrb.mxu0 %v80_v63  ;;  %v305_v60 = vld [vmem:[%s8981_s1 + $0x890] sm:$0xff]  ;;  %v415_v61 = vld [vmem:[%s8981_s1 + $0xc00] sm:$0xff]  ;;  %v270_v63 = vld [vmem:[%s8981_s1 + $0x778] sm:$0xff] }
 0x20f   :  { %2549 = vmatpush.msrb.mxu1 %v1004_v4  ;;  %2569 = vmatpush.msrb.mxu2 %v1084_v5  ;;  %v140_v4 = vld [vmem:[%s8981_s1 + $0x368] sm:$0xff] }
 0x210   :  { %2589 = vmatpush.msrb.mxu3 %v1164_v6  ;;  %2623 = vmatpush.msrb.mxu0 %v75_v7  ;;  %v300_v5 = vld [vmem:[%s8981_s1 + $0x868] sm:$0xff]  ;;  %v410_v6 = vld [vmem:[%s8981_s1 + $0xbd8] sm:$0xff] }
 0x211   :  { %2550 = vmatpush.msrb.mxu1 %v999_v8  ;;  %2570 = vmatpush.msrb.mxu2 %v1079_v9  ;;  %v3854_v7 = vld.sshfl [vmem:[#allocation1 + $0x38] sm:$0xff pattern:$0x73625140]  ;;  %v265_v8 = vld [vmem:[%s8981_s1 + $0x750] sm:$0xff]  ;;  %v135_v9 = vld [vmem:[%s8981_s1 + $0x340] sm:$0xff] }
 0x212   :  { %2590 = vmatpush.msrb.mxu3 %v1159_v10  ;;  %2624 = vmatpush.msrb.mxu0 %v70_v11  ;;  %v295_v10 = vld [vmem:[%s8981_s1 + $0x840] sm:$0xff]  ;;  %v405_v11 = vld [vmem:[%s8981_s1 + $0xbb0] sm:$0xff] }
 0x213   :  { %2551 = vmatpush.msrb.mxu1 %v994_v12  ;;  %2571 = vmatpush.msrb.mxu2 %v1074_v13  ;;  %v260_v12 = vld [vmem:[%s8981_s1 + $0x728] sm:$0xff]  ;;  %v130_v13 = vld [vmem:[%s8981_s1 + $0x318] sm:$0xff] }
 0x214   :  { %2591 = vmatpush.msrb.mxu3 %v1154_v14  ;;  %2625 = vmatpush.msrb.mxu0 %v65_v15  ;;  %v290_v14 = vld [vmem:[%s8981_s1 + $0x818] sm:$0xff]  ;;  %v400_v15 = vld [vmem:[%s8981_s1 + $0xb88] sm:$0xff] }
 0x215   :  { %2552 = vmatmul.f32.vlgmr.msrb.gmra.mxu1 %v3852_v19  ;;  %2572 = vmatmul.f32.vlgmr.msrb.gmra.mxu2 %v3853_v20  ;;  %v250_v19 = vld [vmem:[%s8981_s1 + $0x6d8] sm:$0xff]  ;;  %v120_v20 = vld [vmem:[%s8981_s1 + $0x2c8] sm:$0xff] }
 0x216   :  { %2602 = vmatpush.msra.mxu2 %v1279_v16  ;;  %2636 = vmatpush.msra.mxu1 %v190_v17  ;;  %v255_v16 = vld [vmem:[%s8981_s1 + $0x700] sm:$0xff]  ;;  %v125_v17 = vld [vmem:[%s8981_s1 + $0x2f0] sm:$0xff] }
 0x217   :  { %2676 = vmatpush.msra.mxu3 %v350_v38  ;;  %2626 = vmatpush.msrb.mxu0 %v60_v18  ;;  %v285_v38 = vld [vmem:[%s8981_s1 + $0x7f0] sm:$0xff]  ;;  %v395_v18 = vld [vmem:[%s8981_s1 + $0xb60] sm:$0xff] }
 0x218   :  { %2592 = vmatmul.f32.vlgmr.msrb.gmra.mxu3 %v6321_v54  ;;  %2603 = vmatpush.msra.mxu2 %v1274_v34  ;;  %v175_v54 = vld [vmem:[%s8981_s1 + $0x480] sm:$0xff]  ;;  %v280_v34 = vld [vmem:[%s8981_s1 + $0x7c8] sm:$0xff] }
 0x219   :  { %2637 = vmatpush.msra.mxu1 %v185_v21  ;;  %2677 = vmatpush.msra.mxu3 %v345_v22  ;;  %v390_v21 = vld [vmem:[%s8981_s1 + $0xb38] sm:$0xff]  ;;  %v245_v22 = vld [vmem:[%s8981_s1 + $0x6b0] sm:$0xff] }
 0x21a   :  { %2627 = vmatpush.msrb.mxu0 %v55_v23  ;;  %2604 = vmatpush.msra.mxu2 %v1269_v24  ;;  %v115_v23 = vld [vmem:[%s8981_s1 + $0x2a0] sm:$0xff] }
 0x21b   :  { %2638 = vmatpush.msra.mxu1 %v180_v25  ;;  %2678 = vmatpush.msra.mxu3 %v340_v26  ;;  %v275_v24 = vld [vmem:[%s8981_s1 + $0x7a0] sm:$0xff]  ;;  %v385_v25 = vld [vmem:[%s8981_s1 + $0xb10] sm:$0xff]  ;;  %v240_v26 = vld [vmem:[%s8981_s1 + $0x688] sm:$0xff] }
 0x21c   :  { %2628 = vmatpush.msrb.mxu0 %v50_v27  ;;  %2605 = vmatpush.msra.mxu2 %v1264_v28  ;;  %v510_v27 = vld [vmem:[%s8981_s1 + $0xef8] sm:$0xff] }
 0x21d   :  { %2639 = vmatpush.msra.mxu1 %v175_v54  ;;  %2679 = vmatpush.msra.mxu3 %v335_v29  ;;  %v670_v28 = vld [vmem:[%s8981_s1 + $0x13f8] sm:$0xff]  ;;  %v380_v54 = vld [vmem:[%s8981_s1 + $0xae8] sm:$0xff]  ;;  %v235_v29 = vld [vmem:[%s8981_s1 + $0x660] sm:$0xff] }
 0x21e   :  { %2629 = vmatpush.msrb.mxu0 %v45_v30  ;;  %2606 = vmatpush.msra.mxu2 %v1259_v31  ;;  %v505_v30 = vld [vmem:[%s8981_s1 + $0xed0] sm:$0xff] }
 0x21f   :  { %2640 = vmatpush.msra.mxu1 %v170_v32  ;;  %2680 = vmatpush.msra.mxu3 %v330_v62  ;;  %v665_v31 = vld [vmem:[%s8981_s1 + $0x13d0] sm:$0xff]  ;;  %v375_v32 = vld [vmem:[%s8981_s1 + $0xac0] sm:$0xff]  ;;  %v230_v62 = vld [vmem:[%s8981_s1 + $0x638] sm:$0xff] }
 0x220   :  { %2630 = vmatpush.msrb.mxu0 %v40_v35  ;;  %2607 = vmatpush.msra.mxu2 %v1254_v36  ;;  %v500_v35 = vld [vmem:[%s8981_s1 + $0xea8] sm:$0xff] }
 0x221   :  { %2641 = vmatpush.msra.mxu1 %v165_v33  ;;  %2681 = vmatpush.msra.mxu3 %v325_v37  ;;  %v660_v36 = vld [vmem:[%s8981_s1 + $0x13a8] sm:$0xff]  ;;  %v370_v33 = vld [vmem:[%s8981_s1 + $0xa98] sm:$0xff]  ;;  %v225_v37 = vld [vmem:[%s8981_s1 + $0x610] sm:$0xff] }
 0x222   :  { %2631 = vmatpush.msrb.mxu0 %v35_v39  ;;  %2608 = vmatpush.msra.mxu2 %v1249_v40  ;;  %v495_v39 = vld [vmem:[%s8981_s1 + $0xe80] sm:$0xff] }
 0x223   :  { %2642 = vmatpush.msra.mxu1 %v160_v41  ;;  %2682 = vmatpush.msra.mxu3 %v320_v42  ;;  %v655_v40 = vld [vmem:[%s8981_s1 + $0x1380] sm:$0xff]  ;;  %v365_v41 = vld [vmem:[%s8981_s1 + $0xa70] sm:$0xff]  ;;  %v220_v42 = vld [vmem:[%s8981_s1 + $0x5e8] sm:$0xff] }
 0x224   :  { %2696 = vmatpush.msra.mxu0 %v430_v43  ;;  %2609 = vmatpush.msra.mxu2 %v1244_v44  ;;  %v490_v43 = vld [vmem:[%s8981_s1 + $0xe58] sm:$0xff] }
 0x225   :  { %2643 = vmatpush.msra.mxu1 %v155_v45  ;;  %2683 = vmatpush.msra.mxu3 %v315_v46  ;;  %v650_v44 = vld [vmem:[%s8981_s1 + $0x1358] sm:$0xff]  ;;  %v360_v45 = vld [vmem:[%s8981_s1 + $0xa48] sm:$0xff]  ;;  %v215_v46 = vld [vmem:[%s8981_s1 + $0x5c0] sm:$0xff] }
 0x226   :  { %2697 = vmatpush.msra.mxu0 %v425_v47  ;;  %2610 = vmatpush.msra.mxu2 %v1239_v52  ;;  %v485_v47 = vld [vmem:[%s8981_s1 + $0xe30] sm:$0xff] }
 0x227   :  { %2644 = vmatpush.msra.mxu1 %v150_v53  ;;  %2684 = vmatpush.msra.mxu3 %v310_v55  ;;  %v645_v52 = vld [vmem:[%s8981_s1 + $0x1330] sm:$0xff]  ;;  %v355_v53 = vld [vmem:[%s8981_s1 + $0xa20] sm:$0xff]  ;;  %v210_v55 = vld [vmem:[%s8981_s1 + $0x598] sm:$0xff] }
 0x228   :  { %2698 = vmatpush.msra.mxu0 %v420_v56  ;;  %2611 = vmatpush.msra.mxu2 %v1234_v57  ;;  %v480_v56 = vld [vmem:[%s8981_s1 + $0xe08] sm:$0xff] }
 0x229   :  { %2645 = vmatpush.msra.mxu1 %v145_v58  ;;  %2685 = vmatpush.msra.mxu3 %v305_v60  ;;  %v640_v57 = vld [vmem:[%s8981_s1 + $0x1308] sm:$0xff]  ;;  %v750_v58 = vld [vmem:[%s8981_s1 + $0x1678] sm:$0xff]  ;;  %v205_v60 = vld [vmem:[%s8981_s1 + $0x570] sm:$0xff] }
 0x22a   :  { %2699 = vmatpush.msra.mxu0 %v415_v61  ;;  %3825 = vmatmul.msk.f32.vlgmr.msra.gmra.mxu2 %vm1333_vm0, %v3854_v7  ;;  %v475_v61 = vld [vmem:[%s8981_s1 + $0xde0] sm:$0xff]  ;;  %v740_v7 = vld [vmem:[%s8981_s1 + $0x1628] sm:$0xff] }
 0x22b   :  { %2656 = vmatpush.msrb.mxu2 %v270_v63  ;;  %2646 = vmatpush.msra.mxu1 %v140_v4  ;;  %v635_v63 = vld [vmem:[%s8981_s1 + $0x12e0] sm:$0xff]  ;;  %v745_v4 = vld [vmem:[%s8981_s1 + $0x1650] sm:$0xff] }
 0x22c   :  { %2686 = vmatpush.msra.mxu3 %v300_v5  ;;  %2700 = vmatpush.msra.mxu0 %v410_v6  ;;  %v200_v5 = vld [vmem:[%s8981_s1 + $0x548] sm:$0xff]  ;;  %v630_v6 = vld [vmem:[%s8981_s1 + $0x12b8] sm:$0xff] }
 0x22d   :  { %2657 = vmatpush.msrb.mxu2 %v265_v8  ;;  %2647 = vmatpush.msra.mxu1 %v135_v9  ;;  %v195_v8 = vld [vmem:[%s8981_s1 + $0x520] sm:$0xff]  ;;  %v465_v9 = vld [vmem:[%s8981_s1 + $0xd90] sm:$0xff] }
 0x22e   :  { %2687 = vmatpush.msra.mxu3 %v295_v10  ;;  %2701 = vmatpush.msra.mxu0 %v405_v11  ;;  %v625_v10 = vld [vmem:[%s8981_s1 + $0x1290] sm:$0xff]  ;;  %v735_v11 = vld [vmem:[%s8981_s1 + $0x1600] sm:$0xff] }
 0x22f   :  { %2658 = vmatpush.msrb.mxu2 %v260_v12  ;;  %2648 = vmatpush.msra.mxu1 %v130_v13  ;;  %v590_v12 = vld [vmem:[%s8981_s1 + $0x1178] sm:$0xff]  ;;  %v460_v13 = vld [vmem:[%s8981_s1 + $0xd68] sm:$0xff] }
 0x230   :  { %2688 = vmatpush.msra.mxu3 %v290_v14  ;;  %2702 = vmatpush.msra.mxu0 %v400_v15  ;;  %v620_v14 = vld [vmem:[%s8981_s1 + $0x1268] sm:$0xff]  ;;  %v730_v15 = vld [vmem:[%s8981_s1 + $0x15d8] sm:$0xff] }
 0x231   :  { %2659 = vmatpush.msrb.mxu2 %v255_v16  ;;  %2649 = vmatpush.msra.mxu1 %v125_v17  ;;  %v585_v16 = vld [vmem:[%s8981_s1 + $0x1150] sm:$0xff]  ;;  %v455_v17 = vld [vmem:[%s8981_s1 + $0xd40] sm:$0xff] }
 0x232   :  { %2689 = vmatpush.msra.mxu3 %v285_v38  ;;  %2703 = vmatpush.msra.mxu0 %v395_v18  ;;  %v615_v38 = vld [vmem:[%s8981_s1 + $0x1240] sm:$0xff]  ;;  %v725_v18 = vld [vmem:[%s8981_s1 + $0x15b0] sm:$0xff] }
 0x233   :  { %2660 = vmatpush.msrb.mxu2 %v250_v19  ;;  %2650 = vmatpush.msra.mxu1 %v120_v20  ;;  %v580_v19 = vld [vmem:[%s8981_s1 + $0x1128] sm:$0xff]  ;;  %v450_v20 = vld [vmem:[%s8981_s1 + $0xd18] sm:$0xff] }
 0x234   :  { %2690 = vmatpush.msra.mxu3 %v280_v34  ;;  %2704 = vmatpush.msra.mxu0 %v390_v21  ;;  %v610_v34 = vld [vmem:[%s8981_s1 + $0x1218] sm:$0xff]  ;;  %v720_v21 = vld [vmem:[%s8981_s1 + $0x1588] sm:$0xff] }
 0x235   :  { %2661 = vmatpush.msrb.mxu2 %v245_v22  ;;  %2651 = vmatpush.msra.mxu1 %v115_v23  ;;  %v575_v22 = vld [vmem:[%s8981_s1 + $0x1100] sm:$0xff]  ;;  %v445_v23 = vld [vmem:[%s8981_s1 + $0xcf0] sm:$0xff] }
 0x236   :  { %2691 = vmatpush.msra.mxu3 %v275_v24  ;;  %2705 = vmatpush.msra.mxu0 %v385_v25  ;;  %v605_v24 = vld [vmem:[%s8981_s1 + $0x11f0] sm:$0xff]  ;;  %v715_v25 = vld [vmem:[%s8981_s1 + $0x1560] sm:$0xff] }
 0x237   :  { %2662 = vmatpush.msrb.mxu2 %v240_v26  ;;  %2716 = vmatpush.msrb.mxu1 %v510_v27  ;;  %v570_v26 = vld [vmem:[%s8981_s1 + $0x10d8] sm:$0xff]  ;;  %v440_v27 = vld [vmem:[%s8981_s1 + $0xcc8] sm:$0xff] }
 0x238   :  { %2756 = vmatpush.msrb.mxu3 %v670_v28  ;;  %2706 = vmatpush.msra.mxu0 %v380_v54  ;;  %v600_v28 = vld [vmem:[%s8981_s1 + $0x11c8] sm:$0xff]  ;;  %v710_v54 = vld [vmem:[%s8981_s1 + $0x1538] sm:$0xff] }
 0x239   :  { %2663 = vmatpush.msrb.mxu2 %v235_v29  ;;  %2717 = vmatpush.msrb.mxu1 %v505_v30  ;;  %v565_v29 = vld [vmem:[%s8981_s1 + $0x10b0] sm:$0xff]  ;;  %v435_v30 = vld [vmem:[%s8981_s1 + $0xca0] sm:$0xff] }
 0x23a   :  { %2757 = vmatpush.msrb.mxu3 %v665_v31  ;;  %2707 = vmatpush.msra.mxu0 %v375_v32  ;;  %v595_v31 = vld [vmem:[%s8981_s1 + $0x11a0] sm:$0xff]  ;;  %v705_v32 = vld [vmem:[%s8981_s1 + $0x1510] sm:$0xff] }
 0x23b   :  { %2664 = vmatpush.msrb.mxu2 %v230_v62  ;;  %2718 = vmatpush.msrb.mxu1 %v500_v35  ;;  %v560_v62 = vld [vmem:[%s8981_s1 + $0x1088] sm:$0xff]  ;;  %v7408_v35 = vpop.f32.mrf.mxu1 }
 0x23c   :  { %2758 = vmatpush.msrb.mxu3 %v660_v36  ;;  %2708 = vmatpush.msra.mxu0 %v370_v33  ;;  %v830_v36 = vld [vmem:[%s8981_s1 + $0x18f8] sm:$0xff] }
 0x23d   :  { %2665 = vmatpush.msrb.mxu2 %v225_v37  ;;  %2719 = vmatpush.msrb.mxu1 %v495_v39  ;;  %v990_v33 = vld [vmem:[%s8981_s1 + $0x1df8] sm:$0xff]  ;;  %v700_v37 = vld [vmem:[%s8981_s1 + $0x14e8] sm:$0xff]  ;;  %v555_v39 = vld [vmem:[%s8981_s1 + $0x1060] sm:$0xff] }
 0x23e   :  { %2759 = vmatpush.msrb.mxu3 %v655_v40  ;;  %2709 = vmatpush.msra.mxu0 %v365_v41  ;;  %v825_v40 = vld [vmem:[%s8981_s1 + $0x18d0] sm:$0xff] }
 0x23f   :  { %2666 = vmatpush.msrb.mxu2 %v220_v42  ;;  %2720 = vmatpush.msrb.mxu1 %v490_v43  ;;  %v985_v41 = vld [vmem:[%s8981_s1 + $0x1dd0] sm:$0xff]  ;;  %v550_v42 = vld [vmem:[%s8981_s1 + $0x1038] sm:$0xff]  ;;  %v820_v43 = vld [vmem:[%s8981_s1 + $0x18a8] sm:$0xff] }
 0x240   :  { %2760 = vmatpush.msrb.mxu3 %v650_v44  ;;  %2710 = vmatpush.msra.mxu0 %v360_v45  ;;  %v980_v44 = vld [vmem:[%s8981_s1 + $0x1da8] sm:$0xff]  ;;  %v690_v45 = vld [vmem:[%s8981_s1 + $0x1498] sm:$0xff] }
 0x241   :  { %2667 = vmatpush.msrb.mxu2 %v215_v46  ;;  %2721 = vmatpush.msrb.mxu1 %v485_v47  ;;  %v545_v46 = vld [vmem:[%s8981_s1 + $0x1010] sm:$0xff]  ;;  %v815_v47 = vld [vmem:[%s8981_s1 + $0x1880] sm:$0xff] }
 0x242   :  { %2761 = vmatpush.msrb.mxu3 %v645_v52  ;;  %2711 = vmatpush.msra.mxu0 %v355_v53  ;;  %v975_v52 = vld [vmem:[%s8981_s1 + $0x1d80] sm:$0xff]  ;;  %v685_v53 = vld [vmem:[%s8981_s1 + $0x1470] sm:$0xff] }
 0x243   :  { %2632 = vmatmul.f32.vlgmr.msrb.gmra.mxu0 %v4268_v48  ;;  %2668 = vmatpush.msrb.mxu2 %v210_v55  ;;  %v470_v48 = vld [vmem:[%s8981_s1 + $0xdb8] sm:$0xff]  ;;  %v540_v55 = vld [vmem:[%s8981_s1 + $0xfe8] sm:$0xff] }
 0x244   :  { %2722 = vmatpush.msrb.mxu1 %v480_v56  ;;  %2762 = vmatpush.msrb.mxu3 %v640_v57  ;;  %v7462_v56 = vpop.f32.mrf.mxu3  ;;  %v810_v57 = vld [vmem:[%s8981_s1 + $0x1858] sm:$0xff] }
 0x245   :  { %2776 = vmatpush.msrb.mxu0 %v750_v58  ;;  %2669 = vmatpush.msrb.mxu2 %v205_v60  ;;  %v970_v58 = vld [vmem:[%s8981_s1 + $0x1d58] sm:$0xff]  ;;  %v680_v60 = vld [vmem:[%s8981_s1 + $0x1448] sm:$0xff] }
 0x246   :  { %2723 = vmatpush.msrb.mxu1 %v475_v61  ;;  %2763 = vmatpush.msrb.mxu3 %v635_v63  ;;  %v535_v61 = vld [vmem:[%s8981_s1 + $0xfc0] sm:$0xff]  ;;  %v7476_v63 = vpop.f32.mrf.mxu1 }
 0x247   :  { %2777 = vmatpush.msrb.mxu0 %v745_v4  ;;  %2670 = vmatpush.msrb.mxu2 %v200_v5  ;;  %v805_v4 = vld [vmem:[%s8981_s1 + $0x1830] sm:$0xff] }
 0x248   :  { %2724 = vmatpush.msrb.mxu1 %v470_v48  ;;  %2764 = vmatpush.msrb.mxu3 %v630_v6  ;;  %v965_v5 = vld [vmem:[%s8981_s1 + $0x1d30] sm:$0xff]  ;;  %v675_v48 = vld [vmem:[%s8981_s1 + $0x1420] sm:$0xff]  ;;  %v530_v6 = vld [vmem:[%s8981_s1 + $0xf98] sm:$0xff] }
 0x249   :  { %2778 = vmatpush.msrb.mxu0 %v740_v7  ;;  %2671 = vmatpush.msrb.mxu2 %v195_v8  ;;  %v7490_v7 = vpop.f32.mrf.mxu0  ;;  %v800_v8 = vld [vmem:[%s8981_s1 + $0x1808] sm:$0xff] }
 0x24a   :  { %2725 = vmatpush.msrb.mxu1 %v465_v9  ;;  %2765 = vmatpush.msrb.mxu3 %v625_v10  ;;  %v960_v9 = vld [vmem:[%s8981_s1 + $0x1d08] sm:$0xff]  ;;  %v1070_v10 = vld [vmem:[%s8981_s1 + $0x2078] sm:$0xff] }
 0x24b   :  { %2779 = vmatpush.msrb.mxu0 %v735_v11  ;;  %2736 = vmatpush.msra.mxu2 %v590_v12  ;;  %v525_v12 = vld [vmem:[%s8981_s1 + $0xf70] sm:$0xff] }
 0x24c   :  { %2726 = vmatpush.msrb.mxu1 %v460_v13  ;;  %2766 = vmatpush.msrb.mxu3 %v620_v14  ;;  %v795_v13 = vld [vmem:[%s8981_s1 + $0x17e0] sm:$0xff] }
 0x24d   :  { %2780 = vmatpush.msrb.mxu0 %v730_v15  ;;  %2737 = vmatpush.msra.mxu2 %v585_v16  ;;  %v955_v14 = vld [vmem:[%s8981_s1 + $0x1ce0] sm:$0xff]  ;;  %v1065_v15 = vld [vmem:[%s8981_s1 + $0x2050] sm:$0xff]  ;;  %v520_v16 = vld [vmem:[%s8981_s1 + $0xf48] sm:$0xff] }
 0x24e   :  { %2727 = vmatpush.msrb.mxu1 %v455_v17  ;;  %2767 = vmatpush.msrb.mxu3 %v615_v38  ;;  %v790_v17 = vld [vmem:[%s8981_s1 + $0x17b8] sm:$0xff]  ;;  %v1060_v38 = vld [vmem:[%s8981_s1 + $0x2028] sm:$0xff] }
 0x24f   :  { %2781 = vmatpush.msrb.mxu0 %v725_v18  ;;  %2738 = vmatpush.msra.mxu2 %v580_v19  ;;  %v7528_v18 = vpop.f32.mrf.mxu3  ;;  %v7530_v19 = vpop.f32.mrf.mxu1 }
 0x250   :  { %2728 = vmatpush.msrb.mxu1 %v450_v20  ;;  %2768 = vmatpush.msrb.mxu3 %v610_v34  ;;  %v515_v20 = vld [vmem:[%s8981_s1 + $0xf20] sm:$0xff]  ;;  %v785_v34 = vld [vmem:[%s8981_s1 + $0x1790] sm:$0xff] }
 0x251   :  { %2782 = vmatpush.msrb.mxu0 %v720_v21  ;;  %2739 = vmatpush.msra.mxu2 %v575_v22  ;;  %v945_v21 = vld [vmem:[%s8981_s1 + $0x1c90] sm:$0xff]  ;;  %v1055_v22 = vld [vmem:[%s8981_s1 + $0x2000] sm:$0xff] }
 0x252   :  { %2729 = vmatpush.msrb.mxu1 %v445_v23  ;;  %2769 = vmatpush.msrb.mxu3 %v605_v24  ;;  %v780_v23 = vld [vmem:[%s8981_s1 + $0x1768] sm:$0xff]  ;;  %v910_v24 = vld [vmem:[%s8981_s1 + $0x1b78] sm:$0xff] }
 0x253   :  { %2783 = vmatpush.msrb.mxu0 %v715_v25  ;;  %2740 = vmatpush.msra.mxu2 %v570_v26  ;;  %v940_v25 = vld [vmem:[%s8981_s1 + $0x1c68] sm:$0xff]  ;;  %v7553_v26 = vpop.f32.mrf.mxu0 }
 0x254   :  { %2730 = vmatpush.msrb.mxu1 %v440_v27  ;;  %2770 = vmatpush.msrb.mxu3 %v600_v28  ;;  %v1050_v28 = vld [vmem:[%s8981_s1 + $0x1fd8] sm:$0xff] }
 0x255   :  { %2784 = vmatpush.msrb.mxu0 %v710_v54  ;;  %2741 = vmatpush.msra.mxu2 %v565_v29  ;;  %v775_v54 = vld [vmem:[%s8981_s1 + $0x1740] sm:$0xff]  ;;  %v905_v29 = vld [vmem:[%s8981_s1 + $0x1b50] sm:$0xff] }
 0x256   :  { %2731 = vmatpush.msrb.mxu1 %v435_v30  ;;  %2771 = vmatpush.msrb.mxu3 %v595_v31  ;;  %v935_v30 = vld [vmem:[%s8981_s1 + $0x1c40] sm:$0xff]  ;;  %v1045_v31 = vld [vmem:[%s8981_s1 + $0x1fb0] sm:$0xff] }
 0x257   :  { %2785 = vmatpush.msrb.mxu0 %v705_v32  ;;  %2652 = vmatmul.f32.vlgmr.msra.gmra.mxu1 %v4270_v49  ;;  %v695_v49 = vld [vmem:[%s8981_s1 + $0x14c0] sm:$0xff]  ;;  %v770_v32 = vld [vmem:[%s8981_s1 + $0x1718] sm:$0xff] }
 0x258   :  { %2692 = vmatmul.f32.vlgmr.msra.gmra.mxu3 %v4274_v51  ;;  %2742 = vmatpush.msra.mxu2 %v560_v62  ;;  %v7436_v51 = vpop.f32.mrf.mxu2 }
 0x259   :  { %2796 = vmatpush.msra.mxu1 %v830_v36  ;;  %2836 = vmatpush.msra.mxu3 %v990_v33  ;;  %v900_v36 = vld [vmem:[%s8981_s1 + $0x1b28] sm:$0xff]  ;;  %v930_v33 = vld [vmem:[%s8981_s1 + $0x1c18] sm:$0xff] }
 0x25a   :  { %2786 = vmatpush.msrb.mxu0 %v700_v37  ;;  %2743 = vmatpush.msra.mxu2 %v555_v39  ;;  %v7588_v37 = vpop.f32.mrf.mxu3  ;;  %v7590_v39 = vpop.f32.mrf.mxu1 }
 0x25b   :  { %2797 = vmatpush.msra.mxu1 %v825_v40  ;;  %2837 = vmatpush.msra.mxu3 %v985_v41  ;;  %v1040_v40 = vld [vmem:[%s8981_s1 + $0x1f88] sm:$0xff]  ;;  %v765_v41 = vld [vmem:[%s8981_s1 + $0x16f0] sm:$0xff] }
 0x25c   :  { %2787 = vmatpush.msrb.mxu0 %v695_v49  ;;  %2744 = vmatpush.msra.mxu2 %v550_v42  ;;  %v895_v49 = vld [vmem:[%s8981_s1 + $0x1b00] sm:$0xff]  ;;  %v925_v42 = vld [vmem:[%s8981_s1 + $0x1bf0] sm:$0xff] }
 0x25d   :  { %2798 = vmatpush.msra.mxu1 %v820_v43  ;;  %2838 = vmatpush.msra.mxu3 %v980_v44  ;;  %v1035_v43 = vld [vmem:[%s8981_s1 + $0x1f60] sm:$0xff] }
 0x25e   :  { %2788 = vmatpush.msrb.mxu0 %v690_v45  ;;  %2745 = vmatpush.msra.mxu2 %v545_v46  ;;  %v890_v45 = vld [vmem:[%s8981_s1 + $0x1ad8] sm:$0xff]  ;;  %v760_v46 = vld [vmem:[%s8981_s1 + $0x16c8] sm:$0xff] }
 0x25f   :  { %2799 = vmatpush.msra.mxu1 %v815_v47  ;;  %2839 = vmatpush.msra.mxu3 %v975_v52  ;;  %v7614_v47 = vpop.f32.mrf.mxu0 }
 0x260   :  { %2789 = vmatpush.msrb.mxu0 %v685_v53  ;;  %2746 = vmatpush.msra.mxu2 %v540_v55  ;;  %v7501_v11 = vpop.f32.mrf.mxu2  ;;  %v920_v53 = vld [vmem:[%s8981_s1 + $0x1bc8] sm:$0xff]  ;;  %v1030_v55 = vld [vmem:[%s8981_s1 + $0x1f38] sm:$0xff] }
 0x261   :  { %2800 = vmatpush.msra.mxu1 %v810_v57  ;;  %2840 = vmatpush.msra.mxu3 %v970_v58  ;;  %v755_v57 = vld [vmem:[%s8981_s1 + $0x16a0] sm:$0xff] }
 0x262   :  { %2790 = vmatpush.msrb.mxu0 %v680_v60  ;;  %2747 = vmatpush.msra.mxu2 %v535_v61  ;;  %v915_v58 = vld [vmem:[%s8981_s1 + $0x1ba0] sm:$0xff]  ;;  %v7638_v61 = vpop.f32.mrf.mxu3 }
 0x263   :  { %2801 = vmatpush.msra.mxu1 %v805_v4  ;;  %2841 = vmatpush.msra.mxu3 %v965_v5  ;;  %v7640_v4 = vpop.f32.mrf.mxu1  ;;  %v880_v5 = vld [vmem:[%s8981_s1 + $0x1a88] sm:$0xff] }
 0x264   :  { %2791 = vmatpush.msrb.mxu0 %v675_v48  ;;  %2748 = vmatpush.msra.mxu2 %v530_v6  ;;  %v1150_v48 = vld [vmem:[%s8981_s1 + $0x22f8] sm:$0xff]  ;;  %v1280_v6 = vld [vmem:[%s8981_s1 + $0x2708] sm:$0xff] }
 0x265   :  { %2712 = vmatmul.f32.vlgmr.msra.gmra.mxu0 %v4314_v1  ;;  %2802 = vmatpush.msra.mxu1 %v800_v8  ;;  %v950_v1 = vld [vmem:[%s8981_s1 + $0x1cb8] sm:$0xff]  ;;  %v1145_v8 = vld [vmem:[%s8981_s1 + $0x22d0] sm:$0xff] }
 0x266   :  { %2842 = vmatpush.msra.mxu3 %v960_v9  ;;  %2856 = vmatpush.msra.mxu0 %v1070_v10  ;;  %v1275_v10 = vld [vmem:[%s8981_s1 + $0x26e0] sm:$0xff] }
 0x267   :  { %2749 = vmatpush.msra.mxu2 %v525_v12  ;;  %2803 = vmatpush.msra.mxu1 %v795_v13  ;;  %v7669_v12 = vpop.f32.mrf.mxu0 }
 0x268   :  { %2843 = vmatpush.msra.mxu3 %v955_v14  ;;  %2857 = vmatpush.msra.mxu0 %v1065_v15  ;;  %v7555_v27 = vpop.f32.mrf.mxu2  ;;  %v870_v14 = vld [vmem:[%s8981_s1 + $0x1a38] sm:$0xff] }
 0x269   :  { %2750 = vmatpush.msra.mxu2 %v520_v16  ;;  %2804 = vmatpush.msra.mxu1 %v790_v17  ;;  %v1270_v15 = vld [vmem:[%s8981_s1 + $0x26b8] sm:$0xff]  ;;  %v865_v17 = vld [vmem:[%s8981_s1 + $0x1a10] sm:$0xff] }
 0x26a   :  { %2844 = vmatpush.msra.mxu3 %v950_v1  ;;  %2858 = vmatpush.msra.mxu0 %v1060_v38  ;;  %v1010_v16 = vld [vmem:[%s8981_s1 + $0x1e98] sm:$0xff]  ;;  %v1135_v38 = vld [vmem:[%s8981_s1 + $0x2280] sm:$0xff] }
 0x26b   :  { %2751 = vmatpush.msra.mxu2 %v515_v20  ;;  %2805 = vmatpush.msra.mxu1 %v785_v34  ;;  %v1265_v20 = vld [vmem:[%s8981_s1 + $0x2690] sm:$0xff]  ;;  %v2013_v34 = vpop.f32.mrf.mxu3 }
 0x26c   :  { %2845 = vmatpush.msra.mxu3 %v945_v21  ;;  %2859 = vmatpush.msra.mxu0 %v1055_v22  ;;  %v1005_v21 = vld [vmem:[%s8981_s1 + $0x1e70] sm:$0xff] }
 0x26d   :  { %2672 = vmatmul.f32.vlgmr.msrb.gmra.mxu2 %v4272_v50  ;;  %2806 = vmatpush.msra.mxu1 %v780_v23  ;;  %v7579_v50 = vld [vmem:[%s8982_s2] sm:$0x1f]  ;;  %v860_v23 = vld [vmem:[%s8981_s1 + $0x19e8] sm:$0xff] }
 0x26e   :  { %2816 = vmatpush.msrb.mxu2 %v910_v24  ;;  %2846 = vmatpush.msra.mxu3 %v940_v25  ;;  %v1284_v62 = vperm.slane %v7579_v50, 1  ;;  %v1285_v22 = vperm.slane %v7579_v50, 2  ;;  %v1130_v24 = vld [vmem:[%s8981_s1 + $0x2258] sm:$0xff]  ;;  %v7703_v25 = vpop.f32.mrf.mxu1 }
 0x26f   :  { %2860 = vmatpush.msra.mxu0 %v1050_v28  ;;  %2807 = vmatpush.msra.mxu1 %v775_v54  ;;  %v1260_v28 = vld [vmem:[%s8981_s1 + $0x2668] sm:$0xff] }
 0x270   :  { %2817 = vmatpush.msrb.mxu2 %v905_v29  ;;  %2847 = vmatpush.msra.mxu3 %v935_v30  ;;  %v1674_v44 = vadd.f32 %v7462_v56, %v1284_v62  ;;  %v7616_v52 = vpop.f32.mrf.mxu2  ;;  %v885_v56 = vld [vmem:[%s8981_s1 + $0x1ab0] sm:$0xff]  ;;  %v1000_v54 = vld [vmem:[%s8981_s1 + $0x1e48] sm:$0xff]  ;;  %v2033_v62 = vpop.f32.mrf.mxu0 }
 0x271   :  { %2861 = vmatpush.msra.mxu0 %v1045_v31  ;;  %2808 = vmatpush.msra.mxu1 %v770_v32  ;;  %v3857_v30 = vld.sshfl [vmem:[#allocation1 + $0x8] sm:$0xff pattern:$0x73625140]  ;;  %v855_v31 = vld [vmem:[%s8981_s1 + $0x19c0] sm:$0xff]  ;;  %v1125_v32 = vld [vmem:[%s8981_s1 + $0x2230] sm:$0xff] }
 0x272   :  { %2818 = vmatpush.msrb.mxu2 %v900_v36  ;;  %2848 = vmatpush.msra.mxu3 %v930_v33  ;;  %v1694_v60 = vadd.f32 %v7490_v7, %v1674_v44  ;;  %v1020_v7 = vld [vmem:[%s8981_s1 + $0x1ee8] sm:$0xff]  ;;  %v1255_v36 = vld [vmem:[%s8981_s1 + $0x2640] sm:$0xff] }
 0x273   :  { %2862 = vmatpush.msra.mxu0 %v1040_v40  ;;  %2809 = vmatpush.msra.mxu1 %v765_v41  ;;  %v850_v40 = vld [vmem:[%s8981_s1 + $0x1998] sm:$0xff]  ;;  %v1120_v41 = vld [vmem:[%s8981_s1 + $0x2208] sm:$0xff] }
 0x274   :  { %2819 = vmatpush.msrb.mxu2 %v895_v49  ;;  %2849 = vmatpush.msra.mxu3 %v925_v42  ;;  %v1714_v9 = vadd.f32 %v7408_v35, %v1694_v60  ;;  %v1140_v35 = vld [vmem:[%s8981_s1 + $0x22a8] sm:$0xff]  ;;  %v1250_v42 = vld [vmem:[%s8981_s1 + $0x2618] sm:$0xff] }
 0x275   :  { %2863 = vmatpush.msra.mxu0 %v1035_v43  ;;  %2752 = vmatmul.f32.vlgmr.msra.gmra.mxu2 %v4312_v0  ;;  %v1025_v0 = vld [vmem:[%s8981_s1 + $0x1f10] sm:$0xff]  ;;  %v3065_v43 = vld [vmem:[%s8983_s3 + $0x3e0] sm:$0xff] }
 0x276   :  { %2820 = vmatpush.msrb.mxu2 %v890_v45  ;;  %2810 = vmatpush.msra.mxu1 %v760_v46  ;;  %v1734_v1 = vadd.f32 %v7436_v51, %v1714_v9  ;;  %v3856_v51 = vld.sshfl [vmem:[#allocation1] sm:$0xff pattern:$0x73625140]  ;;  %v845_v45 = vld [vmem:[%s8981_s1 + $0x1970] sm:$0xff]  ;;  %v7759_v60 = vpop.f32.mrf.mxu1 }
 0x277   :  { %2850 = vmatpush.msra.mxu3 %v920_v53  ;;  %2864 = vmatpush.msra.mxu0 %v1030_v55  ;;  %v1115_v46 = vld [vmem:[%s8981_s1 + $0x21e0] sm:$0xff]  ;;  %v1245_v53 = vld [vmem:[%s8981_s1 + $0x25f0] sm:$0xff] }
 0x278   :  { %2772 = vmatmul.f32.vlgmr.msrb.gmra.mxu3 %v4316_v2  ;;  %2821 = vmatpush.msrb.mxu2 %v885_v56  ;;  %v875_v2 = vld [vmem:[%s8981_s1 + $0x1a60] sm:$0xff]  ;;  %v1993_v13 = vpop.f32.mrf.mxu2  ;;  %v1754_v29 = vadd.f32 %v7528_v18, %v1734_v1  ;;  %v840_v56 = vld [vmem:[%s8981_s1 + $0x1948] sm:$0xff]  ;;  %v7780_v9 = vpop.f32.mrf.mxu0  ;;  %v1225_v1 = vld [vmem:[%s8981_s1 + $0x2550] sm:$0xff] }
 0x279   :  { %2811 = vmatpush.msra.mxu1 %v755_v57  ;;  %2851 = vmatpush.msra.mxu3 %v915_v58  ;;  %v995_v18 = vld [vmem:[%s8981_s1 + $0x1e20] sm:$0xff]  ;;  %v1994_v33 = vadd.f32 %v1993_v13, %v1285_v22  ;;  %v1110_v57 = vld [vmem:[%s8981_s1 + $0x21b8] sm:$0xff]  ;;  %v7757_v58 = vpop.f32.mrf.mxu3 }
 0x27a   :  { %2865 = vmatpush.msra.mxu0 %v1025_v0  ;;  %2732 = vmatmul.f32.vlgmr.msrb.gmra.mxu1 %v4318_v3  ;;  %v1015_v3 = vld [vmem:[%s8981_s1 + $0x1ec0] sm:$0xff]  ;;  %v1774_v44 = vadd.f32 %v7553_v26, %v1754_v29  ;;  %v1240_v0 = vld [vmem:[%s8981_s1 + $0x25c8] sm:$0xff] }
 0x27b   :  { %2822 = vmatpush.msrb.mxu2 %v880_v5  ;;  %2876 = vmatpush.msrb.mxu1 %v1150_v48  ;;  %v3061_v26 = vld [vmem:[%s8983_s3 + $0x3c0] sm:$0xff]  ;;  %v2014_v55 = vadd.f32 %v2013_v34, %v1994_v33 }
 0x27c   :  { %2922 = vmatpush.msrb.mxu3 %v1280_v6  ;;  %2866 = vmatpush.msra.mxu0 %v1020_v7  ;;  %v3057_v5 = vld [vmem:[%s8983_s3 + $0x3a0] sm:$0xff]  ;;  %v1794_v48 = vadd.f32 %v7476_v63, %v1774_v44  ;;  %v1105_v7 = vld [vmem:[%s8981_s1 + $0x2190] sm:$0xff] }
 0x27d   :  { %2823 = vmatpush.msrb.mxu2 %v875_v2  ;;  %2877 = vmatpush.msrb.mxu1 %v1145_v8  ;;  %v835_v6 = vld [vmem:[%s8981_s1 + $0x1920] sm:$0xff]  ;;  %v2034_v8 = vadd.f32 %v2033_v62, %v2014_v55  ;;  %v1200_v55 = vld [vmem:[%s8981_s1 + $0x2488] sm:$0xff] }
 0x27e   :  { %2923 = vmatpush.msrb.mxu3 %v1275_v10  ;;  %2867 = vmatpush.msra.mxu0 %v1015_v3  ;;  %v1235_v2 = vld [vmem:[%s8981_s1 + $0x25a0] sm:$0xff]  ;;  %v1230_v3 = vld [vmem:[%s8981_s1 + $0x2578] sm:$0xff] }
 0x27f   :  { %2824 = vmatpush.msrb.mxu2 %v870_v14  ;;  %2878 = vmatpush.msrb.mxu1 %v1140_v35  ;;  %v3053_v63 = vld [vmem:[%s8983_s3 + $0x380] sm:$0xff]  ;;  %v1814_v14 = vadd.f32 %v7501_v11, %v1794_v48  ;;  %v1100_v35 = vld [vmem:[%s8981_s1 + $0x2168] sm:$0xff] }
 0x280   :  { %2924 = vmatpush.msrb.mxu3 %v1270_v15  ;;  %2868 = vmatpush.msra.mxu0 %v1010_v16  ;;  %v7730_v49 = vpop.f32.mrf.mxu2  ;;  %v3001_v13 = vld [vmem:[%s8983_s3 + $0x1e0] sm:$0xff]  ;;  %v3858_v16 = vld.sshfl [vmem:[#allocation1 + $0x10] sm:$0xff pattern:$0x73625140] }
 0x281   :  { %2792 = vmatmul.f32.vlgmr.msrb.gmra.mxu0 %v3856_v51  ;;  %2825 = vmatpush.msrb.mxu2 %v865_v17  ;;  %v3049_v15 = vld [vmem:[%s8983_s3 + $0x360] sm:$0xff]  ;;  %v3859_v17 = vld.sshfl [vmem:[#allocation1 + $0x18] sm:$0xff pattern:$0x73625140]  ;;  %v7811_v22 = vpop.f32.mrf.mxu3  ;;  %v7813_v51 = vpop.f32.mrf.mxu1 }
 0x282   :  { %2879 = vmatpush.msrb.mxu1 %v1135_v38  ;;  %2925 = vmatpush.msrb.mxu3 %v1265_v20  ;;  %v2997_v11 = vld [vmem:[%s8983_s3 + $0x1c0] sm:$0xff]  ;;  %v1834_v38 = vadd.f32 %v7588_v37, %v1814_v14  ;;  %v2054_v20 = vadd.f32 %v7640_v4, %v2034_v8  ;;  %v1220_v37 = vld [vmem:[%s8981_s1 + $0x2528] sm:$0xff] }
 0x283   :  { %2869 = vmatpush.msra.mxu0 %v1005_v21  ;;  %2812 = vmatmul.f32.vlgmr.msra.gmra.mxu1 %v3857_v30  ;;  %v1095_v34 = vld [vmem:[%s8981_s1 + $0x2140] sm:$0xff]  ;;  %v1085_v30 = vld [vmem:[%s8981_s1 + $0x20f0] sm:$0xff]  ;;  %v3861_v48 = vld.sshfl [vmem:[#allocation1 + $0x28] sm:$0xff pattern:$0x73625140] }
 0x284   :  { %2826 = vmatpush.msrb.mxu2 %v860_v23  ;;  %2880 = vmatpush.msrb.mxu1 %v1130_v24  ;;  %v3045_v21 = vld [vmem:[%s8983_s3 + $0x340] sm:$0xff]  ;;  %v1854_v23 = vadd.f32 %v7614_v47, %v1834_v38  ;;  %v1090_v24 = vld [vmem:[%s8981_s1 + $0x2118] sm:$0xff]  ;;  %v2074_v29 = vadd.f32 %v7730_v49, %v2054_v20  ;;  %v1205_v49 = vld [vmem:[%s8981_s1 + $0x24b0] sm:$0xff] }
 0x285   :  { %2926 = vmatpush.msrb.mxu3 %v1260_v28  ;;  %2870 = vmatpush.msra.mxu0 %v1000_v54  ;;  %v2993_v4 = vld [vmem:[%s8983_s3 + $0x1a0] sm:$0xff]  ;;  %v1180_v20 = vld [vmem:[%s8981_s1 + $0x23e8] sm:$0xff] }
 0x286   :  { %2827 = vmatpush.msrb.mxu2 %v855_v31  ;;  %2881 = vmatpush.msrb.mxu1 %v1125_v32  ;;  %v3041_v28 = vld [vmem:[%s8983_s3 + $0x320] sm:$0xff]  ;;  %v7841_v32 = vpop.f32.mrf.mxu0  ;;  %v1874_v33 = vadd.f32 %v7530_v19, %v1854_v23  ;;  %v2094_v19 = vadd.f32 %v7757_v58, %v2074_v29  ;;  %v1170_v29 = vld [vmem:[%s8981_s1 + $0x2398] sm:$0xff] }
 0x287   :  { %2927 = vmatpush.msrb.mxu3 %v1255_v36  ;;  %2871 = vmatpush.msra.mxu0 %v995_v18  ;;  %v1215_v54 = vld [vmem:[%s8981_s1 + $0x2500] sm:$0xff]  ;;  %v1210_v36 = vld [vmem:[%s8981_s1 + $0x24d8] sm:$0xff] }
 0x288   :  { %2828 = vmatpush.msrb.mxu2 %v850_v40  ;;  %2882 = vmatpush.msrb.mxu1 %v1120_v41  ;;  %v7782_v10 = vpop.f32.mrf.mxu2  ;;  %v2989_v47 = vld [vmem:[%s8983_s3 + $0x180] sm:$0xff]  ;;  %v1080_v40 = vld [vmem:[%s8981_s1 + $0x20c8] sm:$0xff] }
 0x289   :  { %2928 = vmatpush.msrb.mxu3 %v1250_v42  ;;  %3275 = vmatpush.msrb.mxu0 %v3065_v43  ;;  %v3037_v31 = vld [vmem:[%s8983_s3 + $0x300] sm:$0xff]  ;;  %v1894_v42 = vadd.f32 %v7555_v27, %v1874_v33  ;;  %v1286_v43 = vperm.slane %v7579_v50, 3 }
 0x28a   :  { %2829 = vmatpush.msrb.mxu2 %v845_v45  ;;  %2883 = vmatpush.msrb.mxu1 %v1115_v46  ;;  %v2985_v18 = vld [vmem:[%s8983_s3 + $0x160] sm:$0xff]  ;;  %v7870_v46 = vpop.f32.mrf.mxu3 }
 0x28b   :  { %2929 = vmatpush.msrb.mxu3 %v1245_v53  ;;  %3276 = vmatpush.msrb.mxu0 %v3061_v26  ;;  %v3033_v41 = vld [vmem:[%s8983_s3 + $0x2e0] sm:$0xff]  ;;  %v2313_v53 = vpop.f32.mrf.mxu1  ;;  %v1914_v50 = vadd.f32 %v7638_v61, %v1894_v42 }
 0x28c   :  { %2830 = vmatpush.msrb.mxu2 %v840_v56  ;;  %2884 = vmatpush.msrb.mxu1 %v1110_v57  ;;  %v2981_v44 = vld [vmem:[%s8983_s3 + $0x140] sm:$0xff] }
 0x28d   :  { %2930 = vmatpush.msrb.mxu3 %v1240_v0  ;;  %3277 = vmatpush.msrb.mxu0 %v3057_v5  ;;  %v1075_v45 = vld [vmem:[%s8981_s1 + $0x20a0] sm:$0xff]  ;;  %v1934_v58 = vadd.f32 %v7669_v12, %v1914_v50  ;;  %v2114_v0 = vadd.f32 %v7780_v9, %v2094_v19  ;;  %v2314_v5 = vadd.f32 %v2313_v53, %v1286_v43  ;;  %v1190_v9 = vld [vmem:[%s8981_s1 + $0x2438] sm:$0xff]  ;;  %v2998_v19 = vld [vmem:[%s8983_s3 + $0x1c8] sm:$0xff] }
 0x28e   :  { %2831 = vmatpush.msrb.mxu2 %v835_v6  ;;  %2885 = vmatpush.msrb.mxu1 %v1105_v7  ;;  %v3029_v27 = vld [vmem:[%s8983_s3 + $0x2c0] sm:$0xff]  ;;  %v1160_v43 = vld [vmem:[%s8981_s1 + $0x2348] sm:$0xff] }
 0x28f   :  { %2931 = vmatpush.msrb.mxu3 %v1235_v2  ;;  %3278 = vmatpush.msrb.mxu0 %v3053_v63  ;;  %v3860_v26 = vld.sshfl [vmem:[#allocation1 + $0x20] sm:$0xff pattern:$0x73625140]  ;;  %v7896_v2 = vpop.f32.mrf.mxu0  ;;  %v2994_v50 = vld [vmem:[%s8983_s3 + $0x1a8] sm:$0xff] }
 0x290   :  { %2832 = vmatmul.f32.vlgmr.msrb.gmra.mxu2 %v3858_v16  ;;  %2852 = vmatmul.f32.vlgmr.msra.gmra.mxu3 %v3859_v17  ;;  %v7843_v62 = vpop.f32.mrf.mxu2  ;;  %v2977_v56 = vld [vmem:[%s8983_s3 + $0x120] sm:$0xff]  ;;  %v1185_v17 = vld [vmem:[%s8981_s1 + $0x2410] sm:$0xff] }
 0x291   :  { %2896 = vmatpush.msra.mxu2 %v1230_v3  ;;  %3255 = vmatpush.msra.mxu3 %v3001_v13  ;;  %v3129_v57 = vld [vmem:[%s8983_s3 + $0x5e0] sm:$0xff] }
 0x292   :  { %2886 = vmatpush.msrb.mxu1 %v1100_v35  ;;  %3279 = vmatpush.msrb.mxu0 %v3049_v15  ;;  %v3025_v61 = vld [vmem:[%s8983_s3 + $0x2a0] sm:$0xff]  ;;  %v1954_v35 = vadd.f32 %v7590_v39, %v1934_v58  ;;  %v2134_v15 = vadd.f32 %v7703_v25, %v2114_v0  ;;  %v8013_v58 = vmax.f32 %v5532_v59, 0.0 }
 0x293   :  { %2897 = vmatpush.msra.mxu2 %v1225_v1  ;;  %3256 = vmatpush.msra.mxu3 %v2997_v11  ;;  %v1195_v6 = vld [vmem:[%s8981_s1 + $0x2460] sm:$0xff]  ;;  %v2353_v11 = vpop.f32.mrf.mxu3 }
 0x294   :  { %2887 = vmatpush.msrb.mxu1 %v1095_v34  ;;  %3280 = vmatpush.msrb.mxu0 %v3045_v21  ;;  %v2973_v7 = vld [vmem:[%s8983_s3 + $0x100] sm:$0xff]  ;;  %v2154_v38 = vadd.f32 %v7782_v10, %v2134_v15 }
 0x295   :  { %2898 = vmatpush.msra.mxu2 %v1220_v37  ;;  %3257 = vmatpush.msra.mxu3 %v2993_v4  ;;  %v3125_v12 = vld [vmem:[%s8983_s3 + $0x5c0] sm:$0xff]  ;;  %v1974_v37 = vadd.f32 %v7616_v52, %v1954_v35  ;;  %v2978_v35 = vld [vmem:[%s8983_s3 + $0x128] sm:$0xff] }
 0x296   :  { %2888 = vmatpush.msrb.mxu1 %v1090_v24  ;;  %3281 = vmatpush.msrb.mxu0 %v3041_v28  ;;  %v3021_v8 = vld [vmem:[%s8983_s3 + $0x280] sm:$0xff]  ;;  %v2174_v52 = vadd.f32 %v7811_v22, %v2154_v38 }
 0x297   :  { %2899 = vmatpush.msra.mxu2 %v1215_v54  ;;  %3258 = vmatpush.msra.mxu3 %v2989_v47  ;;  %v2969_v3 = vld [vmem:[%s8983_s3 + $0xe0] sm:$0xff]  ;;  %v2373_v28 = vpop.f32.mrf.mxu0 }
 0x298   :  { %2889 = vmatpush.msrb.mxu1 %v1085_v30  ;;  %3282 = vmatpush.msrb.mxu0 %v3037_v31  ;;  %v2333_v63 = vpop.f32.mrf.mxu2  ;;  %v3121_v13 = vld [vmem:[%s8983_s3 + $0x5a0] sm:$0xff]  ;;  %v7963_v31 = vmax.f32 %v1974_v37, 0.0  ;;  %v2194_v22 = vadd.f32 %v7841_v32, %v2174_v52  ;;  %v1165_v32 = vld [vmem:[%s8981_s1 + $0x2370] sm:$0xff] }
 0x299   :  { %2900 = vmatpush.msra.mxu2 %v1210_v36  ;;  %3259 = vmatpush.msra.mxu3 %v2985_v18  ;;  %v3017_v14 = vld [vmem:[%s8983_s3 + $0x260] sm:$0xff]  ;;  %v2334_v16 = vadd.f32 %v2333_v63, %v2314_v5  ;;  %v3862_v18 = vld.sshfl [vmem:[#allocation1 + $0x38] sm:$0xff pattern:$0x73625140] }
 0x29a   :  { %2890 = vmatpush.msrb.mxu1 %v1080_v40  ;;  %3283 = vmatpush.msrb.mxu0 %v3033_v41  ;;  %v2965_v1 = vld [vmem:[%s8983_s3 + $0xc0] sm:$0xff]  ;;  %v3002_v40 = vld [vmem:[%s8983_s3 + $0x1e8] sm:$0xff]  ;;  %v2393_v41 = vpop.f32.mrf.mxu1 }
 0x29b   :  { %2872 = vmatmul.f32.vlgmr.msra.gmra.mxu0 %v3860_v26  ;;  %2901 = vmatpush.msra.mxu2 %v1205_v49  ;;  %v3117_v39 = vld [vmem:[%s8983_s3 + $0x580] sm:$0xff]  ;;  %v2354_v4 = vadd.f32 %v2353_v11, %v2334_v16 }
 0x29c   :  { %3260 = vmatpush.msra.mxu3 %v2981_v44  ;;  %2891 = vmatpush.msrb.mxu1 %v1075_v45  ;;  %v3013_v25 = vld [vmem:[%s8983_s3 + $0x240] sm:$0xff]  ;;  %v2214_v45 = vadd.f32 %v7759_v60, %v2194_v22 }
 0x29d   :  { %3284 = vmatpush.msrb.mxu0 %v3029_v27  ;;  %2892 = vmatmul.f32.vlgmr.msrb.gmra.mxu1 %v3861_v48  ;;  %v2961_v34 = vld [vmem:[%s8983_s3 + $0xa0] sm:$0xff]  ;;  %v2374_v36 = vadd.f32 %v2373_v28, %v2354_v4  ;;  %v2433_v48 = vpop.f32.mrf.mxu3 }
 0x29e   :  { %2902 = vmatpush.msra.mxu2 %v1200_v55  ;;  %3261 = vmatpush.msra.mxu3 %v2977_v56  ;;  %v3113_v21 = vld [vmem:[%s8983_s3 + $0x560] sm:$0xff]  ;;  %v2234_v56 = vadd.f32 %v7843_v62, %v2214_v45  ;;  %v3050_v45 = vld [vmem:[%s8983_s3 + $0x368] sm:$0xff] }
 0x29f   :  { %3295 = vmatpush.msra.mxu1 %v3129_v57  ;;  %3285 = vmatpush.msrb.mxu0 %v3025_v61  ;;  %v3009_v10 = vld [vmem:[%s8983_s3 + $0x220] sm:$0xff]  ;;  %v2394_v53 = vadd.f32 %v2393_v41, %v2374_v36  ;;  %v2990_v61 = vld [vmem:[%s8983_s3 + $0x188] sm:$0xff] }
 0x2a0   :  { %2903 = vmatpush.msra.mxu2 %v1195_v6  ;;  %3262 = vmatpush.msra.mxu3 %v2973_v7  ;;  %v1175_v23 = vld [vmem:[%s8981_s1 + $0x23c0] sm:$0xff]  ;;  %v2413_v26 = vpop.f32.mrf.mxu2  ;;  %v2986_v6 = vld [vmem:[%s8983_s3 + $0x168] sm:$0xff]  ;;  %v2254_v59 = vadd.f32 %v7870_v46, %v2234_v56  ;;  %v3863_v7 = vld.sshfl [vmem:[#allocation1 + $0x30] sm:$0xff pattern:$0x73625140] }
 0x2a1   :  { %3296 = vmatpush.msra.mxu1 %v3125_v12  ;;  %3286 = vmatpush.msrb.mxu0 %v3021_v8  ;;  %v2957_v24 = vld [vmem:[%s8983_s3 + $0x80] sm:$0xff]  ;;  %v2414_v0 = vadd.f32 %v2413_v26, %v2394_v53  ;;  %v2982_v8 = vld [vmem:[%s8983_s3 + $0x148] sm:$0xff] }
 0x2a2   :  { %2904 = vmatpush.msra.mxu2 %v1190_v9  ;;  %3263 = vmatpush.msra.mxu3 %v2969_v3  ;;  %v3109_v54 = vld [vmem:[%s8983_s3 + $0x540] sm:$0xff]  ;;  %v2274_v46 = vadd.f32 %v7896_v2, %v2254_v59  ;;  %v2473_v16 = vpop.f32.mrf.mxu1  ;;  %v2954_v41 = vld [vmem:[%s8983_s3 + $0x68] sm:$0xff] }
 0x2a3   :  { %3297 = vmatpush.msra.mxu1 %v3121_v13  ;;  %3287 = vmatpush.msrb.mxu0 %v3017_v14  ;;  %v3005_v47 = vld [vmem:[%s8983_s3 + $0x200] sm:$0xff]  ;;  %v2434_v9 = vadd.f32 %v2433_v48, %v2414_v0  ;;  %v2453_v14 = vpop.f32.mrf.mxu0  ;;  %v2946_v53 = vld [vmem:[%s8983_s3 + $0x28] sm:$0xff] }
 0x2a4   :  { %2905 = vmatpush.msra.mxu2 %v1185_v17  ;;  %3264 = vmatpush.msra.mxu3 %v2965_v1  ;;  %v2953_v30 = vld [vmem:[%s8983_s3 + $0x60] sm:$0xff]  ;;  %v2974_v17 = vld [vmem:[%s8983_s3 + $0x108] sm:$0xff]  ;;  %v2294_v1 = vadd.f32 %v7813_v51, %v2274_v46 }
 0x2a5   :  { %3298 = vmatpush.msra.mxu1 %v3117_v39  ;;  %3288 = vmatpush.msrb.mxu0 %v3013_v25  ;;  %v3105_v33 = vld [vmem:[%s8983_s3 + $0x520] sm:$0xff]  ;;  %v2454_v11 = vadd.f32 %v2453_v14, %v2434_v9  ;;  %v2513_v28 = vpop.f32.mrf.mxu3  ;;  %v3046_v26 = vld [vmem:[%s8983_s3 + $0x348] sm:$0xff] }
 0x2a6   :  { %2906 = vmatpush.msra.mxu2 %v1180_v20  ;;  %3265 = vmatpush.msra.mxu3 %v2961_v34  ;;  %v2949_v49 = vld [vmem:[%s8983_s3 + $0x40] sm:$0xff]  ;;  %v2970_v20 = vld [vmem:[%s8983_s3 + $0xe8] sm:$0xff]  ;;  %v8073_v37 = vmax.f32 %v2294_v1, 0.0 }
 0x2a7   :  { %3299 = vmatpush.msra.mxu1 %v3113_v21  ;;  %3289 = vmatpush.msrb.mxu0 %v3009_v10  ;;  %v3101_v42 = vld [vmem:[%s8983_s3 + $0x500] sm:$0xff]  ;;  %v2474_v34 = vadd.f32 %v2473_v16, %v2454_v11  ;;  %v2966_v10 = vld [vmem:[%s8983_s3 + $0xc8] sm:$0xff] }
 0x2a8   :  { %2907 = vmatpush.msra.mxu2 %v1175_v23  ;;  %3266 = vmatpush.msra.mxu3 %v2957_v24  ;;  %v2945_v44 = vld [vmem:[%s8983_s3 + $0x20] sm:$0xff]  ;;  %v2493_v38 = vpop.f32.mrf.mxu2  ;;  %v3066_v24 = vld [vmem:[%s8983_s3 + $0x3e8] sm:$0xff] }
 0x2a9   :  { %3300 = vmatpush.msra.mxu1 %v3109_v54  ;;  %3826 = vmatmul.msk.f32.vlgmr.msrb.gmra.mxu3 %vm1333_vm0, %v3862_v18  ;;  %v3097_v27 = vld [vmem:[%s8983_s3 + $0x4e0] sm:$0xff]  ;;  %v2494_v4 = vadd.f32 %v2493_v38, %v2474_v34  ;;  %v2962_v54 = vld [vmem:[%s8983_s3 + $0xa8] sm:$0xff]  ;;  %v2999_v38 = vld [vmem:[%s8983_s3 + $0x1d0] sm:$0xff] }
 0x2aa   :  { %3290 = vmatpush.msrb.mxu0 %v3005_v47  ;;  %2908 = vmatpush.msra.mxu2 %v1170_v29  ;;  %v1155_v55 = vld [vmem:[%s8981_s1 + $0x2320] sm:$0xff]  ;;  %v3062_v47 = vld [vmem:[%s8983_s3 + $0x3c8] sm:$0xff]  ;;  %v2995_v34 = vld [vmem:[%s8983_s3 + $0x1b0] sm:$0xff] }
 0x2ab   :  { %3267 = vmatpush.msra.mxu3 %v2953_v30  ;;  %3291 = vmatmul.f32.vlgmr.msrb.gmra.mxu0 %v7963_v31  ;;  %v2941_v60 = vld [vmem:[%s8983_s3] sm:$0xff]  ;;  %v2533_v29 = vpop.f32.mrf.mxu0  ;;  %v2958_v30 = vld [vmem:[%s8983_s3 + $0x88] sm:$0xff]  ;;  %v2514_v22 = vadd.f32 %v2513_v28, %v2494_v4  ;;  %v2987_v4 = vld [vmem:[%s8983_s3 + $0x170] sm:$0xff] }
 0x2ac   :  { %3301 = vmatpush.msra.mxu1 %v3105_v33  ;;  %3355 = vmatpush.msra.mxu0 %v3002_v40  ;;  %v3093_v57 = vld [vmem:[%s8983_s3 + $0x4c0] sm:$0xff]  ;;  %v3058_v18 = vld [vmem:[%s8983_s3 + $0x3a8] sm:$0xff]  ;;  %v2553_v33 = vpop.f32.mrf.mxu1 }
 0x2ad   :  { %2909 = vmatpush.msra.mxu2 %v1165_v32  ;;  %3268 = vmatpush.msra.mxu3 %v2949_v49  ;;  %v3193_v62 = vld [vmem:[%s8983_s3 + $0x7e0] sm:$0xff]  ;;  %v2534_v32 = vadd.f32 %v2533_v29, %v2514_v22  ;;  %v3034_v59 = vld [vmem:[%s8983_s3 + $0x2e8] sm:$0xff] }
 0x2ae   :  { %3302 = vmatpush.msra.mxu1 %v3101_v42  ;;  %3356 = vmatpush.msra.mxu0 %v2998_v19  ;;  %v3089_v5 = vld [vmem:[%s8983_s3 + $0x4a0] sm:$0xff]  ;;  %v3054_v42 = vld [vmem:[%s8983_s3 + $0x388] sm:$0xff] }
 0x2af   :  { %2910 = vmatpush.msra.mxu2 %v1160_v43  ;;  %3269 = vmatpush.msra.mxu3 %v2945_v44  ;;  %v3189_v63 = vld [vmem:[%s8983_s3 + $0x7c0] sm:$0xff]  ;;  %v2950_v19 = vld [vmem:[%s8983_s3 + $0x48] sm:$0xff]  ;;  %v2554_v43 = vadd.f32 %v2553_v33, %v2534_v32  ;;  %v2971_v33 = vld [vmem:[%s8983_s3 + $0xf0] sm:$0xff] }
 0x2b0   :  { %3303 = vmatpush.msra.mxu1 %v3097_v27  ;;  %3357 = vmatpush.msra.mxu0 %v2994_v50  ;;  %v3085_v12 = vld [vmem:[%s8983_s3 + $0x480] sm:$0xff]  ;;  %v2573_v40 = vpop.f32.mrf.mxu2  ;;  %v3026_v46 = vld [vmem:[%s8983_s3 + $0x2a8] sm:$0xff] }
 0x2b1   :  { %2911 = vmatpush.msra.mxu2 %v1155_v55  ;;  %3270 = vmatpush.msra.mxu3 %v2941_v60  ;;  %v3185_v3 = vld [vmem:[%s8983_s3 + $0x7a0] sm:$0xff]  ;;  %v2574_v27 = vadd.f32 %v2573_v40, %v2554_v43  ;;  %v2593_v55 = vpop.f32.mrf.mxu3  ;;  %v2942_v60 = vld [vmem:[%s8983_s3 + $0x8] sm:$0xff]  ;;  %v3067_v43 = vld [vmem:[%s8983_s3 + $0x3f0] sm:$0xff] }
 0x2b2   :  { %3304 = vmatpush.msra.mxu1 %v3093_v57  ;;  %3358 = vmatpush.msra.mxu0 %v2990_v61  ;;  %v3081_v13 = vld [vmem:[%s8983_s3 + $0x460] sm:$0xff]  ;;  %v3042_v61 = vld [vmem:[%s8983_s3 + $0x328] sm:$0xff] }
 0x2b3   :  { %2912 = vmatmul.f32.vlgmr.msra.gmra.mxu2 %v3863_v7  ;;  %3271 = vmatmul.f32.vlgmr.msra.gmra.mxu3 %v8013_v58  ;;  %v3181_v2 = vld [vmem:[%s8983_s3 + $0x780] sm:$0xff]  ;;  %v2594_v0 = vadd.f32 %v2593_v55, %v2574_v27  ;;  %v3126_v9 = vld [vmem:[%s8983_s3 + $0x5c8] sm:$0xff]  ;;  %v2955_v55 = vld [vmem:[%s8983_s3 + $0x70] sm:$0xff] }
 0x2b4   :  { %3315 = vmatpush.msrb.mxu2 %v3193_v62  ;;  %3305 = vmatpush.msra.mxu1 %v3089_v5  ;;  %v3077_v15 = vld [vmem:[%s8983_s3 + $0x440] sm:$0xff]  ;;  %v3038_v5 = vld [vmem:[%s8983_s3 + $0x308] sm:$0xff] }
 0x2b5   :  { %3359 = vmatpush.msra.mxu0 %v2986_v6  ;;  %v3177_v39 = vld [vmem:[%s8983_s3 + $0x760] sm:$0xff]  ;;  %v3018_v14 = vld [vmem:[%s8983_s3 + $0x268] sm:$0xff] }
 0x2b6   :  { %3316 = vmatpush.msrb.mxu2 %v3189_v63  ;;  %3306 = vmatpush.msra.mxu1 %v3085_v12  ;;  %v3073_v25 = vld [vmem:[%s8983_s3 + $0x420] sm:$0xff]  ;;  %v3030_v63 = vld [vmem:[%s8983_s3 + $0x2c8] sm:$0xff] }
 0x2b7   :  { %3360 = vmatpush.msra.mxu0 %v2982_v8  ;;  %v3173_v51 = vld [vmem:[%s8983_s3 + $0x740] sm:$0xff]  ;;  %v3130_v8 = vld [vmem:[%s8983_s3 + $0x5e8] sm:$0xff] }
 0x2b8   :  { %3317 = vmatpush.msrb.mxu2 %v3185_v3  ;;  %3307 = vmatpush.msra.mxu1 %v3081_v13  ;;  %v3069_v21 = vld [vmem:[%s8983_s3 + $0x400] sm:$0xff]  ;;  %v2613_v57 = vpop.f32.mrf.mxu2  ;;  %v3022_v3 = vld [vmem:[%s8983_s3 + $0x288] sm:$0xff] }
 0x2b9   :  { %3361 = vmatpush.msra.mxu0 %v2978_v35  ;;  %v3169_v23 = vld [vmem:[%s8983_s3 + $0x720] sm:$0xff]  ;;  %v2614_v48 = vadd.f32 %v2613_v57, %v2594_v0  ;;  %v3122_v13 = vld [vmem:[%s8983_s3 + $0x5a8] sm:$0xff]  ;;  %v3055_v57 = vld [vmem:[%s8983_s3 + $0x390] sm:$0xff] }
 0x2ba   :  { %3318 = vmatpush.msrb.mxu2 %v3181_v2  ;;  %3308 = vmatpush.msra.mxu1 %v3077_v15  ;;  %v3165_v52 = vld [vmem:[%s8983_s3 + $0x700] sm:$0xff]  ;;  %v3118_v35 = vld [vmem:[%s8983_s3 + $0x588] sm:$0xff] }
 0x2bb   :  { %3362 = vmatpush.msra.mxu0 %v2974_v17  ;;  %v3161_v36 = vld [vmem:[%s8983_s3 + $0x6e0] sm:$0xff]  ;;  %v8155_v12 = vmax.f32 %v2614_v48, 0.0  ;;  %v3014_v2 = vld [vmem:[%s8983_s3 + $0x248] sm:$0xff]  ;;  %v2947_v48 = vld [vmem:[%s8983_s3 + $0x30] sm:$0xff] }
 0x2bc   :  { %3319 = vmatpush.msrb.mxu2 %v3177_v39  ;;  %3309 = vmatpush.msra.mxu1 %v3073_v25  ;;  %v3157_v49 = vld [vmem:[%s8983_s3 + $0x6c0] sm:$0xff]  ;;  %v3114_v15 = vld [vmem:[%s8983_s3 + $0x568] sm:$0xff]  ;;  %v3003_v39 = vld [vmem:[%s8983_s3 + $0x1f0] sm:$0xff] }
 0x2bd   :  { %3363 = vmatpush.msra.mxu0 %v2970_v20  ;;  %v3153_v44 = vld [vmem:[%s8983_s3 + $0x6a0] sm:$0xff]  ;;  %v3010_v16 = vld [vmem:[%s8983_s3 + $0x228] sm:$0xff] }
 0x2be   :  { %3320 = vmatpush.msrb.mxu2 %v3173_v51  ;;  %3310 = vmatpush.msra.mxu1 %v3069_v21  ;;  %v3149_v50 = vld [vmem:[%s8983_s3 + $0x680] sm:$0xff]  ;;  %v3110_v17 = vld [vmem:[%s8983_s3 + $0x548] sm:$0xff]  ;;  %v2991_v21 = vld [vmem:[%s8983_s3 + $0x190] sm:$0xff] }
 0x2bf   :  { %3364 = vmatpush.msra.mxu0 %v2966_v10  ;;  %3311 = vmatmul.f32.vlgmr.msra.gmra.mxu1 %v8073_v37  ;;  %v3145_v56 = vld [vmem:[%s8983_s3 + $0x660] sm:$0xff]  ;;  %v3006_v1 = vld [vmem:[%s8983_s3 + $0x208] sm:$0xff] }
 0x2c0   :  { %3321 = vmatpush.msrb.mxu2 %v3169_v23  ;;  %3375 = vmatpush.msrb.mxu1 %v3066_v24  ;;  %v3141_v62 = vld [vmem:[%s8983_s3 + $0x640] sm:$0xff]  ;;  %v3106_v11 = vld [vmem:[%s8983_s3 + $0x528] sm:$0xff]  ;;  %v2983_v24 = vld [vmem:[%s8983_s3 + $0x150] sm:$0xff] }
 0x2c1   :  { %3365 = vmatpush.msra.mxu0 %v2962_v54  ;;  %v3137_v6 = vld [vmem:[%s8983_s3 + $0x620] sm:$0xff]  ;;  %v3102_v25 = vld [vmem:[%s8983_s3 + $0x508] sm:$0xff]  ;;  %v2979_v54 = vld [vmem:[%s8983_s3 + $0x130] sm:$0xff] }
 0x2c2   :  { %3322 = vmatpush.msrb.mxu2 %v3165_v52  ;;  %3376 = vmatpush.msrb.mxu1 %v3062_v47  ;;  %v3133_v7 = vld [vmem:[%s8983_s3 + $0x600] sm:$0xff]  ;;  %v3098_v20 = vld [vmem:[%s8983_s3 + $0x4e8] sm:$0xff] }
 0x2c3   :  { %3366 = vmatpush.msra.mxu0 %v2958_v30  ;;  %v3094_v51 = vld [vmem:[%s8983_s3 + $0x4c8] sm:$0xff]  ;;  %v3237_v52 = vld [vmem:[%s8983_s3 + $0x940] sm:$0xff]  ;;  %v2975_v30 = vld [vmem:[%s8983_s3 + $0x110] sm:$0xff] }
 0x2c4   :  { %3323 = vmatpush.msrb.mxu2 %v3161_v36  ;;  %3377 = vmatpush.msrb.mxu1 %v3058_v18  ;;  %v3090_v10 = vld [vmem:[%s8983_s3 + $0x4a8] sm:$0xff]  ;;  %v3233_v22 = vld [vmem:[%s8983_s3 + $0x920] sm:$0xff] }
 0x2c5   :  { %3367 = vmatpush.msra.mxu0 %v2954_v41  ;;  %v3086_v23 = vld [vmem:[%s8983_s3 + $0x488] sm:$0xff]  ;;  %3340 = vmatpush.msrb.mxu3 %v3237_v52  ;;  %v3229_v40 = vld [vmem:[%s8983_s3 + $0x900] sm:$0xff]  ;;  %v3187_v52 = vld [vmem:[%s8983_s3 + $0x7b0] sm:$0xff] }
 0x2c6   :  { %3324 = vmatpush.msrb.mxu2 %v3157_v49  ;;  %3378 = vmatpush.msrb.mxu1 %v3054_v42  ;;  %v3082_v28 = vld [vmem:[%s8983_s3 + $0x468] sm:$0xff]  ;;  %v2967_v49 = vld [vmem:[%s8983_s3 + $0xd0] sm:$0xff]  ;;  %v3225_v42 = vld [vmem:[%s8983_s3 + $0x8e0] sm:$0xff] }
 0x2c7   :  { %3368 = vmatpush.msra.mxu0 %v2950_v19  ;;  %v3238_v47 = vld [vmem:[%s8983_s3 + $0x948] sm:$0xff]  ;;  %3341 = vmatpush.msrb.mxu3 %v3233_v22  ;;  %v3221_v27 = vld [vmem:[%s8983_s3 + $0x8c0] sm:$0xff] }
 0x2c8   :  { %3325 = vmatpush.msrb.mxu2 %v3153_v44  ;;  %3379 = vmatpush.msrb.mxu1 %v3050_v45  ;;  %v3078_v29 = vld [vmem:[%s8983_s3 + $0x448] sm:$0xff]  ;;  %v2963_v44 = vld [vmem:[%s8983_s3 + $0xb0] sm:$0xff]  ;;  %v3213_v0 = vld [vmem:[%s8983_s3 + $0x880] sm:$0xff] }
 0x2c9   :  { %3369 = vmatpush.msra.mxu0 %v2946_v53  ;;  %v3234_v36 = vld [vmem:[%s8983_s3 + $0x928] sm:$0xff]  ;;  %3342 = vmatpush.msrb.mxu3 %v3229_v40  ;;  %v3063_v45 = vld [vmem:[%s8983_s3 + $0x3d0] sm:$0xff] }
 0x2ca   :  { %3326 = vmatpush.msrb.mxu2 %v3149_v50  ;;  %3380 = vmatpush.msrb.mxu1 %v3046_v26  ;;  %v3074_v18 = vld [vmem:[%s8983_s3 + $0x428] sm:$0xff]  ;;  %v2959_v53 = vld [vmem:[%s8983_s3 + $0x90] sm:$0xff] }
 0x2cb   :  { %3370 = vmatpush.msra.mxu0 %v2942_v60  ;;  %v3230_v41 = vld [vmem:[%s8983_s3 + $0x908] sm:$0xff]  ;;  %3343 = vmatpush.msrb.mxu3 %v3225_v42  ;;  %v3059_v26 = vld [vmem:[%s8983_s3 + $0x3b0] sm:$0xff]  ;;  %v3217_v60 = vld [vmem:[%s8983_s3 + $0x8a0] sm:$0xff] }
 0x2cc   :  { %3327 = vmatpush.msrb.mxu2 %v3145_v56  ;;  %3371 = vmatmul.f32.vlgmr.msra.gmra.mxu0 %v8013_v58  ;;  %v3070_v32 = vld [vmem:[%s8983_s3 + $0x408] sm:$0xff]  ;;  %v3015_v42 = vld [vmem:[%s8983_s3 + $0x250] sm:$0xff] }
 0x2cd   :  { %3381 = vmatpush.msrb.mxu1 %v3042_v61  ;;  %3440 = vmatpush.msrb.mxu0 %v3238_v47  ;;  %v3226_v19 = vld [vmem:[%s8983_s3 + $0x8e8] sm:$0xff]  ;;  %v2951_v61 = vld [vmem:[%s8983_s3 + $0x50] sm:$0xff] }
 0x2ce   :  { %3328 = vmatpush.msrb.mxu2 %v3141_v62  ;;  %v3222_v50 = vld [vmem:[%s8983_s3 + $0x8c8] sm:$0xff]  ;;  %3344 = vmatpush.msrb.mxu3 %v3221_v27 }
 0x2cf   :  { %3382 = vmatpush.msrb.mxu1 %v3038_v5  ;;  %3441 = vmatpush.msrb.mxu0 %v3234_v36  ;;  %v3218_v56 = vld [vmem:[%s8983_s3 + $0x8a8] sm:$0xff]  ;;  %v3051_v5 = vld [vmem:[%s8983_s3 + $0x370] sm:$0xff] }
 0x2d0   :  { %3329 = vmatpush.msrb.mxu2 %v3137_v6  ;;  %3345 = vmatpush.msrb.mxu3 %v3217_v60  ;;  %v3214_v62 = vld [vmem:[%s8983_s3 + $0x888] sm:$0xff]  ;;  %v3209_v6 = vld [vmem:[%s8983_s3 + $0x860] sm:$0xff]  ;;  %v3219_v36 = vld [vmem:[%s8983_s3 + $0x8b0] sm:$0xff] }
 0x2d1   :  { %3383 = vmatpush.msrb.mxu1 %v3034_v59  ;;  %3442 = vmatpush.msrb.mxu0 %v3230_v41  ;;  %v3210_v59 = vld [vmem:[%s8983_s3 + $0x868] sm:$0xff]  ;;  %v3215_v41 = vld [vmem:[%s8983_s3 + $0x890] sm:$0xff] }
 0x2d2   :  { %3330 = vmatpush.msrb.mxu2 %v3133_v7  ;;  %3346 = vmatpush.msrb.mxu3 %v3213_v0  ;;  %v3047_v7 = vld [vmem:[%s8983_s3 + $0x350] sm:$0xff]  ;;  %v3178_v40 = vld [vmem:[%s8983_s3 + $0x768] sm:$0xff]  ;;  %v3004_v0 = vld [vmem:[%s8983_s3 + $0x1f8] sm:$0xff] }
 0x2d3   :  { %3384 = vmatpush.msrb.mxu1 %v3030_v63  ;;  %3331 = vmatmul.f32.vlgmr.msrb.gmra.mxu2 %v8155_v12  ;;  %v2943_v63 = vld [vmem:[%s8983_s3 + $0x10] sm:$0xff]  ;;  %v3170_v27 = vld [vmem:[%s8983_s3 + $0x728] sm:$0xff] }
 0x2d4   :  { %3395 = vmatpush.msra.mxu2 %v3130_v8  ;;  %3443 = vmatpush.msrb.mxu0 %v3226_v19  ;;  %v3205_v8 = vld [vmem:[%s8983_s3 + $0x840] sm:$0xff]  ;;  %v3174_v19 = vld [vmem:[%s8983_s3 + $0x748] sm:$0xff]  ;;  %v3007_v60 = vld [vmem:[%s8983_s3 + $0x210] sm:$0xff] }
 0x2d5   :  { %3385 = vmatpush.msrb.mxu1 %v3026_v46  ;;  %3347 = vmatpush.msrb.mxu3 %v3209_v6  ;;  %v3206_v46 = vld [vmem:[%s8983_s3 + $0x848] sm:$0xff] }
 0x2d6   :  { %3396 = vmatpush.msra.mxu2 %v3126_v9  ;;  %3444 = vmatpush.msrb.mxu0 %v3222_v50  ;;  %v3043_v9 = vld [vmem:[%s8983_s3 + $0x330] sm:$0xff] }
 0x2d7   :  { %3386 = vmatpush.msrb.mxu1 %v3022_v3  ;;  %3348 = vmatpush.msrb.mxu3 %v3205_v8  ;;  %v3239_v3 = vld [vmem:[%s8983_s3 + $0x950] sm:$0xff] }
 0x2d8   :  { %3397 = vmatpush.msra.mxu2 %v3122_v13  ;;  %3445 = vmatpush.msrb.mxu0 %v3218_v56  ;;  %v3201_v13 = vld [vmem:[%s8983_s3 + $0x820] sm:$0xff]  ;;  %v3207_v50 = vld [vmem:[%s8983_s3 + $0x850] sm:$0xff]  ;;  %v3166_v56 = vld [vmem:[%s8983_s3 + $0x708] sm:$0xff] }
 0x2d9   :  { %3387 = vmatpush.msrb.mxu1 %v3018_v14  ;;  %v3202_v14 = vld [vmem:[%s8983_s3 + $0x828] sm:$0xff]  ;;  %3349 = vmatpush.msrb.mxu3 %v3201_v13  ;;  %v3163_v8 = vld [vmem:[%s8983_s3 + $0x6f0] sm:$0xff] }
 0x2da   :  { %3398 = vmatpush.msra.mxu2 %v3118_v35  ;;  %3446 = vmatpush.msrb.mxu0 %v3214_v62  ;;  %v3864_v35 = vld [vmem:[%s8982_s2] sm:$0x1f]  ;;  %v3167_v62 = vld [vmem:[%s8983_s3 + $0x710] sm:$0xff] }
 0x2db   :  { %3388 = vmatpush.msrb.mxu1 %v3014_v2  ;;  %v1287_v2 = vperm.slane %v3864_v35, 4  ;;  %v3159_v13 = vld [vmem:[%s8983_s3 + $0x6d0] sm:$0xff] }
 0x2dc   :  { %3399 = vmatpush.msra.mxu2 %v3114_v15  ;;  %3447 = vmatpush.msrb.mxu0 %v3210_v59  ;;  %v3039_v15 = vld [vmem:[%s8983_s3 + $0x310] sm:$0xff]  ;;  %v3000_v59 = vld [vmem:[%s8983_s3 + $0x1d8] sm:$0xff] }
 0x2dd   :  { %3389 = vmatpush.msrb.mxu1 %v3010_v16  ;;  %v2633_v16 = vpop.f32.mrf.mxu0 }
 0x2de   :  { %3400 = vmatpush.msra.mxu2 %v3110_v17  ;;  %3448 = vmatpush.msrb.mxu0 %v3206_v46  ;;  %v3235_v17 = vld [vmem:[%s8983_s3 + $0x930] sm:$0xff]  ;;  %v3158_v46 = vld [vmem:[%s8983_s3 + $0x6c8] sm:$0xff] }
 0x2df   :  { %3390 = vmatpush.msrb.mxu1 %v3006_v1  ;;  %v3197_v1 = vld [vmem:[%s8983_s3 + $0x800] sm:$0xff] }
 0x2e0   :  { %3391 = vmatmul.f32.vlgmr.msrb.gmra.mxu1 %v7963_v31  ;;  %3401 = vmatpush.msra.mxu2 %v3106_v11  ;;  %v3198_v11 = vld [vmem:[%s8983_s3 + $0x808] sm:$0xff] }
 0x2e1   :  { %3455 = vmatpush.msra.mxu1 %v3003_v39  ;;  %v3035_v39 = vld [vmem:[%s8983_s3 + $0x2f0] sm:$0xff]  ;;  %3449 = vmatpush.msrb.mxu0 %v3202_v14  ;;  %v3154_v14 = vld [vmem:[%s8983_s3 + $0x6a8] sm:$0xff] }
 0x2e2   :  { %3402 = vmatpush.msra.mxu2 %v3102_v25  ;;  %v3194_v25 = vld [vmem:[%s8983_s3 + $0x7e8] sm:$0xff]  ;;  %3350 = vmatpush.msrb.mxu3 %v3197_v1 }
 0x2e3   :  { %3456 = vmatpush.msra.mxu1 %v2999_v38  ;;  %v3231_v38 = vld [vmem:[%s8983_s3 + $0x910] sm:$0xff]  ;;  %3450 = vmatpush.msrb.mxu0 %v3198_v11  ;;  %v3150_v1 = vld [vmem:[%s8983_s3 + $0x688] sm:$0xff]  ;;  %v2988_v11 = vld [vmem:[%s8983_s3 + $0x178] sm:$0xff] }
 0x2e4   :  { %3403 = vmatpush.msra.mxu2 %v3098_v20  ;;  %v3195_v20 = vld [vmem:[%s8983_s3 + $0x7f0] sm:$0xff]  ;;  %3415 = vmatpush.msra.mxu3 %v3194_v25 }
 0x2e5   :  { %3457 = vmatpush.msra.mxu1 %v2995_v34  ;;  %v2634_v34 = vadd.f32 %v2633_v16, %v1287_v2  ;;  %3515 = vmatpush.msra.mxu0 %v3195_v20  ;;  %v2992_v2 = vld [vmem:[%s8983_s3 + $0x198] sm:$0xff]  ;;  %v3151_v25 = vld [vmem:[%s8983_s3 + $0x690] sm:$0xff] }
 0x2e6   :  { %3404 = vmatpush.msra.mxu2 %v3094_v51  ;;  %v3031_v51 = vld [vmem:[%s8983_s3 + $0x2d0] sm:$0xff] }
 0x2e7   :  { %3458 = vmatpush.msra.mxu1 %v2991_v21  ;;  %v3190_v21 = vld [vmem:[%s8983_s3 + $0x7c8] sm:$0xff] }
 0x2e8   :  { %3405 = vmatpush.msra.mxu2 %v3090_v10  ;;  %v2653_v10 = vpop.f32.mrf.mxu1  ;;  %3416 = vmatpush.msra.mxu3 %v3190_v21 }
 0x2e9   :  { %3459 = vmatpush.msra.mxu1 %v2987_v4  ;;  %v3227_v4 = vld [vmem:[%s8983_s3 + $0x8f0] sm:$0xff]  ;;  %v2654_v47 = vadd.f32 %v2653_v10, %v2634_v34  ;;  %v2984_v34 = vld [vmem:[%s8983_s3 + $0x158] sm:$0xff] }
 0x2ea   :  { %3406 = vmatpush.msra.mxu2 %v3086_v23  ;;  %v3191_v23 = vld [vmem:[%s8983_s3 + $0x7d0] sm:$0xff] }
 0x2eb   :  { %3460 = vmatpush.msra.mxu1 %v2983_v24  ;;  %v3027_v24 = vld [vmem:[%s8983_s3 + $0x2b0] sm:$0xff]  ;;  %3516 = vmatpush.msra.mxu0 %v3191_v23  ;;  %v2980_v23 = vld [vmem:[%s8983_s3 + $0x138] sm:$0xff] }
 0x2ec   :  { %3407 = vmatpush.msra.mxu2 %v3082_v28  ;;  %v3186_v28 = vld [vmem:[%s8983_s3 + $0x7a8] sm:$0xff]  ;;  %v3147_v10 = vld [vmem:[%s8983_s3 + $0x670] sm:$0xff] }
 0x2ed   :  { %3461 = vmatpush.msra.mxu1 %v2979_v54  ;;  %v3223_v54 = vld [vmem:[%s8983_s3 + $0x8d0] sm:$0xff]  ;;  %3417 = vmatpush.msra.mxu3 %v3186_v28 }
 0x2ee   :  { %3408 = vmatpush.msra.mxu2 %v3078_v29  ;;  %v3023_v29 = vld [vmem:[%s8983_s3 + $0x290] sm:$0xff]  ;;  %3517 = vmatpush.msra.mxu0 %v3187_v52 }
 0x2ef   :  { %3462 = vmatpush.msra.mxu1 %v2975_v30  ;;  %v3182_v30 = vld [vmem:[%s8983_s3 + $0x788] sm:$0xff]  ;;  %v3143_v28 = vld [vmem:[%s8983_s3 + $0x650] sm:$0xff] }
 0x2f0   :  { %3409 = vmatpush.msra.mxu2 %v3074_v18  ;;  %v2673_v22 = vpop.f32.mrf.mxu2  ;;  %v3183_v18 = vld [vmem:[%s8983_s3 + $0x790] sm:$0xff]  ;;  %3418 = vmatpush.msra.mxu3 %v3182_v30 }
 0x2f1   :  { %3463 = vmatpush.msra.mxu1 %v2971_v33  ;;  %v3019_v33 = vld [vmem:[%s8983_s3 + $0x270] sm:$0xff]  ;;  %3518 = vmatpush.msra.mxu0 %v3183_v18  ;;  %v2972_v18 = vld [vmem:[%s8983_s3 + $0xf8] sm:$0xff] }
 0x2f2   :  { %3410 = vmatpush.msra.mxu2 %v3070_v32  ;;  %v3179_v32 = vld [vmem:[%s8983_s3 + $0x770] sm:$0xff]  ;;  %3419 = vmatpush.msra.mxu3 %v3178_v40 }
 0x2f3   :  { %3464 = vmatpush.msra.mxu1 %v2967_v49  ;;  %3411 = vmatmul.f32.vlgmr.msra.gmra.mxu2 %v8073_v37  ;;  %v2674_v49 = vadd.f32 %v2673_v22, %v2654_v47  ;;  %v2976_v47 = vld [vmem:[%s8983_s3 + $0x118] sm:$0xff]  ;;  %v3139_v22 = vld [vmem:[%s8983_s3 + $0x630] sm:$0xff] }
 0x2f4   :  { %3475 = vmatpush.msrb.mxu2 %v3067_v43  ;;  %v2693_v43 = vpop.f32.mrf.mxu3  ;;  %3519 = vmatpush.msra.mxu0 %v3179_v32  ;;  %v3135_v40 = vld [vmem:[%s8983_s3 + $0x610] sm:$0xff]  ;;  %v2968_v32 = vld [vmem:[%s8983_s3 + $0xd8] sm:$0xff] }
 0x2f5   :  { %3465 = vmatpush.msra.mxu1 %v2963_v44  ;;  %v3211_v44 = vld [vmem:[%s8983_s3 + $0x870] sm:$0xff]  ;;  %3420 = vmatpush.msra.mxu3 %v3174_v19  ;;  %v2964_v19 = vld [vmem:[%s8983_s3 + $0xb8] sm:$0xff] }
 0x2f6   :  { %3476 = vmatpush.msrb.mxu2 %v3063_v45  ;;  %v3175_v45 = vld [vmem:[%s8983_s3 + $0x750] sm:$0xff] }
 0x2f7   :  { %3466 = vmatpush.msra.mxu1 %v2959_v53  ;;  %v3011_v53 = vld [vmem:[%s8983_s3 + $0x230] sm:$0xff]  ;;  %3520 = vmatpush.msra.mxu0 %v3175_v45 }
 0x2f8   :  { %3477 = vmatpush.msrb.mxu2 %v3059_v26  ;;  %v3171_v26 = vld [vmem:[%s8983_s3 + $0x730] sm:$0xff]  ;;  %3421 = vmatpush.msra.mxu3 %v3170_v27  ;;  %v2753_v16 = vpop.f32.mrf.mxu2  ;;  %v3156_v27 = vld [vmem:[%s8983_s3 + $0x6b8] sm:$0xff] }
 0x2f9   :  { %3467 = vmatpush.msra.mxu1 %v2955_v55  ;;  %v2694_v55 = vadd.f32 %v2693_v43, %v2674_v49  ;;  %3521 = vmatpush.msra.mxu0 %v3171_v26  ;;  %v3164_v49 = vld [vmem:[%s8983_s3 + $0x6f8] sm:$0xff] }
 0x2fa   :  { %3478 = vmatpush.msrb.mxu2 %v3055_v57  ;;  %v2713_v57 = vpop.f32.mrf.mxu0  ;;  %3422 = vmatpush.msra.mxu3 %v3166_v56  ;;  %v3160_v43 = vld [vmem:[%s8983_s3 + $0x6d8] sm:$0xff] }
 0x2fb   :  { %3468 = vmatpush.msra.mxu1 %v2951_v61  ;;  %v3203_v61 = vld [vmem:[%s8983_s3 + $0x830] sm:$0xff]  ;;  %v2714_v6 = vadd.f32 %v2713_v57, %v2694_v55  ;;  %3522 = vmatpush.msra.mxu0 %v3167_v62  ;;  %v2956_v26 = vld [vmem:[%s8983_s3 + $0x78] sm:$0xff] }
 0x2fc   :  { %3479 = vmatpush.msrb.mxu2 %v3051_v5  ;;  %v3199_v5 = vld [vmem:[%s8983_s3 + $0x810] sm:$0xff]  ;;  %v2773_v21 = vpop.f32.mrf.mxu3  ;;  %v3152_v55 = vld [vmem:[%s8983_s3 + $0x698] sm:$0xff] }
 0x2fd   :  { %3469 = vmatpush.msra.mxu1 %v2947_v48  ;;  %v3162_v48 = vld [vmem:[%s8983_s3 + $0x6e8] sm:$0xff]  ;;  %3523 = vmatpush.msra.mxu0 %v3163_v8  ;;  %v2952_v56 = vld [vmem:[%s8983_s3 + $0x58] sm:$0xff] }
 0x2fe   :  { %3480 = vmatpush.msrb.mxu2 %v3047_v7  ;;  %v3196_v7 = vld [vmem:[%s8983_s3 + $0x7f8] sm:$0xff]  ;;  %3423 = vmatpush.msra.mxu3 %v3162_v48 }
 0x2ff   :  { %3470 = vmatpush.msra.mxu1 %v2943_v63  ;;  %v2733_v63 = vpop.f32.mrf.mxu1  ;;  %3524 = vmatpush.msra.mxu0 %v3159_v13  ;;  %v3148_v57 = vld [vmem:[%s8983_s3 + $0x678] sm:$0xff] }
 0x300   :  { %3471 = vmatmul.f32.vlgmr.msra.gmra.mxu1 %v8013_v58  ;;  %3481 = vmatpush.msrb.mxu2 %v3043_v9  ;;  %v2996_v9 = vld [vmem:[%s8983_s3 + $0x1b8] sm:$0xff]  ;;  %v2734_v35 = vadd.f32 %v2733_v63, %v2714_v6 }
 0x301   :  { %3540 = vmatpush.msrb.mxu1 %v3239_v3  ;;  %v3192_v3 = vld [vmem:[%s8983_s3 + $0x7d8] sm:$0xff]  ;;  %3424 = vmatpush.msra.mxu3 %v3158_v46 }
 0x302   :  { %3482 = vmatpush.msrb.mxu2 %v3039_v15  ;;  %v3188_v15 = vld [vmem:[%s8983_s3 + $0x7b8] sm:$0xff]  ;;  %v2754_v20 = vadd.f32 %v2753_v16, %v2734_v35  ;;  %v2793_v30 = vpop.f32.mrf.mxu0 }
 0x303   :  { %3541 = vmatpush.msrb.mxu1 %v3235_v17  ;;  %v3155_v17 = vld [vmem:[%s8983_s3 + $0x6b0] sm:$0xff]  ;;  %3425 = vmatpush.msra.mxu3 %v3154_v14  ;;  %v3144_v62 = vld [vmem:[%s8983_s3 + $0x658] sm:$0xff] }
 0x304   :  { %3483 = vmatpush.msrb.mxu2 %v3035_v39  ;;  %v3184_v39 = vld [vmem:[%s8983_s3 + $0x798] sm:$0xff]  ;;  %3525 = vmatpush.msra.mxu0 %v3155_v17  ;;  %v2774_v52 = vadd.f32 %v2773_v21, %v2754_v20 }
 0x305   :  { %3542 = vmatpush.msrb.mxu1 %v3231_v38  ;;  %v3146_v38 = vld [vmem:[%s8983_s3 + $0x668] sm:$0xff]  ;;  %3426 = vmatpush.msra.mxu3 %v3150_v1  ;;  %v2944_v48 = vld [vmem:[%s8983_s3 + $0x18] sm:$0xff]  ;;  %v3131_v1 = vld [vmem:[%s8983_s3 + $0x5f0] sm:$0xff] }
 0x306   :  { %3484 = vmatpush.msrb.mxu2 %v3031_v51  ;;  %v3180_v51 = vld [vmem:[%s8983_s3 + $0x778] sm:$0xff]  ;;  %3526 = vmatpush.msra.mxu0 %v3151_v25  ;;  %v3127_v25 = vld [vmem:[%s8983_s3 + $0x5d0] sm:$0xff] }
 0x307   :  { %3543 = vmatpush.msrb.mxu1 %v3227_v4  ;;  %v3142_v4 = vld [vmem:[%s8983_s3 + $0x648] sm:$0xff]  ;;  %3427 = vmatpush.msra.mxu3 %v3146_v38  ;;  %v3140_v6 = vld [vmem:[%s8983_s3 + $0x638] sm:$0xff] }
 0x308   :  { %3485 = vmatpush.msrb.mxu2 %v3027_v24  ;;  %v3176_v24 = vld [vmem:[%s8983_s3 + $0x758] sm:$0xff]  ;;  %3527 = vmatpush.msra.mxu0 %v3147_v10  ;;  %v3119_v10 = vld [vmem:[%s8983_s3 + $0x590] sm:$0xff] }
 0x309   :  { %3544 = vmatpush.msrb.mxu1 %v3223_v54  ;;  %v3138_v54 = vld [vmem:[%s8983_s3 + $0x628] sm:$0xff]  ;;  %3428 = vmatpush.msra.mxu3 %v3142_v4  ;;  %v3136_v63 = vld [vmem:[%s8983_s3 + $0x618] sm:$0xff] }
 0x30a   :  { %3486 = vmatpush.msrb.mxu2 %v3023_v29  ;;  %v3172_v29 = vld [vmem:[%s8983_s3 + $0x738] sm:$0xff]  ;;  %3528 = vmatpush.msra.mxu0 %v3143_v28 }
 0x30b   :  { %3545 = vmatpush.msrb.mxu1 %v3219_v36  ;;  %v3134_v36 = vld [vmem:[%s8983_s3 + $0x608] sm:$0xff]  ;;  %3429 = vmatpush.msra.mxu3 %v3138_v54  ;;  %v3236_v46 = vld [vmem:[%s8983_s3 + $0x938] sm:$0xff] }
 0x30c   :  { %3487 = vmatpush.msrb.mxu2 %v3019_v33  ;;  %v3168_v33 = vld [vmem:[%s8983_s3 + $0x718] sm:$0xff]  ;;  %3529 = vmatpush.msra.mxu0 %v3139_v22 }
 0x30d   :  { %3546 = vmatpush.msrb.mxu1 %v3215_v41  ;;  %v2794_v41 = vadd.f32 %v2793_v30, %v2774_v52  ;;  %3430 = vmatpush.msra.mxu3 %v3134_v36  ;;  %v3228_v14 = vld [vmem:[%s8983_s3 + $0x8f8] sm:$0xff]  ;;  %v3111_v52 = vld [vmem:[%s8983_s3 + $0x550] sm:$0xff] }
 0x30e   :  { %3488 = vmatpush.msrb.mxu2 %v3015_v42  ;;  %v2813_v42 = vpop.f32.mrf.mxu1  ;;  %3530 = vmatpush.msra.mxu0 %v3135_v40  ;;  %v3220_v17 = vld [vmem:[%s8983_s3 + $0x8b8] sm:$0xff]  ;;  %v3099_v36 = vld [vmem:[%s8983_s3 + $0x4f0] sm:$0xff] }
 0x30f   :  { %3547 = vmatpush.msrb.mxu1 %v3211_v44  ;;  %v2814_v45 = vadd.f32 %v2813_v42, %v2794_v41  ;;  %v3128_v38 = vld [vmem:[%s8983_s3 + $0x5d8] sm:$0xff]  ;;  %v3091_v41 = vld [vmem:[%s8983_s3 + $0x4b0] sm:$0xff] }
 0x310   :  { %3489 = vmatpush.msrb.mxu2 %v3011_v53  ;;  %v2960_v53 = vld [vmem:[%s8983_s3 + $0x98] sm:$0xff] }
 0x311   :  { %3548 = vmatpush.msrb.mxu1 %v3207_v50  ;;  %v3212_v20 = vld [vmem:[%s8983_s3 + $0x878] sm:$0xff] }
 0x312   :  { %3490 = vmatpush.msrb.mxu2 %v3007_v60  ;;  %v3208_v21 = vld [vmem:[%s8983_s3 + $0x858] sm:$0xff] }
 0x313   :  { %3491 = vmatmul.f32.vlgmr.msrb.gmra.mxu2 %v7963_v31  ;;  %3549 = vmatpush.msrb.mxu1 %v3203_v61  ;;  %v2833_v44 = vpop.f32.mrf.mxu2  ;;  %v2853_v60 = vpop.f32.mrf.mxu3  ;;  %v3120_v4 = vld [vmem:[%s8983_s3 + $0x598] sm:$0xff] }
 0x314   :  { %3555 = vmatpush.msra.mxu2 %v3004_v0  ;;  %v2834_v50 = vadd.f32 %v2833_v44, %v2814_v45  ;;  %v2948_v0 = vld [vmem:[%s8983_s3 + $0x38] sm:$0xff]  ;;  %v3079_v44 = vld [vmem:[%s8983_s3 + $0x450] sm:$0xff] }
 0x315   :  { %3550 = vmatpush.msrb.mxu1 %v3199_v5  ;;  %v3200_v28 = vld [vmem:[%s8983_s3 + $0x818] sm:$0xff] }
 0x316   :  { %3556 = vmatpush.msra.mxu2 %v3000_v59  ;;  %v2854_v61 = vadd.f32 %v2853_v60, %v2834_v50  ;;  %v3116_v54 = vld [vmem:[%s8983_s3 + $0x578] sm:$0xff]  ;;  %v3071_v50 = vld [vmem:[%s8983_s3 + $0x410] sm:$0xff] }
 0x317   :  { %3615 = vmatpush.msra.mxu1 %v3196_v7  ;;  %v3240_v7 = vld [vmem:[%s8983_s3 + $0x958] sm:$0xff] }
 0x318   :  { %3557 = vmatpush.msra.mxu2 %v2996_v9  ;;  %v2873_v5 = vpop.f32.mrf.mxu0  ;;  %v3108_v30 = vld [vmem:[%s8983_s3 + $0x538] sm:$0xff] }
 0x319   :  { %3616 = vmatpush.msra.mxu1 %v3192_v3  ;;  %v2874_v59 = vadd.f32 %v2873_v5, %v2854_v61  ;;  %v3232_v3 = vld [vmem:[%s8983_s3 + $0x918] sm:$0xff] }
 0x31a   :  { %3558 = vmatpush.msra.mxu2 %v2992_v2  ;;  %v2893_v8 = vpop.f32.mrf.mxu1  ;;  %v3104_v22 = vld [vmem:[%s8983_s3 + $0x518] sm:$0xff] }
 0x31b   :  { %3617 = vmatpush.msra.mxu1 %v3188_v15  ;;  %v2894_v9 = vadd.f32 %v2893_v8, %v2874_v59  ;;  %v3224_v15 = vld [vmem:[%s8983_s3 + $0x8d8] sm:$0xff] }
 0x31c   :  { %3559 = vmatpush.msra.mxu2 %v2988_v11  ;;  %v3132_v11 = vld [vmem:[%s8983_s3 + $0x5f8] sm:$0xff] }
 0x31d   :  { %3618 = vmatpush.msra.mxu1 %v3184_v39  ;;  %v3216_v39 = vld [vmem:[%s8983_s3 + $0x898] sm:$0xff] }
 0x31e   :  { %3560 = vmatpush.msra.mxu2 %v2984_v34  ;;  %v3123_v34 = vld [vmem:[%s8983_s3 + $0x5b0] sm:$0xff]  ;;  %v3096_v40 = vld [vmem:[%s8983_s3 + $0x4d8] sm:$0xff] }
 0x31f   :  { %3619 = vmatpush.msra.mxu1 %v3180_v51  ;;  %v3124_v51 = vld [vmem:[%s8983_s3 + $0x5b8] sm:$0xff] }
 0x320   :  { %3561 = vmatpush.msra.mxu2 %v2980_v23  ;;  %v3204_v23 = vld [vmem:[%s8983_s3 + $0x838] sm:$0xff] }
 0x321   :  { %3620 = vmatpush.msra.mxu1 %v3176_v24  ;;  %v3115_v24 = vld [vmem:[%s8983_s3 + $0x570] sm:$0xff]  ;;  %v3088_v42 = vld [vmem:[%s8983_s3 + $0x498] sm:$0xff] }
 0x322   :  { %3562 = vmatpush.msra.mxu2 %v2976_v47  ;;  %v3112_v47 = vld [vmem:[%s8983_s3 + $0x558] sm:$0xff] }
 0x323   :  { %3621 = vmatpush.msra.mxu1 %v3172_v29  ;;  %v3107_v29 = vld [vmem:[%s8983_s3 + $0x530] sm:$0xff]  ;;  %v3080_v45 = vld [vmem:[%s8983_s3 + $0x458] sm:$0xff] }
 0x324   :  { %3563 = vmatpush.msra.mxu2 %v2972_v18  ;;  %v3100_v18 = vld [vmem:[%s8983_s3 + $0x4f8] sm:$0xff] }
 0x325   :  { %3622 = vmatpush.msra.mxu1 %v3168_v33  ;;  %v3095_v33 = vld [vmem:[%s8983_s3 + $0x4d0] sm:$0xff]  ;;  %v3064_v60 = vld [vmem:[%s8983_s3 + $0x3d8] sm:$0xff] }
 0x326   :  { %3564 = vmatpush.msra.mxu2 %v2968_v32  ;;  %v3092_v32 = vld [vmem:[%s8983_s3 + $0x4b8] sm:$0xff] }
 0x327   :  { %3623 = vmatpush.msra.mxu1 %v3164_v49  ;;  %v3087_v49 = vld [vmem:[%s8983_s3 + $0x490] sm:$0xff]  ;;  %v3052_v61 = vld [vmem:[%s8983_s3 + $0x378] sm:$0xff] }
 0x328   :  { %3565 = vmatpush.msra.mxu2 %v2964_v19  ;;  %v3083_v19 = vld [vmem:[%s8983_s3 + $0x470] sm:$0xff]  ;;  %v3036_v5 = vld [vmem:[%s8983_s3 + $0x2f8] sm:$0xff] }
 0x329   :  { %3624 = vmatpush.msra.mxu1 %v3160_v43  ;;  %v3084_v43 = vld [vmem:[%s8983_s3 + $0x478] sm:$0xff] }
 0x32a   :  { %3566 = vmatpush.msra.mxu2 %v2960_v53  ;;  %v3075_v53 = vld [vmem:[%s8983_s3 + $0x430] sm:$0xff]  ;;  %v3024_v59 = vld [vmem:[%s8983_s3 + $0x298] sm:$0xff] }
 0x32b   :  { %3625 = vmatpush.msra.mxu1 %v3156_v27  ;;  %v3076_v27 = vld [vmem:[%s8983_s3 + $0x438] sm:$0xff] }
 0x32c   :  { %3567 = vmatpush.msra.mxu2 %v2956_v26  ;;  %v2933_v2 = vpop.f32.mrf.mxu3  ;;  %v3072_v26 = vld [vmem:[%s8983_s3 + $0x418] sm:$0xff] }
 0x32d   :  { %3626 = vmatpush.msra.mxu1 %v3152_v55  ;;  %v3068_v55 = vld [vmem:[%s8983_s3 + $0x3f8] sm:$0xff] }
 0x32e   :  { %3568 = vmatpush.msra.mxu2 %v2952_v56  ;;  %v3060_v56 = vld [vmem:[%s8983_s3 + $0x3b8] sm:$0xff] }
 0x32f   :  { %3627 = vmatpush.msra.mxu1 %v3148_v57  ;;  %v3056_v57 = vld [vmem:[%s8983_s3 + $0x398] sm:$0xff] }
 0x330   :  { %3569 = vmatpush.msra.mxu2 %v2948_v0  ;;  %v3048_v0 = vld [vmem:[%s8983_s3 + $0x358] sm:$0xff] }
 0x331   :  { %3628 = vmatpush.msra.mxu1 %v3144_v62  ;;  %v3040_v62 = vld [vmem:[%s8983_s3 + $0x318] sm:$0xff] }
 0x332   :  { %3570 = vmatpush.msra.mxu2 %v2944_v48  ;;  %v3032_v48 = vld [vmem:[%s8983_s3 + $0x2d8] sm:$0xff] }
 0x333   :  { %3629 = vmatpush.msra.mxu1 %v3140_v6  ;;  %3571 = vmatmul.f32.vlgmr.msra.gmra.mxu2 %v8013_v58  ;;  %v3028_v6 = vld [vmem:[%s8983_s3 + $0x2b8] sm:$0xff] }
 0x334   :  { %3640 = vmatpush.msrb.mxu2 %v3240_v7  ;;  %v3020_v7 = vld [vmem:[%s8983_s3 + $0x278] sm:$0xff] }
 0x335   :  { %3630 = vmatpush.msra.mxu1 %v3136_v63  ;;  %v3016_v63 = vld [vmem:[%s8983_s3 + $0x258] sm:$0xff] }
 0x336   :  { %3641 = vmatpush.msrb.mxu2 %v3236_v46  ;;  %v2913_v13 = vpop.f32.mrf.mxu2  ;;  %v3012_v8 = vld [vmem:[%s8983_s3 + $0x238] sm:$0xff] }
 0x337   :  { %v2914_v35 = vadd.f32 %v2913_v13, %v2894_v9  ;;  %v3690_v46 = vld [vmem:[%s8985_s5 + $0xf8] sm:$0xff]  ;;  %v3673_v13 = vld [vmem:[%s8985_s5 + $0x70] sm:$0xff] }
 0x338   :  { %3642 = vmatpush.msrb.mxu2 %v3232_v3  ;;  %v3008_v9 = vld [vmem:[%s8983_s3 + $0x218] sm:$0xff] }
 0x339   :  { %v2934_v58 = vadd.f32 %v2933_v2, %v2914_v35  ;;  %v3674_v3 = vld [vmem:[%s8985_s5 + $0x78] sm:$0xff]  ;;  %v3671_v35 = vld [vmem:[%s8985_s5 + $0x60] sm:$0xff] }
 0x33a   :  { %3643 = vmatpush.msrb.mxu2 %v3228_v14  ;;  %v3672_v14 = vld [vmem:[%s8985_s5 + $0x68] sm:$0xff]  ;;  %v3670_v2 = vld [vmem:[%s8985_s5 + $0x58] sm:$0xff] }
 0x33b   :  { %v2940_v16 = vmax.f32 %v2934_v58, 0.0  ;;  %v3668_v58 = vld [vmem:[%s8985_s5 + $0x48] sm:$0xff] }
 0x33c   :  { %3644 = vmatpush.msrb.mxu2 %v3224_v15  ;;  %v3689_v15 = vld [vmem:[%s8985_s5 + $0xf0] sm:$0xff] }
 0x33d   :  { %3827 = vmatmul.msk.f32.vlgmr.msrb.gmra.mxu3 %vm3251_vm1, %v2940_v16  ;;  %3828 = vmatmul.msk.f32.vlgmr.msrb.gmra.mxu0 %vm3251_vm1, %v2940_v16 }
 0x33e   :  { %3645 = vmatpush.msrb.mxu2 %v3220_v17  ;;  %3495 = vmatpush.msrb.mxu3 %v3131_v1  ;;  %v3688_v17 = vld [vmem:[%s8985_s5 + $0xe8] sm:$0xff]  ;;  %v3666_v1 = vld [vmem:[%s8985_s5 + $0x38] sm:$0xff] }
 0x33f   :  { %3829 = vmatmul.msk.f32.vlgmr.msrb.gmra.mxu1 %vm3251_vm1, %v2940_v16  ;;  %3595 = vmatpush.msrb.mxu0 %v3132_v11  ;;  %v3687_v11 = vld [vmem:[%s8985_s5 + $0xe0] sm:$0xff] }
 0x340   :  { %3646 = vmatpush.msrb.mxu2 %v3216_v39  ;;  %3496 = vmatpush.msrb.mxu3 %v3127_v25  ;;  %v3665_v39 = vld [vmem:[%s8985_s5 + $0x30] sm:$0xff]  ;;  %v3686_v25 = vld [vmem:[%s8985_s5 + $0xd8] sm:$0xff] }
 0x341   :  { %3596 = vmatpush.msrb.mxu0 %v3128_v38  ;;  %v3664_v38 = vld [vmem:[%s8985_s5 + $0x28] sm:$0xff] }
 0x342   :  { %3647 = vmatpush.msrb.mxu2 %v3212_v20  ;;  %3497 = vmatpush.msrb.mxu3 %v3123_v34  ;;  %v3685_v20 = vld [vmem:[%s8985_s5 + $0xd0] sm:$0xff]  ;;  %v3663_v34 = vld [vmem:[%s8985_s5 + $0x20] sm:$0xff] }
 0x343   :  { %3597 = vmatpush.msrb.mxu0 %v3124_v51  ;;  %v3684_v51 = vld [vmem:[%s8985_s5 + $0xc8] sm:$0xff] }
 0x344   :  { %3648 = vmatpush.msrb.mxu2 %v3208_v21  ;;  %3498 = vmatpush.msrb.mxu3 %v3119_v10  ;;  %v3662_v21 = vld [vmem:[%s8985_s5 + $0x18] sm:$0xff]  ;;  %v3683_v10 = vld [vmem:[%s8985_s5 + $0xc0] sm:$0xff] }
 0x345   :  { %3598 = vmatpush.msrb.mxu0 %v3120_v4  ;;  %3431 = vmatmul.f32.vlgmr.msra.gmra.mxu3 %v8155_v12  ;;  %v3661_v4 = vld [vmem:[%s8985_s5 + $0x10] sm:$0xff] }
 0x346   :  { %3649 = vmatpush.msrb.mxu2 %v3204_v23  ;;  %3499 = vmatpush.msrb.mxu3 %v3115_v24  ;;  %v3682_v23 = vld [vmem:[%s8985_s5 + $0xb8] sm:$0xff]  ;;  %v3660_v24 = vld [vmem:[%s8985_s5 + $0x8] sm:$0xff] }
 0x347   :  { %3531 = vmatmul.f32.vlgmr.msra.gmra.mxu0 %v8155_v12  ;;  %3631 = vmatmul.f32.vlgmr.msra.gmra.mxu1 %v8155_v12  ;;  %v3103_v12 = vld [vmem:[%s8983_s3 + $0x510] sm:$0xff] }
 0x348   :  { %3650 = vmatpush.msrb.mxu2 %v3200_v28  ;;  %3599 = vmatpush.msrb.mxu0 %v3116_v54  ;;  %v3681_v28 = vld [vmem:[%s8985_s5 + $0xb0] sm:$0xff]  ;;  %v3659_v54 = vld [vmem:[%s8985_s5] sm:$0xff] }
 0x349   :  { %3830 = vmatmul.msk.f32.vlgmr.msrb.gmra.mxu2 %vm3251_vm1, %v2940_v16  ;;  %3500 = vmatpush.msrb.mxu3 %v3111_v52  ;;  %v3667_v16 = vld [vmem:[%s8985_s5 + $0x40] sm:$0xff]  ;;  %v3680_v52 = vld [vmem:[%s8985_s5 + $0xa8] sm:$0xff] }
 0x34a   :  { %3600 = vmatpush.msrb.mxu0 %v3112_v47  ;;  %v3679_v47 = vld [vmem:[%s8985_s5 + $0xa0] sm:$0xff] }
 0x34b   :  { %3501 = vmatpush.msrb.mxu3 %v3107_v29  ;;  %v3678_v29 = vld [vmem:[%s8985_s5 + $0x98] sm:$0xff] }
 0x34c   :  { %3601 = vmatpush.msrb.mxu0 %v3108_v30  ;;  %v3706_v30 = vld [vmem:[%s8985_s5 + $0x178] sm:$0xff] }
 0x34d   :  { %3502 = vmatpush.msrb.mxu3 %v3103_v12  ;;  %v3677_v12 = vld [vmem:[%s8985_s5 + $0x90] sm:$0xff]  ;;  %3764 = vmatpush.msrb.mxu1 %v3706_v30 }
 0x34e   :  { %3602 = vmatpush.msrb.mxu0 %v3104_v22  ;;  %v3705_v22 = vld [vmem:[%s8985_s5 + $0x170] sm:$0xff] }
 0x34f   :  { %3503 = vmatpush.msrb.mxu3 %v3099_v36  ;;  %v3676_v36 = vld [vmem:[%s8985_s5 + $0x88] sm:$0xff]  ;;  %3765 = vmatpush.msrb.mxu1 %v3705_v22 }
 0x350   :  { %3603 = vmatpush.msrb.mxu0 %v3100_v18  ;;  %v3704_v18 = vld [vmem:[%s8985_s5 + $0x168] sm:$0xff] }
 0x351   :  { %3504 = vmatpush.msrb.mxu3 %v3095_v33  ;;  %v8911_v33 = vld [vmem:[%s8984_s4] sm:$0xf]  ;;  %3766 = vmatpush.msrb.mxu1 %v3704_v18 }
 0x352   :  { %3604 = vmatpush.msrb.mxu0 %v3096_v40  ;;  %v3675_v40 = vld [vmem:[%s8985_s5 + $0x80] sm:$0xff] }
 0x353   :  { %3505 = vmatpush.msrb.mxu3 %v3091_v41  ;;  %v3703_v41 = vld [vmem:[%s8985_s5 + $0x160] sm:$0xff] }
 0x354   :  { %3605 = vmatpush.msrb.mxu0 %v3092_v32  ;;  %v3243_v32 = vperm.slane %v8911_v33, 0  ;;  %3767 = vmatpush.msrb.mxu1 %v3703_v41 }
 0x355   :  { %3506 = vmatpush.msrb.mxu3 %v3087_v49  ;;  %v3702_v49 = vld [vmem:[%s8985_s5 + $0x158] sm:$0xff] }
 0x356   :  { %3606 = vmatpush.msrb.mxu0 %v3088_v42  ;;  %v3272_v42 = vpop.f32.mrf.mxu3  ;;  %3768 = vmatpush.msrb.mxu1 %v3702_v49 }
 0x357   :  { %3507 = vmatpush.msrb.mxu3 %v3083_v19  ;;  %v3701_v19 = vld [vmem:[%s8985_s5 + $0x150] sm:$0xff] }
 0x358   :  { %3607 = vmatpush.msrb.mxu0 %v3084_v43  ;;  %v3273_v43 = vadd.f32 %v3272_v42, %v3243_v32  ;;  %3769 = vmatpush.msrb.mxu1 %v3701_v19  ;;  %v3834_v42 = vld [vmem:[%s8986_s6] ss:$0 sm:$0xff] }
 0x359   :  { %3508 = vmatpush.msrb.mxu3 %v3079_v44  ;;  %v3700_v44 = vld [vmem:[%s8985_s5 + $0x148] sm:$0xff] }
 0x35a   :  { %3608 = vmatpush.msrb.mxu0 %v3080_v45  ;;  %v3292_v45 = vpop.f32.mrf.mxu0  ;;  %3770 = vmatpush.msrb.mxu1 %v3700_v44 }
 0x35b   :  { %3509 = vmatpush.msrb.mxu3 %v3075_v53  ;;  %v3699_v53 = vld [vmem:[%s8985_s5 + $0x140] sm:$0xff] }
 0x35c   :  { %3609 = vmatpush.msrb.mxu0 %v3076_v27  ;;  %v3312_v27 = vpop.f32.mrf.mxu1  ;;  %3771 = vmatpush.msrb.mxu1 %v3699_v53 }
 0x35d   :  { %3510 = vmatpush.msrb.mxu3 %v3071_v50  ;;  %v3293_v50 = vadd.f32 %v3292_v45, %v3273_v43 }
 0x35e   :  { %3610 = vmatpush.msrb.mxu0 %v3072_v26  ;;  %3511 = vmatmul.f32.vlgmr.msrb.gmra.mxu3 %v8073_v37  ;;  %v3332_v26 = vpop.f32.mrf.mxu2 }
 0x35f   :  { %3575 = vmatpush.msra.mxu3 %v3068_v55  ;;  %3611 = vmatmul.f32.vlgmr.msrb.gmra.mxu0 %v8073_v37  ;;  %v3044_v37 = vld [vmem:[%s8983_s3 + $0x338] sm:$0xff] }
 0x360   :  { %3744 = vmatpush.msra.mxu0 %v3690_v46  ;;  %v3698_v55 = vld [vmem:[%s8985_s5 + $0x138] sm:$0xff] }
 0x361   :  { %3576 = vmatpush.msra.mxu3 %v3064_v60  ;;  %v3313_v60 = vadd.f32 %v3312_v27, %v3293_v50  ;;  %3772 = vmatpush.msrb.mxu1 %v3698_v55  ;;  %v3694_v46 = vld [vmem:[%s8985_s5 + $0x118] sm:$0xff] }
 0x362   :  { %3745 = vmatpush.msra.mxu0 %v3689_v15 }
 0x363   :  { %3577 = vmatpush.msra.mxu3 %v3060_v56  ;;  %v3697_v56 = vld [vmem:[%s8985_s5 + $0x130] sm:$0xff] }
 0x364   :  { %3746 = vmatpush.msra.mxu0 %v3688_v17  ;;  %3773 = vmatpush.msrb.mxu1 %v3697_v56 }
 0x365   :  { %3578 = vmatpush.msra.mxu3 %v3056_v57  ;;  %v3244_v57 = vperm.slane %v8911_v33, 1 }
 0x366   :  { %3747 = vmatpush.msra.mxu0 %v3687_v11 }
 0x367   :  { %3579 = vmatpush.msra.mxu3 %v3052_v61  ;;  %v3333_v61 = vadd.f32 %v3332_v26, %v3313_v60 }
 0x368   :  { %3748 = vmatpush.msra.mxu0 %v3686_v25 }
 0x369   :  { %3580 = vmatpush.msra.mxu3 %v3048_v0  ;;  %v3696_v0 = vld [vmem:[%s8985_s5 + $0x128] sm:$0xff] }
 0x36a   :  { %3749 = vmatpush.msra.mxu0 %v3685_v20  ;;  %3774 = vmatpush.msrb.mxu1 %v3696_v0 }
 0x36b   :  { %3581 = vmatpush.msra.mxu3 %v3044_v37  ;;  %v3372_v37 = vpop.f32.mrf.mxu0 }
 0x36c   :  { %3750 = vmatpush.msra.mxu0 %v3684_v51  ;;  %v3711_v51 = vld [vmem:[%s8985_s5 + $0x1a0] sm:$0xf] }
 0x36d   :  { %3582 = vmatpush.msra.mxu3 %v3040_v62  ;;  %3831 = vmatpush.msk.msra.mxu2 %vm3720_vm2, %v3711_v51 }
 0x36e   :  { %3751 = vmatpush.msra.mxu0 %v3683_v10 }
 0x36f   :  { %3583 = vmatpush.msra.mxu3 %v3036_v5 }
 0x370   :  { %3752 = vmatpush.msra.mxu0 %v3682_v23 }
 0x371   :  { %3584 = vmatpush.msra.mxu3 %v3032_v48  ;;  %v3392_v48 = vpop.f32.mrf.mxu1 }
 0x372   :  { %3753 = vmatpush.msra.mxu0 %v3681_v28  ;;  %v3708_v28 = vld [vmem:[%s8985_s5 + $0x188] sm:$0xff] }
 0x373   :  { %3585 = vmatpush.msra.mxu3 %v3028_v6  ;;  %v3373_v6 = vadd.f32 %v3372_v37, %v3244_v57 }
 0x374   :  { %3754 = vmatpush.msra.mxu0 %v3680_v52  ;;  %v3246_v52 = vperm.slane %v8911_v33, 3 }
 0x375   :  { %3586 = vmatpush.msra.mxu3 %v3024_v59 }
 0x376   :  { %3755 = vmatpush.msra.mxu0 %v3679_v47 }
 0x377   :  { %3587 = vmatpush.msra.mxu3 %v3020_v7  ;;  %v3695_v7 = vld [vmem:[%s8985_s5 + $0x120] sm:$0xff] }
 0x378   :  { %3756 = vmatpush.msra.mxu0 %v3678_v29  ;;  %3775 = vmatpush.msrb.mxu1 %v3695_v7 }
 0x379   :  { %3588 = vmatpush.msra.mxu3 %v3016_v63  ;;  %v3412_v63 = vpop.f32.mrf.mxu2 }
 0x37a   :  { %3757 = vmatpush.msra.mxu0 %v3677_v12  ;;  %3776 = vmatpush.msrb.mxu1 %v3694_v46 }
 0x37b   :  { %3589 = vmatpush.msra.mxu3 %v3012_v8  ;;  %v3393_v8 = vadd.f32 %v3392_v48, %v3373_v6 }
 0x37c   :  { %3758 = vmatpush.msra.mxu0 %v3676_v36 }
 0x37d   :  { %3590 = vmatpush.msra.mxu3 %v3008_v9  ;;  %v3413_v9 = vadd.f32 %v3412_v63, %v3393_v8  ;;  %v3472_v17 = vpop.f32.mrf.mxu1 }
 0x37e   :  { %3591 = vmatmul.f32.vlgmr.msra.gmra.mxu3 %v7963_v31  ;;  %v3669_v31 = vld [vmem:[%s8985_s5 + $0x50] sm:$0xff]  ;;  %3759 = vmatpush.msra.mxu0 %v3675_v40 }
 0x37f   :  { %3724 = vmatpush.msrb.mxu3 %v3674_v3  ;;  %v3693_v3 = vld [vmem:[%s8985_s5 + $0x110] sm:$0xff] }
 0x380   :  { %3777 = vmatpush.msrb.mxu1 %v3693_v3 }
 0x381   :  { %3725 = vmatpush.msrb.mxu3 %v3673_v13 }
 0x383   :  { %3726 = vmatpush.msrb.mxu3 %v3672_v14  ;;  %v3692_v14 = vld [vmem:[%s8985_s5 + $0x108] sm:$0xff] }
 0x384   :  { %3778 = vmatpush.msrb.mxu1 %v3692_v14 }
 0x385   :  { %3727 = vmatpush.msrb.mxu3 %v3671_v35 }
 0x387   :  { %3728 = vmatpush.msrb.mxu3 %v3670_v2  ;;  %v3691_v2 = vld [vmem:[%s8985_s5 + $0x100] sm:$0xff] }
 0x388   :  { %3779 = vmatpush.msrb.mxu1 %v3691_v2 }
 0x389   :  { %3729 = vmatpush.msrb.mxu3 %v3669_v31 }
 0x38b   :  { %3730 = vmatpush.msrb.mxu3 %v3668_v58 }
 0x38d   :  { %3731 = vmatpush.msrb.mxu3 %v3667_v16  ;;  %v3245_v16 = vperm.slane %v8911_v33, 2 }
 0x38f   :  { %3732 = vmatpush.msrb.mxu3 %v3666_v1  ;;  %v3473_v11 = vadd.f32 %v3472_v17, %v3245_v16 }
 0x391   :  { %3733 = vmatpush.msrb.mxu3 %v3665_v39 }
 0x393   :  { %3734 = vmatpush.msrb.mxu3 %v3664_v38 }
 0x395   :  { %3735 = vmatpush.msrb.mxu3 %v3663_v34 }
 0x396   :  { %v3492_v1 = vpop.f32.mrf.mxu2 }
 0x397   :  { %3736 = vmatpush.msrb.mxu3 %v3662_v21  ;;  %v3493_v39 = vadd.f32 %v3492_v1, %v3473_v11 }
 0x399   :  { %3737 = vmatpush.msrb.mxu3 %v3661_v4  ;;  %v3710_v4 = vld [vmem:[%s8985_s5 + $0x198] sm:$0xff] }
 0x39a   :  { %3796 = vmatpush.msra.mxu2 %v3710_v4 }
 0x39b   :  { %3738 = vmatpush.msrb.mxu3 %v3660_v24  ;;  %v3709_v24 = vld [vmem:[%s8985_s5 + $0x190] sm:$0xff] }
 0x39c   :  { %3797 = vmatpush.msra.mxu2 %v3709_v24 }
 0x39d   :  { %3739 = vmatpush.msrb.mxu3 %v3659_v54  ;;  %v3707_v54 = vld [vmem:[%s8985_s5 + $0x180] sm:$0xff]  ;;  %s3891_s5 = smov [#allocation2]  }
 0x39e   :  { %3798 = vmatpush.msra.mxu2 %v3708_v28  ;;  %s3811_s0 = sshll.u32 %s3891_s5, 4  ;;  %s3812_s0 = int_to_ptr.vmem [resolvable:$true] %s3811_s0 }
 0x3a0   :  { %3799 = vmatpush.msra.mxu2 %v3707_v54 }
 0x3b6   :  { %v3572_v47 = vpop.f32.mrf.mxu2 }
 0x3b7   :  { %v3573_v29 = vadd.f32 %v3572_v47, %v3246_v52 }
 0x3ba   :  { %v3452_v31 = vpop.f32.mrf.mxu0 }
 0x3bc   :  { %v3552_v21 = vpop.f32.mrf.mxu1 }
 0x3c0   :  { %v3352_v62 = vpop.f32.mrf.mxu3 }
 0x3c1   :  { %v3353_v5 = vadd.f32 %v3352_v62, %v3333_v61 }
 0x3c3   :  { %v3655_v59 = vmax.f32 %v3353_v5, 0.0 }
 0x3c4   :  { %v3532_v20 = vpop.f32.mrf.mxu0  ;;  %v3632_v18 = vpop.f32.mrf.mxu1 }
 0x3c5   :  { %3740 = vmatmul.f32.vlgmr.msrb.gmra.mxu3 %v3655_v59 }
 0x3c8   :  { %v3432_v13 = vpop.f32.mrf.mxu3 }
 0x3c9   :  { %v3433_v35 = vadd.f32 %v3432_v13, %v3413_v9 }
 0x3cb   :  { %v3453_v58 = vadd.f32 %v3452_v31, %v3433_v35 }
 0x3cc   :  { %v3652_v41 = vpop.f32.mrf.mxu2 }
 0x3cd   :  { %v3656_v15 = vmax.f32 %v3453_v58, 0.0 }
 0x3cf   :  { %3760 = vmatmul.f32.vlgmr.msra.gmra.mxu0 %v3656_v15 }
 0x3dc   :  { %v3612_v22 = vpop.f32.mrf.mxu0 }
 0x3e1   :  { %v3512_v25 = vpop.f32.mrf.mxu3 }
 0x3e2   :  { %v3513_v38 = vadd.f32 %v3512_v25, %v3493_v39 }
 0x3e4   :  { %v3533_v34 = vadd.f32 %v3532_v20, %v3513_v38 }
 0x3e6   :  { %v3553_v10 = vadd.f32 %v3552_v21, %v3533_v34 }
 0x3e8   :  { %v3657_v23 = vmax.f32 %v3553_v10, 0.0 }
 0x3ea   :  { %3780 = vmatmul.f32.vlgmr.msrb.gmra.mxu1 %v3657_v23 }
 0x401   :  { %v3592_v30 = vpop.f32.mrf.mxu3 }
 0x402   :  { %v3593_v12 = vadd.f32 %v3592_v30, %v3573_v29 }
 0x404   :  { %v3613_v36 = vadd.f32 %v3612_v22, %v3593_v12 }
 0x406   :  { %v3633_v40 = vadd.f32 %v3632_v18, %v3613_v36 }
 0x408   :  { %v3653_v32 = vadd.f32 %v3652_v41, %v3633_v40 }
 0x40a   :  { %v3658_v49 = vmax.f32 %v3653_v32, 0.0 }
 0x40c   :  { %3832 = vmatmul.msk.f32.vlgmr.msra.gmra.mxu2 %vm3716_vm3, %v3658_v49 }
 0x448   :  { %v3741_v19 = vpop.f32.mrf.mxu3 }
 0x449   :  { %v3742_v33 = vadd.f32 %v3834_v42, %v3741_v19 }
 0x44c   :  { %v3761_v43 = vpop.f32.mrf.mxu0 }
 0x44d   :  { %v3762_v45 = vadd.f32 %v3761_v43, %v3742_v33 }
 0x467   :  { %v3781_v44 = vpop.f32.mrf.mxu1 }
 0x468   :  { %v3782_v53 = vadd.f32 %v3781_v44, %v3762_v45 }
 0x48f   :  { %v3801_v27 = vpop.f32.mrf.mxu2 }
 0x490   :  { %v3802_v50 = vadd.f32 %v3801_v27, %v3782_v53 }
 0x492   :  { %3805 = vst.msk [vmem:[#allocation2] sm:$0x3] %vm3804_vm4, %v3802_v50 }
 0x493   :  { %3816 = dma.vmem_to_hbm [thread:$0]  %s3812_s0, 32, %s3814_s23, [#allocation3]  }
 0x494   :  { %3889 = dma.done.wait [#allocation3], 32  }
 0x495   :  { %3890 = vsyncadd [#allocation3], 4294967264 }
 0x496   :  { %3821 = vsyncpa [#allocation3], 1 }

</bundles_post_ra>
